<compile_context>
chip_gen: v6e
topology: v6e:2x2x1
jax: 0.10.0
libtpu: 0.0.40
codegen_flags: <defaults>
</compile_context>

<pallas_src>
import jax
import jax.numpy as jnp
from jax.experimental import pallas as pl
from jax.experimental.pallas import tpu as pltpu


def _make_block_kernel(h_real):
    """h_real: true (unpadded) image height.  Needed for conv2's H zero-pad
    mask because the output height may be padded up to a multiple of TH."""

    def kernel(xpad_ref, xres_ref, w1_ref, a1_ref, w2_ref, a2_ref, out_ref):
        # xpad_ref : (Hp, Wp, C) bf16  zero-padded image for current n
        #            (2 zero rows/cols on every side; resident across strips)
        # xres_ref : (TH, W, C) f32    unpadded input strip, residual path only
        # w1_ref   : (9C, C) bf16      conv1 taps, row index = (kh*3+kw)*C + ci
        # a1_ref   : (1, C)  f32       PReLU1 slopes
        # w2_ref   : (9C, C) bf16      conv2 taps
        # a2_ref   : (1, C)  f32       PReLU2 slopes
        # out_ref  : (TH, W, C) f32    output strip
        Hp, Wp, C = xpad_ref.shape
        TH, W, _ = out_ref.shape
        R = TH + 2            # conv1 rows incl. 1-row halo each side (for conv2)
        Wc = W + 2            # conv1 cols incl. 1-col halo each side (for conv2)

        h = pl.program_id(1)
        r0 = h * TH
        if TH % 8 == 0:
            r0 = pl.multiple_of(r0, 8)

        def prelu(v, a_ref):
            a = a_ref[...].reshape(1, 1, C)
            return jnp.where(v >= 0, v, a * v)

        # ---- conv1: 9 accumulated K=C matmuls (no lane-axis im2col concat) ----
        acc1 = None
        for k in range(9):
            kh, kw = k // 3, k % 3
            tap = xpad_ref[pl.ds(r0 + kh, R), pl.ds(kw, Wc), :]     # (R, Wc, C) bf16
            part = jnp.dot(tap.reshape(R * Wc, C),
                           w1_ref[k * C:(k + 1) * C, :],
                           preferred_element_type=jnp.float32)
            acc1 = part if acc1 is None else acc1 + part
        h1 = prelu(acc1.reshape(R, Wc, C), a1_ref)                  # f32

        # conv2's zero padding: halo rows outside the real image and the two
        # halo columns must be exactly zero.  Cheap VPU select, no concat.
        g = r0 - 1 + jax.lax.broadcasted_iota(jnp.int32, (R, Wc, 1), 0)
        c = jax.lax.broadcasted_iota(jnp.int32, (R, Wc, 1), 1)
        valid = (g >= 0) & (g < h_real) & (c >= 1) & (c <= W)
        h1 = jnp.where(valid, h1, 0.0).astype(jnp.bfloat16)

        # ---- conv2: 9 accumulated K=C matmuls over the TH output rows ----
        acc2 = None
        for k in range(9):
            kh, kw = k // 3, k % 3
            tap = h1[kh:kh + TH, kw:kw + W, :]                      # (TH, W, C) bf16
            part = jnp.dot(tap.reshape(TH * W, C),
                           w2_ref[k * C:(k + 1) * C, :],
                           preferred_element_type=jnp.float32)
            acc2 = part if acc2 is None else acc2 + part
        h2 = prelu(acc2.reshape(TH, W, C), a2_ref)                  # f32

        # ---- residual add in f32 from the dedicated unpadded strip ----
        out_ref[...] = xres_ref[...] + h2

    return kernel


def block_forward_nhwc(x_nhwc, w1, a1, w2, a2, block_h=64):
    """Forward pass of Block in NHWC (no boundary transposes).
       x_nhwc: (N, H, W, C) f32; w*: (C_out, C_in, 3, 3) OIHW; a*: (C,)."""
    N, H, W, C = x_nhwc.shape
    x = x_nhwc.astype(jnp.float32)

    th = max(1, min(block_h, H))
    n_strips = pl.cdiv(H, th)
    H_pad = n_strips * th          # pad H so strips tile exactly (sliced off below)

    # bf16 padded image for the conv path (pad fuses with the cast);
    # separate f32 (unpadded) copy just for the residual add.
    x_bf = jnp.pad(x.astype(jnp.bfloat16),
                   ((0, 0), (2, 2 + H_pad - H), (2, 2), (0, 0)))
    x_res = x if H_pad == H else jnp.pad(x, ((0, 0), (0, H_pad - H), (0, 0), (0, 0)))

    def prep_w(w):   # (O, I, kh, kw) -> (9*C_in, C_out), row = (kh*3+kw)*C + ci
        return jnp.transpose(w, (2, 3, 1, 0)).reshape(9 * C, C).astype(jnp.bfloat16)

    w1f, w2f = prep_w(w1), prep_w(w2)
    a1r = a1.reshape(1, C).astype(jnp.float32)
    a2r = a2.reshape(1, C).astype(jnp.float32)

    # VMEM budget, clamped below physical VMEM (v7x has only 64 MiB per TC).
    est = (2 * (H_pad + 4) * (W + 4) * C * 2          # resident bf16 image (x2 buffers)
           + 4 * th * W * C * 4                       # residual + output strips (x2 buffers)
           + 2 * (2 * 9 * C * C * 2 + 2 * C * 4)      # weights (bf16) + slopes (f32)
           + 6 * (th + 2) * (W + 2) * C * 4)          # h1 / acc / tap temporaries
    try:
        phys = pltpu.get_tpu_info().vmem_capacity_bytes
    except Exception:
        phys = 64 * 1024 * 1024                       # conservative (v7x)
    vmem_limit = int(min(max(32 * 1024 * 1024, 2 * est), phys * 3 // 4))

    flops = 4 * N * H_pad * W * 9 * C * C             # two 3x3 convs, 2 flops/MAC
    bytes_accessed = (N * (H_pad + 4) * (W + 4) * C * 2   # bf16 padded image
                      + 2 * N * H_pad * W * C * 4         # f32 residual in + f32 out
                      + 2 * 9 * C * C * 2 + 2 * C * 4)    # weights + slopes

    out = pl.pallas_call(
        _make_block_kernel(H),
        out_shape=jax.ShapeDtypeStruct((N, H_pad, W, C), jnp.float32),
        grid=(N, n_strips),
        in_specs=[
            # whole padded image per n; constant over the strip axis -> resident
            pl.BlockSpec((None, H_pad + 4, W + 4, C), lambda n, h: (n, 0, 0, 0)),
            # f32 residual strip, pipelined per grid step
            pl.BlockSpec((None, th, W, C), lambda n, h: (n, h, 0, 0)),
            # weights / slopes: constant index_maps -> fetched once, stay in VMEM
            pl.BlockSpec((9 * C, C), lambda n, h: (0, 0)),
            pl.BlockSpec((1, C), lambda n, h: (0, 0)),
            pl.BlockSpec((9 * C, C), lambda n, h: (0, 0)),
            pl.BlockSpec((1, C), lambda n, h: (0, 0)),
        ],
        out_specs=pl.BlockSpec((None, th, W, C), lambda n, h: (n, h, 0, 0)),
        compiler_params=pltpu.CompilerParams(
            dimension_semantics=("parallel", "parallel"),
            vmem_limit_bytes=vmem_limit,
        ),
        cost_estimate=pl.CostEstimate(flops=flops, transcendentals=0,
                                      bytes_accessed=bytes_accessed),
    )(x_bf, x_res, w1f, a1r, w2f, a2r)

    return out if H_pad == H else out[:, :H]


def block_forward(x_nchw, w1, a1, w2, a2, block_h=64):
    """PyTorch-convention wrapper: x (N, C, H, W) -> y (N, C, H, W)."""
    # TODO(synk): NHWC callers should use block_forward_nhwc directly and skip
    # both boundary transposes (each is a full image-sized HBM round trip).
    x = jnp.transpose(x_nchw, (0, 2, 3, 1))
    y = block_forward_nhwc(x, w1, a1, w2, a2, block_h=block_h)
    return jnp.transpose(y, (0, 3, 1, 2))


def _reference(x_nchw, w1, a1, w2, a2):
    dn = jax.lax.conv_dimension_numbers(x_nchw.shape, w1.shape,
                                        ('NCHW', 'OIHW', 'NCHW'))

    def conv(x, w):
        return jax.lax.conv_general_dilated(x, w, (1, 1), ((1, 1), (1, 1)),
                                            dimension_numbers=dn)

    def prelu(v, a):
        a = a.reshape(1, -1, 1, 1)
        return jnp.where(v >= 0, v, a * v)

    h = prelu(conv(x_nchw, w1), a1)
    h = prelu(conv(h, w2), a2)
    return x_nchw + h


if __name__ == "__main__":
    N, C, H, W = 2, 4, 16, 16
    key = jax.random.PRNGKey(0)
    kx, k1, k2 = jax.random.split(key, 3)

    x = jax.random.normal(kx, (N, C, H, W), jnp.float32)
    # shapes from nn.Conv2d(planes, planes, 3, bias=False) / nn.PReLU(planes)
    w1 = 0.1 * jax.random.normal(k1, (C, C, 3, 3), jnp.float32)
    w2 = 0.1 * jax.random.normal(k2, (C, C, 3, 3), jnp.float32)
    a1 = 0.25 * jnp.ones((C,), jnp.float32)   # PyTorch PReLU default init
    a2 = 0.25 * jnp.ones((C,), jnp.float32)

    # block_h=8 -> 2 H-strips, exercising the halo / boundary-mask path.
    y = block_forward(x, w1, a1, w2, a2, block_h=8)
    jax.block_until_ready(y)

    y_ref = _reference(x, w1, a1, w2, a2)
    assert y.shape == (N, C, H, W)
    max_err = float(jnp.max(jnp.abs(y - y_ref)))
    # bf16 MXU matmuls (f32 accumulation) vs. the f32 reference -> ~1e-3..1e-2 abs error.
    assert jnp.allclose(y, y_ref, atol=3e-2, rtol=3e-2), f"mismatch vs reference (max abs err {max_err})"

    print("KERNEL_OK")
</pallas_src>

<mosaic_0001>
module attributes {stable_mosaic.version = 11 : i64} {
  func.func @kernel(%arg0: i32, %arg1: i32, %arg2: memref<1x20x20x4xbf16, #tpu.memory_space<vmem>>, %arg3: memref<1x8x16x4xf32, #tpu.memory_space<vmem>>, %arg4: memref<36x4xbf16, #tpu.memory_space<vmem>>, %arg5: memref<1x4xf32, #tpu.memory_space<vmem>>, %arg6: memref<36x4xbf16, #tpu.memory_space<vmem>>, %arg7: memref<1x4xf32, #tpu.memory_space<vmem>>, %arg8: memref<1x8x16x4xf32, #tpu.memory_space<vmem>>) attributes {dimension_semantics = [#tpu.dimension_semantics<parallel>, #tpu.dimension_semantics<parallel>], iteration_bounds = array<i64: 2, 2>, scalar_prefetch = 0 : i64, scratch_operands = 0 : i64, tpu.core_type = #tpu.core_type<tc>, window_params = [{transform_indices = @transform_0, window_bounds = array<i64: 1, 20, 20, 4>}, {transform_indices = @transform_1, window_bounds = array<i64: 1, 8, 16, 4>}, {pipeline_mode = #tpu.pipeline_mode<synchronous>, transform_indices = @transform_2, window_bounds = array<i64: 36, 4>}, {pipeline_mode = #tpu.pipeline_mode<synchronous>, transform_indices = @transform_3, window_bounds = array<i64: 1, 4>}, {pipeline_mode = #tpu.pipeline_mode<synchronous>, transform_indices = @transform_4, window_bounds = array<i64: 36, 4>}, {pipeline_mode = #tpu.pipeline_mode<synchronous>, transform_indices = @transform_5, window_bounds = array<i64: 1, 4>}, {transform_indices = @transform_6, window_bounds = array<i64: 1, 8, 16, 4>}]} {
    %c8_i32 = arith.constant 8 : i32
    %0 = arith.muli %arg1, %c8_i32 : i32
    %1 = tpu.assume_multiple %0, 8 : i32
    %c0_i32 = arith.constant 0 : i32
    %2 = arith.addi %1, %c0_i32 : i32
    %c0 = arith.constant 0 : index
    %3 = arith.index_cast %2 : i32 to index
    %c0_0 = arith.constant 0 : index
    %c0_1 = arith.constant 0 : index
    %4 = vector.load %arg2[%c0, %3, %c0_0, %c0_1] : memref<1x20x20x4xbf16, #tpu.memory_space<vmem>>, vector<1x10x18x4xbf16>
    %5 = vector.shape_cast %4 : vector<1x10x18x4xbf16> to vector<10x18x4xbf16>
    %6 = vector.shape_cast %5 : vector<10x18x4xbf16> to vector<180x4xbf16>
    %c0_2 = arith.constant 0 : index
    %c0_3 = arith.constant 0 : index
    %7 = vector.load %arg4[%c0_2, %c0_3] : memref<36x4xbf16, #tpu.memory_space<vmem>>, vector<4x4xbf16>
    %cst = arith.constant dense<0.000000e+00> : vector<180x4xf32>
    %8 = tpu.matmul %6, %7, %cst {dimension_numbers = #tpu.dot_dimension_numbers<[1], [0], [0], [1], [0, 0, 1, 1], [], []>} : vector<180x4xbf16>, vector<4x4xbf16>, vector<180x4xf32> -> vector<180x4xf32>
    %c0_i32_4 = arith.constant 0 : i32
    %9 = arith.addi %1, %c0_i32_4 : i32
    %c0_5 = arith.constant 0 : index
    %10 = arith.index_cast %9 : i32 to index
    %c1 = arith.constant 1 : index
    %c0_6 = arith.constant 0 : index
    %11 = vector.load %arg2[%c0_5, %10, %c1, %c0_6] : memref<1x20x20x4xbf16, #tpu.memory_space<vmem>>, vector<1x10x18x4xbf16>
    %12 = vector.shape_cast %11 : vector<1x10x18x4xbf16> to vector<10x18x4xbf16>
    %13 = vector.shape_cast %12 : vector<10x18x4xbf16> to vector<180x4xbf16>
    %c4 = arith.constant 4 : index
    %c0_7 = arith.constant 0 : index
    %14 = vector.load %arg4[%c4, %c0_7] : memref<36x4xbf16, #tpu.memory_space<vmem>>, vector<4x4xbf16>
    %cst_8 = arith.constant dense<0.000000e+00> : vector<180x4xf32>
    %15 = tpu.matmul %13, %14, %cst_8 {dimension_numbers = #tpu.dot_dimension_numbers<[1], [0], [0], [1], [0, 0, 1, 1], [], []>} : vector<180x4xbf16>, vector<4x4xbf16>, vector<180x4xf32> -> vector<180x4xf32>
    %16 = arith.addf %8, %15 : vector<180x4xf32>
    %c0_i32_9 = arith.constant 0 : i32
    %17 = arith.addi %1, %c0_i32_9 : i32
    %c0_10 = arith.constant 0 : index
    %18 = arith.index_cast %17 : i32 to index
    %c2 = arith.constant 2 : index
    %c0_11 = arith.constant 0 : index
    %19 = vector.load %arg2[%c0_10, %18, %c2, %c0_11] : memref<1x20x20x4xbf16, #tpu.memory_space<vmem>>, vector<1x10x18x4xbf16>
    %20 = vector.shape_cast %19 : vector<1x10x18x4xbf16> to vector<10x18x4xbf16>
    %21 = vector.shape_cast %20 : vector<10x18x4xbf16> to vector<180x4xbf16>
    %c8 = arith.constant 8 : index
    %c0_12 = arith.constant 0 : index
    %22 = vector.load %arg4[%c8, %c0_12] : memref<36x4xbf16, #tpu.memory_space<vmem>>, vector<4x4xbf16>
    %cst_13 = arith.constant dense<0.000000e+00> : vector<180x4xf32>
    %23 = tpu.matmul %21, %22, %cst_13 {dimension_numbers = #tpu.dot_dimension_numbers<[1], [0], [0], [1], [0, 0, 1, 1], [], []>} : vector<180x4xbf16>, vector<4x4xbf16>, vector<180x4xf32> -> vector<180x4xf32>
    %24 = arith.addf %16, %23 : vector<180x4xf32>
    %c1_i32 = arith.constant 1 : i32
    %25 = arith.addi %1, %c1_i32 : i32
    %c0_14 = arith.constant 0 : index
    %26 = arith.index_cast %25 : i32 to index
    %c0_15 = arith.constant 0 : index
    %c0_16 = arith.constant 0 : index
    %27 = vector.load %arg2[%c0_14, %26, %c0_15, %c0_16] : memref<1x20x20x4xbf16, #tpu.memory_space<vmem>>, vector<1x10x18x4xbf16>
    %28 = vector.shape_cast %27 : vector<1x10x18x4xbf16> to vector<10x18x4xbf16>
    %29 = vector.shape_cast %28 : vector<10x18x4xbf16> to vector<180x4xbf16>
    %c12 = arith.constant 12 : index
    %c0_17 = arith.constant 0 : index
    %30 = vector.load %arg4[%c12, %c0_17] : memref<36x4xbf16, #tpu.memory_space<vmem>>, vector<4x4xbf16>
    %cst_18 = arith.constant dense<0.000000e+00> : vector<180x4xf32>
    %31 = tpu.matmul %29, %30, %cst_18 {dimension_numbers = #tpu.dot_dimension_numbers<[1], [0], [0], [1], [0, 0, 1, 1], [], []>} : vector<180x4xbf16>, vector<4x4xbf16>, vector<180x4xf32> -> vector<180x4xf32>
    %32 = arith.addf %24, %31 : vector<180x4xf32>
    %c1_i32_19 = arith.constant 1 : i32
    %33 = arith.addi %1, %c1_i32_19 : i32
    %c0_20 = arith.constant 0 : index
    %34 = arith.index_cast %33 : i32 to index
    %c1_21 = arith.constant 1 : index
    %c0_22 = arith.constant 0 : index
    %35 = vector.load %arg2[%c0_20, %34, %c1_21, %c0_22] : memref<1x20x20x4xbf16, #tpu.memory_space<vmem>>, vector<1x10x18x4xbf16>
    %36 = vector.shape_cast %35 : vector<1x10x18x4xbf16> to vector<10x18x4xbf16>
    %37 = vector.shape_cast %36 : vector<10x18x4xbf16> to vector<180x4xbf16>
    %c16 = arith.constant 16 : index
    %c0_23 = arith.constant 0 : index
    %38 = vector.load %arg4[%c16, %c0_23] : memref<36x4xbf16, #tpu.memory_space<vmem>>, vector<4x4xbf16>
    %cst_24 = arith.constant dense<0.000000e+00> : vector<180x4xf32>
    %39 = tpu.matmul %37, %38, %cst_24 {dimension_numbers = #tpu.dot_dimension_numbers<[1], [0], [0], [1], [0, 0, 1, 1], [], []>} : vector<180x4xbf16>, vector<4x4xbf16>, vector<180x4xf32> -> vector<180x4xf32>
    %40 = arith.addf %32, %39 : vector<180x4xf32>
    %c1_i32_25 = arith.constant 1 : i32
    %41 = arith.addi %1, %c1_i32_25 : i32
    %c0_26 = arith.constant 0 : index
    %42 = arith.index_cast %41 : i32 to index
    %c2_27 = arith.constant 2 : index
    %c0_28 = arith.constant 0 : index
    %43 = vector.load %arg2[%c0_26, %42, %c2_27, %c0_28] : memref<1x20x20x4xbf16, #tpu.memory_space<vmem>>, vector<1x10x18x4xbf16>
    %44 = vector.shape_cast %43 : vector<1x10x18x4xbf16> to vector<10x18x4xbf16>
    %45 = vector.shape_cast %44 : vector<10x18x4xbf16> to vector<180x4xbf16>
    %c20 = arith.constant 20 : index
    %c0_29 = arith.constant 0 : index
    %46 = vector.load %arg4[%c20, %c0_29] : memref<36x4xbf16, #tpu.memory_space<vmem>>, vector<4x4xbf16>
    %cst_30 = arith.constant dense<0.000000e+00> : vector<180x4xf32>
    %47 = tpu.matmul %45, %46, %cst_30 {dimension_numbers = #tpu.dot_dimension_numbers<[1], [0], [0], [1], [0, 0, 1, 1], [], []>} : vector<180x4xbf16>, vector<4x4xbf16>, vector<180x4xf32> -> vector<180x4xf32>
    %48 = arith.addf %40, %47 : vector<180x4xf32>
    %c2_i32 = arith.constant 2 : i32
    %49 = arith.addi %1, %c2_i32 : i32
    %c0_31 = arith.constant 0 : index
    %50 = arith.index_cast %49 : i32 to index
    %c0_32 = arith.constant 0 : index
    %c0_33 = arith.constant 0 : index
    %51 = vector.load %arg2[%c0_31, %50, %c0_32, %c0_33] : memref<1x20x20x4xbf16, #tpu.memory_space<vmem>>, vector<1x10x18x4xbf16>
    %52 = vector.shape_cast %51 : vector<1x10x18x4xbf16> to vector<10x18x4xbf16>
    %53 = vector.shape_cast %52 : vector<10x18x4xbf16> to vector<180x4xbf16>
    %c24 = arith.constant 24 : index
    %c0_34 = arith.constant 0 : index
    %54 = vector.load %arg4[%c24, %c0_34] : memref<36x4xbf16, #tpu.memory_space<vmem>>, vector<4x4xbf16>
    %cst_35 = arith.constant dense<0.000000e+00> : vector<180x4xf32>
    %55 = tpu.matmul %53, %54, %cst_35 {dimension_numbers = #tpu.dot_dimension_numbers<[1], [0], [0], [1], [0, 0, 1, 1], [], []>} : vector<180x4xbf16>, vector<4x4xbf16>, vector<180x4xf32> -> vector<180x4xf32>
    %56 = arith.addf %48, %55 : vector<180x4xf32>
    %c2_i32_36 = arith.constant 2 : i32
    %57 = arith.addi %1, %c2_i32_36 : i32
    %c0_37 = arith.constant 0 : index
    %58 = arith.index_cast %57 : i32 to index
    %c1_38 = arith.constant 1 : index
    %c0_39 = arith.constant 0 : index
    %59 = vector.load %arg2[%c0_37, %58, %c1_38, %c0_39] : memref<1x20x20x4xbf16, #tpu.memory_space<vmem>>, vector<1x10x18x4xbf16>
    %60 = vector.shape_cast %59 : vector<1x10x18x4xbf16> to vector<10x18x4xbf16>
    %61 = vector.shape_cast %60 : vector<10x18x4xbf16> to vector<180x4xbf16>
    %c28 = arith.constant 28 : index
    %c0_40 = arith.constant 0 : index
    %62 = vector.load %arg4[%c28, %c0_40] : memref<36x4xbf16, #tpu.memory_space<vmem>>, vector<4x4xbf16>
    %cst_41 = arith.constant dense<0.000000e+00> : vector<180x4xf32>
    %63 = tpu.matmul %61, %62, %cst_41 {dimension_numbers = #tpu.dot_dimension_numbers<[1], [0], [0], [1], [0, 0, 1, 1], [], []>} : vector<180x4xbf16>, vector<4x4xbf16>, vector<180x4xf32> -> vector<180x4xf32>
    %64 = arith.addf %56, %63 : vector<180x4xf32>
    %c2_i32_42 = arith.constant 2 : i32
    %65 = arith.addi %1, %c2_i32_42 : i32
    %c0_43 = arith.constant 0 : index
    %66 = arith.index_cast %65 : i32 to index
    %c2_44 = arith.constant 2 : index
    %c0_45 = arith.constant 0 : index
    %67 = vector.load %arg2[%c0_43, %66, %c2_44, %c0_45] : memref<1x20x20x4xbf16, #tpu.memory_space<vmem>>, vector<1x10x18x4xbf16>
    %68 = vector.shape_cast %67 : vector<1x10x18x4xbf16> to vector<10x18x4xbf16>
    %69 = vector.shape_cast %68 : vector<10x18x4xbf16> to vector<180x4xbf16>
    %c32 = arith.constant 32 : index
    %c0_46 = arith.constant 0 : index
    %70 = vector.load %arg4[%c32, %c0_46] : memref<36x4xbf16, #tpu.memory_space<vmem>>, vector<4x4xbf16>
    %cst_47 = arith.constant dense<0.000000e+00> : vector<180x4xf32>
    %71 = tpu.matmul %69, %70, %cst_47 {dimension_numbers = #tpu.dot_dimension_numbers<[1], [0], [0], [1], [0, 0, 1, 1], [], []>} : vector<180x4xbf16>, vector<4x4xbf16>, vector<180x4xf32> -> vector<180x4xf32>
    %72 = arith.addf %64, %71 : vector<180x4xf32>
    %73 = vector.shape_cast %72 : vector<180x4xf32> to vector<10x18x4xf32>
    %c0_48 = arith.constant 0 : index
    %c0_49 = arith.constant 0 : index
    %74 = vector.load %arg5[%c0_48, %c0_49] : memref<1x4xf32, #tpu.memory_space<vmem>>, vector<1x4xf32>
    %75 = vector.shape_cast %74 : vector<1x4xf32> to vector<1x1x4xf32>
    %cst_50 = arith.constant 0.000000e+00 : f32
    %76 = vector.broadcast %cst_50 : f32 to vector<10x18x4xf32>
    %77 = arith.cmpf oge, %73, %76 : vector<10x18x4xf32>
    %78 = vector.broadcast %75 : vector<1x1x4xf32> to vector<10x18x4xf32>
    %79 = arith.mulf %78, %73 : vector<10x18x4xf32>
    %80 = arith.select %77, %73, %79 : vector<10x18x4xi1>, vector<10x18x4xf32>
    %c1_i32_51 = arith.constant 1 : i32
    %81 = arith.subi %1, %c1_i32_51 : i32
    %82 = tpu.iota {dimensions = array<i32: 0>} : vector<10x18x1xi32>
    %83 = vector.broadcast %81 : i32 to vector<10x18x1xi32>
    %84 = arith.addi %83, %82 : vector<10x18x1xi32>
    %85 = tpu.iota {dimensions = array<i32: 1>} : vector<10x18x1xi32>
    %c0_i32_52 = arith.constant 0 : i32
    %86 = vector.broadcast %c0_i32_52 : i32 to vector<10x18x1xi32>
    %87 = arith.cmpi sge, %84, %86 : vector<10x18x1xi32>
    %c16_i32 = arith.constant 16 : i32
    %88 = vector.broadcast %c16_i32 : i32 to vector<10x18x1xi32>
    %89 = arith.cmpi slt, %84, %88 : vector<10x18x1xi32>
    %90 = arith.andi %87, %89 : vector<10x18x1xi1>
    %c1_i32_53 = arith.constant 1 : i32
    %91 = vector.broadcast %c1_i32_53 : i32 to vector<10x18x1xi32>
    %92 = arith.cmpi sge, %85, %91 : vector<10x18x1xi32>
    %93 = arith.andi %90, %92 : vector<10x18x1xi1>
    %c16_i32_54 = arith.constant 16 : i32
    %94 = vector.broadcast %c16_i32_54 : i32 to vector<10x18x1xi32>
    %95 = arith.cmpi sle, %85, %94 : vector<10x18x1xi32>
    %96 = arith.andi %93, %95 : vector<10x18x1xi1>
    %cst_55 = arith.constant 0.000000e+00 : f32
    %97 = vector.shape_cast %96 : vector<10x18x1xi1> to vector<10x18x1xi1>
    %98 = vector.broadcast %97 : vector<10x18x1xi1> to vector<10x18x4xi1>
    %99 = vector.broadcast %cst_55 : f32 to vector<10x18x4xf32>
    %100 = arith.select %98, %80, %99 : vector<10x18x4xi1>, vector<10x18x4xf32>
    %101 = arith.truncf %100 : vector<10x18x4xf32> to vector<10x18x4xbf16>
    %102 = vector.extract_strided_slice %101 {offsets = [0, 0, 0], sizes = [8, 16, 4], strides = [1, 1, 1]} : vector<10x18x4xbf16> to vector<8x16x4xbf16>
    %103 = vector.shape_cast %102 : vector<8x16x4xbf16> to vector<128x4xbf16>
    %c0_56 = arith.constant 0 : index
    %c0_57 = arith.constant 0 : index
    %104 = vector.load %arg6[%c0_56, %c0_57] : memref<36x4xbf16, #tpu.memory_space<vmem>>, vector<4x4xbf16>
    %cst_58 = arith.constant dense<0.000000e+00> : vector<128x4xf32>
    %105 = tpu.matmul %103, %104, %cst_58 {dimension_numbers = #tpu.dot_dimension_numbers<[1], [0], [0], [1], [0, 0, 1, 1], [], []>} : vector<128x4xbf16>, vector<4x4xbf16>, vector<128x4xf32> -> vector<128x4xf32>
    %106 = vector.extract_strided_slice %101 {offsets = [0, 1, 0], sizes = [8, 16, 4], strides = [1, 1, 1]} : vector<10x18x4xbf16> to vector<8x16x4xbf16>
    %107 = vector.shape_cast %106 : vector<8x16x4xbf16> to vector<128x4xbf16>
    %c4_59 = arith.constant 4 : index
    %c0_60 = arith.constant 0 : index
    %108 = vector.load %arg6[%c4_59, %c0_60] : memref<36x4xbf16, #tpu.memory_space<vmem>>, vector<4x4xbf16>
    %cst_61 = arith.constant dense<0.000000e+00> : vector<128x4xf32>
    %109 = tpu.matmul %107, %108, %cst_61 {dimension_numbers = #tpu.dot_dimension_numbers<[1], [0], [0], [1], [0, 0, 1, 1], [], []>} : vector<128x4xbf16>, vector<4x4xbf16>, vector<128x4xf32> -> vector<128x4xf32>
    %110 = arith.addf %105, %109 : vector<128x4xf32>
    %111 = vector.extract_strided_slice %101 {offsets = [0, 2, 0], sizes = [8, 16, 4], strides = [1, 1, 1]} : vector<10x18x4xbf16> to vector<8x16x4xbf16>
    %112 = vector.shape_cast %111 : vector<8x16x4xbf16> to vector<128x4xbf16>
    %c8_62 = arith.constant 8 : index
    %c0_63 = arith.constant 0 : index
    %113 = vector.load %arg6[%c8_62, %c0_63] : memref<36x4xbf16, #tpu.memory_space<vmem>>, vector<4x4xbf16>
    %cst_64 = arith.constant dense<0.000000e+00> : vector<128x4xf32>
    %114 = tpu.matmul %112, %113, %cst_64 {dimension_numbers = #tpu.dot_dimension_numbers<[1], [0], [0], [1], [0, 0, 1, 1], [], []>} : vector<128x4xbf16>, vector<4x4xbf16>, vector<128x4xf32> -> vector<128x4xf32>
    %115 = arith.addf %110, %114 : vector<128x4xf32>
    %116 = vector.extract_strided_slice %101 {offsets = [1, 0, 0], sizes = [8, 16, 4], strides = [1, 1, 1]} : vector<10x18x4xbf16> to vector<8x16x4xbf16>
    %117 = vector.shape_cast %116 : vector<8x16x4xbf16> to vector<128x4xbf16>
    %c12_65 = arith.constant 12 : index
    %c0_66 = arith.constant 0 : index
    %118 = vector.load %arg6[%c12_65, %c0_66] : memref<36x4xbf16, #tpu.memory_space<vmem>>, vector<4x4xbf16>
    %cst_67 = arith.constant dense<0.000000e+00> : vector<128x4xf32>
    %119 = tpu.matmul %117, %118, %cst_67 {dimension_numbers = #tpu.dot_dimension_numbers<[1], [0], [0], [1], [0, 0, 1, 1], [], []>} : vector<128x4xbf16>, vector<4x4xbf16>, vector<128x4xf32> -> vector<128x4xf32>
    %120 = arith.addf %115, %119 : vector<128x4xf32>
    %121 = vector.extract_strided_slice %101 {offsets = [1, 1, 0], sizes = [8, 16, 4], strides = [1, 1, 1]} : vector<10x18x4xbf16> to vector<8x16x4xbf16>
    %122 = vector.shape_cast %121 : vector<8x16x4xbf16> to vector<128x4xbf16>
    %c16_68 = arith.constant 16 : index
    %c0_69 = arith.constant 0 : index
    %123 = vector.load %arg6[%c16_68, %c0_69] : memref<36x4xbf16, #tpu.memory_space<vmem>>, vector<4x4xbf16>
    %cst_70 = arith.constant dense<0.000000e+00> : vector<128x4xf32>
    %124 = tpu.matmul %122, %123, %cst_70 {dimension_numbers = #tpu.dot_dimension_numbers<[1], [0], [0], [1], [0, 0, 1, 1], [], []>} : vector<128x4xbf16>, vector<4x4xbf16>, vector<128x4xf32> -> vector<128x4xf32>
    %125 = arith.addf %120, %124 : vector<128x4xf32>
    %126 = vector.extract_strided_slice %101 {offsets = [1, 2, 0], sizes = [8, 16, 4], strides = [1, 1, 1]} : vector<10x18x4xbf16> to vector<8x16x4xbf16>
    %127 = vector.shape_cast %126 : vector<8x16x4xbf16> to vector<128x4xbf16>
    %c20_71 = arith.constant 20 : index
    %c0_72 = arith.constant 0 : index
    %128 = vector.load %arg6[%c20_71, %c0_72] : memref<36x4xbf16, #tpu.memory_space<vmem>>, vector<4x4xbf16>
    %cst_73 = arith.constant dense<0.000000e+00> : vector<128x4xf32>
    %129 = tpu.matmul %127, %128, %cst_73 {dimension_numbers = #tpu.dot_dimension_numbers<[1], [0], [0], [1], [0, 0, 1, 1], [], []>} : vector<128x4xbf16>, vector<4x4xbf16>, vector<128x4xf32> -> vector<128x4xf32>
    %130 = arith.addf %125, %129 : vector<128x4xf32>
    %131 = vector.extract_strided_slice %101 {offsets = [2, 0, 0], sizes = [8, 16, 4], strides = [1, 1, 1]} : vector<10x18x4xbf16> to vector<8x16x4xbf16>
    %132 = vector.shape_cast %131 : vector<8x16x4xbf16> to vector<128x4xbf16>
    %c24_74 = arith.constant 24 : index
    %c0_75 = arith.constant 0 : index
    %133 = vector.load %arg6[%c24_74, %c0_75] : memref<36x4xbf16, #tpu.memory_space<vmem>>, vector<4x4xbf16>
    %cst_76 = arith.constant dense<0.000000e+00> : vector<128x4xf32>
    %134 = tpu.matmul %132, %133, %cst_76 {dimension_numbers = #tpu.dot_dimension_numbers<[1], [0], [0], [1], [0, 0, 1, 1], [], []>} : vector<128x4xbf16>, vector<4x4xbf16>, vector<128x4xf32> -> vector<128x4xf32>
    %135 = arith.addf %130, %134 : vector<128x4xf32>
    %136 = vector.extract_strided_slice %101 {offsets = [2, 1, 0], sizes = [8, 16, 4], strides = [1, 1, 1]} : vector<10x18x4xbf16> to vector<8x16x4xbf16>
    %137 = vector.shape_cast %136 : vector<8x16x4xbf16> to vector<128x4xbf16>
    %c28_77 = arith.constant 28 : index
    %c0_78 = arith.constant 0 : index
    %138 = vector.load %arg6[%c28_77, %c0_78] : memref<36x4xbf16, #tpu.memory_space<vmem>>, vector<4x4xbf16>
    %cst_79 = arith.constant dense<0.000000e+00> : vector<128x4xf32>
    %139 = tpu.matmul %137, %138, %cst_79 {dimension_numbers = #tpu.dot_dimension_numbers<[1], [0], [0], [1], [0, 0, 1, 1], [], []>} : vector<128x4xbf16>, vector<4x4xbf16>, vector<128x4xf32> -> vector<128x4xf32>
    %140 = arith.addf %135, %139 : vector<128x4xf32>
    %141 = vector.extract_strided_slice %101 {offsets = [2, 2, 0], sizes = [8, 16, 4], strides = [1, 1, 1]} : vector<10x18x4xbf16> to vector<8x16x4xbf16>
    %142 = vector.shape_cast %141 : vector<8x16x4xbf16> to vector<128x4xbf16>
    %c32_80 = arith.constant 32 : index
    %c0_81 = arith.constant 0 : index
    %143 = vector.load %arg6[%c32_80, %c0_81] : memref<36x4xbf16, #tpu.memory_space<vmem>>, vector<4x4xbf16>
    %cst_82 = arith.constant dense<0.000000e+00> : vector<128x4xf32>
    %144 = tpu.matmul %142, %143, %cst_82 {dimension_numbers = #tpu.dot_dimension_numbers<[1], [0], [0], [1], [0, 0, 1, 1], [], []>} : vector<128x4xbf16>, vector<4x4xbf16>, vector<128x4xf32> -> vector<128x4xf32>
    %145 = arith.addf %140, %144 : vector<128x4xf32>
    %146 = vector.shape_cast %145 : vector<128x4xf32> to vector<8x16x4xf32>
    %c0_83 = arith.constant 0 : index
    %c0_84 = arith.constant 0 : index
    %147 = vector.load %arg7[%c0_83, %c0_84] : memref<1x4xf32, #tpu.memory_space<vmem>>, vector<1x4xf32>
    %148 = vector.shape_cast %147 : vector<1x4xf32> to vector<1x1x4xf32>
    %cst_85 = arith.constant 0.000000e+00 : f32
    %149 = vector.broadcast %cst_85 : f32 to vector<8x16x4xf32>
    %150 = arith.cmpf oge, %146, %149 : vector<8x16x4xf32>
    %151 = vector.broadcast %148 : vector<1x1x4xf32> to vector<8x16x4xf32>
    %152 = arith.mulf %151, %146 : vector<8x16x4xf32>
    %153 = arith.select %150, %146, %152 : vector<8x16x4xi1>, vector<8x16x4xf32>
    %c0_86 = arith.constant 0 : index
    %c0_87 = arith.constant 0 : index
    %c0_88 = arith.constant 0 : index
    %c0_89 = arith.constant 0 : index
    %154 = vector.load %arg3[%c0_86, %c0_87, %c0_88, %c0_89] : memref<1x8x16x4xf32, #tpu.memory_space<vmem>>, vector<1x8x16x4xf32>
    %155 = vector.shape_cast %154 : vector<1x8x16x4xf32> to vector<8x16x4xf32>
    %156 = arith.addf %155, %153 : vector<8x16x4xf32>
    %c0_90 = arith.constant 0 : index
    %c0_91 = arith.constant 0 : index
    %c0_92 = arith.constant 0 : index
    %c0_93 = arith.constant 0 : index
    %157 = vector.load %arg8[%c0_90, %c0_91, %c0_92, %c0_93] : memref<1x8x16x4xf32, #tpu.memory_space<vmem>>, vector<1x8x16x4xf32>
    %158 = vector.shape_cast %157 : vector<1x8x16x4xf32> to vector<8x16x4xf32>
    %159 = vector.shape_cast %156 : vector<8x16x4xf32> to vector<1x8x16x4xf32>
    tpu.vector_store %arg8[%c0_90, %c0_91, %c0_92, %c0_93], %159 {strides = array<i32>} : memref<1x8x16x4xf32, #tpu.memory_space<vmem>>, vector<1x8x16x4xf32>,
    return
  }
  func.func @transform_0(%arg0: i32, %arg1: i32) -> (i32, i32, i32, i32) {
    %c0_i32 = arith.constant 0 : i32
    %c0_i32_0 = arith.constant 0 : i32
    %c0_i32_1 = arith.constant 0 : i32
    %c0_i32_2 = arith.constant 0 : i32
    return %arg0, %c0_i32, %c0_i32_0, %c0_i32_1 : i32, i32, i32, i32
  }
  func.func @transform_1(%arg0: i32, %arg1: i32) -> (i32, i32, i32, i32) {
    %c0_i32 = arith.constant 0 : i32
    %c0_i32_0 = arith.constant 0 : i32
    %c0_i32_1 = arith.constant 0 : i32
    return %arg0, %arg1, %c0_i32, %c0_i32_0 : i32, i32, i32, i32
  }
  func.func @transform_2(%arg0: i32, %arg1: i32) -> (i32, i32) {
    %c0_i32 = arith.constant 0 : i32
    %c0_i32_0 = arith.constant 0 : i32
    %c0_i32_1 = arith.constant 0 : i32
    return %c0_i32, %c0_i32_0 : i32, i32
  }
  func.func @transform_3(%arg0: i32, %arg1: i32) -> (i32, i32) {
    %c0_i32 = arith.constant 0 : i32
    %c0_i32_0 = arith.constant 0 : i32
    %c0_i32_1 = arith.constant 0 : i32
    return %c0_i32, %c0_i32_0 : i32, i32
  }
  func.func @transform_4(%arg0: i32, %arg1: i32) -> (i32, i32) {
    %c0_i32 = arith.constant 0 : i32
    %c0_i32_0 = arith.constant 0 : i32
    %c0_i32_1 = arith.constant 0 : i32
    return %c0_i32, %c0_i32_0 : i32, i32
  }
  func.func @transform_5(%arg0: i32, %arg1: i32) -> (i32, i32) {
    %c0_i32 = arith.constant 0 : i32
    %c0_i32_0 = arith.constant 0 : i32
    %c0_i32_1 = arith.constant 0 : i32
    return %c0_i32, %c0_i32_0 : i32, i32
  }
  func.func @transform_6(%arg0: i32, %arg1: i32) -> (i32, i32, i32, i32) {
    %c0_i32 = arith.constant 0 : i32
    %c0_i32_0 = arith.constant 0 : i32
    %c0_i32_1 = arith.constant 0 : i32
    return %arg0, %arg1, %c0_i32, %c0_i32_0 : i32, i32, i32, i32
  }
}

</mosaic_0001>

<bundles_post_ra>
// kernel: tpu_custom_call.1
= control target key start
LH: loop header
LB: loop body
LE: loop exit
PB: predicated region body
PF: predicated region fallthrough
CT: control target
= control target key end

     0   :  { %s20959_s21 = smov 0   ;;  %s20961_s22 = smov 0   ;;  %s26839_s0 = inlined_call_operand.vmem [shape: bf16[2,20,20,4], index: 0, kind: input, shape index: {}]   ;;  %s26840_s1 = inlined_call_operand.vmem [shape: f32[2,16,16,4], index: 1, kind: input, shape index: {}]   ;;  %s26841_s2 = inlined_call_operand.vmem [shape: bf16[36,4], index: 2, kind: input, shape index: {}]   ;;  %s26842_s3 = inlined_call_operand.vmem [shape: f32[1,4], index: 3, kind: input, shape index: {}]   ;;  %s26843_s4 = inlined_call_operand.vmem [shape: bf16[36,4], index: 4, kind: input, shape index: {}]   ;;  %s26844_s5 = inlined_call_operand.vmem [shape: f32[1,4], index: 5, kind: input, shape index: {}]   ;;  %s26845_s6 = inlined_call_operand.vmem [shape: f32[2,16,16,4], index: 6, kind: output, shape index: {}]  }
   0x1   :  { %s20963_s23 = smov 0   ;;  %s20965_s24 = smov 0  }
   0x2   :  { %s20967_s25 = smov 0  }
   0x3 LB: > { %s25_s26 = sadd.s32 1, %s20912_s23  ;;  %s28_s27 = sadd.s32 1, %s20916_s24  ;;  %s20920_s25 = sphi %s20967_s25, %s16_s25   ;;  %s20916_s24 = sphi %s20965_s24, %s27236_s24   ;;  %s20912_s23 = sphi %s20963_s23, %s27235_s23   ;;  %s20908_s22 = sphi %s20961_s22, %s27234_s22   ;;  %s20904_s21 = sphi %s20959_s21, %s27233_s21  }
   0x4   : > { %p26_p0 = scmp.ge.s32.totalorder %s25_s26, 2  ;;  %p19241_p1 = scmp.ge.s32.totalorder %s20920_s25, 1 }
   0x5   : > { %p244_p2 = scmp.lt.s32.totalorder %s20920_s25, 5 }
   0x6   : > { %s27238_s26 = smov (%p26_p0, %s25_s26), 0  ;;  %s27240_s27 = smov (!%p26_p0, %s28_s27), %s20916_s24 }
   0x7   : > { %p245_p3 = pnand %p19241_p1, %p244_p2  ;;  %p30_p4 = scmp.ge.s32.totalorder %s27240_s27, 2 }
   0x9   : > { %s27242_s27 = smov (%p30_p4, %s27240_s27), 0  ;;  %248 = sbr.rel (%p245_p3) target bundleno = 1415 (0x587), region = 44 }
   0xe   : > { %v20870_v0 = vld [vmem:[%s26841_s2] ss:$0 sps:$4 sm:$0xcc]   ;;  %v392_v1 = vlaneseq  ;;  %vm26865_vm0 = vcmask 1041408   ;;  %p289_p5 = scmp.lt.s32.totalorder %s20908_s22, 1  ;;  %s20211_s8 = smul.u32 96, %s20904_s21 }
   0xf   : > { %vm1242_vm1 = vsmask.f32 256  ;;  %v2545_v2 = vrot.slane %v20870_v0, 2  ;;  %v20922_v3 = vmov 1966171168   ;;  %s24828_s19 = sshll.u32 %s20904_s21, 3 }
  0x10   : > { %v390_v4 = vunpack.c.l.s4 %v20922_v3  ;;  %v20994_v5 = vshrl.u32 %v392_v1, 7  ;;  %vm1243_vm2 = vsmask.f32 1284  ;;  %v4196_v6 = vld [vmem:[%s26841_s2 + $0x4] sm:$0x3]  ;;  %s27244_s22 = smov (!%p289_p5, %s20908_s22), 1 }
  0x11   : > { %vm1244_vm3 = vmor %vm1242_vm1, %vm1243_vm2  ;;  %vm1245_vm4 = vsmask.f32 2312  ;;  %vm1247_vm5 = vsmask.f32 3340  ;;  %20808 = vmatprep.subr.msk.bf16.mxu0 %vm26865_vm0, %v2545_v2  ;;  %20809 = vmatprep.subr.msk.bf16.mxu1 %vm26865_vm0, %v2545_v2  ;;  %v2585_v7 = vsel %vm26865_vm0, %v2545_v2, 0  ;;  %s20827_s9 = smul.u32 240, %s27244_s22 }
  0x12   : > { %26867 = vst [vmem:[#allocation2_spill] sm:$0xff] %v20994_v5  ;;  %v391_v8 = vunpack.c.0.s8 %v390_v4  ;;  %vm1246_vm6 = vmor %vm1244_vm3, %vm1245_vm4  ;;  %vm1249_vm7 = vsmask.f32 4368  ;;  %vm1251_vm8 = vsmask.f32 5396  ;;  %20411 = vmatpush3.bf16.msra.mxu0 %v2585_v7  ;;  %20807 = vmatpush3.bf16.msra.mxu1 %v2585_v7  ;;  %v21029_v18 = vsel %vm26865_vm0, %v4196_v6, 0 }
  0x13   : > { %vm1248_vm9 = vmor %vm1246_vm6, %vm1247_vm5  ;;  %20811 = vmatprep.subr.msk.bf16.mxu0 %vm26865_vm0, %v4196_v6  ;;  %v1001_v10 = vld [vmem:[%s26841_s2] sm:$0x3]  ;;  %s293_s14 = scalar_lea.vmem %s26839_s0, %s20827_s9  ;;  %vm1253_vm12 = vsmask.f32 6424  ;;  %vm1255_vm13 = vsmask.f32 7452 }
  0x14   : > { %v21007_v9 = vsub.s32 %v391_v8, %v20994_v5  ;;  %vm1250_vm10 = vmor %vm1248_vm9, %vm1249_vm7  ;;  %20810 = vmatprep.subr.msk.bf16.mxu1 %vm26865_vm0, %v1001_v10  ;;  %s21017_s15 = scalar_lea.vmem %s293_s14, %s20211_s8  ;;  %v21032_v19 = vsel %vm26865_vm0, %v1001_v10, 0  ;;  %vm2546_vm1 = vcmask 31744   ;;  %s20131_s20 = sadd.s32 4294967295, %s24828_s19 }
  0x15   : > { %vm1252_vm11 = vmor %vm1250_vm10, %vm1251_vm8  ;;  %v19254_v11 = vld.sshfl [vmem:[%s21017_s15] sm:$0x33 pattern:$0x75316420]  ;;  %p297_p6 = scmp.lt.s32.totalorder %s24828_s19, 15  ;;  %s19245_s7 = sshll.u32 %s27244_s22, 5 }
  0x16   : > { %v19255_v12 = vld.sshfl [vmem:[%s21017_s15 + $0x4] sm:$0x33 pattern:$0x75316420]  ;;  %v388_v13 = vcombine.high %v19254_v11, %v19254_v11  ;;  %v21022_v14 = vrot.slane %v19254_v11, %v21007_v9  ;;  %vm1254_vm14 = vmor %vm1252_vm11, %vm1253_vm12 }
  0x17   : > { %v412_v15 = vcombine.high %v19255_v12, %v19255_v12  ;;  %v21025_v16 = vrot.slane %v19255_v12, %v21007_v9  ;;  %v19284_v17 = vld.sshfl [vmem:[%s21017_s15 + $0x8] sm:$0x11 pattern:$0x75316420]  ;;  %vm21048_vm15 = vmor %vm1254_vm14, %vm1255_vm13  ;;  %s27246_s19 = smov (!%p297_p6, %s24828_s19), 15 }
  0x18   : > { %v21035_v20 = vrot.slane %v388_v13, %v21007_v9  ;;  %v403_v21 = vcombine.high %v21022_v14, %v21022_v14  ;;  %v1029_v22 = vcombine.high %v19284_v17, %v19284_v17  ;;  %v21040_v23 = vrot.slane %v19284_v17, %v21007_v9  ;;  %v19281_v41 = vld.sshfl [vmem:[%s21017_s15 + $0x6c] sm:$0x33 pattern:$0x75316420]  ;;  %s19244_s30 = sshll.u32 %s27246_s19, 1 }
  0x19   : > { %v21043_v24 = vrot.slane %v412_v15, %v21007_v9  ;;  %v427_v25 = vcombine.high %v21025_v16, %v21025_v16  ;;  %v1258_v27 = vshrl.u32 %v21022_v14, 16  ;;  %v1287_v28 = vshll.u32 %v21025_v16, 16  ;;  %v19282_v50 = vld.sshfl [vmem:[%s21017_s15 + $0x70] sm:$0x33 pattern:$0x75316420]  ;;  %s26641_s8 = sadd.s32 %s19245_s7, %s19244_s30 }
  0x1a   : > { %v404_v29 = vcombine.high %v21035_v20, %v21035_v20  ;;  %v21057_v30 = vrot.slane %v1029_v22, %v21007_v9  ;;  %v1263_v31 = vshll.u32 %v21035_v20, 16  ;;  %v1266_v32 = vshrl.u32 %v21035_v20, 16  ;;  %v19292_v63 = vld.sshfl [vmem:[%s21017_s15 + $0x68] sm:$0x11 pattern:$0x75316420] }
  0x1b   : > { %v428_v33 = vcombine.high %v21043_v24, %v21043_v24  ;;  %v1271_v34 = vshll.u32 %v403_v21, 16  ;;  %v1274_v35 = vshrl.u32 %v403_v21, 16  ;;  %v1290_v36 = vshrl.u32 %v21025_v16, 16  ;;  %s19246_s22 = sshll.u32 %s26641_s8, 3 }
  0x1c   : > { %v1265_v37 = vsel %vm21048_vm15, %v1258_v27, %v1263_v31  ;;  %v1279_v38 = vshll.u32 %v404_v29, 16  ;;  %v1282_v39 = vshrl.u32 %v404_v29, 16  ;;  %v1295_v40 = vshll.u32 %v21043_v24, 16  ;;  %s26675_s10 = scalar_lea.vmem %s26840_s1, %s19246_s22 }
  0x1d   : > { %v1273_v42 = vsel %vm21048_vm15, %v1266_v32, %v1271_v34  ;;  %v1298_v43 = vshrl.u32 %v21043_v24, 16  ;;  %v1303_v44 = vshll.u32 %v427_v25, 16  ;;  %v1306_v45 = vshrl.u32 %v427_v25, 16 }
  0x1e   : > { %v1281_v46 = vsel %vm21048_vm15, %v1274_v35, %v1279_v38  ;;  %v1289_v47 = vsel %vm21048_vm15, %v1282_v39, %v1287_v28  ;;  %v1297_v48 = vsel %vm21048_vm15, %v1290_v36, %v1295_v40  ;;  %v1311_v49 = vshll.u32 %v428_v33, 16 }
  0x1f   : > { %v1305_v51 = vsel %vm21048_vm15, %v1298_v43, %v1303_v44  ;;  %v1314_v52 = vshrl.u32 %v428_v33, 16  ;;  %v1319_v53 = vshll.u32 %v21040_v23, 16  ;;  %v1322_v54 = vshrl.u32 %v21040_v23, 16 }
  0x20   : > { %v1313_v55 = vsel %vm21048_vm15, %v1306_v45, %v1311_v49  ;;  %v1988_v56 = vcombine.low %v1265_v37, %v1273_v42  ;;  %v1989_v57 = vcombine.low %v1281_v46, %v1289_v47  ;;  %v1990_v58 = vcombine.low %v1297_v48, %v1305_v51  ;;  %v19257_v47 = vld.sshfl [vmem:[%s21017_s15 + $0xc] sm:$0x33 pattern:$0x75316420] }
  0x21   : > { %v1321_v59 = vsel %vm21048_vm15, %v1314_v52, %v1319_v53  ;;  %v946_v60 = vcombine.high %v19281_v41, %v19281_v41  ;;  %v21087_v61 = vrot.slane %v19281_v41, %v21007_v9  ;;  %v970_v62 = vcombine.high %v19282_v50, %v19282_v50 }
  0x22   : > { %v1991_v0 = vcombine.low %v1313_v55, %v1321_v59  ;;  %v1998_v1 = vrot.slane %v1988_v56, %v21007_v9  ;;  %v2005_v2 = vrot.slane %v1989_v57, %v21007_v9  ;;  %v2012_v3 = vrot.slane %v1990_v58, %v21007_v9  ;;  %v19258_v57 = vld.sshfl [vmem:[%s21017_s15 + $0x10] sm:$0x33 pattern:$0x75316420] }
  0x23   : > { %v21094_v4 = vrot.slane %v946_v60, %v21007_v9  ;;  %v21098_v6 = vcombine.high %v21087_v61, %v21087_v61  ;;  %v21101_v7 = vrot.slane %v19282_v50, %v21007_v9  ;;  %v21104_v8 = vrot.slane %v970_v62, %v21007_v9 }
  0x24   : > { %v2019_v10 = vrot.slane %v1991_v0, %v21007_v9  ;;  %v2020_v11 = vcombine.low %v1998_v1, %v2005_v2  ;;  %v1205_v12 = vcombine.high %v19292_v63, %v19292_v63  ;;  %v21108_v13 = vrot.slane %v19292_v63, %v21007_v9 }
  0x25   : > { %v21112_v15 = vcombine.high %v21094_v4, %v21094_v4  ;;  %v21116_v17 = vcombine.high %v21101_v7, %v21101_v7  ;;  %v21120_v21 = vcombine.high %v21104_v8, %v21104_v8  ;;  %v1915_v22 = vshrl.u32 %v21087_v61, 16 }
  0x26   : > { %v2021_v25 = vcombine.low %v2012_v3, %v2019_v10  ;;  %v2028_v27 = vrot.slane %v2020_v11, %v21007_v9  ;;  %v1219_v28 = vrot.slane %v1205_v12, %v21007_v9  ;;  %v1903_v29 = vshll.u32 %v21108_v13, 16 }
  0x27   : > { %v1906_v31 = vshrl.u32 %v21108_v13, 16  ;;  %v1920_v32 = vshll.u32 %v21094_v4, 16  ;;  %v1923_v33 = vshrl.u32 %v21094_v4, 16  ;;  %v1928_v34 = vshll.u32 %v21098_v6, 16 }
  0x28   : > { %v2035_v35 = vrot.slane %v2021_v25, %v21007_v9  ;;  %v1911_v36 = vshll.u32 %v1219_v28, 16  ;;  %v1931_v37 = vshrl.u32 %v21098_v6, 16  ;;  %v1936_v38 = vshll.u32 %v21112_v15, 16 }
  0x29   : > { %v1922_v39 = vsel %vm21048_vm15, %v1915_v22, %v1920_v32  ;;  %v1930_v40 = vsel %vm21048_vm15, %v1923_v33, %v1928_v34  ;;  %v1939_v41 = vshrl.u32 %v21112_v15, 16  ;;  %v1944_v42 = vshll.u32 %v21101_v7, 16 }
  0x2a   : > { %v2036_v43 = vcombine.low %v2028_v27, %v2035_v35  ;;  %v1913_v44 = vsel %vm21048_vm15, %v1906_v31, %v1911_v36  ;;  %v1938_v45 = vsel %vm21048_vm15, %v1931_v37, %v1936_v38  ;;  %v1947_v46 = vshrl.u32 %v21101_v7, 16 }
  0x2b   : > { %v1946_v48 = vsel %vm21048_vm15, %v1939_v41, %v1944_v42  ;;  %v1952_v49 = vshll.u32 %v21104_v8, 16  ;;  %v1955_v50 = vshrl.u32 %v21104_v8, 16  ;;  %v1960_v51 = vshll.u32 %v21116_v17, 16 }
  0x2c   : > { %20412 = vmatprep.mubr.msk.bf16.mxu0 %vm2546_vm1, %v2036_v43  ;;  %v1963_v52 = vshrl.u32 %v21116_v17, 16  ;;  %v1968_v53 = vshll.u32 %v21120_v21, 16  ;;  %v2478_v55 = vcombine.low %v1913_v44, %v1922_v39  ;;  %v2479_v56 = vcombine.low %v1930_v40, %v1938_v45 }
  0x2d   : > { %v1954_v58 = vsel %vm21048_vm15, %v1947_v46, %v1952_v49  ;;  %v1962_v59 = vsel %vm21048_vm15, %v1955_v50, %v1960_v51  ;;  %v450_v60 = vcombine.high %v19257_v47, %v19257_v47  ;;  %v21159_v62 = vrot.slane %v19257_v47, %v21007_v9 }
  0x2e   : > { %v1970_v63 = vsel %vm21048_vm15, %v1963_v52, %v1968_v53  ;;  %v2480_v0 = vcombine.low %v1946_v48, %v1954_v58  ;;  %v2488_v1 = vrot.slane %v2478_v55, %v21007_v9  ;;  %v2495_v2 = vrot.slane %v2479_v56, %v21007_v9  ;;  %v19293_v48 = vld.sshfl [vmem:[%s21017_s15 + $0x74] sm:$0x11 pattern:$0x75316420] }
  0x2f   : > { %v2481_v3 = vcombine.low %v1962_v59, %v1970_v63  ;;  %v21166_v10 = vrot.slane %v450_v60, %v21007_v9  ;;  %v21170_v11 = vcombine.high %v21159_v62, %v21159_v62  ;;  %v474_v12 = vcombine.high %v19258_v57, %v19258_v57 }
  0x30   : > { %v2502_v22 = vrot.slane %v2480_v0, %v21007_v9  ;;  %v2510_v25 = vcombine.low %v2488_v1, %v2495_v2  ;;  %v21174_v27 = vrot.slane %v19258_v57, %v21007_v9  ;;  %v1327_v28 = vshll.u32 %v21057_v30, 16 }
  0x31   : > { %v2509_v31 = vrot.slane %v2481_v3, %v21007_v9  ;;  %v21180_v32 = vcombine.high %v21166_v10, %v21166_v10  ;;  %v21183_v33 = vrot.slane %v474_v12, %v21007_v9  ;;  %v1331_v34 = vshrl.u32 %v21159_v62, 16  ;;  %v19260_v12 = vld.sshfl [vmem:[%s21017_s15 + $0x18] sm:$0x33 pattern:$0x75316420] }
  0x32   : > { %v2518_v35 = vrot.slane %v2510_v25, %v21007_v9  ;;  %v21189_v36 = vcombine.high %v21174_v27, %v21174_v27  ;;  %v1329_v30 = vsel %vm21048_vm15, %v1322_v54, %v1327_v28  ;;  %v1336_v37 = vshll.u32 %v21166_v10, 16 }
  0x33   : > { %v2511_v38 = vcombine.low %v2502_v22, %v2509_v31  ;;  %v21198_v39 = vcombine.high %v21183_v33, %v21183_v33  ;;  %v1339_v40 = vshrl.u32 %v21166_v10, 16  ;;  %v1344_v41 = vshll.u32 %v21170_v11, 16 }
  0x34   : > { %v1338_v42 = vsel %vm21048_vm15, %v1331_v34, %v1336_v37  ;;  %v1347_v43 = vshrl.u32 %v21170_v11, 16  ;;  %v1352_v23 = vshll.u32 %v21180_v32, 16  ;;  %v1355_v54 = vshrl.u32 %v21180_v32, 16 }
  0x35   : > { %v2525_v44 = vrot.slane %v2511_v38, %v21007_v9  ;;  %v1346_v45 = vsel %vm21048_vm15, %v1339_v40, %v1344_v41  ;;  %v1360_v46 = vshll.u32 %v21174_v27, 16  ;;  %v1363_v47 = vshrl.u32 %v21174_v27, 16  ;;  %v19261_v34 = vld.sshfl [vmem:[%s21017_s15 + $0x1c] sm:$0x33 pattern:$0x75316420] }
  0x36   : > { %v1354_v49 = vsel %vm21048_vm15, %v1347_v43, %v1352_v23  ;;  %v1368_v50 = vshll.u32 %v21183_v33, 16  ;;  %v1371_v51 = vshrl.u32 %v21183_v33, 16  ;;  %v1376_v52 = vshll.u32 %v21189_v36, 16 }
  0x37   : > { %v2526_v53 = vcombine.low %v2518_v35, %v2525_v44  ;;  %v1362_v55 = vsel %vm21048_vm15, %v1355_v54, %v1360_v46  ;;  %v1379_v56 = vshrl.u32 %v21189_v36, 16  ;;  %v1384_v57 = vshll.u32 %v21198_v39, 16  ;;  %v19285_v23 = vld.sshfl [vmem:[%s21017_s15 + $0x14] sm:$0x11 pattern:$0x75316420] }
  0x38   : > { %v1370_v58 = vsel %vm21048_vm15, %v1363_v47, %v1368_v50  ;;  %v1378_v59 = vsel %vm21048_vm15, %v1371_v51, %v1376_v52  ;;  %v2037_v60 = vcombine.low %v1329_v30, %v1338_v42  ;;  %v2038_v63 = vcombine.low %v1346_v45, %v1354_v49 }
  0x39   : > { %20432 = vmatprep.mubr.msk.bf16.mxu1 %vm2546_vm1, %v2526_v53  ;;  %v1386_v0 = vsel %vm21048_vm15, %v1379_v56, %v1384_v57  ;;  %v2039_v1 = vcombine.low %v1362_v55, %v1370_v58  ;;  %v1227_v2 = vcombine.high %v19293_v48, %v19293_v48  ;;  %v1234_v3 = vrot.slane %v19293_v48, %v21007_v9 }
  0x3a   : > { %v2040_v22 = vcombine.low %v1378_v59, %v1386_v0  ;;  %v2047_v25 = vrot.slane %v2037_v60, %v21007_v9  ;;  %v2054_v28 = vrot.slane %v2038_v63, %v21007_v9  ;;  %v1971_v31 = vshrl.u32 %v21120_v21, 16 }
  0x3b   : > { %v2061_v35 = vrot.slane %v2039_v1, %v21007_v9  ;;  %v1241_v30 = vrot.slane %v1227_v2, %v21007_v9  ;;  %v1976_v37 = vshll.u32 %v1234_v3, 16  ;;  %v1979_v38 = vshrl.u32 %v1234_v3, 16 }
  0x3c   : > { %v2068_v40 = vrot.slane %v2040_v22, %v21007_v9  ;;  %v2069_v41 = vcombine.low %v2047_v25, %v2054_v28  ;;  %v512_v42 = vcombine.high %v19260_v12, %v19260_v12  ;;  %v21239_v43 = vrot.slane %v19260_v12, %v21007_v9 }
  0x3d   : > { %v1978_v54 = vsel %vm21048_vm15, %v1971_v31, %v1976_v37  ;;  %v1984_v44 = vshll.u32 %v1241_v30, 16  ;;  %v536_v45 = vcombine.high %v19261_v34, %v19261_v34  ;;  %v21245_v46 = vrot.slane %v19261_v34, %v21007_v9 }
  0x3e   : > { %v2070_v47 = vcombine.low %v2061_v35, %v2068_v40  ;;  %v2077_v48 = vrot.slane %v2069_v41, %v21007_v9  ;;  %v21249_v49 = vrot.slane %v512_v42, %v21007_v9  ;;  %v527_v50 = vcombine.high %v21239_v43, %v21239_v43 }
  0x3f   : > { %v1986_v51 = vsel %vm21048_vm15, %v1979_v38, %v1984_v44  ;;  %v21256_v52 = vrot.slane %v536_v45, %v21007_v9  ;;  %v21260_v53 = vcombine.high %v21245_v46, %v21245_v46  ;;  %v1051_v55 = vcombine.high %v19285_v23, %v19285_v23 }
  0x40   : > { %v2084_v56 = vrot.slane %v2070_v47, %v21007_v9  ;;  %v2527_v57 = vcombine.low %v1978_v54, %v1986_v51  ;;  %v528_v58 = vcombine.high %v21249_v49, %v21249_v49  ;;  %v1058_v59 = vrot.slane %v19285_v23, %v21007_v9 }
  0x41   : > { %v1065_v60 = vrot.slane %v1051_v55, %v21007_v9  ;;  %v1387_v63 = vshrl.u32 %v21198_v39, 16  ;;  %v1404_v0 = vshrl.u32 %v21239_v43, 16  ;;  %v1409_v1 = vshll.u32 %v21249_v49, 16 }
  0x42   : > { %v2085_v2 = vcombine.low %v2077_v48, %v2084_v56  ;;  %v2534_v3 = vrot.slane %v2527_v57, %v21007_v9  ;;  %v1392_v12 = vshll.u32 %v1058_v59, 16  ;;  %v1395_v22 = vshrl.u32 %v1058_v59, 16 }
  0x43   : > { %v1400_v25 = vshll.u32 %v1065_v60, 16  ;;  %v1411_v28 = vsel %vm21048_vm15, %v1404_v0, %v1409_v1  ;;  %v1412_v31 = vshrl.u32 %v21249_v49, 16  ;;  %v1417_v34 = vshll.u32 %v527_v50, 16 }
  0x44   : > { %20413 = vmatmul.mubr.msk.bf16.vlgmr.msra.gmra.mxu0 %vm2546_vm1, %v2085_v2  ;;  %v2541_v35 = vrot.slane %v2534_v3, %v21007_v9  ;;  %v1394_v30 = vsel %vm21048_vm15, %v1387_v63, %v1392_v12  ;;  %v1420_v37 = vshrl.u32 %v527_v50, 16  ;;  %v1425_v38 = vshll.u32 %v528_v58, 16  ;;  %v19263_v0 = vld.sshfl [vmem:[%s21017_s15 + $0x24] sm:$0x33 pattern:$0x75316420] }
  0x45   : > { %20463 = vmatpush3.bf16.msra.mxu0 %v21029_v18  ;;  %v1402_v40 = vsel %vm21048_vm15, %v1395_v22, %v1400_v25  ;;  %v1419_v41 = vsel %vm21048_vm15, %v1412_v31, %v1417_v34  ;;  %v1428_v42 = vshrl.u32 %v528_v58, 16  ;;  %v1433_v23 = vshll.u32 %v21245_v46, 16 }
  0x46   : > { %20433 = vmatmul.mubr.msk.bf16.vlgmr.msra.gmra.mxu1 %vm2546_vm1, %v2541_v35  ;;  %v1427_v54 = vsel %vm21048_vm15, %v1420_v37, %v1425_v38  ;;  %v1436_v44 = vshrl.u32 %v21245_v46, 16  ;;  %v1441_v45 = vshll.u32 %v21256_v52, 16  ;;  %v1444_v18 = vshrl.u32 %v21256_v52, 16 }
  0x47   : > { %20437 = vmatpush3.bf16.msra.mxu1 %v21032_v19  ;;  %v1435_v47 = vsel %vm21048_vm15, %v1428_v42, %v1433_v23  ;;  %v1449_v48 = vshll.u32 %v21260_v53, 16  ;;  %v2086_v50 = vcombine.low %v1394_v30, %v1402_v40  ;;  %v2087_v51 = vcombine.low %v1411_v28, %v1419_v41 }
  0x48   : > { %v1443_v55 = vsel %vm21048_vm15, %v1436_v44, %v1441_v45  ;;  %v2088_v56 = vcombine.low %v1427_v54, %v1435_v47  ;;  %v2715_v57 = vcombine.low %v21022_v14, %v21035_v20  ;;  %v19397_v58 = vcombine.high %v21022_v14, %v21035_v20  ;;  %v19264_v20 = vld.sshfl [vmem:[%s21017_s15 + $0x28] sm:$0x33 pattern:$0x75316420] }
  0x49   : > { %v1451_v19 = vsel %vm21048_vm15, %v1444_v18, %v1449_v48  ;;  %v2096_v59 = vrot.slane %v2086_v50, %v21007_v9  ;;  %v2103_v60 = vrot.slane %v2087_v51, %v21007_v9  ;;  %v2717_v63 = vcombine.low %v21025_v16, %v21043_v24  ;;  %v7864_v44 = vld [vmem:[%s26841_s2 + $0x8] sm:$0x3] }
  0x4a   : > { %v2089_v1 = vcombine.low %v1443_v55, %v1451_v19  ;;  %v2110_v2 = vrot.slane %v2088_v56, %v21007_v9  ;;  %v19398_v3 = vcombine.high %v21025_v16, %v21043_v24  ;;  %v2725_v14 = vrot.slane %v2715_v57, %v21007_v9  ;;  %v19286_v16 = vld.sshfl [vmem:[%s21017_s15 + $0x20] sm:$0x11 pattern:$0x75316420]  ;;  %20813 = vmatprep.subr.msk.bf16.mxu0 %vm26865_vm0, %v7864_v44 }
  0x4b   : > { %v2118_v12 = vcombine.low %v2096_v59, %v2103_v60  ;;  %v2732_v22 = vrot.slane %v19397_v58, %v21007_v9  ;;  %v2739_v25 = vrot.slane %v2717_v63, %v21007_v9  ;;  %v552_v28 = vcombine.high %v21256_v52, %v21256_v52 }
  0x4c   : > { %v2117_v31 = vrot.slane %v2089_v1, %v21007_v9  ;;  %v2746_v34 = vrot.slane %v19398_v3, %v21007_v9  ;;  %v574_v35 = vcombine.high %v19263_v0, %v19263_v0  ;;  %v21319_v30 = vrot.slane %v19263_v0, %v21007_v9 }
  0x4d   : > { %v2126_v24 = vrot.slane %v2118_v12, %v21007_v9  ;;  %v2747_v37 = vcombine.low %v2725_v14, %v2732_v22  ;;  %v598_v38 = vcombine.high %v19264_v20, %v19264_v20  ;;  %v21324_v40 = vrot.slane %v19264_v20, %v21007_v9 }
  0x4e   : > { %v2119_v41 = vcombine.low %v2110_v2, %v2117_v31  ;;  %v2748_v42 = vcombine.low %v2739_v25, %v2746_v34  ;;  %v21327_v23 = vrot.slane %v574_v35, %v21007_v9  ;;  %v21331_v54 = vcombine.high %v21319_v30, %v21319_v30 }
  0x4f   : > { %v2755_v45 = vrot.slane %v2747_v37, %v21007_v9  ;;  %v21338_v18 = vrot.slane %v598_v38, %v21007_v9  ;;  %v1073_v47 = vcombine.high %v19286_v16, %v19286_v16  ;;  %v1080_v48 = vrot.slane %v19286_v16, %v21007_v9  ;;  %v19256_v16 = vld.sshfl [vmem:[%s21017_s15 + $0x8] sm:$0x1 pattern:$0x75316420] }
  0x50   : > { %v2133_v50 = vrot.slane %v2119_v41, %v21007_v9  ;;  %v2762_v51 = vrot.slane %v2748_v42, %v21007_v9  ;;  %v21346_v55 = vcombine.high %v21327_v23, %v21327_v23  ;;  %v1452_v56 = vshrl.u32 %v21260_v53, 16 }
  0x51   : > { %v1087_v57 = vrot.slane %v1073_v47, %v21007_v9  ;;  %v1457_v58 = vshll.u32 %v552_v28, 16  ;;  %v1460_v19 = vshrl.u32 %v552_v28, 16  ;;  %v1465_v59 = vshll.u32 %v1080_v48, 16 }
  0x52   : > { %v2134_v60 = vcombine.low %v2126_v24, %v2133_v50  ;;  %v2763_v63 = vcombine.low %v2755_v45, %v2762_v51  ;;  %v1468_v0 = vshrl.u32 %v1080_v48, 16  ;;  %v1477_v1 = vshrl.u32 %v21319_v30, 16 }
  0x53   : > { %v1459_v2 = vsel %vm21048_vm15, %v1452_v56, %v1457_v58  ;;  %v1467_v3 = vsel %vm21048_vm15, %v1460_v19, %v1465_v59  ;;  %v1473_v14 = vshll.u32 %v1087_v57, 16  ;;  %v1482_v53 = vshll.u32 %v21327_v23, 16 }
  0x54   : > { %20416 = vmatprep.mubr.msk.bf16.mxu0 %vm2546_vm1, %v2134_v60  ;;  %20438 = vmatprep.mubr.msk.bf16.mxu1 %vm2546_vm1, %v2763_v63  ;;  %v1485_v20 = vshrl.u32 %v21327_v23, 16  ;;  %v1490_v12 = vshll.u32 %v21331_v54, 16  ;;  %v1493_v22 = vshrl.u32 %v21331_v54, 16  ;;  %v1498_v25 = vshll.u32 %v21346_v55, 16 }
  0x55   : > { %v1475_v28 = vsel %vm21048_vm15, %v1468_v0, %v1473_v14  ;;  %v1484_v31 = vsel %vm21048_vm15, %v1477_v1, %v1482_v53  ;;  %v1501_v34 = vshrl.u32 %v21346_v55, 16  ;;  %v1506_v35 = vshll.u32 %v21324_v40, 16  ;;  %v19266_v60 = vld.sshfl [vmem:[%s21017_s15 + $0x30] sm:$0x33 pattern:$0x75316420] }
  0x56   : > { %v1492_v24 = vsel %vm21048_vm15, %v1485_v20, %v1490_v12  ;;  %v1500_v37 = vsel %vm21048_vm15, %v1493_v22, %v1498_v25  ;;  %v1509_v38 = vshrl.u32 %v21324_v40, 16  ;;  %v1514_v41 = vshll.u32 %v21338_v18, 16 }
  0x57   : > { %v1508_v42 = vsel %vm21048_vm15, %v1501_v34, %v1506_v35  ;;  %v2135_v44 = vcombine.low %v1459_v2, %v1467_v3  ;;  %v2136_v45 = vcombine.low %v1475_v28, %v1484_v31  ;;  %v2137_v47 = vcombine.low %v1492_v24, %v1500_v37 }
  0x58   : > { %v1516_v48 = vsel %vm21048_vm15, %v1509_v38, %v1514_v41  ;;  %v442_v50 = vrot.slane %v19256_v16, %v21007_v9  ;;  %v2765_v51 = vcombine.low %v21166_v10, %v21170_v11  ;;  %v2766_v56 = vcombine.low %v21180_v32, %v21174_v27  ;;  %v19287_v11 = vld.sshfl [vmem:[%s21017_s15 + $0x2c] sm:$0x11 pattern:$0x75316420] }
  0x59   : > { %v2138_v57 = vcombine.low %v1508_v42, %v1516_v48  ;;  %v2145_v58 = vrot.slane %v2135_v44, %v21007_v9  ;;  %v2152_v19 = vrot.slane %v2136_v45, %v21007_v9  ;;  %v2159_v59 = vrot.slane %v2137_v47, %v21007_v9 }
  0x5a   : > { %v2764_v63 = vcombine.low %v442_v50, %v21159_v62  ;;  %v2767_v0 = vcombine.low %v21183_v33, %v21189_v36  ;;  %v2781_v1 = vrot.slane %v2765_v51, %v21007_v9  ;;  %v2788_v10 = vrot.slane %v2766_v56, %v21007_v9  ;;  %v21406_v36 = vld.sshfl [vmem:[%s21017_s15 + $0x34] sm:$0x33 pattern:$0x75316420] }
  0x5b   : > { %v2166_v27 = vrot.slane %v2138_v57, %v21007_v9  ;;  %v2167_v32 = vcombine.low %v2145_v58, %v2152_v19  ;;  %v21397_v2 = vcombine.high %v21324_v40, %v21324_v40  ;;  %v21401_v3 = vcombine.high %v21338_v18, %v21338_v18 }
  0x5c   : > { %v2774_v62 = vrot.slane %v2764_v63, %v21007_v9  ;;  %v2795_v33 = vrot.slane %v2767_v0, %v21007_v9  ;;  %v636_v14 = vcombine.high %v19266_v60, %v19266_v60  ;;  %v21409_v53 = vrot.slane %v19266_v60, %v21007_v9 }
  0x5d   : > { %v2168_v20 = vcombine.low %v2159_v59, %v2166_v27  ;;  %v2175_v12 = vrot.slane %v2167_v32, %v21007_v9  ;;  %v21414_v22 = vrot.slane %v21406_v36, %v21007_v9  ;;  %v1095_v25 = vcombine.high %v19287_v11, %v19287_v11  ;;  %v19259_v59 = vld.sshfl [vmem:[%s21017_s15 + $0x14] sm:$0x1 pattern:$0x75316420] }
  0x5e   : > { %v2796_v28 = vcombine.low %v2774_v62, %v2781_v1  ;;  %v2797_v31 = vcombine.low %v2788_v10, %v2795_v33  ;;  %v21417_v34 = vrot.slane %v636_v14, %v21007_v9  ;;  %v651_v35 = vcombine.high %v21409_v53, %v21409_v53 }
  0x5f   : > { %v2182_v16 = vrot.slane %v2168_v20, %v21007_v9  ;;  %v1102_v24 = vrot.slane %v19287_v11, %v21007_v9  ;;  %v1109_v37 = vrot.slane %v1095_v25, %v21007_v9  ;;  %v1517_v38 = vshrl.u32 %v21338_v18, 16 }
  0x60   : > { %v2804_v41 = vrot.slane %v2796_v28, %v21007_v9  ;;  %v2811_v42 = vrot.slane %v2797_v31, %v21007_v9  ;;  %v652_v44 = vcombine.high %v21417_v34, %v21417_v34  ;;  %v1522_v45 = vshll.u32 %v21397_v2, 16 }
  0x61   : > { %v2183_v47 = vcombine.low %v2175_v12, %v2182_v16  ;;  %v1525_v48 = vshrl.u32 %v21397_v2, 16  ;;  %v1530_v50 = vshll.u32 %v21401_v3, 16  ;;  %v1533_v51 = vshrl.u32 %v21401_v3, 16 }
  0x62   : > { %v2812_v56 = vcombine.low %v2804_v41, %v2811_v42  ;;  %v1524_v57 = vsel %vm21048_vm15, %v1517_v38, %v1522_v45  ;;  %v1538_v58 = vshll.u32 %v1102_v24, 16  ;;  %v1541_v19 = vshrl.u32 %v1102_v24, 16 }
  0x63   : > { %20417 = vmatmul.mubr.msk.bf16.gmra.mxu0 %vm2546_vm1, %v2183_v47  ;;  %v1532_v60 = vsel %vm21048_vm15, %v1525_v48, %v1530_v50  ;;  %v1546_v63 = vshll.u32 %v1109_v37, 16  ;;  %v1550_v0 = vshrl.u32 %v21409_v53, 16  ;;  %v1555_v1 = vshll.u32 %v21417_v34, 16 }
  0x64   : > { %20439 = vmatmul.mubr.msk.bf16.vlgmr.msra.gmra.mxu1 %vm2546_vm1, %v2812_v56  ;;  %v1540_v10 = vsel %vm21048_vm15, %v1533_v51, %v1538_v58  ;;  %v1558_v11 = vshrl.u32 %v21417_v34, 16  ;;  %v1563_v27 = vshll.u32 %v651_v35, 16  ;;  %v1566_v32 = vshrl.u32 %v651_v35, 16 }
  0x65   : > { %v1548_v62 = vsel %vm21048_vm15, %v1541_v19, %v1546_v63  ;;  %v1557_v33 = vsel %vm21048_vm15, %v1550_v0, %v1555_v1  ;;  %v1571_v14 = vshll.u32 %v652_v44, 16  ;;  %v1574_v20 = vshrl.u32 %v652_v44, 16  ;;  %v19269_v51 = vld.sshfl [vmem:[%s21017_s15 + $0x3c] sm:$0x33 pattern:$0x75316420] }
  0x66   : > { %v1565_v12 = vsel %vm21048_vm15, %v1558_v11, %v1563_v27  ;;  %v1579_v25 = vshll.u32 %v21414_v22, 16  ;;  %v2184_v28 = vcombine.low %v1524_v57, %v1532_v60  ;;  %v2185_v31 = vcombine.low %v1540_v10, %v1548_v62 }
  0x67   : > { %v1573_v16 = vsel %vm21048_vm15, %v1566_v32, %v1571_v14  ;;  %v2186_v35 = vcombine.low %v1557_v33, %v1565_v12  ;;  %v504_v24 = vrot.slane %v19259_v59, %v21007_v9  ;;  %v2814_v37 = vcombine.low %v21239_v43, %v21249_v49  ;;  %v19288_v59 = vld.sshfl [vmem:[%s21017_s15 + $0x38] sm:$0x11 pattern:$0x75316420] }
  0x68   : > { %v1581_v38 = vsel %vm21048_vm15, %v1574_v20, %v1579_v25  ;;  %v2194_v41 = vrot.slane %v2184_v28, %v21007_v9  ;;  %v2201_v42 = vrot.slane %v2185_v31, %v21007_v9  ;;  %v19399_v44 = vcombine.high %v21239_v43, %v21249_v49 }
  0x69   : > { %v2187_v45 = vcombine.low %v1573_v16, %v1581_v38  ;;  %v2208_v47 = vrot.slane %v2186_v35, %v21007_v9  ;;  %v2813_v48 = vcombine.low %v21198_v39, %v504_v24  ;;  %v2816_v50 = vcombine.low %v21245_v46, %v21256_v52 }
  0x6a   : > { %v2216_v56 = vcombine.low %v2194_v41, %v2201_v42  ;;  %v2830_v57 = vrot.slane %v2814_v37, %v21007_v9  ;;  %v2837_v58 = vrot.slane %v19399_v44, %v21007_v9  ;;  %v660_v19 = vcombine.high %v21406_v36, %v21406_v36 }
  0x6b   : > { %v2215_v43 = vrot.slane %v2187_v45, %v21007_v9  ;;  %v2823_v49 = vrot.slane %v2813_v48, %v21007_v9  ;;  %v2844_v60 = vrot.slane %v2816_v50, %v21007_v9  ;;  %v675_v39 = vcombine.high %v21414_v22, %v21414_v22  ;;  %v19262_v45 = vld.sshfl [vmem:[%s21017_s15 + $0x20] sm:$0x1 pattern:$0x75316420] }
  0x6c   : > { %v2224_v63 = vrot.slane %v2216_v56, %v21007_v9  ;;  %v21480_v0 = vrot.slane %v660_v19, %v21007_v9  ;;  %v698_v1 = vcombine.high %v19269_v51, %v19269_v51  ;;  %v21483_v10 = vrot.slane %v19269_v51, %v21007_v9 }
  0x6d   : > { %v2217_v36 = vcombine.low %v2208_v47, %v2215_v43  ;;  %v2845_v11 = vcombine.low %v2823_v49, %v2830_v57  ;;  %v2846_v27 = vcombine.low %v2837_v58, %v2844_v60  ;;  %v1117_v32 = vcombine.high %v19288_v59, %v19288_v59 }
  0x6e   : > { %v676_v62 = vcombine.high %v21480_v0, %v21480_v0  ;;  %v21488_v33 = vrot.slane %v698_v1, %v21007_v9  ;;  %v21492_v14 = vcombine.high %v21483_v10, %v21483_v10  ;;  %v1124_v20 = vrot.slane %v19288_v59, %v21007_v9 }
  0x6f   : > { %v2231_v12 = vrot.slane %v2217_v36, %v21007_v9  ;;  %v2853_v25 = vrot.slane %v2845_v11, %v21007_v9  ;;  %v2860_v28 = vrot.slane %v2846_v27, %v21007_v9  ;;  %v1131_v31 = vrot.slane %v1117_v32, %v21007_v9 }
  0x70   : > { %v21501_v16 = vcombine.high %v21488_v33, %v21488_v33  ;;  %v1582_v35 = vshrl.u32 %v21414_v22, 16  ;;  %v1587_v24 = vshll.u32 %v21480_v0, 16  ;;  %v1590_v37 = vshrl.u32 %v21480_v0, 16 }
  0x71   : > { %v2232_v38 = vcombine.low %v2224_v63, %v2231_v12  ;;  %v2861_v41 = vcombine.low %v2853_v25, %v2860_v28  ;;  %v1595_v42 = vshll.u32 %v675_v39, 16  ;;  %v1598_v44 = vshrl.u32 %v675_v39, 16 }
  0x72   : > { %v1589_v47 = vsel %vm21048_vm15, %v1582_v35, %v1587_v24  ;;  %v1603_v48 = vshll.u32 %v676_v62, 16  ;;  %v1606_v50 = vshrl.u32 %v676_v62, 16  ;;  %v1611_v51 = vshll.u32 %v1124_v20, 16 }
  0x73   : > { %20420 = vmatprep.mubr.msk.bf16.mxu0 %vm2546_vm1, %v2232_v38  ;;  %20442 = vmatprep.mubr.msk.bf16.mxu1 %vm2546_vm1, %v2861_v41  ;;  %v1597_v56 = vsel %vm21048_vm15, %v1590_v37, %v1595_v42  ;;  %v1614_v57 = vshrl.u32 %v1124_v20, 16  ;;  %v1619_v58 = vshll.u32 %v1131_v31, 16  ;;  %v1623_v19 = vshrl.u32 %v21483_v10, 16 }
  0x74   : > { %v1605_v59 = vsel %vm21048_vm15, %v1598_v44, %v1603_v48  ;;  %v1613_v43 = vsel %vm21048_vm15, %v1606_v50, %v1611_v51  ;;  %v1628_v49 = vshll.u32 %v21488_v33, 16  ;;  %v1631_v60 = vshrl.u32 %v21488_v33, 16  ;;  %v19270_v31 = vld.sshfl [vmem:[%s21017_s15 + $0x40] sm:$0x33 pattern:$0x75316420] }
  0x75   : > { %v1621_v39 = vsel %vm21048_vm15, %v1614_v57, %v1619_v58  ;;  %v1636_v63 = vshll.u32 %v21492_v14, 16  ;;  %v1639_v1 = vshrl.u32 %v21492_v14, 16  ;;  %v1644_v36 = vshll.u32 %v21501_v16, 16 }
  0x76   : > { %v1630_v11 = vsel %vm21048_vm15, %v1623_v19, %v1628_v49  ;;  %v2233_v27 = vcombine.low %v1589_v47, %v1597_v56  ;;  %v2234_v32 = vcombine.low %v1605_v59, %v1613_v43  ;;  %v566_v62 = vrot.slane %v19262_v45, %v21007_v9  ;;  %v19272_v41 = vld.sshfl [vmem:[%s21017_s15 + $0x48] sm:$0x33 pattern:$0x75316420] }
  0x77   : > { %v1638_v20 = vsel %vm21048_vm15, %v1631_v60, %v1636_v63  ;;  %v1646_v12 = vsel %vm21048_vm15, %v1639_v1, %v1644_v36  ;;  %v2235_v25 = vcombine.low %v1621_v39, %v1630_v11  ;;  %v19400_v28 = vcombine.high %v21245_v46, %v21256_v52 }
  0x78   : > { %v2236_v35 = vcombine.low %v1638_v20, %v1646_v12  ;;  %v2243_v24 = vrot.slane %v2233_v27, %v21007_v9  ;;  %v2250_v37 = vrot.slane %v2234_v32, %v21007_v9  ;;  %v2863_v38 = vcombine.low %v566_v62, %v21319_v30 }
  0x79   : > { %v2257_v42 = vrot.slane %v2235_v25, %v21007_v9  ;;  %v2864_v44 = vcombine.low %v21327_v23, %v21331_v54  ;;  %v2865_v45 = vcombine.low %v21346_v55, %v21324_v40  ;;  %v2872_v46 = vrot.slane %v19400_v28, %v21007_v9  ;;  %v19289_v23 = vld.sshfl [vmem:[%s21017_s15 + $0x44] sm:$0x11 pattern:$0x75316420] }
  0x7a   : > { %v2264_v52 = vrot.slane %v2236_v35, %v21007_v9  ;;  %v2265_v47 = vcombine.low %v2243_v24, %v2250_v37  ;;  %v2879_v48 = vrot.slane %v2863_v38, %v21007_v9  ;;  %v722_v50 = vcombine.high %v19270_v31, %v19270_v31 }
  0x7b   : > { %v2886_v51 = vrot.slane %v2864_v44, %v21007_v9  ;;  %v2893_v30 = vrot.slane %v2865_v45, %v21007_v9  ;;  %v21550_v56 = vrot.slane %v19270_v31, %v21007_v9  ;;  %v760_v57 = vcombine.high %v19272_v41, %v19272_v41 }
  0x7c   : > { %v2266_v54 = vcombine.low %v2257_v42, %v2264_v52  ;;  %v2273_v40 = vrot.slane %v2265_v47, %v21007_v9  ;;  %v2894_v55 = vcombine.low %v2872_v46, %v2879_v48  ;;  %v21555_v58 = vrot.slane %v722_v50, %v21007_v9  ;;  %v19265_v47 = vld.sshfl [vmem:[%s21017_s15 + $0x2c] sm:$0x1 pattern:$0x75316420] }
  0x7d   : > { %v2895_v19 = vcombine.low %v2886_v51, %v2893_v30  ;;  %v21559_v59 = vcombine.high %v21550_v56, %v21550_v56  ;;  %v21562_v43 = vrot.slane %v19272_v41, %v21007_v9  ;;  %v21565_v49 = vrot.slane %v760_v57, %v21007_v9 }
  0x7e   : > { %v2280_v60 = vrot.slane %v2266_v54, %v21007_v9  ;;  %v2902_v39 = vrot.slane %v2894_v55, %v21007_v9  ;;  %v21571_v63 = vcombine.high %v21555_v58, %v21555_v58  ;;  %v1139_v1 = vcombine.high %v19289_v23, %v19289_v23 }
  0x7f   : > { %v2909_v36 = vrot.slane %v2895_v19, %v21007_v9  ;;  %v21576_v11 = vcombine.high %v21562_v43, %v21562_v43  ;;  %v1146_v27 = vrot.slane %v19289_v23, %v21007_v9  ;;  %v1647_v32 = vshrl.u32 %v21501_v16, 16 }
  0x80   : > { %v2281_v62 = vcombine.low %v2273_v40, %v2280_v60  ;;  %v1153_v20 = vrot.slane %v1139_v1, %v21007_v9  ;;  %v1652_v12 = vshll.u32 %v21550_v56, 16  ;;  %v1655_v25 = vshrl.u32 %v21550_v56, 16 }
  0x81   : > { %v2910_v28 = vcombine.low %v2902_v39, %v2909_v36  ;;  %v1660_v31 = vshll.u32 %v21555_v58, 16  ;;  %v1663_v35 = vshrl.u32 %v21555_v58, 16  ;;  %v1668_v24 = vshll.u32 %v21559_v59, 16 }
  0x82   : > { %20421 = vmatmul.mubr.msk.bf16.gmra.mxu0 %vm2546_vm1, %v2281_v62  ;;  %v1654_v37 = vsel %vm21048_vm15, %v1647_v32, %v1652_v12  ;;  %v1671_v38 = vshrl.u32 %v21559_v59, 16  ;;  %v1676_v41 = vshll.u32 %v21571_v63, 16  ;;  %v1679_v42 = vshrl.u32 %v21571_v63, 16 }
  0x83   : > { %20443 = vmatmul.mubr.msk.bf16.gmra.mxu1 %vm2546_vm1, %v2910_v28  ;;  %v1662_v44 = vsel %vm21048_vm15, %v1655_v25, %v1660_v31  ;;  %v1670_v45 = vsel %vm21048_vm15, %v1663_v35, %v1668_v24  ;;  %v1684_v46 = vshll.u32 %v1146_v27, 16  ;;  %v1687_v52 = vshrl.u32 %v1146_v27, 16  ;;  %v19273_v62 = vld.sshfl [vmem:[%s21017_s15 + $0x4c] sm:$0x33 pattern:$0x75316420] }
  0x84   : > { %v1678_v48 = vsel %vm21048_vm15, %v1671_v38, %v1676_v41  ;;  %v1692_v50 = vshll.u32 %v1153_v20, 16  ;;  %v1696_v51 = vshrl.u32 %v21562_v43, 16  ;;  %v1701_v30 = vshll.u32 %v21565_v49, 16 }
  0x85   : > { %v1686_v57 = vsel %vm21048_vm15, %v1679_v42, %v1684_v46  ;;  %v1704_v23 = vshrl.u32 %v21565_v49, 16  ;;  %v1709_v54 = vshll.u32 %v21576_v11, 16  ;;  %v2282_v40 = vcombine.low %v1654_v37, %v1662_v44  ;;  %v19275_v31 = vld.sshfl [vmem:[%s21017_s15 + $0x54] sm:$0x33 pattern:$0x75316420] }
  0x86   : > { %v1694_v55 = vsel %vm21048_vm15, %v1687_v52, %v1692_v50  ;;  %v1703_v19 = vsel %vm21048_vm15, %v1696_v51, %v1701_v30  ;;  %v2283_v60 = vcombine.low %v1670_v45, %v1678_v48  ;;  %v628_v39 = vrot.slane %v19265_v47, %v21007_v9 }
  0x87   : > { %v1711_v1 = vsel %vm21048_vm15, %v1704_v23, %v1709_v54  ;;  %v2284_v36 = vcombine.low %v1686_v57, %v1694_v55  ;;  %v2292_v27 = vrot.slane %v2282_v40, %v21007_v9  ;;  %v2911_v32 = vcombine.low %v21338_v18, %v21397_v2 }
  0x88   : > { %v2285_v20 = vcombine.low %v1703_v19, %v1711_v1  ;;  %v2299_v12 = vrot.slane %v2283_v60, %v21007_v9  ;;  %v2912_v25 = vcombine.low %v21401_v3, %v628_v39  ;;  %v2913_v28 = vcombine.low %v21409_v53, %v21417_v34 }
  0x89   : > { %v2306_v35 = vrot.slane %v2284_v36, %v21007_v9  ;;  %v19401_v24 = vcombine.high %v21409_v53, %v21417_v34  ;;  %v2921_v37 = vrot.slane %v2911_v32, %v21007_v9  ;;  %v776_v18 = vcombine.high %v21565_v49, %v21565_v49  ;;  %v19290_v53 = vld.sshfl [vmem:[%s21017_s15 + $0x50] sm:$0x11 pattern:$0x75316420] }
  0x8a   : > { %v2313_v2 = vrot.slane %v2285_v20, %v21007_v9  ;;  %v2314_v38 = vcombine.low %v2292_v27, %v2299_v12  ;;  %v2928_v41 = vrot.slane %v2912_v25, %v21007_v9  ;;  %v2935_v3 = vrot.slane %v2913_v28, %v21007_v9 }
  0x8b   : > { %v2942_v42 = vrot.slane %v19401_v24, %v21007_v9  ;;  %v784_v44 = vcombine.high %v19273_v62, %v19273_v62  ;;  %v21633_v45 = vrot.slane %v19273_v62, %v21007_v9  ;;  %v822_v46 = vcombine.high %v19275_v31, %v19275_v31 }
  0x8c   : > { %v2315_v34 = vcombine.low %v2306_v35, %v2313_v2  ;;  %v2322_v52 = vrot.slane %v2314_v38, %v21007_v9  ;;  %v2943_v47 = vcombine.low %v2921_v37, %v2928_v41  ;;  %v21638_v48 = vrot.slane %v19275_v31, %v21007_v9  ;;  %v19268_v31 = vld.sshfl [vmem:[%s21017_s15 + $0x38] sm:$0x1 pattern:$0x75316420] }
  0x8d   : > { %v2944_v50 = vcombine.low %v2935_v3, %v2942_v42  ;;  %v21641_v51 = vrot.slane %v784_v44, %v21007_v9  ;;  %v799_v30 = vcombine.high %v21633_v45, %v21633_v45  ;;  %v21646_v57 = vrot.slane %v822_v46, %v21007_v9 }
  0x8e   : > { %v2329_v23 = vrot.slane %v2315_v34, %v21007_v9  ;;  %v2951_v54 = vrot.slane %v2943_v47, %v21007_v9  ;;  %v1161_v40 = vcombine.high %v19290_v53, %v19290_v53  ;;  %v1168_v55 = vrot.slane %v19290_v53, %v21007_v9 }
  0x8f   : > { %v2958_v19 = vrot.slane %v2944_v50, %v21007_v9  ;;  %v800_v60 = vcombine.high %v21641_v51, %v21641_v51  ;;  %v1712_v39 = vshrl.u32 %v21576_v11, 16  ;;  %v1717_v1 = vshll.u32 %v776_v18, 16 }
  0x90   : > { %v2330_v36 = vcombine.low %v2322_v52, %v2329_v23  ;;  %v1175_v27 = vrot.slane %v1161_v40, %v21007_v9  ;;  %v1720_v32 = vshrl.u32 %v776_v18, 16  ;;  %v1725_v62 = vshll.u32 %v21633_v45, 16 }
  0x91   : > { %v2959_v20 = vcombine.low %v2951_v54, %v2958_v19  ;;  %v1719_v12 = vsel %vm21048_vm15, %v1712_v39, %v1717_v1  ;;  %v1728_v25 = vshrl.u32 %v21633_v45, 16  ;;  %v1733_v28 = vshll.u32 %v21641_v51, 16 }
  0x92   : > { %20424 = vmatprep.mubr.msk.bf16.mxu0 %vm2546_vm1, %v2330_v36  ;;  %v1727_v11 = vsel %vm21048_vm15, %v1720_v32, %v1725_v62  ;;  %v1736_v35 = vshrl.u32 %v21641_v51, 16  ;;  %v1741_v24 = vshll.u32 %v799_v30, 16  ;;  %v1744_v37 = vshrl.u32 %v799_v30, 16 }
  0x93   : > { %20446 = vmatprep.mubr.msk.bf16.mxu1 %vm2546_vm1, %v2959_v20  ;;  %v1735_v18 = vsel %vm21048_vm15, %v1728_v25, %v1733_v28  ;;  %v1749_v2 = vshll.u32 %v800_v60, 16  ;;  %v1752_v38 = vshrl.u32 %v800_v60, 16  ;;  %v1757_v41 = vshll.u32 %v1168_v55, 16 }
  0x94   : > { %v1743_v3 = vsel %vm21048_vm15, %v1736_v35, %v1741_v24  ;;  %v1760_v42 = vshrl.u32 %v1168_v55, 16  ;;  %v1765_v44 = vshll.u32 %v1175_v27, 16  ;;  %v1769_v46 = vshrl.u32 %v21638_v48, 16 }
  0x95   : > { %v1751_v53 = vsel %vm21048_vm15, %v1744_v37, %v1749_v2  ;;  %v1759_v34 = vsel %vm21048_vm15, %v1752_v38, %v1757_v41  ;;  %v1774_v52 = vshll.u32 %v21646_v57, 16  ;;  %v2331_v47 = vcombine.low %v1719_v12, %v1727_v11  ;;  %v19276_v32 = vld.sshfl [vmem:[%s21017_s15 + $0x58] sm:$0x33 pattern:$0x75316420] }
  0x96   : > { %v1767_v50 = vsel %vm21048_vm15, %v1760_v42, %v1765_v44  ;;  %v2332_v30 = vcombine.low %v1735_v18, %v1743_v3  ;;  %v2333_v23 = vcombine.low %v1751_v53, %v1759_v34  ;;  %v690_v54 = vrot.slane %v19268_v31, %v21007_v9 }
  0x97   : > { %v1776_v40 = vsel %vm21048_vm15, %v1769_v46, %v1774_v52  ;;  %v2341_v55 = vrot.slane %v2331_v47, %v21007_v9  ;;  %v2960_v19 = vcombine.low %v21414_v22, %v21480_v0  ;;  %v19402_v60 = vcombine.high %v21414_v22, %v21480_v0  ;;  %v19291_v22 = vld.sshfl [vmem:[%s21017_s15 + $0x5c] sm:$0x11 pattern:$0x75316420] }
  0x98   : > { %v2334_v39 = vcombine.low %v1767_v50, %v1776_v40  ;;  %v2348_v1 = vrot.slane %v2332_v30, %v21007_v9  ;;  %v2355_v36 = vrot.slane %v2333_v23, %v21007_v9  ;;  %v2962_v27 = vcombine.low %v690_v54, %v21483_v10 }
  0x99   : > { %v2963_v62 = vcombine.low %v21488_v33, %v21492_v14  ;;  %v2970_v20 = vrot.slane %v2960_v19, %v21007_v9  ;;  %v2977_v12 = vrot.slane %v19402_v60, %v21007_v9  ;;  %v21697_v25 = vcombine.high %v21638_v48, %v21638_v48 }
  0x9a   : > { %v2362_v0 = vrot.slane %v2334_v39, %v21007_v9  ;;  %v2363_v28 = vcombine.low %v2341_v55, %v2348_v1  ;;  %v2984_v31 = vrot.slane %v2962_v27, %v21007_v9  ;;  %v21704_v10 = vcombine.high %v21646_v57, %v21646_v57 }
  0x9b   : > { %v2991_v33 = vrot.slane %v2963_v62, %v21007_v9  ;;  %v2992_v14 = vcombine.low %v2970_v20, %v2977_v12  ;;  %v846_v11 = vcombine.high %v19276_v32, %v19276_v32  ;;  %v21708_v35 = vrot.slane %v19276_v32, %v21007_v9 }
  0x9c   : > { %v2364_v24 = vcombine.low %v2355_v36, %v2362_v0  ;;  %v2371_v37 = vrot.slane %v2363_v28, %v21007_v9  ;;  %v1183_v18 = vcombine.high %v19291_v22, %v19291_v22  ;;  %v21712_v2 = vrot.slane %v19291_v22, %v21007_v9  ;;  %v19271_v36 = vld.sshfl [vmem:[%s21017_s15 + $0x44] sm:$0x1 pattern:$0x75316420] }
  0x9d   : > { %v2993_v38 = vcombine.low %v2984_v31, %v2991_v33  ;;  %v3000_v41 = vrot.slane %v2992_v14, %v21007_v9  ;;  %v21716_v3 = vrot.slane %v846_v11, %v21007_v9  ;;  %v21720_v42 = vcombine.high %v21708_v35, %v21708_v35 }
  0x9e   : > { %v2378_v44 = vrot.slane %v2364_v24, %v21007_v9  ;;  %v21724_v46 = vrot.slane %v1183_v18, %v21007_v9  ;;  %v1777_v53 = vshrl.u32 %v21646_v57, 16  ;;  %v1782_v34 = vshll.u32 %v21697_v25, 16 }
  0x9f   : > { %v3007_v52 = vrot.slane %v2993_v38, %v21007_v9  ;;  %v21731_v47 = vcombine.high %v21716_v3, %v21716_v3  ;;  %v1785_v50 = vshrl.u32 %v21697_v25, 16  ;;  %v1790_v30 = vshll.u32 %v21704_v10, 16 }
  0xa0   : > { %v2379_v23 = vcombine.low %v2371_v37, %v2378_v44  ;;  %v1784_v54 = vsel %vm21048_vm15, %v1777_v53, %v1782_v34  ;;  %v1793_v40 = vshrl.u32 %v21704_v10, 16  ;;  %v1798_v55 = vshll.u32 %v21708_v35, 16 }
  0xa1   : > { %v3008_v19 = vcombine.low %v3000_v41, %v3007_v52  ;;  %v1792_v60 = vsel %vm21048_vm15, %v1785_v50, %v1790_v30  ;;  %v1801_v39 = vshrl.u32 %v21708_v35, 16  ;;  %v1806_v1 = vshll.u32 %v21716_v3, 16  ;;  %v19278_v41 = vld.sshfl [vmem:[%s21017_s15 + $0x60] sm:$0x33 pattern:$0x75316420] }
  0xa2   : > { %20425 = vmatmul.mubr.msk.bf16.gmra.mxu0 %vm2546_vm1, %v2379_v23  ;;  %v1800_v27 = vsel %vm21048_vm15, %v1793_v40, %v1798_v55  ;;  %v1809_v32 = vshrl.u32 %v21716_v3, 16  ;;  %v1814_v62 = vshll.u32 %v21720_v42, 16  ;;  %v1817_v20 = vshrl.u32 %v21720_v42, 16 }
  0xa3   : > { %20447 = vmatmul.mubr.msk.bf16.gmra.mxu1 %vm2546_vm1, %v3008_v19  ;;  %v1808_v12 = vsel %vm21048_vm15, %v1801_v39, %v1806_v1  ;;  %v1822_v22 = vshll.u32 %v21731_v47, 16  ;;  %v1825_v0 = vshrl.u32 %v21731_v47, 16  ;;  %v1830_v28 = vshll.u32 %v21712_v2, 16 }
  0xa4   : > { %v1816_v31 = vsel %vm21048_vm15, %v1809_v32, %v1814_v62  ;;  %v1833_v33 = vshrl.u32 %v21712_v2, 16  ;;  %v1838_v14 = vshll.u32 %v21724_v46, 16  ;;  %v2380_v11 = vcombine.low %v1784_v54, %v1792_v60  ;;  %v19279_v40 = vld.sshfl [vmem:[%s21017_s15 + $0x64] sm:$0x33 pattern:$0x75316420] }
  0xa5   : > { %v1824_v24 = vsel %vm21048_vm15, %v1817_v20, %v1822_v22  ;;  %v1832_v37 = vsel %vm21048_vm15, %v1825_v0, %v1830_v28  ;;  %v2381_v18 = vcombine.low %v1800_v27, %v1808_v12  ;;  %v752_v38 = vrot.slane %v19271_v36, %v21007_v9 }
  0xa6   : > { %v1840_v44 = vsel %vm21048_vm15, %v1833_v33, %v1838_v14  ;;  %v2382_v53 = vcombine.low %v1816_v31, %v1824_v24  ;;  %v2390_v34 = vrot.slane %v2380_v11, %v21007_v9  ;;  %v3009_v52 = vcombine.low %v21501_v16, %v21550_v56 }
  0xa7   : > { %v2383_v50 = vcombine.low %v1832_v37, %v1840_v44  ;;  %v2397_v30 = vrot.slane %v2381_v18, %v21007_v9  ;;  %v3010_v23 = vcombine.low %v21555_v58, %v21559_v59  ;;  %v3011_v54 = vcombine.low %v21571_v63, %v752_v38 }
  0xa8   : > { %v2404_v55 = vrot.slane %v2382_v53, %v21007_v9  ;;  %v3012_v19 = vcombine.low %v21562_v43, %v21565_v49  ;;  %v3019_v60 = vrot.slane %v3009_v52, %v21007_v9  ;;  %v884_v39 = vcombine.high %v19278_v41, %v19278_v41 }
  0xa9   : > { %v2411_v1 = vrot.slane %v2383_v50, %v21007_v9  ;;  %v2412_v16 = vcombine.low %v2390_v34, %v2397_v30  ;;  %v3026_v56 = vrot.slane %v3010_v23, %v21007_v9  ;;  %v3033_v36 = vrot.slane %v3011_v54, %v21007_v9 }
  0xaa   : > { %v3040_v58 = vrot.slane %v3012_v19, %v21007_v9  ;;  %v21785_v59 = vrot.slane %v19278_v41, %v21007_v9  ;;  %v21788_v63 = vrot.slane %v884_v39, %v21007_v9  ;;  %v908_v27 = vcombine.high %v19279_v40, %v19279_v40  ;;  %v19274_v39 = vld.sshfl [vmem:[%s21017_s15 + $0x50] sm:$0x1 pattern:$0x75316420] }
  0xab   : > { %v2413_v32 = vcombine.low %v2404_v55, %v2411_v1  ;;  %v2420_v62 = vrot.slane %v2412_v16, %v21007_v9  ;;  %v3041_v20 = vcombine.low %v3019_v60, %v3026_v56  ;;  %v21792_v12 = vrot.slane %v19279_v40, %v21007_v9 }
  0xac   : > { %v3042_v22 = vcombine.low %v3033_v36, %v3040_v58  ;;  %v899_v0 = vcombine.high %v21785_v59, %v21785_v59  ;;  %v900_v28 = vcombine.high %v21788_v63, %v21788_v63  ;;  %v21799_v31 = vrot.slane %v908_v27, %v21007_v9 }
  0xad   : > { %v2427_v33 = vrot.slane %v2413_v32, %v21007_v9  ;;  %v3049_v14 = vrot.slane %v3041_v20, %v21007_v9  ;;  %v21805_v11 = vcombine.high %v21792_v12, %v21792_v12  ;;  %v1842_v24 = vshrl.u32 %v21785_v59, 16  ;;  %v20871_v20 = vld [vmem:[%s26841_s2 + $0x4] ss:$0 sps:$4 sm:$0xcc]  }
  0xae   : > { %v3056_v37 = vrot.slane %v3042_v22, %v21007_v9  ;;  %v21811_v18 = vcombine.high %v21799_v31, %v21799_v31  ;;  %v1847_v38 = vshll.u32 %v21788_v63, 16  ;;  %v1850_v41 = vshrl.u32 %v21788_v63, 16 }
  0xaf   : > { %v2428_v44 = vcombine.low %v2420_v62, %v2427_v33  ;;  %v1855_v53 = vshll.u32 %v899_v0, 16  ;;  %v1858_v34 = vshrl.u32 %v899_v0, 16  ;;  %v1863_v52 = vshll.u32 %v900_v28, 16 }
  0xb0   : > { %v3057_v50 = vcombine.low %v3049_v14, %v3056_v37  ;;  %v1849_v30 = vsel %vm21048_vm15, %v1842_v24, %v1847_v38  ;;  %v1866_v23 = vshrl.u32 %v900_v28, 16  ;;  %v1871_v54 = vshll.u32 %v21792_v12, 16 }
  0xb1   : > { %20428 = vmatprep.mubr.msk.bf16.mxu0 %vm2546_vm1, %v2428_v44  ;;  %v1857_v40 = vsel %vm21048_vm15, %v1850_v41, %v1855_v53  ;;  %v1865_v55 = vsel %vm21048_vm15, %v1858_v34, %v1863_v52  ;;  %v1874_v19 = vshrl.u32 %v21792_v12, 16  ;;  %v1879_v60 = vshll.u32 %v21799_v31, 16 }
  0xb2   : > { %20450 = vmatprep.mubr.msk.bf16.mxu1 %vm2546_vm1, %v3057_v50  ;;  %v1873_v1 = vsel %vm21048_vm15, %v1866_v23, %v1871_v54  ;;  %v1882_v16 = vshrl.u32 %v21799_v31, 16  ;;  %v1887_v56 = vshll.u32 %v21805_v11, 16  ;;  %v1890_v36 = vshrl.u32 %v21805_v11, 16 }
  0xb3   : > { %v1881_v58 = vsel %vm21048_vm15, %v1874_v19, %v1879_v60  ;;  %v1895_v27 = vshll.u32 %v21811_v18, 16  ;;  %v1898_v32 = vshrl.u32 %v21811_v18, 16  ;;  %v2429_v62 = vcombine.low %v1849_v30, %v1857_v40 }
  0xb4   : > { %v1889_v22 = vsel %vm21048_vm15, %v1882_v16, %v1887_v56  ;;  %v2430_v0 = vcombine.low %v1865_v55, %v1873_v1  ;;  %v814_v28 = vrot.slane %v19274_v39, %v21007_v9  ;;  %v19403_v33 = vcombine.high %v21562_v43, %v21565_v49  ;;  %v19277_v49 = vld.sshfl [vmem:[%s21017_s15 + $0x5c] sm:$0x1 pattern:$0x75316420] }
  0xb5   : > { %v1897_v14 = vsel %vm21048_vm15, %v1890_v36, %v1895_v27  ;;  %v1905_v24 = vsel %vm21048_vm15, %v1898_v32, %v1903_v29  ;;  %v2431_v37 = vcombine.low %v1881_v58, %v1889_v22  ;;  %v2439_v38 = vrot.slane %v2429_v62, %v21007_v9  ;;  %v19419_v55 = vld.sshfl [vmem:[%s21017_s15] sm:$0x32 pattern:$0x75316420] }
  0xb6   : > { %v2432_v41 = vcombine.low %v1897_v14, %v1905_v24  ;;  %v2446_v44 = vrot.slane %v2430_v0, %v21007_v9  ;;  %v3059_v53 = vcombine.low %v21633_v45, %v21641_v51  ;;  %v19404_v43 = vcombine.high %v21633_v45, %v21641_v51  ;;  %v19421_v0 = vld.sshfl [vmem:[%s21017_s15 + $0x8] sm:$0x11 pattern:$0x75316420] }
  0xb7   : > { %v2453_v34 = vrot.slane %v2431_v37, %v21007_v9  ;;  %v3061_v13 = vcombine.low %v814_v28, %v21638_v48  ;;  %v3068_v29 = vrot.slane %v19403_v33, %v21007_v9  ;;  %v6183_v52 = vrot.slane %v20871_v20, 2  ;;  %v19422_v33 = vld.sshfl [vmem:[%s21017_s15 + $0xc] sm:$0x32 pattern:$0x75316420] }
  0xb8   : > { %v2460_v50 = vrot.slane %v2432_v41, %v21007_v9  ;;  %v2461_v30 = vcombine.low %v2439_v38, %v2446_v44  ;;  %v3075_v23 = vrot.slane %v3059_v53, %v21007_v9  ;;  %v3082_v54 = vrot.slane %v19404_v43, %v21007_v9 }
  0xb9   : > { %v3089_v40 = vrot.slane %v3061_v13, %v21007_v9  ;;  %20812 = vmatprep.subr.msk.bf16.mxu1 %vm26865_vm0, %v6183_v52  ;;  %v6221_v45 = vsel %vm26865_vm0, %v6183_v52, 0  ;;  %v876_v51 = vrot.slane %v19277_v49, %v21007_v9  ;;  %v3107_v48 = vcombine.low %v21646_v57, %v21697_v25  ;;  %v19420_v57 = vld.sshfl [vmem:[%s21017_s15 + $0x4] sm:$0x33 pattern:$0x75316420] }
  0xba   : > { %v2462_v19 = vcombine.low %v2453_v34, %v2460_v50  ;;  %v2469_v60 = vrot.slane %v2461_v30, %v21007_v9  ;;  %v3090_v39 = vcombine.low %v3068_v29, %v3075_v23  ;;  %20489 = vmatpush3.bf16.msra.mxu1 %v6221_v45  ;;  %v3108_v1 = vcombine.low %v21704_v10, %v21708_v35 }
  0xbb   : > { %v3091_v16 = vcombine.low %v3082_v54, %v3089_v40  ;;  %v3109_v56 = vcombine.low %v21716_v3, %v21720_v42  ;;  %v3110_v36 = vcombine.low %v21731_v47, %v876_v51  ;;  %v3117_v58 = vrot.slane %v3107_v48, %v21007_v9 }
  0xbc   : > { %v2476_v25 = vrot.slane %v2462_v19, %v21007_v9  ;;  %v3098_v27 = vrot.slane %v3090_v39, %v21007_v9  ;;  %v3124_v32 = vrot.slane %v3108_v1, %v21007_v9  ;;  %v3503_v62 = vcombine.high %v19419_v55, %v19419_v55 }
  0xbd   : > { %v3105_v20 = vrot.slane %v3091_v16, %v21007_v9  ;;  %v3131_v10 = vrot.slane %v3109_v56, %v21007_v9  ;;  %v3138_v22 = vrot.slane %v3110_v36, %v21007_v9  ;;  %v3510_v42 = vrot.slane %v19419_v55, %v21007_v9  ;;  %v19423_v16 = vld.sshfl [vmem:[%s21017_s15 + $0x10] sm:$0x33 pattern:$0x75316420] }
  0xbe   : > { %v2477_v47 = vcombine.low %v2469_v60, %v2476_v25  ;;  %v3139_v28 = vcombine.low %v3117_v58, %v3124_v32  ;;  %v3517_v14 = vrot.slane %v3503_v62, %v21007_v9  ;;  %v3527_v24 = vcombine.high %v19420_v57, %v19420_v57 }
  0xbf   : > { %v3106_v37 = vcombine.low %v3098_v27, %v3105_v20  ;;  %v3140_v38 = vcombine.low %v3131_v10, %v3138_v22  ;;  %v3518_v41 = vcombine.high %v3510_v42, %v3510_v42  ;;  %v3534_v44 = vrot.slane %v19420_v57, %v21007_v9  ;;  %v19280_v22 = vld.sshfl [vmem:[%s21017_s15 + $0x68] sm:$0x1 pattern:$0x75316420] }
  0xc0   : > { %20429 = vmatmul.mubr.msk.bf16.gmra.mxu0 %vm2546_vm1, %v2477_v47  ;;  %v3147_v53 = vrot.slane %v3139_v28, %v21007_v9  ;;  %v3519_v43 = vcombine.high %v3517_v14, %v3517_v14  ;;  %v3541_v49 = vrot.slane %v3527_v24, %v21007_v9  ;;  %v3551_v34 = vcombine.high %v19421_v0, %v19421_v0 }
  0xc1   : > { %20451 = vmatmul.mubr.msk.bf16.gmra.mxu1 %vm2546_vm1, %v3106_v37  ;;  %v3154_v13 = vrot.slane %v3140_v38, %v21007_v9  ;;  %v3542_v29 = vcombine.high %v3534_v44, %v3534_v44  ;;  %v3558_v52 = vrot.slane %v19421_v0, %v21007_v9  ;;  %v3573_v50 = vcombine.high %v19422_v33, %v19422_v33 }
  0xc2   : > { %v3543_v30 = vcombine.high %v3541_v49, %v3541_v49  ;;  %v3565_v23 = vrot.slane %v3551_v34, %v21007_v9  ;;  %v4197_v54 = vcombine.low %v3517_v14, %v3518_v41  ;;  %v4198_v40 = vcombine.low %v3519_v43, %v3534_v44 }
  0xc3   : > { %v3155_v45 = vcombine.low %v3147_v53, %v3154_v13  ;;  %v3587_v51 = vrot.slane %v3573_v50, %v21007_v9  ;;  %v4199_v48 = vcombine.low %v3541_v49, %v3542_v29  ;;  %v3156_v55 = vcombine.low %v21785_v59, %v21788_v63 }
  0xc4   : > { %v4200_v19 = vcombine.low %v3543_v30, %v3558_v52  ;;  %v4207_v60 = vrot.slane %v4197_v54, %v21007_v9  ;;  %v4214_v39 = vrot.slane %v4198_v40, %v21007_v9  ;;  %v19405_v1 = vcombine.high %v21785_v59, %v21788_v63  ;;  %v19424_v54 = vld.sshfl [vmem:[%s21017_s15 + $0x14] sm:$0x11 pattern:$0x75316420] }
  0xc5   : > { %20454 = vmatprep.mubr.msk.bf16.mxu1 %vm2546_vm1, %v3155_v45  ;;  %v4221_v56 = vrot.slane %v4199_v48, %v21007_v9  ;;  %v4246_v36 = vcombine.low %v3565_v23, %v3587_v51  ;;  %v3158_v58 = vcombine.low %v21792_v12, %v21799_v31  ;;  %v19406_v57 = vcombine.high %v21792_v12, %v21799_v31 }
  0xc6   : > { %v4228_v25 = vrot.slane %v4200_v19, %v21007_v9  ;;  %v4229_v27 = vcombine.low %v4207_v60, %v4214_v39  ;;  %v3166_v32 = vrot.slane %v3156_v55, %v21007_v9  ;;  %v3173_v62 = vrot.slane %v19405_v1, %v21007_v9  ;;  %v19425_v55 = vld.sshfl [vmem:[%s21017_s15 + $0x18] sm:$0x32 pattern:$0x75316420] }
  0xc7   : > { %v3180_v59 = vrot.slane %v3158_v58, %v21007_v9  ;;  %v3187_v63 = vrot.slane %v19406_v57, %v21007_v9  ;;  %v3580_v20 = vrot.slane %v19422_v33, %v21007_v9  ;;  %v3597_v10 = vcombine.high %v19423_v16, %v19423_v16  ;;  %v20878_v33 = vld [vmem:[%s26841_s2 + $0x8] sm:$0x3] }
  0xc8   : > { %v4230_v0 = vcombine.low %v4221_v56, %v4228_v25  ;;  %v4237_v42 = vrot.slane %v4229_v27, %v21007_v9  ;;  %v3188_v47 = vcombine.low %v3166_v32, %v3173_v62  ;;  %v3604_v28 = vrot.slane %v19423_v16, %v21007_v9  ;;  %v19283_v27 = vld.sshfl [vmem:[%s21017_s15 + $0x74] sm:$0x1 pattern:$0x75316420] }
  0xc9   : > { %v3189_v14 = vcombine.low %v3180_v59, %v3187_v63  ;;  %v3611_v24 = vrot.slane %v3597_v10, %v21007_v9  ;;  %v19449_v37 = vcombine.high %v3580_v20, %v3587_v51  ;;  %v4256_v38 = vrot.slane %v4246_v36, %v21007_v9  ;;  %v19427_v20 = vld.sshfl [vmem:[%s21017_s15 + $0x20] sm:$0x11 pattern:$0x75316420] }
  0xca   : > { %v4244_v41 = vrot.slane %v4230_v0, %v21007_v9  ;;  %v3196_v44 = vrot.slane %v3188_v47, %v21007_v9  ;;  %v8456_v53 = vsel %vm26865_vm0, %v20878_v33, 0  ;;  %v21928_v43 = vrot.slane %v19280_v22, %v21007_v9 }
  0xcb   : > { %v3203_v49 = vrot.slane %v3189_v14, %v21007_v9  ;;  %v4248_v34 = vcombine.low %v3604_v28, %v3611_v24  ;;  %v19450_v13 = vcombine.high %v3604_v28, %v3611_v24  ;;  %v4263_v29 = vrot.slane %v19449_v37, %v21007_v9  ;;  %v19428_v37 = vld.sshfl [vmem:[%s21017_s15 + $0x24] sm:$0x32 pattern:$0x75316420] }
  0xcc   : > { %v4245_v52 = vcombine.low %v4237_v42, %v4244_v41  ;;  %v3205_v50 = vcombine.low %v21928_v43, %v21087_v61  ;;  %v3206_v30 = vcombine.low %v21094_v4, %v21098_v6  ;;  %v3207_v23 = vcombine.low %v21112_v15, %v21101_v7  ;;  %v19426_v7 = vld.sshfl [vmem:[%s21017_s15 + $0x1c] sm:$0x33 pattern:$0x75316420] }
  0xcd   : > { %v3204_v40 = vcombine.low %v3196_v44, %v3203_v49  ;;  %v4270_v45 = vrot.slane %v4248_v34, %v21007_v9  ;;  %v4277_v51 = vrot.slane %v19450_v13, %v21007_v9  ;;  %v4278_v48 = vcombine.low %v4256_v38, %v4263_v29  ;;  %v21981_v38 = vld [vmem:[%s26841_s2 + $0xc] sm:$0x3] }
  0xce   : > { %20464 = vmatprep.mubr.msk.bf16.mxu0 %vm2546_vm1, %v4245_v52  ;;  %v3208_v19 = vcombine.low %v21104_v8, %v21116_v17  ;;  %v3215_v61 = vrot.slane %v3205_v50, %v21007_v9  ;;  %v3222_v4 = vrot.slane %v3206_v30, %v21007_v9  ;;  %v3229_v6 = vrot.slane %v3207_v23, %v21007_v9  ;;  %v19429_v50 = vld.sshfl [vmem:[%s21017_s15 + $0x28] sm:$0x33 pattern:$0x75316420] }
  0xcf   : > { %20455 = vmatmul.mubr.msk.bf16.gmra.mxu1 %vm2546_vm1, %v3204_v40  ;;  %v4279_v15 = vcombine.low %v4270_v45, %v4277_v51  ;;  %v4286_v60 = vrot.slane %v4278_v48, %v21007_v9  ;;  %v3621_v39 = vcombine.high %v19424_v54, %v19424_v54  ;;  %v21952_v1 = vrot.slane %v19424_v54, %v21007_v9  ;;  %v19430_v45 = vld.sshfl [vmem:[%s21017_s15 + $0x2c] sm:$0x11 pattern:$0x75316420] }
  0xd0   : > { %v3236_v8 = vrot.slane %v3208_v19, %v21007_v9  ;;  %v3237_v17 = vcombine.low %v3215_v61, %v3222_v4  ;;  %v3643_v16 = vcombine.high %v19425_v55, %v19425_v55  ;;  %v3650_v56 = vrot.slane %v19425_v55, %v21007_v9 }
  0xd1   : > { %v21957_v36 = vrot.slane %v4279_v15, %v21007_v9  ;;  %v21960_v58 = vrot.slane %v3621_v39, %v21007_v9  ;;  %v3667_v57 = vcombine.high %v19426_v7, %v19426_v7  ;;  %v21963_v25 = vrot.slane %v19426_v7, %v21007_v9 }
  0xd2   : > { %v3238_v32 = vcombine.low %v3229_v6, %v3236_v8  ;;  %v3245_v62 = vrot.slane %v3237_v17, %v21007_v9  ;;  %v3657_v59 = vrot.slane %v3643_v16, %v21007_v9  ;;  %v3658_v63 = vcombine.high %v3650_v56, %v3650_v56  ;;  %v19431_v6 = vld.sshfl [vmem:[%s21017_s15 + $0x30] sm:$0x32 pattern:$0x75316420] }
  0xd3   : > { %v4294_v10 = vcombine.low %v4286_v60, %v21957_v36  ;;  %v3681_v22 = vrot.slane %v3667_v57, %v21007_v9  ;;  %v3682_v0 = vcombine.high %v21963_v25, %v21963_v25  ;;  %v4295_v42 = vcombine.low %v21952_v1, %v21960_v58 }
  0xd4   : > { %v3252_v47 = vrot.slane %v3238_v32, %v21007_v9  ;;  %v3659_v28 = vcombine.high %v3657_v59, %v3657_v59  ;;  %v4296_v14 = vcombine.low %v3657_v59, %v3658_v63  ;;  %v1000_v24 = vrot.slane %v19283_v27, %v21007_v9  ;;  %v19432_v27 = vld.sshfl [vmem:[%s21017_s15 + $0x34] sm:$0x33 pattern:$0x75316420] }
  0xd5   : > { %20465 = vmatmul.mubr.msk.bf16.vlgmr.msra.gmra.mxu0 %vm2546_vm1, %v4294_v10  ;;  %v4298_v41 = vcombine.low %v3681_v22, %v3682_v0  ;;  %v4305_v44 = vrot.slane %v4295_v42, %v21007_v9  ;;  %v21985_v33 = vcombine.high %v3681_v22, %v3681_v22  ;;  %v3691_v49 = vcombine.high %v19427_v20, %v19427_v20  ;;  %v19503_v0 = vld.sshfl [vmem:[%s21017_s15 + $0xc] sm:$0x33 pattern:$0x75316420] }
  0xd6   : > { %20515 = vmatpush3.bf16.msra.mxu0 %v8456_v53  ;;  %v3253_v34 = vcombine.low %v3245_v62, %v3252_v47  ;;  %v4297_v13 = vcombine.low %v3659_v28, %v21963_v25  ;;  %v4312_v29 = vrot.slane %v4296_v14, %v21007_v9  ;;  %v3254_v52 = vcombine.low %v21120_v21, %v1000_v24 }
  0xd7   : > { %v21992_v30 = vrot.slane %v4298_v41, %v21007_v9  ;;  %v3698_v23 = vrot.slane %v19427_v20, %v21007_v9  ;;  %v3705_v54 = vrot.slane %v3691_v49, %v21007_v9  ;;  %v3713_v40 = vcombine.high %v19428_v37, %v19428_v37  ;;  %20815 = vmatprep.subr.msk.bf16.mxu0 %vm26865_vm0, %v21981_v38 }
  0xd8   : > { %20458 = vmatprep.mubr.msk.bf16.mxu1 %vm2546_vm1, %v3253_v34  ;;  %v4319_v53 = vrot.slane %v4297_v13, %v21007_v9  ;;  %v4327_v51 = vcombine.low %v4305_v44, %v4312_v29  ;;  %v3261_v21 = vrot.slane %v3254_v52, %v21007_v9  ;;  %v3720_v48 = vrot.slane %v19428_v37, %v21007_v9  ;;  %v19433_v52 = vld.sshfl [vmem:[%s21017_s15 + $0x38] sm:$0x11 pattern:$0x75316420] }
  0xd9   : > { %v3727_v55 = vrot.slane %v3713_v40, %v21007_v9  ;;  %v3737_v19 = vcombine.high %v19429_v50, %v19429_v50  ;;  %v3744_v61 = vrot.slane %v19429_v50, %v21007_v9  ;;  %v4344_v4 = vcombine.low %v21985_v33, %v3698_v23 }
  0xda   : > { %v4328_v7 = vcombine.low %v4319_v53, %v21992_v30  ;;  %v4335_v15 = vrot.slane %v4327_v51, %v21007_v9  ;;  %v3268_v60 = vrot.slane %v3261_v21, %v21007_v9  ;;  %v3761_v39 = vcombine.high %v19430_v45, %v19430_v45 }
  0xdb   : > { %v3751_v8 = vrot.slane %v3737_v19, %v21007_v9  ;;  %v4345_v17 = vcombine.low %v3705_v54, %v3727_v55  ;;  %v19451_v16 = vcombine.high %v3720_v48, %v3727_v55  ;;  %v4354_v56 = vrot.slane %v4344_v4, %v21007_v9 }
  0xdc   : > { %v4342_v57 = vrot.slane %v4328_v7, %v21007_v9  ;;  %20459 = vmatmul.mubr.msk.bf16.gmra.mxu1 %vm2546_vm1, %v3268_v60  ;;  %v3768_v32 = vrot.slane %v19430_v45, %v21007_v9  ;;  %v3775_v62 = vrot.slane %v3761_v39, %v21007_v9  ;;  %v3783_v59 = vcombine.high %v19431_v6, %v19431_v6  ;;  %v19505_v39 = vld.sshfl [vmem:[%s21017_s15 + $0x14] sm:$0x1 pattern:$0x75316420] }
  0xdd   : > { %v4347_v63 = vcombine.low %v3744_v61, %v3751_v8  ;;  %v4361_v20 = vrot.slane %v4345_v17, %v21007_v9  ;;  %v4368_v10 = vrot.slane %v19451_v16, %v21007_v9  ;;  %v3790_v22 = vrot.slane %v19431_v6, %v21007_v9 }
  0xde   : > { %v4343_v42 = vcombine.low %v4335_v15, %v4342_v57  ;;  %v3797_v47 = vrot.slane %v3783_v59, %v21007_v9  ;;  %v22023_v28 = vrot.slane %v19432_v27, %v21007_v9  ;;  %v19452_v14 = vcombine.high %v3744_v61, %v3751_v8  ;;  %v19434_v61 = vld.sshfl [vmem:[%s21017_s15 + $0x3c] sm:$0x32 pattern:$0x75316420] }
  0xdf   : > { %v22026_v24 = vrot.slane %v4347_v63, %v21007_v9  ;;  %v4376_v37 = vcombine.low %v4354_v56, %v4361_v20  ;;  %v3798_v41 = vcombine.high %v3790_v22, %v3790_v22  ;;  %v4394_v44 = vcombine.low %v3768_v32, %v3775_v62  ;;  %v19506_v57 = vld.sshfl [vmem:[%s21017_s15 + $0x18] sm:$0x33 pattern:$0x75316420] }
  0xe0   : > { %20468 = vmatprep.mubr.msk.bf16.mxu0 %vm2546_vm1, %v4343_v42  ;;  %v3799_v49 = vcombine.high %v3797_v47, %v3797_v47  ;;  %v22030_v34 = vrot.slane %v19452_v14, %v21007_v9  ;;  %v5012_v13 = vcombine.high %v19503_v0, %v19503_v0  ;;  %v22033_v29 = vrot.slane %v19503_v0, %v21007_v9  ;;  %v19435_v63 = vld.sshfl [vmem:[%s21017_s15 + $0x40] sm:$0x33 pattern:$0x75316420] }
  0xe1   : > { %v4377_v50 = vcombine.low %v4368_v10, %v22026_v24  ;;  %v4384_v23 = vrot.slane %v4376_v37, %v21007_v9  ;;  %v4395_v54 = vcombine.low %v3797_v47, %v3798_v41  ;;  %v4410_v40 = vrot.slane %v4394_v44, %v21007_v9 }
  0xe2   : > { %v4396_v45 = vcombine.low %v3799_v49, %v22023_v28  ;;  %v22041_v53 = vrot.slane %v5012_v13, %v21007_v9  ;;  %v3807_v51 = vcombine.high %v19432_v27, %v19432_v27  ;;  %v3822_v21 = vcombine.high %v22023_v28, %v22023_v28 }
  0xe3   : > { %v4391_v48 = vrot.slane %v4377_v50, %v21007_v9  ;;  %v4417_v55 = vrot.slane %v4395_v54, %v21007_v9  ;;  %v4425_v19 = vcombine.low %v22030_v34, %v4410_v40  ;;  %v3831_v4 = vcombine.high %v19433_v52, %v19433_v52 }
  0xe4   : > { %v4424_v6 = vrot.slane %v4396_v45, %v21007_v9  ;;  %v5626_v7 = vcombine.low %v22033_v29, %v22041_v53  ;;  %v19533_v15 = vcombine.high %v22033_v29, %v22041_v53  ;;  %v3821_v60 = vrot.slane %v3807_v51, %v21007_v9 }
  0xe5   : > { %v4392_v8 = vcombine.low %v4384_v23, %v4391_v48  ;;  %v4433_v17 = vrot.slane %v4425_v19, %v21007_v9  ;;  %v3838_v16 = vrot.slane %v19433_v52, %v21007_v9  ;;  %v3845_v56 = vrot.slane %v3831_v4, %v21007_v9  ;;  %v19436_v48 = vld.sshfl [vmem:[%s21017_s15 + $0x44] sm:$0x11 pattern:$0x75316420] }
  0xe6   : > { %v4426_v27 = vcombine.low %v4417_v55, %v4424_v6  ;;  %v5636_v32 = vrot.slane %v5626_v7, %v21007_v9  ;;  %v5643_v62 = vrot.slane %v19533_v15, %v21007_v9  ;;  %v22062_v59 = vcombine.high %v3821_v60, %v3821_v60  ;;  %v19437_v4 = vld.sshfl [vmem:[%s21017_s15 + $0x48] sm:$0x32 pattern:$0x75316420] }
  0xe7   : > { %20469 = vmatmul.mubr.msk.bf16.gmra.mxu0 %vm2546_vm1, %v4392_v8  ;;  %v3853_v20 = vcombine.high %v19434_v61, %v19434_v61  ;;  %v3860_v10 = vrot.slane %v19434_v61, %v21007_v9  ;;  %v4442_v22 = vcombine.low %v3821_v60, %v3822_v21  ;;  %v5066_v0 = vrot.slane %v19505_v39, %v21007_v9 }
  0xe8   : > { %v4440_v42 = vrot.slane %v4426_v27, %v21007_v9  ;;  %v5658_v47 = vcombine.low %v5636_v32, %v5643_v62  ;;  %v4443_v14 = vcombine.low %v22062_v59, %v3838_v16  ;;  %v5074_v37 = vcombine.high %v19506_v57, %v19506_v57 }
  0xe9   : > { %v3867_v41 = vrot.slane %v3853_v20, %v21007_v9  ;;  %v22072_v44 = vrot.slane %v4442_v22, %v21007_v9  ;;  %v22075_v49 = vrot.slane %v19506_v57, %v21007_v9  ;;  %v3877_v13 = vcombine.high %v19435_v63, %v19435_v63  ;;  %v19508_v22 = vld.sshfl [vmem:[%s21017_s15 + $0x20] sm:$0x1 pattern:$0x75316420] }
  0xea   : > { %v4441_v52 = vcombine.low %v4433_v17, %v4440_v42  ;;  %v5666_v50 = vrot.slane %v5658_v47, %v21007_v9  ;;  %v4459_v23 = vrot.slane %v4443_v14, %v21007_v9  ;;  %v22080_v54 = vrot.slane %v5074_v37, %v21007_v9  ;;  %v19509_v14 = vld.sshfl [vmem:[%s21017_s15 + $0x24] sm:$0x33 pattern:$0x75316420] }
  0xeb   : > { %v4444_v40 = vcombine.low %v3845_v56, %v3867_v41  ;;  %v19453_v45 = vcombine.high %v3860_v10, %v3867_v41  ;;  %v22084_v51 = vcombine.high %v22075_v49, %v22075_v49  ;;  %v5675_v21 = vcombine.low %v5066_v0, %v22075_v49 }
  0xec   : > { %20472 = vmatprep.mubr.msk.bf16.mxu0 %vm2546_vm1, %v4441_v52  ;;  %v5674_v55 = vcombine.low %v5666_v50, %v21957_v36  ;;  %v4474_v19 = vcombine.low %v22072_v44, %v4459_v23  ;;  %v22093_v61 = vcombine.high %v22080_v54, %v22080_v54  ;;  %v3884_v6 = vrot.slane %v19435_v63, %v21007_v9 }
  0xed   : > { %v4466_v7 = vrot.slane %v4444_v40, %v21007_v9  ;;  %v4473_v15 = vrot.slane %v19453_v45, %v21007_v9  ;;  %v5676_v60 = vcombine.low %v22080_v54, %v22084_v51  ;;  %v5685_v39 = vrot.slane %v5675_v21, %v21007_v9  ;;  %v19438_v21 = vld.sshfl [vmem:[%s21017_s15 + $0x4c] sm:$0x33 pattern:$0x75316420] }
  0xee   : > { %20490 = vmatprep.mubr.msk.bf16.mxu1 %vm2546_vm1, %v5674_v55  ;;  %v4482_v36 = vrot.slane %v4474_v19, %v21007_v9  ;;  %v5677_v8 = vcombine.low %v22093_v61, %v21963_v25  ;;  %v3891_v17 = vrot.slane %v3877_v13, %v21007_v9  ;;  %v3901_v16 = vcombine.high %v19436_v48, %v19436_v48 }
  0xef   : > { %v4475_v56 = vcombine.low %v4466_v7, %v4473_v15  ;;  %v5692_v57 = vrot.slane %v5676_v60, %v21007_v9  ;;  %v3908_v27 = vrot.slane %v19436_v48, %v21007_v9  ;;  %v3923_v32 = vcombine.high %v19437_v4, %v19437_v4 }
  0xf0   : > { %v5699_v62 = vrot.slane %v5677_v8, %v21007_v9  ;;  %v3915_v63 = vrot.slane %v3901_v16, %v21007_v9  ;;  %v3930_v20 = vrot.slane %v19437_v4, %v21007_v9  ;;  %v4491_v10 = vcombine.low %v3884_v6, %v3891_v17 }
  0xf1   : > { %v4489_v25 = vrot.slane %v4475_v56, %v21007_v9  ;;  %v5707_v0 = vcombine.low %v5685_v39, %v5692_v57  ;;  %v3937_v42 = vrot.slane %v3923_v32, %v21007_v9  ;;  %v19454_v47 = vcombine.high %v3884_v6, %v3891_v17  ;;  %v19440_v17 = vld.sshfl [vmem:[%s21017_s15 + $0x54] sm:$0x32 pattern:$0x75316420] }
  0xf2   : > { %v5708_v37 = vcombine.low %v5699_v62, %v21992_v30  ;;  %v3938_v41 = vcombine.high %v3930_v20, %v3930_v20  ;;  %v4493_v13 = vcombine.low %v3908_v27, %v3915_v63  ;;  %v4501_v52 = vrot.slane %v4491_v10, %v21007_v9  ;;  %v19439_v30 = vld.sshfl [vmem:[%s21017_s15 + $0x50] sm:$0x11 pattern:$0x75316420] }
  0xf3   : > { %v4490_v50 = vcombine.low %v4482_v36, %v4489_v25  ;;  %v5715_v23 = vrot.slane %v5707_v0, %v21007_v9  ;;  %v4508_v40 = vrot.slane %v19454_v47, %v21007_v9  ;;  %v5128_v45 = vrot.slane %v19508_v22, %v21007_v9  ;;  %v19511_v10 = vld.sshfl [vmem:[%s21017_s15 + $0x2c] sm:$0x1 pattern:$0x75316420] }
  0xf4   : > { %v5722_v48 = vrot.slane %v5708_v37, %v21007_v9  ;;  %v4494_v55 = vcombine.low %v3937_v42, %v3938_v41  ;;  %v4515_v19 = vrot.slane %v4493_v13, %v21007_v9  ;;  %v5136_v4 = vcombine.high %v19509_v14, %v19509_v14  ;;  %v19512_v13 = vld.sshfl [vmem:[%s21017_s15 + $0x30] sm:$0x33 pattern:$0x75316420] }
  0xf5   : > { %20473 = vmatmul.mubr.msk.bf16.gmra.mxu0 %vm2546_vm1, %v4490_v50  ;;  %v4523_v6 = vcombine.low %v4501_v52, %v4508_v40  ;;  %v22127_v7 = vrot.slane %v19509_v14, %v21007_v9  ;;  %v5724_v15 = vcombine.low %v21985_v33, %v5128_v45  ;;  %v3939_v60 = vcombine.high %v3937_v42, %v3937_v42 }
  0xf6   : > { %v5723_v39 = vcombine.low %v5715_v23, %v5722_v48  ;;  %v4522_v36 = vrot.slane %v4494_v55, %v21007_v9  ;;  %v22132_v8 = vrot.slane %v5136_v4, %v21007_v9  ;;  %v3947_v16 = vcombine.high %v19438_v21, %v19438_v21 }
  0xf7   : > { %v22136_v56 = vrot.slane %v4523_v6, %v21007_v9  ;;  %v5734_v57 = vrot.slane %v5724_v15, %v21007_v9  ;;  %v22140_v27 = vrot.slane %v19438_v21, %v21007_v9  ;;  %v3971_v33 = vcombine.high %v19439_v30, %v19439_v30 }
  0xf8   : > { %20491 = vmatmul.mubr.msk.bf16.vlgmr.msra.gmra.mxu1 %vm2546_vm1, %v5723_v39  ;;  %v4524_v32 = vcombine.low %v4515_v19, %v4522_v36  ;;  %v5725_v62 = vcombine.low %v22127_v7, %v22132_v8  ;;  %v19535_v63 = vcombine.high %v22127_v7, %v22132_v8  ;;  %v3961_v20 = vrot.slane %v3947_v16, %v21007_v9 }
  0xf9   : > { %v3962_v22 = vcombine.high %v22140_v27, %v22140_v27  ;;  %v3978_v25 = vrot.slane %v19439_v30, %v21007_v9  ;;  %v3985_v0 = vrot.slane %v3971_v33, %v21007_v9  ;;  %v3993_v42 = vcombine.high %v19440_v17, %v19440_v17 }
  0xfa   : > { %v4538_v47 = vrot.slane %v4524_v32, %v21007_v9  ;;  %v5741_v14 = vrot.slane %v5725_v62, %v21007_v9  ;;  %v5748_v37 = vrot.slane %v19535_v63, %v21007_v9  ;;  %v22156_v41 = vcombine.high %v3961_v20, %v3961_v20 }
  0xfb   : > { %v4007_v52 = vrot.slane %v3993_v42, %v21007_v9  ;;  %v4540_v50 = vcombine.low %v3939_v60, %v22140_v27  ;;  %v4541_v23 = vcombine.low %v3961_v20, %v3962_v22  ;;  %v5190_v40 = vrot.slane %v19511_v10, %v21007_v9 }
  0xfc   : > { %v4539_v45 = vcombine.low %v22136_v56, %v4538_v47  ;;  %v5756_v21 = vcombine.low %v5734_v57, %v5741_v14  ;;  %v5757_v48 = vcombine.low %v5748_v37, %v22026_v24  ;;  %v4542_v55 = vcombine.low %v22156_v41, %v3978_v25  ;;  %v19514_v37 = vld.sshfl [vmem:[%s21017_s15 + $0x38] sm:$0x1 pattern:$0x75316420] }
  0xfd   : > { %v4543_v19 = vcombine.low %v3985_v0, %v4007_v52  ;;  %v4550_v4 = vrot.slane %v4540_v50, %v21007_v9  ;;  %v22167_v30 = vrot.slane %v4541_v23, %v21007_v9  ;;  %v5198_v6 = vcombine.high %v19512_v13, %v19512_v13 }
  0xfe   : > { %20476 = vmatprep.mubr.msk.bf16.mxu0 %vm2546_vm1, %v4539_v45  ;;  %v5764_v15 = vrot.slane %v5756_v21, %v21007_v9  ;;  %v5771_v60 = vrot.slane %v5757_v48, %v21007_v9  ;;  %v4564_v39 = vrot.slane %v4542_v55, %v21007_v9  ;;  %v22174_v36 = vrot.slane %v19512_v13, %v21007_v9 }
  0xff   : > { %v4571_v24 = vrot.slane %v4543_v19, %v21007_v9  ;;  %v4572_v16 = vcombine.low %v4550_v4, %v22167_v30  ;;  %v22179_v57 = vrot.slane %v5198_v6, %v21007_v9  ;;  %v4000_v33 = vrot.slane %v19440_v17, %v21007_v9  ;;  %v19445_v19 = vld.sshfl [vmem:[%s21017_s15 + $0x68] sm:$0x11 pattern:$0x75316420] }
 0x100   : > { %v5772_v32 = vcombine.low %v5764_v15, %v5771_v60  ;;  %v22184_v62 = vcombine.high %v22174_v36, %v22174_v36  ;;  %v5774_v63 = vcombine.low %v5190_v40, %v22174_v36  ;;  %v4590_v20 = vcombine.low %v21708_v35, %v21716_v3  ;;  %v19515_v40 = vld.sshfl [vmem:[%s21017_s15 + $0x3c] sm:$0x33 pattern:$0x75316420] }
 0x101   : > { %v4573_v10 = vcombine.low %v4564_v39, %v4571_v24  ;;  %v4580_v22 = vrot.slane %v4572_v16, %v21007_v9  ;;  %v22192_v25 = vcombine.high %v22179_v57, %v22179_v57  ;;  %v19455_v0 = vcombine.high %v4000_v33, %v4007_v52 }
 0x102   : > { %20494 = vmatprep.mubr.msk.bf16.mxu1 %vm2546_vm1, %v5772_v32  ;;  %v5775_v17 = vcombine.low %v22179_v57, %v22184_v62  ;;  %v5790_v42 = vrot.slane %v5774_v63, %v21007_v9  ;;  %v19456_v47 = vcombine.high %v21708_v35, %v21716_v3  ;;  %v4592_v14 = vcombine.low %v21712_v2, %v21724_v46  ;;  %v19443_v3 = vld.sshfl [vmem:[%s21017_s15 + $0x60] sm:$0x32 pattern:$0x75316420] }
 0x103   : > { %v4587_v13 = vrot.slane %v4573_v10, %v21007_v9  ;;  %v5776_v52 = vcombine.low %v22192_v25, %v22023_v28  ;;  %v4599_v50 = vrot.slane %v19455_v0, %v21007_v9  ;;  %v4606_v23 = vrot.slane %v4590_v20, %v21007_v9 }
 0x104   : > { %v5797_v45 = vrot.slane %v5775_v17, %v21007_v9  ;;  %v5805_v21 = vcombine.low %v22030_v34, %v5790_v42  ;;  %v4613_v35 = vrot.slane %v19456_v47, %v21007_v9  ;;  %v4620_v2 = vrot.slane %v4592_v14, %v21007_v9 }
 0x105   : > { %v4588_v46 = vcombine.low %v4580_v22, %v4587_v13  ;;  %v5804_v48 = vrot.slane %v5776_v52, %v21007_v9  ;;  %v4621_v55 = vcombine.low %v4599_v50, %v4606_v23  ;;  %v5252_v28 = vrot.slane %v19514_v37, %v21007_v9  ;;  %v19517_v37 = vld.sshfl [vmem:[%s21017_s15 + $0x44] sm:$0x1 pattern:$0x75316420] }
 0x106   : > { %v5813_v4 = vrot.slane %v5805_v21, %v21007_v9  ;;  %v4622_v6 = vcombine.low %v4613_v35, %v4620_v2  ;;  %v5260_v15 = vcombine.high %v19515_v40, %v19515_v40  ;;  %v22219_v60 = vrot.slane %v19515_v40, %v21007_v9  ;;  %v19518_v40 = vld.sshfl [vmem:[%s21017_s15 + $0x48] sm:$0x33 pattern:$0x75316420] }
 0x107   : > { %20477 = vmatmul.mubr.msk.bf16.gmra.mxu0 %vm2546_vm1, %v4588_v46  ;;  %v5806_v34 = vcombine.low %v5797_v45, %v5804_v48  ;;  %v4629_v39 = vrot.slane %v4621_v55, %v21007_v9  ;;  %v5823_v24 = vcombine.low %v22062_v59, %v5252_v28  ;;  %v4063_v16 = vcombine.high %v19443_v3, %v19443_v3  ;;  %v19446_v35 = vld.sshfl [vmem:[%s21017_s15 + $0x6c] sm:$0x32 pattern:$0x75316420] }
 0x108   : > { %v4636_v33 = vrot.slane %v4622_v6, %v21007_v9  ;;  %v22226_v32 = vrot.slane %v5260_v15, %v21007_v9  ;;  %v4070_v63 = vrot.slane %v19443_v3, %v21007_v9  ;;  %v4118_v20 = vrot.slane %v19445_v19, %v21007_v9 }
 0x109   : > { %v5820_v10 = vrot.slane %v5806_v34, %v21007_v9  ;;  %v5839_v22 = vrot.slane %v5823_v24, %v21007_v9  ;;  %v4077_v0 = vrot.slane %v4063_v16, %v21007_v9  ;;  %v4640_v59 = vcombine.low %v21799_v31, %v21805_v11 }
 0x10a   : > { %v4637_v17 = vcombine.low %v4629_v39, %v4636_v33  ;;  %v5824_v42 = vcombine.low %v22219_v60, %v22226_v32  ;;  %v19537_v47 = vcombine.high %v22219_v60, %v22226_v32  ;;  %v4078_v14 = vcombine.high %v4070_v63, %v4070_v63  ;;  %v19447_v33 = vld.sshfl [vmem:[%s21017_s15 + $0x70] sm:$0x33 pattern:$0x75316420] }
 0x10b   : > { %v5821_v13 = vcombine.low %v5813_v4, %v5820_v10  ;;  %v5854_v52 = vcombine.low %v22072_v44, %v5839_v22  ;;  %v4079_v50 = vcombine.high %v4077_v0, %v4077_v0  ;;  %v4641_v23 = vcombine.low %v21811_v18, %v4118_v20  ;;  %v19520_v22 = vld.sshfl [vmem:[%s21017_s15 + $0x50] sm:$0x1 pattern:$0x75316420] }
 0x10c   : > { %20480 = vmatprep.mubr.msk.bf16.mxu0 %vm2546_vm1, %v4637_v17  ;;  %v5846_v31 = vrot.slane %v5824_v42, %v21007_v9  ;;  %v5853_v11 = vrot.slane %v19537_v47, %v21007_v9  ;;  %v4638_v45 = vcombine.low %v4077_v0, %v4078_v14  ;;  %v4662_v21 = vrot.slane %v4640_v59, %v21007_v9  ;;  %v19521_v47 = vld.sshfl [vmem:[%s21017_s15 + $0x54] sm:$0x33 pattern:$0x75316420] }
 0x10d   : > { %20495 = vmatmul.mubr.msk.bf16.gmra.mxu1 %vm2546_vm1, %v5821_v13  ;;  %v5862_v2 = vrot.slane %v5854_v52, %v21007_v9  ;;  %v4639_v44 = vcombine.low %v4079_v50, %v21792_v12  ;;  %v4669_v18 = vrot.slane %v4641_v23, %v21007_v9  ;;  %v5314_v3 = vrot.slane %v19517_v37, %v21007_v9 }
 0x10e   : > { %v5855_v46 = vcombine.low %v5846_v31, %v5853_v11  ;;  %v4648_v48 = vrot.slane %v4638_v45, %v21007_v9  ;;  %v5322_v55 = vcombine.high %v19518_v40, %v19518_v40  ;;  %v22255_v28 = vrot.slane %v19518_v40, %v21007_v9 }
 0x10f   : > { %v4655_v4 = vrot.slane %v4639_v44, %v21007_v9  ;;  %v4671_v6 = vcombine.low %v4662_v21, %v4669_v18  ;;  %v4111_v15 = vcombine.high %v19445_v19, %v19445_v19  ;;  %v4133_v34 = vcombine.high %v19446_v35, %v19446_v35 }
 0x110   : > { %v5869_v12 = vrot.slane %v5855_v46, %v21007_v9  ;;  %v22260_v39 = vrot.slane %v5322_v55, %v21007_v9  ;;  %v22264_v24 = vcombine.high %v22255_v28, %v22255_v28  ;;  %v5873_v16 = vcombine.low %v5314_v3, %v22255_v28 }
 0x111   : > { %v4670_v63 = vcombine.low %v4648_v48, %v4655_v4  ;;  %v4685_v20 = vrot.slane %v4671_v6, %v21007_v9  ;;  %v4125_v10 = vrot.slane %v4111_v15, %v21007_v9  ;;  %v4140_v19 = vrot.slane %v19446_v35, %v21007_v9  ;;  %v19522_v15 = vld.sshfl [vmem:[%s21017_s15 + $0x58] sm:$0x33 pattern:$0x75316420] }
 0x112   : > { %v5870_v0 = vcombine.low %v5862_v2, %v5869_v12  ;;  %v5874_v59 = vcombine.low %v22260_v39, %v22264_v24  ;;  %v5895_v17 = vrot.slane %v5873_v16, %v21007_v9  ;;  %v4147_v42 = vrot.slane %v4133_v34, %v21007_v9  ;;  %v19448_v2 = vld.sshfl [vmem:[%s21017_s15 + $0x74] sm:$0x11 pattern:$0x75316420] }
 0x113   : > { %v4678_v14 = vrot.slane %v4670_v63, %v21007_v9  ;;  %v4157_v37 = vcombine.high %v19447_v33, %v19447_v33  ;;  %v4164_v13 = vrot.slane %v19447_v33, %v21007_v9  ;;  %v22281_v52 = vcombine.high %v22260_v39, %v22260_v39  ;;  %v19523_v63 = vld.sshfl [vmem:[%s21017_s15 + $0x5c] sm:$0x1 pattern:$0x75316420] }
 0x114   : > { %20498 = vmatprep.mubr.msk.bf16.mxu1 %vm2546_vm1, %v5870_v0  ;;  %v5902_v50 = vrot.slane %v5874_v59, %v21007_v9  ;;  %v4687_v23 = vcombine.low %v4125_v10, %v4147_v42  ;;  %v19457_v40 = vcombine.high %v4140_v19, %v4147_v42  ;;  %v5376_v31 = vrot.slane %v19520_v22, %v21007_v9  ;;  %v19524_v22 = vld.sshfl [vmem:[%s21017_s15 + $0x60] sm:$0x33 pattern:$0x75316420] }
 0x115   : > { %v4686_v11 = vcombine.low %v4678_v14, %v4685_v20  ;;  %v4171_v45 = vrot.slane %v4157_v37, %v21007_v9  ;;  %v5384_v21 = vcombine.high %v19521_v47, %v19521_v47  ;;  %v5391_v35 = vrot.slane %v19521_v47, %v21007_v9  ;;  %v20872_v42 = vld [vmem:[%s26841_s2 + $0x8] ss:$0 sps:$4 sm:$0xcc]  }
 0x116   : > { %v5904_v44 = vcombine.low %v5895_v17, %v5902_v50  ;;  %v4697_v18 = vrot.slane %v4687_v23, %v21007_v9  ;;  %v4704_v3 = vrot.slane %v19457_v40, %v21007_v9  ;;  %v5920_v46 = vcombine.low %v22281_v52, %v22140_v27 }
 0x117   : > { %20481 = vmatmul.mubr.msk.bf16.gmra.mxu0 %vm2546_vm1, %v4686_v11  ;;  %v4689_v48 = vcombine.low %v4164_v13, %v4171_v45  ;;  %v19458_v55 = vcombine.high %v4164_v13, %v4171_v45  ;;  %v5398_v4 = vrot.slane %v5384_v21, %v21007_v9  ;;  %v5922_v6 = vcombine.low %v22156_v41, %v5376_v31 }
 0x118   : > { %v5918_v34 = vrot.slane %v5904_v44, %v21007_v9  ;;  %v4719_v12 = vcombine.low %v4697_v18, %v4704_v3  ;;  %v5930_v16 = vrot.slane %v5920_v46, %v21007_v9  ;;  %v4181_v33 = vcombine.high %v19448_v2, %v19448_v2 }
 0x119   : > { %v4711_v20 = vrot.slane %v4689_v48, %v21007_v9  ;;  %v4718_v27 = vrot.slane %v19458_v55, %v21007_v9  ;;  %v5923_v10 = vcombine.low %v5391_v35, %v5398_v4  ;;  %v5944_v19 = vrot.slane %v5922_v6, %v21007_v9  ;;  %v19525_v6 = vld.sshfl [vmem:[%s21017_s15 + $0x64] sm:$0x33 pattern:$0x75316420] }
 0x11a   : > { %v5919_v0 = vcombine.low %v22136_v56, %v5918_v34  ;;  %v4727_v41 = vrot.slane %v4719_v12, %v21007_v9  ;;  %v5952_v59 = vcombine.low %v5930_v16, %v22167_v30  ;;  %v4188_v17 = vrot.slane %v19448_v2, %v21007_v9 }
 0x11b   : > { %v4720_v47 = vcombine.low %v4711_v20, %v4718_v27  ;;  %v5951_v14 = vrot.slane %v5923_v10, %v21007_v9  ;;  %v4195_v37 = vrot.slane %v4181_v33, %v21007_v9  ;;  %v5408_v13 = vcombine.high %v19522_v15, %v19522_v15 }
 0x11c   : > { %20499 = vmatmul.mubr.msk.bf16.gmra.mxu1 %vm2546_vm1, %v5919_v0  ;;  %v5960_v56 = vrot.slane %v5952_v59, %v21007_v9  ;;  %v5415_v50 = vrot.slane %v19522_v15, %v21007_v9  ;;  %v5438_v30 = vrot.slane %v19523_v63, %v21007_v9  ;;  %v5453_v23 = vrot.slane %v19524_v22, %v21007_v9 }
 0x11d   : > { %v22319_v40 = vrot.slane %v4720_v47, %v21007_v9  ;;  %v5953_v31 = vcombine.low %v5944_v19, %v5951_v14  ;;  %v4736_v11 = vcombine.low %v4188_v17, %v4195_v37  ;;  %v5422_v45 = vrot.slane %v5408_v13, %v21007_v9 }
 0x11e   : > { %v19539_v21 = vcombine.high %v5391_v35, %v5398_v4  ;;  %v5972_v2 = vcombine.low %v5438_v30, %v5453_v23  ;;  %v9927_v44 = vrot.slane %v20872_v42, 2  ;;  %v5446_v18 = vcombine.high %v19524_v22, %v19524_v22  ;;  %v19587_v22 = vld.sshfl [vmem:[%s21017_s15 + $0x10] sm:$0x33 pattern:$0x75316420] }
 0x11f   : > { %v4735_v3 = vcombine.low %v4727_v41, %v22319_v40  ;;  %v5967_v46 = vrot.slane %v5953_v31, %v21007_v9  ;;  %v4743_v48 = vrot.slane %v4736_v11, %v21007_v9  ;;  %v5970_v55 = vcombine.low %v5415_v50, %v5422_v45 }
 0x120   : > { %v19540_v15 = vcombine.high %v5415_v50, %v5422_v45  ;;  %v5979_v34 = vrot.slane %v19539_v21, %v21007_v9  ;;  %v6000_v12 = vrot.slane %v5972_v2, %v21007_v9  ;;  %20814 = vmatprep.subr.msk.bf16.mxu1 %vm26865_vm0, %v9927_v44  ;;  %v9965_v35 = vsel %vm26865_vm0, %v9927_v44, 0 }
 0x121   : > { %20484 = vmatprep.mubr.msk.bf16.mxu0 %vm2546_vm1, %v4735_v3  ;;  %v5968_v4 = vcombine.low %v5960_v56, %v5967_v46  ;;  %v4750_v16 = vrot.slane %v4743_v48, %v21007_v9  ;;  %v5986_v33 = vrot.slane %v5970_v55, %v21007_v9  ;;  %20541 = vmatpush3.bf16.msra.mxu1 %v9965_v35  ;;  %v7135_v63 = vshrl.u32 %v22033_v29, 16 }
 0x122   : > { %v5993_v20 = vrot.slane %v19540_v15, %v21007_v9  ;;  %v5460_v27 = vrot.slane %v5446_v18, %v21007_v9  ;;  %v5461_v10 = vcombine.high %v5453_v23, %v5453_v23  ;;  %v5470_v19 = vcombine.high %v19525_v6, %v19525_v6 }
 0x123   : > { %20502 = vmatprep.mubr.msk.bf16.mxu1 %vm2546_vm1, %v5968_v4  ;;  %20485 = vmatmul.mubr.msk.bf16.gmra.mxu0 %vm2546_vm1, %v4750_v16  ;;  %v6001_v0 = vcombine.low %v5979_v34, %v5986_v33  ;;  %v5477_v41 = vrot.slane %v19525_v6, %v21007_v9  ;;  %v6456_v59 = vcombine.high %v22033_v29, %v22033_v29  ;;  %v7140_v17 = vshll.u32 %v22041_v53, 16 }
 0x124   : > { %v6002_v42 = vcombine.low %v5993_v20, %v6000_v12  ;;  %v5462_v47 = vcombine.high %v5460_v27, %v5460_v27  ;;  %v5484_v14 = vrot.slane %v5470_v19, %v21007_v9  ;;  %v6018_v37 = vcombine.low %v5460_v27, %v5461_v10 }
 0x125   : > { %v6009_v13 = vrot.slane %v6001_v0, %v21007_v9  ;;  %v5485_v56 = vcombine.high %v5477_v41, %v5477_v41  ;;  %v6457_v50 = vcombine.high %v22041_v53, %v22041_v53  ;;  %v6465_v30 = vcombine.high %v19587_v22, %v19587_v22 }
 0x126   : > { %v6016_v23 = vrot.slane %v6002_v42, %v21007_v9  ;;  %v5486_v31 = vcombine.high %v5484_v14, %v5484_v14  ;;  %v6019_v11 = vcombine.low %v5462_v47, %v5477_v41  ;;  %v6028_v29 = vrot.slane %v6018_v37, %v21007_v9 }
 0x127   : > { %v6020_v45 = vcombine.low %v5484_v14, %v5485_v56  ;;  %v22350_v21 = vrot.slane %v19587_v22, %v21007_v9  ;;  %v22353_v2 = vrot.slane %v6465_v30, %v21007_v9  ;;  %v7142_v44 = vsel %vm21048_vm15, %v7135_v63, %v7140_v17  ;;  %v19590_v17 = vld.sshfl [vmem:[%s21017_s15 + $0x1c] sm:$0x33 pattern:$0x75316420] }
 0x128   : > { %v6017_v18 = vcombine.low %v6009_v13, %v6016_v23  ;;  %v6021_v3 = vcombine.low %v5486_v31, %v21928_v43  ;;  %v6035_v46 = vrot.slane %v6019_v11, %v21007_v9  ;;  %v7143_v48 = vshrl.u32 %v22041_v53, 16  ;;  %v19527_v13 = vld.sshfl [vmem:[%s21017_s15 + $0x6c] sm:$0x33 pattern:$0x75316420] }
 0x129   : > { %v6042_v55 = vrot.slane %v6020_v45, %v21007_v9  ;;  %v22363_v6 = vcombine.high %v22350_v21, %v22350_v21  ;;  %v22367_v15 = vcombine.high %v22353_v2, %v22353_v2  ;;  %v7148_v34 = vshll.u32 %v6456_v59, 16 }
 0x12a   : > { %20503 = vmatmul.mubr.msk.bf16.gmra.mxu1 %vm2546_vm1, %v6017_v18  ;;  %v6049_v12 = vrot.slane %v6021_v3, %v21007_v9  ;;  %v6050_v43 = vcombine.low %v6028_v29, %v6035_v46  ;;  %v7151_v35 = vshrl.u32 %v6456_v59, 16  ;;  %v7156_v4 = vshll.u32 %v6457_v50, 16 }
 0x12b   : > { %v7150_v53 = vsel %vm21048_vm15, %v7143_v48, %v7148_v34  ;;  %v7159_v16 = vshrl.u32 %v6457_v50, 16  ;;  %v7164_v33 = vshll.u32 %v22350_v21, 16  ;;  %v7167_v63 = vshrl.u32 %v22350_v21, 16 }
 0x12c   : > { %v6051_v20 = vcombine.low %v6042_v55, %v6049_v12  ;;  %v6058_v27 = vrot.slane %v6050_v43, %v21007_v9  ;;  %v7158_v10 = vsel %vm21048_vm15, %v7151_v35, %v7156_v4  ;;  %v7172_v19 = vshll.u32 %v22353_v2, 16 }
 0x12d   : > { %v7166_v22 = vsel %vm21048_vm15, %v7159_v16, %v7164_v33  ;;  %v7175_v0 = vshrl.u32 %v22353_v2, 16  ;;  %v7180_v41 = vshll.u32 %v22363_v6, 16  ;;  %v7183_v59 = vshrl.u32 %v22363_v6, 16 }
 0x12e   : > { %v6065_v42 = vrot.slane %v6051_v20, %v21007_v9  ;;  %v7174_v47 = vsel %vm21048_vm15, %v7167_v63, %v7172_v19  ;;  %v7188_v14 = vshll.u32 %v22367_v15, 16  ;;  %v7191_v37 = vshrl.u32 %v22367_v15, 16 }
 0x12f   : > { %v7182_v56 = vsel %vm21048_vm15, %v7175_v0, %v7180_v41  ;;  %v7196_v50 = vshll.u32 %v21952_v1, 16  ;;  %v7199_v30 = vshrl.u32 %v21952_v1, 16  ;;  %v7204_v23 = vshll.u32 %v21960_v58, 16 }
 0x130   : > { %v6066_v31 = vcombine.low %v6058_v27, %v6065_v42  ;;  %v7190_v11 = vsel %vm21048_vm15, %v7183_v59, %v7188_v14  ;;  %v7865_v29 = vcombine.low %v7142_v44, %v7150_v53  ;;  %v7866_v45 = vcombine.low %v7158_v10, %v7166_v22 }
 0x131   : > { %v7198_v18 = vsel %vm21048_vm15, %v7191_v37, %v7196_v50  ;;  %v7867_v3 = vcombine.low %v7174_v47, %v7182_v56  ;;  %v5508_v46 = vcombine.high %v19527_v13, %v19527_v13  ;;  %v5515_v48 = vrot.slane %v19527_v13, %v21007_v9 }
 0x132   : > { %20506 = vmatprep.mubr.msk.bf16.mxu1 %vm2546_vm1, %v6066_v31  ;;  %v7868_v55 = vcombine.low %v7190_v11, %v7198_v18  ;;  %v7875_v1 = vrot.slane %v7865_v29, %v21007_v9  ;;  %v7882_v58 = vrot.slane %v7866_v45, %v21007_v9  ;;  %v6535_v34 = vcombine.high %v19590_v17, %v19590_v17 }
 0x133   : > { %v7889_v12 = vrot.slane %v7867_v3, %v21007_v9  ;;  %v5522_v44 = vrot.slane %v5508_v46, %v21007_v9  ;;  %v22407_v43 = vrot.slane %v19590_v17, %v21007_v9  ;;  %v7206_v35 = vsel %vm21048_vm15, %v7199_v30, %v7204_v23  ;;  %v19529_v3 = vld.sshfl [vmem:[%s21017_s15 + $0x74] sm:$0x1 pattern:$0x75316420] }
 0x134   : > { %v7896_v4 = vrot.slane %v7868_v55, %v21007_v9  ;;  %v7897_v53 = vcombine.low %v7875_v1, %v7882_v58  ;;  %v22413_v16 = vrot.slane %v6535_v34, %v21007_v9  ;;  %v7208_v33 = vshrl.u32 %v22075_v49, 16  ;;  %v19591_v46 = vld.sshfl [vmem:[%s21017_s15 + $0x20] sm:$0x11 pattern:$0x75316420] }
 0x135   : > { %v6067_v63 = vcombine.low %v5515_v48, %v5522_v44  ;;  %v19541_v20 = vcombine.high %v5515_v48, %v5522_v44  ;;  %v6550_v27 = vcombine.high %v22407_v43, %v22407_v43  ;;  %v7213_v10 = vshll.u32 %v22080_v54, 16  ;;  %v19530_v34 = vld.sshfl [vmem:[%s21017_s15 + $0x78] sm:$0x33 pattern:$0x75316420] }
 0x136   : > { %v7898_v19 = vcombine.low %v7889_v12, %v7896_v4  ;;  %v7905_v22 = vrot.slane %v7897_v53, %v21007_v9  ;;  %v22422_v0 = vcombine.high %v22413_v16, %v22413_v16  ;;  %v7216_v41 = vshrl.u32 %v22080_v54, 16 }
 0x137   : > { %v6077_v59 = vrot.slane %v6067_v63, %v21007_v9  ;;  %v6084_v49 = vrot.slane %v19541_v20, %v21007_v9  ;;  %v7215_v17 = vsel %vm21048_vm15, %v7208_v33, %v7213_v10  ;;  %v7221_v42 = vshll.u32 %v22084_v51, 16  ;;  %v19531_v33 = vld.sshfl [vmem:[%s21017_s15 + $0x7c] sm:$0x33 pattern:$0x75316420] }
 0x138   : > { %v7912_v47 = vrot.slane %v7898_v19, %v21007_v9  ;;  %v7224_v14 = vshrl.u32 %v22084_v51, 16  ;;  %v7229_v37 = vshll.u32 %v22093_v61, 16  ;;  %v7232_v13 = vshrl.u32 %v22093_v61, 16 }
 0x139   : > { %v6099_v54 = vcombine.low %v6077_v59, %v6084_v49  ;;  %v7223_v56 = vsel %vm21048_vm15, %v7216_v41, %v7221_v42  ;;  %v7237_v50 = vshll.u32 %v22407_v43, 16  ;;  %v7240_v30 = vshrl.u32 %v22407_v43, 16 }
 0x13a   : > { %v7913_v23 = vcombine.low %v7905_v22, %v7912_v47  ;;  %v7231_v31 = vsel %vm21048_vm15, %v7224_v14, %v7229_v37  ;;  %v7245_v51 = vshll.u32 %v22413_v16, 16  ;;  %v7248_v11 = vshrl.u32 %v22413_v16, 16 }
 0x13b   : > { %v6107_v29 = vrot.slane %v6099_v54, %v21007_v9  ;;  %v7239_v61 = vsel %vm21048_vm15, %v7232_v13, %v7237_v50  ;;  %v7253_v45 = vshll.u32 %v6550_v27, 16  ;;  %v7256_v18 = vshrl.u32 %v6550_v27, 16 }
 0x13c   : > { %20516 = vmatprep.mubr.msk.bf16.mxu0 %vm2546_vm1, %v7913_v23  ;;  %v7247_v48 = vsel %vm21048_vm15, %v7240_v30, %v7245_v51  ;;  %v7261_v55 = vshll.u32 %v22422_v0, 16  ;;  %v7914_v1 = vcombine.low %v7206_v35, %v7215_v17  ;;  %v7915_v58 = vcombine.low %v7223_v56, %v7231_v31  ;;  %v19593_v56 = vld.sshfl [vmem:[%s21017_s15 + $0x28] sm:$0x33 pattern:$0x75316420] }
 0x13d   : > { %v6115_v12 = vcombine.low %v6107_v29, %v22319_v40  ;;  %v7255_v44 = vsel %vm21048_vm15, %v7248_v11, %v7253_v45  ;;  %v7916_v4 = vcombine.low %v7239_v61, %v7247_v48  ;;  %v11394_v53 = vsel %vm26865_vm0, %v21981_v38, 0 }
 0x13e   : > { %v7263_v63 = vsel %vm21048_vm15, %v7256_v18, %v7261_v55  ;;  %v7924_v20 = vrot.slane %v7914_v1, %v21007_v9  ;;  %v7931_v27 = vrot.slane %v7915_v58, %v21007_v9  ;;  %v5562_v35 = vrot.slane %v19529_v3, %v21007_v9 }
 0x13f   : > { %20507 = vmatmul.mubr.msk.bf16.gmra.mxu1 %vm2546_vm1, %v6115_v12  ;;  %v7917_v40 = vcombine.low %v7255_v44, %v7263_v63  ;;  %v7938_v10 = vrot.slane %v7916_v4, %v21007_v9  ;;  %v5570_v19 = vcombine.high %v19530_v34, %v19530_v34  ;;  %v5577_v22 = vrot.slane %v19530_v34, %v21007_v9 }
 0x140   : > { %v7946_v38 = vcombine.low %v7924_v20, %v7931_v27  ;;  %v5594_v41 = vcombine.high %v19531_v33, %v19531_v33  ;;  %v5601_v59 = vrot.slane %v19531_v33, %v21007_v9  ;;  %v6559_v49 = vcombine.high %v19591_v46, %v19591_v46 }
 0x141   : > { %v7945_v17 = vrot.slane %v7917_v40, %v21007_v9  ;;  %v5584_v42 = vrot.slane %v5570_v19, %v21007_v9  ;;  %v5585_v47 = vcombine.high %v5577_v22, %v5577_v22  ;;  %v6116_v14 = vcombine.low %v5562_v35, %v5577_v22 }
 0x142   : > { %v7954_v37 = vrot.slane %v7946_v38, %v21007_v9  ;;  %v22471_v13 = vrot.slane %v5594_v41, %v21007_v9  ;;  %v5609_v54 = vcombine.high %v5601_v59, %v5601_v59  ;;  %v22475_v50 = vrot.slane %v19591_v46, %v21007_v9 }
 0x143   : > { %v7947_v30 = vcombine.low %v7938_v10, %v7945_v17  ;;  %v5586_v23 = vcombine.high %v5584_v42, %v5584_v42  ;;  %v6117_v31 = vcombine.low %v5584_v42, %v5585_v47  ;;  %v6126_v51 = vrot.slane %v6116_v14, %v21007_v9  ;;  %v19532_v14 = vld.sshfl [vmem:[%s21017_s15 + $0x80] sm:$0x1 pattern:$0x75316420] }
 0x144   : > { %v6119_v11 = vcombine.low %v22471_v13, %v5609_v54  ;;  %v22480_v29 = vrot.slane %v6559_v49, %v21007_v9  ;;  %v6596_v61 = vcombine.high %v22127_v7, %v22127_v7  ;;  %v6597_v45 = vcombine.high %v22132_v8, %v22132_v8 }
 0x145   : > { %v7961_v18 = vrot.slane %v7947_v30, %v21007_v9  ;;  %v6118_v3 = vcombine.low %v5586_v23, %v5601_v59  ;;  %v6133_v46 = vrot.slane %v6117_v31, %v21007_v9  ;;  %v6605_v48 = vcombine.high %v19593_v56, %v19593_v56 }
 0x146   : > { %v6147_v55 = vrot.slane %v6119_v11, %v21007_v9  ;;  %v22490_v1 = vrot.slane %v19593_v56, %v21007_v9  ;;  %v7264_v58 = vshrl.u32 %v22422_v0, 16  ;;  %v7269_v34 = vshll.u32 %v22475_v50, 16 }
 0x147   : > { %v7962_v12 = vcombine.low %v7954_v37, %v7961_v18  ;;  %v6140_v44 = vrot.slane %v6118_v3, %v21007_v9  ;;  %v6148_v4 = vcombine.low %v6126_v51, %v6133_v46  ;;  %v22496_v33 = vrot.slane %v6605_v48, %v21007_v9 }
 0x148   : > { %v22500_v63 = vcombine.high %v22490_v1, %v22490_v1  ;;  %v7271_v20 = vsel %vm21048_vm15, %v7264_v58, %v7269_v34  ;;  %v7272_v27 = vshrl.u32 %v22475_v50, 16  ;;  %v7277_v0 = vshll.u32 %v22480_v29, 16 }
 0x149   : > { %20517 = vmatmul.mubr.msk.bf16.vlgmr.msra.gmra.mxu0 %vm2546_vm1, %v7962_v12  ;;  %v6149_v35 = vcombine.low %v6140_v44, %v6147_v55  ;;  %v6156_v40 = vrot.slane %v6148_v4, %v21007_v9  ;;  %v7281_v10 = vshrl.u32 %v22127_v7, 16  ;;  %v7286_v19 = vshll.u32 %v22132_v8, 16  ;;  %v19596_v55 = vld.sshfl [vmem:[%s21017_s15 + $0x34] sm:$0x33 pattern:$0x75316420] }
 0x14a   : > { %20567 = vmatpush3.bf16.msra.mxu0 %v11394_v53  ;;  %v7279_v22 = vsel %vm21048_vm15, %v7272_v27, %v7277_v0  ;;  %v7289_v38 = vshrl.u32 %v22132_v8, 16  ;;  %v7294_v41 = vshll.u32 %v6596_v61, 16  ;;  %v7297_v59 = vshrl.u32 %v6596_v61, 16 }
 0x14b   : > { %v6163_v49 = vrot.slane %v6149_v35, %v21007_v9  ;;  %v7288_v17 = vsel %vm21048_vm15, %v7281_v10, %v7286_v19  ;;  %v7302_v42 = vshll.u32 %v6597_v45, 16  ;;  %v7305_v47 = vshrl.u32 %v6597_v45, 16  ;;  %v19594_v45 = vld.sshfl [vmem:[%s21017_s15 + $0x2c] sm:$0x11 pattern:$0x75316420] }
 0x14c   : > { %v7296_v7 = vsel %vm21048_vm15, %v7289_v38, %v7294_v41  ;;  %v7310_v53 = vshll.u32 %v22490_v1, 16  ;;  %v7313_v37 = vshrl.u32 %v22490_v1, 16  ;;  %v7318_v8 = vshll.u32 %v22496_v33, 16 }
 0x14d   : > { %v6164_v54 = vcombine.low %v6156_v40, %v6163_v49  ;;  %v7304_v56 = vsel %vm21048_vm15, %v7297_v59, %v7302_v42  ;;  %v7321_v30 = vshrl.u32 %v22496_v33, 16  ;;  %v7326_v23 = vshll.u32 %v22500_v63, 16 }
 0x14e   : > { %v7312_v31 = vsel %vm21048_vm15, %v7305_v47, %v7310_v53  ;;  %v7320_v51 = vsel %vm21048_vm15, %v7313_v37, %v7318_v8  ;;  %v7963_v11 = vcombine.low %v7271_v20, %v7279_v22  ;;  %v7964_v61 = vcombine.low %v7288_v17, %v7296_v7 }
 0x14f   : > { %20510 = vmatprep.mubr.msk.bf16.mxu1 %vm2546_vm1, %v6164_v54  ;;  %v7328_v18 = vsel %vm21048_vm15, %v7321_v30, %v7326_v23  ;;  %v7965_v3 = vcombine.low %v7304_v56, %v7312_v31  ;;  %v5610_v46 = vcombine.high %v22471_v13, %v22471_v13  ;;  %v5624_v48 = vrot.slane %v19532_v14, %v21007_v9 }
 0x150   : > { %v7966_v58 = vcombine.low %v7320_v51, %v7328_v18  ;;  %v7973_v34 = vrot.slane %v7963_v11, %v21007_v9  ;;  %v7980_v12 = vrot.slane %v7964_v61, %v21007_v9  ;;  %v22542_v44 = vcombine.high %v22496_v33, %v22496_v33  ;;  %v19597_v18 = vld.sshfl [vmem:[%s21017_s15 + $0x38] sm:$0x11 pattern:$0x75316420] }
 0x151   : > { %v7987_v4 = vrot.slane %v7965_v3, %v21007_v9  ;;  %v6165_v20 = vcombine.low %v5610_v46, %v5624_v48  ;;  %v6629_v27 = vcombine.high %v19594_v45, %v19594_v45  ;;  %v22546_v0 = vrot.slane %v19594_v45, %v21007_v9 }
 0x152   : > { %v7994_v13 = vrot.slane %v7966_v58, %v21007_v9  ;;  %v7995_v35 = vcombine.low %v7973_v34, %v7980_v12  ;;  %v6675_v40 = vcombine.high %v19596_v55, %v19596_v55  ;;  %v22550_v10 = vrot.slane %v19596_v55, %v21007_v9 }
 0x153   : > { %v6172_v19 = vrot.slane %v6165_v20, %v21007_v9  ;;  %v22554_v22 = vrot.slane %v6629_v27, %v21007_v9  ;;  %v7329_v38 = vshrl.u32 %v22500_v63, 16  ;;  %v7334_v41 = vshll.u32 %v22542_v44, 16 }
 0x154   : > { %v7996_v59 = vcombine.low %v7987_v4, %v7994_v13  ;;  %v8003_v49 = vrot.slane %v7995_v35, %v21007_v9  ;;  %v22560_v17 = vrot.slane %v6675_v40, %v21007_v9  ;;  %v7337_v42 = vshrl.u32 %v22542_v44, 16 }
 0x155   : > { %v6179_v47 = vrot.slane %v6172_v19, %v21007_v9  ;;  %v7336_v14 = vsel %vm21048_vm15, %v7329_v38, %v7334_v41  ;;  %v7342_v7 = vshll.u32 %v22546_v0, 16  ;;  %v7345_v53 = vshrl.u32 %v22546_v0, 16  ;;  %v22605_v41 = vld.sshfl [vmem:[%s21017_s15 + $0x40] sm:$0x33 pattern:$0x75316420] }
 0x156   : > { %v8010_v37 = vrot.slane %v7996_v59, %v21007_v9  ;;  %v7350_v8 = vshll.u32 %v22554_v22, 16  ;;  %v7354_v54 = vshrl.u32 %v22174_v36, 16  ;;  %v7359_v56 = vshll.u32 %v22179_v57, 16 }
 0x157   : > { %20511 = vmatmul.mubr.msk.bf16.gmra.mxu1 %vm2546_vm1, %v6179_v47  ;;  %v7344_v30 = vsel %vm21048_vm15, %v7337_v42, %v7342_v7  ;;  %v7362_v23 = vshrl.u32 %v22179_v57, 16  ;;  %v7367_v31 = vshll.u32 %v22184_v62, 16  ;;  %v7370_v51 = vshrl.u32 %v22184_v62, 16 }
 0x158   : > { %v8011_v11 = vcombine.low %v8003_v49, %v8010_v37  ;;  %v7352_v61 = vsel %vm21048_vm15, %v7345_v53, %v7350_v8  ;;  %v7361_v36 = vsel %vm21048_vm15, %v7354_v54, %v7359_v56  ;;  %v7375_v45 = vshll.u32 %v22192_v25, 16 }
 0x159   : > { %v7369_v3 = vsel %vm21048_vm15, %v7362_v23, %v7367_v31  ;;  %v7378_v46 = vshrl.u32 %v22192_v25, 16  ;;  %v7383_v57 = vshll.u32 %v22550_v10, 16  ;;  %v7386_v48 = vshrl.u32 %v22550_v10, 16 }
 0x15a   : > { %20520 = vmatprep.mubr.msk.bf16.mxu0 %vm2546_vm1, %v8011_v11  ;;  %v7377_v62 = vsel %vm21048_vm15, %v7370_v51, %v7375_v45  ;;  %v7391_v55 = vshll.u32 %v22560_v17, 16  ;;  %v8012_v58 = vcombine.low %v7336_v14, %v7344_v30  ;;  %v8013_v34 = vcombine.low %v7352_v61, %v7361_v36 }
 0x15b   : > { %v7385_v12 = vsel %vm21048_vm15, %v7378_v46, %v7383_v57  ;;  %v8014_v4 = vcombine.low %v7369_v3, %v7377_v62  ;;  %v6690_v25 = vcombine.high %v22550_v10, %v22550_v10  ;;  %v6691_v20 = vcombine.high %v22560_v17, %v22560_v17  ;;  %v19748_v57 = vld.sshfl [vmem:[%s21017_s15 + $0xc] sm:$0x32 pattern:$0x75316420] }
 0x15c   : > { %v7393_v27 = vsel %vm21048_vm15, %v7386_v48, %v7391_v55  ;;  %v8022_v13 = vrot.slane %v8012_v58, %v21007_v9  ;;  %v8029_v35 = vrot.slane %v8013_v34, %v21007_v9  ;;  %v6699_v40 = vcombine.high %v19597_v18, %v19597_v18  ;;  %v19750_v34 = vld.sshfl [vmem:[%s21017_s15 + $0x14] sm:$0x11 pattern:$0x75316420] }
 0x15d   : > { %v8015_v19 = vcombine.low %v7385_v12, %v7393_v27  ;;  %v8036_v38 = vrot.slane %v8014_v4, %v21007_v9  ;;  %v22608_v59 = vrot.slane %v19597_v18, %v21007_v9  ;;  %v6736_v49 = vcombine.high %v22219_v60, %v22219_v60 }
 0x15e   : > { %v8044_v42 = vcombine.low %v8022_v13, %v8029_v35  ;;  %v22613_v47 = vrot.slane %v6699_v40, %v21007_v9  ;;  %v6737_v14 = vcombine.high %v22226_v32, %v22226_v32  ;;  %v22619_v7 = vrot.slane %v22605_v41, %v21007_v9 }
 0x15f   : > { %v8043_v53 = vrot.slane %v8015_v19, %v21007_v9  ;;  %v7394_v37 = vshrl.u32 %v22560_v17, 16  ;;  %v7399_v8 = vshll.u32 %v6690_v25, 16  ;;  %v7402_v54 = vshrl.u32 %v6690_v25, 16 }
 0x160   : > { %v8052_v56 = vrot.slane %v8044_v42, %v21007_v9  ;;  %v7407_v30 = vshll.u32 %v6691_v20, 16  ;;  %v7410_v23 = vshrl.u32 %v6691_v20, 16  ;;  %v7415_v31 = vshll.u32 %v22608_v59, 16 }
 0x161   : > { %v8045_v51 = vcombine.low %v8036_v38, %v8043_v53  ;;  %v7401_v11 = vsel %vm21048_vm15, %v7394_v37, %v7399_v8  ;;  %v7418_v61 = vshrl.u32 %v22608_v59, 16  ;;  %v7423_v36 = vshll.u32 %v22613_v47, 16  ;;  %v22649_v38 = vld.sshfl [vmem:[%s21017_s15 + $0x18] sm:$0x32 pattern:$0x75316420] }
 0x162   : > { %v7409_v45 = vsel %vm21048_vm15, %v7402_v54, %v7407_v30  ;;  %v7417_v18 = vsel %vm21048_vm15, %v7410_v23, %v7415_v31  ;;  %v7427_v3 = vshrl.u32 %v22219_v60, 16  ;;  %v7432_v46 = vshll.u32 %v22226_v32, 16  ;;  %v14546_v8 = vld [vmem:[%s26841_s2 + $0x10] sm:$0x3] }
 0x163   : > { %v8059_v48 = vrot.slane %v8045_v51, %v21007_v9  ;;  %v7425_v62 = vsel %vm21048_vm15, %v7418_v61, %v7423_v36  ;;  %v7435_v55 = vshrl.u32 %v22226_v32, 16  ;;  %v7440_v58 = vshll.u32 %v6736_v49, 16  ;;  %20817 = vmatprep.subr.msk.bf16.mxu0 %vm26865_vm0, %v14546_v8 }
 0x164   : > { %v7434_v12 = vsel %vm21048_vm15, %v7427_v3, %v7432_v46  ;;  %v7443_v4 = vshrl.u32 %v6736_v49, 16  ;;  %v7448_v25 = vshll.u32 %v6737_v14, 16  ;;  %v7451_v20 = vshrl.u32 %v6737_v14, 16 }
 0x165   : > { %v8060_v60 = vcombine.low %v8052_v56, %v8059_v48  ;;  %v7442_v27 = vsel %vm21048_vm15, %v7435_v55, %v7440_v58  ;;  %v7456_v13 = vshll.u32 %v22619_v7, 16  ;;  %v8061_v35 = vcombine.low %v7401_v11, %v7409_v45 }
 0x166   : > { %v7450_v40 = vsel %vm21048_vm15, %v7443_v4, %v7448_v25  ;;  %v8062_v19 = vcombine.low %v7417_v18, %v7425_v62  ;;  %v8063_v32 = vcombine.low %v7434_v12, %v7442_v27  ;;  %v8676_v42 = vcombine.high %v19748_v57, %v19748_v57  ;;  %v19600_v62 = vld.sshfl [vmem:[%s21017_s15 + $0x44] sm:$0x11 pattern:$0x75316420] }
 0x167   : > { %20521 = vmatmul.mubr.msk.bf16.gmra.mxu0 %vm2546_vm1, %v8060_v60  ;;  %v7458_v49 = vsel %vm21048_vm15, %v7451_v20, %v7456_v13  ;;  %v8071_v14 = vrot.slane %v8061_v35, %v21007_v9  ;;  %v8683_v53 = vrot.slane %v19748_v57, %v21007_v9  ;;  %v8724_v37 = vcombine.high %v19750_v34, %v19750_v34 }
 0x168   : > { %v8064_v54 = vcombine.low %v7450_v40, %v7458_v49  ;;  %v8078_v56 = vrot.slane %v8062_v19, %v21007_v9  ;;  %v8085_v30 = vrot.slane %v8063_v32, %v21007_v9  ;;  %v8690_v23 = vrot.slane %v8676_v42, %v21007_v9 }
 0x169   : > { %v8691_v31 = vcombine.high %v8683_v53, %v8683_v53  ;;  %v8731_v51 = vrot.slane %v19750_v34, %v21007_v9  ;;  %v22665_v11 = vrot.slane %v8724_v37, %v21007_v9  ;;  %v8746_v61 = vcombine.high %v22649_v38, %v22649_v38 }
 0x16a   : > { %v8092_v36 = vrot.slane %v8064_v54, %v21007_v9  ;;  %v8093_v45 = vcombine.low %v8071_v14, %v8078_v56  ;;  %v8692_v18 = vcombine.high %v8690_v23, %v8690_v23  ;;  %v9372_v3 = vcombine.low %v22353_v2, %v22363_v6 }
 0x16b   : > { %v22673_v46 = vrot.slane %v8746_v61, %v21007_v9  ;;  %v9370_v57 = vcombine.low %v8690_v23, %v8691_v31  ;;  %v9373_v48 = vcombine.low %v22367_v15, %v8731_v51  ;;  %v6745_v55 = vcombine.high %v22605_v41, %v22605_v41 }
 0x16c   : > { %v8094_v58 = vcombine.low %v8085_v30, %v8092_v36  ;;  %v8101_v34 = vrot.slane %v8093_v45, %v21007_v9  ;;  %v9371_v12 = vcombine.low %v8692_v18, %v22350_v21  ;;  %v9394_v4 = vrot.slane %v9372_v3, %v21007_v9 }
 0x16d   : > { %v9380_v25 = vrot.slane %v9370_v57, %v21007_v9  ;;  %v9401_v2 = vrot.slane %v9373_v48, %v21007_v9  ;;  %v9419_v6 = vcombine.low %v22665_v11, %v22673_v46  ;;  %v22687_v15 = vrot.slane %v6745_v55, %v21007_v9 }
 0x16e   : > { %v8108_v20 = vrot.slane %v8094_v58, %v21007_v9  ;;  %v9387_v41 = vrot.slane %v9371_v12, %v21007_v9  ;;  %v22693_v60 = vcombine.high %v22619_v7, %v22619_v7  ;;  %v6769_v21 = vcombine.high %v19600_v62, %v19600_v62 }
 0x16f   : > { %v9403_v27 = vcombine.low %v9394_v4, %v9401_v2  ;;  %v22697_v13 = vcombine.high %v22687_v15, %v22687_v15  ;;  %v22700_v35 = vrot.slane %v19600_v62, %v21007_v9  ;;  %v7459_v40 = vshrl.u32 %v22619_v7, 16 }
 0x170   : > { %v8109_v19 = vcombine.low %v8101_v34, %v8108_v20  ;;  %v9402_v32 = vcombine.low %v9380_v25, %v9387_v41  ;;  %v22704_v42 = vrot.slane %v6769_v21, %v21007_v9  ;;  %v7464_v49 = vshll.u32 %v22687_v15, 16  ;;  %v19602_v20 = vld.sshfl [vmem:[%s21017_s15 + $0x4c] sm:$0x33 pattern:$0x75316420] }
 0x171   : > { %v9417_v14 = vrot.slane %v9403_v27, %v21007_v9  ;;  %v7467_v53 = vshrl.u32 %v22687_v15, 16  ;;  %v7472_v37 = vshll.u32 %v22693_v60, 16  ;;  %v7475_v8 = vshrl.u32 %v22693_v60, 16 }
 0x172   : > { %20524 = vmatprep.mubr.msk.bf16.mxu0 %vm2546_vm1, %v8109_v19  ;;  %v9410_v54 = vrot.slane %v9402_v32, %v21007_v9  ;;  %v7466_v56 = vsel %vm21048_vm15, %v7459_v40, %v7464_v49  ;;  %v7480_v30 = vshll.u32 %v22697_v13, 16  ;;  %v7483_v23 = vshrl.u32 %v22697_v13, 16  ;;  %v19603_v49 = vld.sshfl [vmem:[%s21017_s15 + $0x50] sm:$0x11 pattern:$0x75316420] }
 0x173   : > { %v7474_v31 = vsel %vm21048_vm15, %v7467_v53, %v7472_v37  ;;  %v7488_v51 = vshll.u32 %v22700_v35, 16  ;;  %v7491_v11 = vshrl.u32 %v22700_v35, 16  ;;  %v7496_v61 = vshll.u32 %v22704_v42, 16 }
 0x174   : > { %v9418_v36 = vcombine.low %v9410_v54, %v9417_v14  ;;  %v7482_v45 = vsel %vm21048_vm15, %v7475_v8, %v7480_v30  ;;  %v7500_v18 = vshrl.u32 %v22255_v28, 16  ;;  %v7505_v3 = vshll.u32 %v22260_v39, 16 }
 0x175   : > { %v7490_v57 = vsel %vm21048_vm15, %v7483_v23, %v7488_v51  ;;  %v7498_v48 = vsel %vm21048_vm15, %v7491_v11, %v7496_v61  ;;  %v7508_v62 = vshrl.u32 %v22260_v39, 16  ;;  %v7513_v55 = vshll.u32 %v22264_v24, 16 }
 0x176   : > { %20542 = vmatprep.mubr.msk.bf16.mxu1 %vm2546_vm1, %v9418_v36  ;;  %v7507_v58 = vsel %vm21048_vm15, %v7500_v18, %v7505_v3  ;;  %v7516_v34 = vshrl.u32 %v22264_v24, 16  ;;  %v7521_v28 = vshll.u32 %v22281_v52, 16  ;;  %v8110_v12 = vcombine.low %v7466_v56, %v7474_v31 }
 0x177   : > { %v7515_v4 = vsel %vm21048_vm15, %v7508_v62, %v7513_v55  ;;  %v8111_v25 = vcombine.low %v7482_v45, %v7490_v57  ;;  %v8112_v2 = vcombine.low %v7498_v48, %v7507_v58  ;;  %v8753_v39 = vrot.slane %v22649_v38, %v21007_v9 }
 0x178   : > { %v7523_v41 = vsel %vm21048_vm15, %v7516_v34, %v7521_v28  ;;  %v8120_v21 = vrot.slane %v8110_v12, %v21007_v9  ;;  %v9421_v24 = vcombine.low %v22407_v43, %v22413_v16  ;;  %v19779_v27 = vcombine.high %v22407_v43, %v22413_v16  ;;  %v19604_v16 = vld.sshfl [vmem:[%s21017_s15 + $0x54] sm:$0x33 pattern:$0x75316420] }
 0x179   : > { %v8113_v40 = vcombine.low %v7515_v4, %v7523_v41  ;;  %v8127_v19 = vrot.slane %v8111_v25, %v21007_v9  ;;  %v8134_v32 = vrot.slane %v8112_v2, %v21007_v9  ;;  %v19778_v38 = vcombine.high %v8753_v39, %v22673_v46 }
 0x17a   : > { %v9429_v14 = vrot.slane %v9419_v6, %v21007_v9  ;;  %v9443_v53 = vrot.slane %v9421_v24, %v21007_v9  ;;  %v9450_v37 = vrot.slane %v19779_v27, %v21007_v9  ;;  %v6815_v8 = vcombine.high %v19602_v20, %v19602_v20  ;;  %v19754_v27 = vld.sshfl [vmem:[%s21017_s15 + $0x24] sm:$0x32 pattern:$0x75316420] }
 0x17b   : > { %v8141_v54 = vrot.slane %v8113_v40, %v21007_v9  ;;  %v8142_v56 = vcombine.low %v8120_v21, %v8127_v19  ;;  %v9436_v43 = vrot.slane %v19778_v38, %v21007_v9  ;;  %v22760_v30 = vrot.slane %v19602_v20, %v21007_v9 }
 0x17c   : > { %v9452_v23 = vcombine.low %v9443_v53, %v9450_v37  ;;  %v22763_v46 = vrot.slane %v6815_v8, %v21007_v9  ;;  %v6839_v31 = vcombine.high %v19603_v49, %v19603_v49  ;;  %v22766_v6 = vrot.slane %v19603_v49, %v21007_v9 }
 0x17d   : > { %v8143_v51 = vcombine.low %v8134_v32, %v8141_v54  ;;  %v8150_v11 = vrot.slane %v8142_v56, %v21007_v9  ;;  %v9451_v61 = vcombine.low %v9429_v14, %v9436_v43  ;;  %v6830_v36 = vcombine.high %v22760_v30, %v22760_v30 }
 0x17e   : > { %v9466_v45 = vrot.slane %v9452_v23, %v21007_v9  ;;  %v6831_v18 = vcombine.high %v22763_v46, %v22763_v46  ;;  %v22775_v3 = vrot.slane %v6839_v31, %v21007_v9  ;;  %v6861_v57 = vcombine.high %v19604_v16, %v19604_v16 }
 0x17f   : > { %v8157_v48 = vrot.slane %v8143_v51, %v21007_v9  ;;  %v9459_v62 = vrot.slane %v9451_v61, %v21007_v9  ;;  %v6868_v55 = vrot.slane %v19604_v16, %v21007_v9  ;;  %v7524_v58 = vshrl.u32 %v22281_v52, 16 }
 0x180   : > { %v6875_v34 = vrot.slane %v6861_v57, %v21007_v9  ;;  %v7529_v28 = vshll.u32 %v22760_v30, 16  ;;  %v7532_v12 = vshrl.u32 %v22760_v30, 16  ;;  %v7537_v4 = vshll.u32 %v22763_v46, 16 }
 0x181   : > { %v8158_v25 = vcombine.low %v8150_v11, %v8157_v48  ;;  %v9467_v2 = vcombine.low %v9459_v62, %v9466_v45  ;;  %v22785_v39 = vcombine.high %v6868_v55, %v6868_v55  ;;  %v7540_v20 = vshrl.u32 %v22763_v46, 16 }
 0x182   : > { %v7531_v41 = vsel %vm21048_vm15, %v7524_v58, %v7529_v28  ;;  %v7539_v52 = vsel %vm21048_vm15, %v7532_v12, %v7537_v4  ;;  %v7545_v21 = vshll.u32 %v6830_v36, 16  ;;  %v7548_v24 = vshrl.u32 %v6830_v36, 16 }
 0x183   : > { %20525 = vmatmul.mubr.msk.bf16.gmra.mxu0 %vm2546_vm1, %v8158_v25  ;;  %20543 = vmatmul.mubr.msk.bf16.vlgmr.msra.gmra.mxu1 %vm2546_vm1, %v9467_v2  ;;  %v7553_v40 = vshll.u32 %v6831_v18, 16  ;;  %v7556_v19 = vshrl.u32 %v6831_v18, 16  ;;  %v7561_v32 = vshll.u32 %v22766_v6, 16  ;;  %v7564_v38 = vshrl.u32 %v22766_v6, 16 }
 0x184   : > { %v7547_v49 = vsel %vm21048_vm15, %v7540_v20, %v7545_v21  ;;  %v7569_v14 = vshll.u32 %v22775_v3, 16  ;;  %v7573_v53 = vshrl.u32 %v6868_v55, 16  ;;  %v7578_v37 = vshll.u32 %v6875_v34, 16 }
 0x185   : > { %v7555_v8 = vsel %vm21048_vm15, %v7548_v24, %v7553_v40  ;;  %v7563_v54 = vsel %vm21048_vm15, %v7556_v19, %v7561_v32  ;;  %v7581_v56 = vshrl.u32 %v6875_v34, 16  ;;  %v7586_v43 = vshll.u32 %v22785_v39, 16  ;;  %v19605_v55 = vld.sshfl [vmem:[%s21017_s15 + $0x58] sm:$0x33 pattern:$0x75316420] }
 0x186   : > { %v7571_v16 = vsel %vm21048_vm15, %v7564_v38, %v7569_v14  ;;  %v7580_v23 = vsel %vm21048_vm15, %v7573_v53, %v7578_v37  ;;  %v8159_v31 = vcombine.low %v7531_v41, %v7539_v52  ;;  %v8160_v51 = vcombine.low %v7547_v49, %v7555_v8  ;;  %v19606_v25 = vld.sshfl [vmem:[%s21017_s15 + $0x5c] sm:$0x11 pattern:$0x75316420] }
 0x187   : > { %v7588_v11 = vsel %vm21048_vm15, %v7581_v56, %v7586_v43  ;;  %v8161_v61 = vcombine.low %v7563_v54, %v7571_v16  ;;  %v8816_v36 = vcombine.high %v19754_v27, %v19754_v27  ;;  %v8823_v45 = vrot.slane %v19754_v27, %v21007_v9 }
 0x188   : > { %v8162_v18 = vcombine.low %v7580_v23, %v7588_v11  ;;  %v8169_v57 = vrot.slane %v8159_v31, %v21007_v9  ;;  %v8176_v48 = vrot.slane %v8160_v51, %v21007_v9  ;;  %v9468_v62 = vcombine.low %v22475_v50, %v22480_v29  ;;  %v19607_v29 = vld.sshfl [vmem:[%s21017_s15 + $0x60] sm:$0x33 pattern:$0x75316420] }
 0x189   : > { %v8183_v58 = vrot.slane %v8161_v61, %v21007_v9  ;;  %v8830_v28 = vrot.slane %v8816_v36, %v21007_v9  ;;  %v8831_v12 = vcombine.high %v8823_v45, %v8823_v45  ;;  %v9471_v4 = vcombine.low %v22496_v33, %v22500_v63 }
 0x18a   : > { %v8190_v2 = vrot.slane %v8162_v18, %v21007_v9  ;;  %v8191_v20 = vcombine.low %v8169_v57, %v8176_v48  ;;  %v9478_v41 = vrot.slane %v9468_v62, %v21007_v9  ;;  %v6877_v52 = vcombine.high %v6875_v34, %v6875_v34 }
 0x18b   : > { %v8832_v21 = vcombine.high %v8830_v28, %v8830_v28  ;;  %v9469_v24 = vcombine.low %v8830_v28, %v8831_v12  ;;  %v9499_v50 = vrot.slane %v9471_v4, %v21007_v9  ;;  %v6885_v27 = vcombine.high %v19605_v55, %v19605_v55 }
 0x18c   : > { %v8192_v40 = vcombine.low %v8183_v58, %v8190_v2  ;;  %v8199_v19 = vrot.slane %v8191_v20, %v21007_v9  ;;  %v22828_v32 = vrot.slane %v19605_v55, %v21007_v9  ;;  %v6909_v33 = vcombine.high %v19606_v25, %v19606_v25 }
 0x18d   : > { %v9470_v63 = vcombine.low %v8832_v21, %v22490_v1  ;;  %v9485_v38 = vrot.slane %v9469_v24, %v21007_v9  ;;  %v22833_v49 = vrot.slane %v6885_v27, %v21007_v9  ;;  %v22836_v34 = vrot.slane %v19606_v25, %v21007_v9  ;;  %v19757_v24 = vld.sshfl [vmem:[%s21017_s15 + $0x30] sm:$0x32 pattern:$0x75316420] }
 0x18e   : > { %v8206_v14 = vrot.slane %v8192_v40, %v21007_v9  ;;  %v22841_v53 = vcombine.high %v22828_v32, %v22828_v32  ;;  %v22844_v37 = vrot.slane %v6909_v33, %v21007_v9  ;;  %v6931_v8 = vcombine.high %v19607_v29, %v19607_v29 }
 0x18f   : > { %v9492_v1 = vrot.slane %v9470_v63, %v21007_v9  ;;  %v9500_v54 = vcombine.low %v9478_v41, %v9485_v38  ;;  %v22849_v56 = vcombine.high %v22833_v49, %v22833_v49  ;;  %v6938_v43 = vrot.slane %v19607_v29, %v21007_v9 }
 0x190   : > { %v8207_v16 = vcombine.low %v8199_v19, %v8206_v14  ;;  %v22853_v23 = vrot.slane %v6931_v8, %v21007_v9  ;;  %v7589_v31 = vshrl.u32 %v22785_v39, 16  ;;  %v7594_v51 = vshll.u32 %v6877_v52, 16 }
 0x191   : > { %v9501_v11 = vcombine.low %v9492_v1, %v9499_v50  ;;  %v9508_v61 = vrot.slane %v9500_v54, %v21007_v9  ;;  %v7597_v36 = vshrl.u32 %v6877_v52, 16  ;;  %v7602_v45 = vshll.u32 %v22828_v32, 16 }
 0x192   : > { %20528 = vmatprep.mubr.msk.bf16.mxu0 %vm2546_vm1, %v8207_v16  ;;  %v7596_v18 = vsel %vm21048_vm15, %v7589_v31, %v7594_v51  ;;  %v7605_v57 = vshrl.u32 %v22828_v32, 16  ;;  %v7610_v48 = vshll.u32 %v22833_v49, 16  ;;  %v7613_v62 = vshrl.u32 %v22833_v49, 16 }
 0x193   : > { %v9515_v39 = vrot.slane %v9501_v11, %v21007_v9  ;;  %v7604_v55 = vsel %vm21048_vm15, %v7597_v36, %v7602_v45  ;;  %v7618_v58 = vshll.u32 %v22841_v53, 16  ;;  %v7621_v28 = vshrl.u32 %v22841_v53, 16  ;;  %v19608_v16 = vld.sshfl [vmem:[%s21017_s15 + $0x64] sm:$0x33 pattern:$0x75316420] }
 0x194   : > { %v7612_v12 = vsel %vm21048_vm15, %v7605_v57, %v7610_v48  ;;  %v7626_v4 = vshll.u32 %v22849_v56, 16  ;;  %v7629_v25 = vshrl.u32 %v22849_v56, 16  ;;  %v7634_v2 = vshll.u32 %v22836_v34, 16 }
 0x195   : > { %v9516_v20 = vcombine.low %v9508_v61, %v9515_v39  ;;  %v7620_v41 = vsel %vm21048_vm15, %v7613_v62, %v7618_v58  ;;  %v7637_v52 = vshrl.u32 %v22836_v34, 16  ;;  %v7642_v21 = vshll.u32 %v22844_v37, 16  ;;  %v19609_v57 = vld.sshfl [vmem:[%s21017_s15 + $0x68] sm:$0x11 pattern:$0x75316420] }
 0x196   : > { %v7628_v50 = vsel %vm21048_vm15, %v7621_v28, %v7626_v4  ;;  %v7636_v29 = vsel %vm21048_vm15, %v7629_v25, %v7634_v2  ;;  %v7646_v27 = vshrl.u32 %v6938_v43, 16  ;;  %v7651_v40 = vshll.u32 %v22853_v23, 16 }
 0x197   : > { %20546 = vmatprep.mubr.msk.bf16.mxu1 %vm2546_vm1, %v9516_v20  ;;  %v7644_v19 = vsel %vm21048_vm15, %v7637_v52, %v7642_v21  ;;  %v8208_v33 = vcombine.low %v7596_v18, %v7604_v55  ;;  %v8209_v63 = vcombine.low %v7612_v12, %v7620_v41  ;;  %v8210_v38 = vcombine.low %v7628_v50, %v7636_v29 }
 0x198   : > { %v7653_v14 = vsel %vm21048_vm15, %v7646_v27, %v7651_v40  ;;  %v8886_v8 = vcombine.high %v19757_v24, %v19757_v24  ;;  %v8893_v1 = vrot.slane %v19757_v24, %v21007_v9  ;;  %v9517_v54 = vcombine.low %v22542_v44, %v22546_v0 }
 0x199   : > { %v8211_v31 = vcombine.low %v7644_v19, %v7653_v14  ;;  %v8218_v51 = vrot.slane %v8208_v33, %v21007_v9  ;;  %v8225_v11 = vrot.slane %v8209_v63, %v21007_v9  ;;  %v8232_v61 = vrot.slane %v8210_v38, %v21007_v9 }
 0x19a   : > { %v8900_v36 = vrot.slane %v8886_v8, %v21007_v9  ;;  %v9520_v45 = vcombine.low %v22550_v10, %v22560_v17  ;;  %v9527_v18 = vrot.slane %v9517_v54, %v21007_v9  ;;  %v6946_v48 = vcombine.high %v6938_v43, %v6938_v43 }
 0x19b   : > { %v8239_v62 = vrot.slane %v8211_v31, %v21007_v9  ;;  %v8240_v44 = vcombine.low %v8218_v51, %v8225_v11  ;;  %v6947_v0 = vcombine.high %v22853_v23, %v22853_v23  ;;  %v6955_v39 = vcombine.high %v19608_v16, %v19608_v16 }
 0x19c   : > { %v9518_v55 = vcombine.low %v22554_v22, %v8900_v36  ;;  %v19780_v58 = vcombine.high %v8893_v1, %v8900_v36  ;;  %v9548_v28 = vrot.slane %v9520_v45, %v21007_v9  ;;  %v22907_v12 = vrot.slane %v19608_v16, %v21007_v9  ;;  %v19760_v36 = vld.sshfl [vmem:[%s21017_s15 + $0x3c] sm:$0x32 pattern:$0x75316420] }
 0x19d   : > { %v8241_v4 = vcombine.low %v8232_v61, %v8239_v62  ;;  %v8248_v25 = vrot.slane %v8240_v44, %v21007_v9  ;;  %v22911_v43 = vrot.slane %v6955_v39, %v21007_v9  ;;  %v6979_v2 = vcombine.high %v19609_v57, %v19609_v57 }
 0x19e   : > { %v9534_v20 = vrot.slane %v9518_v55, %v21007_v9  ;;  %v9541_v41 = vrot.slane %v19780_v58, %v21007_v9  ;;  %v6970_v22 = vcombine.high %v22907_v12, %v22907_v12  ;;  %v22918_v52 = vrot.slane %v19609_v57, %v21007_v9 }
 0x19f   : > { %v8255_v21 = vrot.slane %v8241_v4, %v21007_v9  ;;  %v6971_v24 = vcombine.high %v22911_v43, %v22911_v43  ;;  %v22924_v50 = vrot.slane %v6979_v2, %v21007_v9  ;;  %v7654_v29 = vshrl.u32 %v22853_v23, 16 }
 0x1a0   : > { %v9549_v27 = vcombine.low %v9527_v18, %v9534_v20  ;;  %v9550_v40 = vcombine.low %v9541_v41, %v9548_v28  ;;  %v7659_v19 = vshll.u32 %v6946_v48, 16  ;;  %v7662_v33 = vshrl.u32 %v6946_v48, 16 }
 0x1a1   : > { %v8256_v63 = vcombine.low %v8248_v25, %v8255_v21  ;;  %v7667_v38 = vshll.u32 %v6947_v0, 16  ;;  %v7670_v14 = vshrl.u32 %v6947_v0, 16  ;;  %v7675_v8 = vshll.u32 %v22907_v12, 16 }
 0x1a2   : > { %v9557_v1 = vrot.slane %v9549_v27, %v21007_v9  ;;  %v9564_v54 = vrot.slane %v9550_v40, %v21007_v9  ;;  %v7661_v16 = vsel %vm21048_vm15, %v7654_v29, %v7659_v19  ;;  %v7678_v31 = vshrl.u32 %v22907_v12, 16 }
 0x1a3   : > { %20529 = vmatmul.mubr.msk.bf16.gmra.mxu0 %vm2546_vm1, %v8256_v63  ;;  %v7669_v23 = vsel %vm21048_vm15, %v7662_v33, %v7667_v38  ;;  %v7677_v51 = vsel %vm21048_vm15, %v7670_v14, %v7675_v8  ;;  %v7683_v11 = vshll.u32 %v22911_v43, 16  ;;  %v7686_v61 = vshrl.u32 %v22911_v43, 16  ;;  %v19611_v38 = vld.sshfl [vmem:[%s21017_s15 + $0x70] sm:$0x33 pattern:$0x75316420] }
 0x1a4   : > { %v9565_v45 = vcombine.low %v9557_v1, %v9564_v54  ;;  %v7691_v18 = vshll.u32 %v6970_v22, 16  ;;  %v7694_v57 = vshrl.u32 %v6970_v22, 16  ;;  %v7699_v48 = vshll.u32 %v6971_v24, 16 }
 0x1a5   : > { %v7685_v62 = vsel %vm21048_vm15, %v7678_v31, %v7683_v11  ;;  %v7702_v44 = vshrl.u32 %v6971_v24, 16  ;;  %v7707_v0 = vshll.u32 %v22918_v52, 16  ;;  %v7710_v39 = vshrl.u32 %v22918_v52, 16 }
 0x1a6   : > { %20547 = vmatmul.mubr.msk.bf16.gmra.mxu1 %vm2546_vm1, %v9565_v45  ;;  %v7693_v55 = vsel %vm21048_vm15, %v7686_v61, %v7691_v18  ;;  %v7701_v58 = vsel %vm21048_vm15, %v7694_v57, %v7699_v48  ;;  %v7715_v28 = vshll.u32 %v22924_v50, 16  ;;  %v8257_v4 = vcombine.low %v7661_v16, %v7669_v23  ;;  %v19610_v22 = vld.sshfl [vmem:[%s21017_s15 + $0x6c] sm:$0x33 pattern:$0x75316420] }
 0x1a7   : > { %v7709_v25 = vsel %vm21048_vm15, %v7702_v44, %v7707_v0  ;;  %v8258_v2 = vcombine.low %v7677_v51, %v7685_v62  ;;  %v8259_v20 = vcombine.low %v7693_v55, %v7701_v58  ;;  %v8956_v41 = vcombine.high %v19760_v36, %v19760_v36  ;;  %v22971_v11 = vld.sshfl [vmem:[%s21017_s15 + $0x74] sm:$0x11 pattern:$0x75316420] }
 0x1a8   : > { %v7717_v21 = vsel %vm21048_vm15, %v7710_v39, %v7715_v28  ;;  %v8267_v24 = vrot.slane %v8257_v4, %v21007_v9  ;;  %v8963_v29 = vrot.slane %v19760_v36, %v21007_v9  ;;  %v19781_v27 = vcombine.high %v22550_v10, %v22560_v17 }
 0x1a9   : > { %v8260_v40 = vcombine.low %v7709_v25, %v7717_v21  ;;  %v8274_v19 = vrot.slane %v8258_v2, %v21007_v9  ;;  %v8281_v33 = vrot.slane %v8259_v20, %v21007_v9  ;;  %v8970_v63 = vrot.slane %v8956_v41, %v21007_v9 }
 0x1aa   : > { %v8971_v14 = vcombine.high %v8963_v29, %v8963_v29  ;;  %v9567_v8 = vcombine.low %v22608_v59, %v22613_v47  ;;  %v9576_v1 = vrot.slane %v19781_v27, %v21007_v9  ;;  %v7001_v54 = vcombine.high %v19610_v22, %v19610_v22 }
 0x1ab   : > { %v8288_v16 = vrot.slane %v8260_v40, %v21007_v9  ;;  %v8289_v31 = vcombine.low %v8267_v24, %v8274_v19  ;;  %v8972_v10 = vcombine.high %v8970_v63, %v8970_v63  ;;  %v7008_v17 = vrot.slane %v19610_v22, %v21007_v9 }
 0x1ac   : > { %v9568_v23 = vcombine.low %v8970_v63, %v8971_v14  ;;  %v9583_v51 = vrot.slane %v9567_v8, %v21007_v9  ;;  %v7015_v61 = vrot.slane %v7001_v54, %v21007_v9  ;;  %v7025_v36 = vcombine.high %v19611_v38, %v19611_v38  ;;  %v19763_v54 = vld.sshfl [vmem:[%s21017_s15 + $0x48] sm:$0x32 pattern:$0x75316420] }
 0x1ad   : > { %v8290_v45 = vcombine.low %v8281_v33, %v8288_v16  ;;  %v8297_v59 = vrot.slane %v8289_v31, %v21007_v9  ;;  %v9569_v47 = vcombine.low %v8972_v10, %v22619_v7  ;;  %v7016_v18 = vcombine.high %v7008_v17, %v7008_v17 }
 0x1ae   : > { %v9590_v57 = vrot.slane %v9568_v23, %v21007_v9  ;;  %v9598_v48 = vcombine.low %v9576_v1, %v9583_v51  ;;  %v7017_v62 = vcombine.high %v7015_v61, %v7015_v61  ;;  %v22978_v44 = vrot.slane %v19611_v38, %v21007_v9 }
 0x1af   : > { %v8304_v0 = vrot.slane %v8290_v45, %v21007_v9  ;;  %v9597_v39 = vrot.slane %v9569_v47, %v21007_v9  ;;  %v22983_v55 = vrot.slane %v7025_v36, %v21007_v9  ;;  %v22987_v58 = vrot.slane %v22971_v11, %v21007_v9 }
 0x1b0   : > { %v9606_v7 = vrot.slane %v9598_v48, %v21007_v9  ;;  %v22992_v28 = vcombine.high %v22978_v44, %v22978_v44  ;;  %v7719_v4 = vshrl.u32 %v7008_v17, 16  ;;  %v7724_v25 = vshll.u32 %v7015_v61, 16 }
 0x1b1   : > { %v8305_v2 = vcombine.low %v8297_v59, %v8304_v0  ;;  %v9599_v20 = vcombine.low %v9590_v57, %v9597_v39  ;;  %v22996_v41 = vcombine.high %v22983_v55, %v22983_v55  ;;  %v7727_v22 = vshrl.u32 %v7015_v61, 16 }
 0x1b2   : > { %v7726_v21 = vsel %vm21048_vm15, %v7719_v4, %v7724_v25  ;;  %v7732_v24 = vshll.u32 %v7016_v18, 16  ;;  %v7735_v29 = vshrl.u32 %v7016_v18, 16  ;;  %v7740_v27 = vshll.u32 %v7017_v62, 16 }
 0x1b3   : > { %20532 = vmatprep.mubr.msk.bf16.mxu0 %vm2546_vm1, %v8305_v2  ;;  %v9613_v40 = vrot.slane %v9599_v20, %v21007_v9  ;;  %v7743_v19 = vshrl.u32 %v7017_v62, 16  ;;  %v7748_v33 = vshll.u32 %v22978_v44, 16  ;;  %v7751_v63 = vshrl.u32 %v22978_v44, 16 }
 0x1b4   : > { %v7734_v38 = vsel %vm21048_vm15, %v7727_v22, %v7732_v24  ;;  %v7742_v14 = vsel %vm21048_vm15, %v7735_v29, %v7740_v27  ;;  %v7756_v8 = vshll.u32 %v22983_v55, 16  ;;  %v7759_v1 = vshrl.u32 %v22983_v55, 16  ;;  %v19613_v2 = vld.sshfl [vmem:[%s21017_s15 + $0x78] sm:$0x33 pattern:$0x75316420] }
 0x1b5   : > { %v9614_v16 = vcombine.low %v9606_v7, %v9613_v40  ;;  %v7750_v31 = vsel %vm21048_vm15, %v7743_v19, %v7748_v33  ;;  %v7764_v10 = vshll.u32 %v22992_v28, 16  ;;  %v7767_v17 = vshrl.u32 %v22992_v28, 16  ;;  %v19614_v33 = vld.sshfl [vmem:[%s21017_s15 + $0x7c] sm:$0x33 pattern:$0x75316420] }
 0x1b6   : > { %v7758_v23 = vsel %vm21048_vm15, %v7751_v63, %v7756_v8  ;;  %v7772_v51 = vshll.u32 %v22996_v41, 16  ;;  %v7775_v61 = vshrl.u32 %v22996_v41, 16  ;;  %v7780_v36 = vshll.u32 %v22987_v58, 16 }
 0x1b7   : > { %20550 = vmatprep.mubr.msk.bf16.mxu1 %vm2546_vm1, %v9614_v16  ;;  %v7766_v45 = vsel %vm21048_vm15, %v7759_v1, %v7764_v10  ;;  %v8306_v59 = vcombine.low %v7726_v21, %v7734_v38  ;;  %v8307_v47 = vcombine.low %v7742_v14, %v7750_v31  ;;  %v9026_v18 = vcombine.high %v19763_v54, %v19763_v54 }
 0x1b8   : > { %v7774_v57 = vsel %vm21048_vm15, %v7767_v17, %v7772_v51  ;;  %v7782_v48 = vsel %vm21048_vm15, %v7775_v61, %v7780_v36  ;;  %v8308_v62 = vcombine.low %v7758_v23, %v7766_v45  ;;  %v9033_v0 = vrot.slane %v19763_v54, %v21007_v9 }
 0x1b9   : > { %v8309_v39 = vcombine.low %v7774_v57, %v7782_v48  ;;  %v8316_v7 = vrot.slane %v8306_v59, %v21007_v9  ;;  %v8323_v4 = vrot.slane %v8307_v47, %v21007_v9  ;;  %v9040_v25 = vrot.slane %v9026_v18, %v21007_v9 }
 0x1ba   : > { %v8330_v20 = vrot.slane %v8308_v62, %v21007_v9  ;;  %v9615_v22 = vcombine.low %v22687_v15, %v22693_v60  ;;  %v9616_v21 = vcombine.low %v22697_v13, %v22700_v35  ;;  %v7049_v24 = vcombine.high %v22971_v11, %v22971_v11 }
 0x1bb   : > { %v8337_v29 = vrot.slane %v8309_v39, %v21007_v9  ;;  %v8338_v27 = vcombine.low %v8316_v7, %v8323_v4  ;;  %v9617_v40 = vcombine.low %v22704_v42, %v9040_v25  ;;  %v19782_v19 = vcombine.high %v9033_v0, %v9040_v25 }
 0x1bc   : > { %v9625_v63 = vrot.slane %v9615_v22, %v21007_v9  ;;  %v9632_v38 = vrot.slane %v9616_v21, %v21007_v9  ;;  %v23045_v14 = vrot.slane %v7049_v24, %v21007_v9  ;;  %v7071_v15 = vcombine.high %v19613_v2, %v19613_v2 }
 0x1bd   : > { %v8339_v60 = vcombine.low %v8330_v20, %v8337_v29  ;;  %v8346_v13 = vrot.slane %v8338_v27, %v21007_v9  ;;  %v9639_v35 = vrot.slane %v9617_v40, %v21007_v9  ;;  %v9646_v11 = vrot.slane %v19782_v19, %v21007_v9 }
 0x1be   : > { %v9647_v8 = vcombine.low %v9625_v63, %v9632_v38  ;;  %v7078_v42 = vrot.slane %v19613_v2, %v21007_v9  ;;  %v7085_v1 = vrot.slane %v7071_v15, %v21007_v9  ;;  %v7095_v54 = vcombine.high %v19614_v33, %v19614_v33  ;;  %v19766_v2 = vld.sshfl [vmem:[%s21017_s15 + $0x54] sm:$0x32 pattern:$0x75316420] }
 0x1bf   : > { %v8353_v16 = vrot.slane %v8339_v60, %v21007_v9  ;;  %v9648_v31 = vcombine.low %v9639_v35, %v9646_v11  ;;  %v23054_v10 = vrot.slane %v19614_v33, %v21007_v9  ;;  %v7783_v17 = vshrl.u32 %v22987_v58, 16 }
 0x1c0   : > { %v9655_v23 = vrot.slane %v9647_v8, %v21007_v9  ;;  %v7086_v51 = vcombine.high %v7078_v42, %v7078_v42  ;;  %v7087_v61 = vcombine.high %v7085_v1, %v7085_v1  ;;  %v23059_v36 = vrot.slane %v7095_v54, %v21007_v9 }
 0x1c1   : > { %v8354_v45 = vcombine.low %v8346_v13, %v8353_v16  ;;  %v9662_v59 = vrot.slane %v9648_v31, %v21007_v9  ;;  %v7110_v47 = vcombine.high %v23054_v10, %v23054_v10  ;;  %v7788_v18 = vshll.u32 %v23045_v14, 16 }
 0x1c2   : > { %v23067_v57 = vcombine.high %v23059_v36, %v23059_v36  ;;  %v7792_v48 = vshrl.u32 %v7078_v42, 16  ;;  %v7797_v62 = vshll.u32 %v7085_v1, 16  ;;  %v7800_v0 = vshrl.u32 %v7085_v1, 16 }
 0x1c3   : > { %20533 = vmatmul.mubr.msk.bf16.gmra.mxu0 %vm2546_vm1, %v8354_v45  ;;  %v9663_v39 = vcombine.low %v9655_v23, %v9662_v59  ;;  %v7790_v7 = vsel %vm21048_vm15, %v7783_v17, %v7788_v18  ;;  %v7805_v4 = vshll.u32 %v7086_v51, 16  ;;  %v7808_v25 = vshrl.u32 %v7086_v51, 16  ;;  %v19615_v51 = vld.sshfl [vmem:[%s21017_s15 + $0x80] sm:$0x11 pattern:$0x75316420] }
 0x1c4   : > { %v7799_v20 = vsel %vm21048_vm15, %v7792_v48, %v7797_v62  ;;  %v7813_v22 = vshll.u32 %v7087_v61, 16  ;;  %v7816_v21 = vshrl.u32 %v7087_v61, 16  ;;  %v7821_v24 = vshll.u32 %v23054_v10, 16 }
 0x1c5   : > { %20551 = vmatmul.mubr.msk.bf16.gmra.mxu1 %vm2546_vm1, %v9663_v39  ;;  %v7807_v29 = vsel %vm21048_vm15, %v7800_v0, %v7805_v4  ;;  %v7824_v27 = vshrl.u32 %v23054_v10, 16  ;;  %v7829_v40 = vshll.u32 %v23059_v36, 16  ;;  %v7832_v19 = vshrl.u32 %v23059_v36, 16 }
 0x1c6   : > { %v7815_v33 = vsel %vm21048_vm15, %v7808_v25, %v7813_v22  ;;  %v7823_v63 = vsel %vm21048_vm15, %v7816_v21, %v7821_v24  ;;  %v7837_v38 = vshll.u32 %v7110_v47, 16  ;;  %v7840_v15 = vshrl.u32 %v7110_v47, 16 }
 0x1c7   : > { %v7831_v60 = vsel %vm21048_vm15, %v7824_v27, %v7829_v40  ;;  %v7845_v13 = vshll.u32 %v23067_v57, 16  ;;  %v8355_v35 = vcombine.low %v7790_v7, %v7799_v20  ;;  %v8356_v11 = vcombine.low %v7807_v29, %v7815_v33 }
 0x1c8   : > { %v7839_v8 = vsel %vm21048_vm15, %v7832_v19, %v7837_v38  ;;  %v8357_v42 = vcombine.low %v7823_v63, %v7831_v60  ;;  %v9096_v1 = vcombine.high %v19766_v2, %v19766_v2  ;;  %v9103_v54 = vrot.slane %v19766_v2, %v21007_v9  ;;  %v19769_v2 = vld.sshfl [vmem:[%s21017_s15 + $0x60] sm:$0x32 pattern:$0x75316420] }
 0x1c9   : > { %v7847_v16 = vsel %vm21048_vm15, %v7840_v15, %v7845_v13  ;;  %v8365_v31 = vrot.slane %v8355_v35, %v21007_v9  ;;  %v8372_v17 = vrot.slane %v8356_v11, %v21007_v9  ;;  %v9664_v23 = vcombine.low %v22760_v30, %v22763_v46  ;;  %v20873_v15 = vld [vmem:[%s26841_s2 + $0xc] ss:$0 sps:$4 sm:$0xcc]  }
 0x1ca   : > { %v8358_v61 = vcombine.low %v7839_v8, %v7847_v16  ;;  %v8379_v45 = vrot.slane %v8357_v42, %v21007_v9  ;;  %v9110_v59 = vrot.slane %v9096_v1, %v21007_v9  ;;  %v9111_v47 = vcombine.high %v9103_v54, %v9103_v54 }
 0x1cb   : > { %v8387_v18 = vcombine.low %v8365_v31, %v8372_v17  ;;  %v19783_v48 = vcombine.high %v22760_v30, %v22763_v46  ;;  %v9666_v62 = vcombine.low %v22766_v6, %v22775_v3  ;;  %v9674_v0 = vrot.slane %v9664_v23, %v21007_v9 }
 0x1cc   : > { %v8386_v39 = vrot.slane %v8358_v61, %v21007_v9  ;;  %v9667_v7 = vcombine.low %v9110_v59, %v9111_v47  ;;  %v7119_v4 = vcombine.high %v19615_v51, %v19615_v51  ;;  %v23108_v25 = vrot.slane %v19615_v51, %v21007_v9 }
 0x1cd   : > { %v8395_v20 = vrot.slane %v8387_v18, %v21007_v9  ;;  %v9681_v22 = vrot.slane %v19783_v48, %v21007_v9  ;;  %v9688_v21 = vrot.slane %v9666_v62, %v21007_v9  ;;  %v7848_v30 = vshrl.u32 %v23067_v57, 16  ;;  %v19834_v62 = vld.sshfl [vmem:[%s21017_s15 + $0x1c] sm:$0x33 pattern:$0x75316420] }
 0x1ce   : > { %v8388_v46 = vcombine.low %v8379_v45, %v8386_v39  ;;  %v9695_v6 = vrot.slane %v9667_v7, %v21007_v9  ;;  %v23117_v3 = vrot.slane %v7119_v4, %v21007_v9  ;;  %v7853_v24 = vshll.u32 %v23108_v25, 16  ;;  %v19833_v45 = vld.sshfl [vmem:[%s21017_s15 + $0x18] sm:$0x33 pattern:$0x75316420] }
 0x1cf   : > { %v9696_v29 = vcombine.low %v9674_v0, %v9681_v22  ;;  %v7856_v27 = vshrl.u32 %v23108_v25, 16  ;;  %v9112_v40 = vcombine.high %v9110_v59, %v9110_v59  ;;  %v9166_v19 = vcombine.high %v19769_v2, %v19769_v2 }
 0x1d0   : > { %v8402_v33 = vrot.slane %v8388_v46, %v21007_v9  ;;  %v9697_v63 = vcombine.low %v9688_v21, %v9695_v6  ;;  %v7855_v38 = vsel %vm21048_vm15, %v7848_v30, %v7853_v24  ;;  %v7861_v57 = vshll.u32 %v23117_v3, 16 }
 0x1d1   : > { %v9704_v60 = vrot.slane %v9696_v29, %v21007_v9  ;;  %v9180_v13 = vrot.slane %v9166_v19, %v21007_v9  ;;  %v9713_v35 = vcombine.low %v9112_v40, %v22828_v32  ;;  %v9714_v11 = vcombine.low %v22833_v49, %v22841_v53 }
 0x1d2   : > { %v8403_v8 = vcombine.low %v8395_v20, %v8402_v33  ;;  %v9711_v42 = vrot.slane %v9697_v63, %v21007_v9  ;;  %v7863_v1 = vsel %vm21048_vm15, %v7856_v27, %v7861_v57  ;;  %v9715_v54 = vcombine.low %v22849_v56, %v22836_v34 }
 0x1d3   : > { %v8404_v16 = vcombine.low %v7855_v38, %v7863_v1  ;;  %v9716_v31 = vcombine.low %v22844_v37, %v9180_v13  ;;  %v9723_v17 = vrot.slane %v9713_v35, %v21007_v9  ;;  %v9730_v32 = vrot.slane %v9714_v11, %v21007_v9  ;;  %v19835_v35 = vld.sshfl [vmem:[%s21017_s15 + $0x20] sm:$0x1 pattern:$0x75316420] }
 0x1d4   : > { %20536 = vmatprep.mubr.msk.bf16.mxu0 %vm2546_vm1, %v8403_v8  ;;  %v9712_v49 = vcombine.low %v9704_v60, %v9711_v42  ;;  %v9737_v53 = vrot.slane %v9715_v54, %v21007_v9  ;;  %v13595_v23 = vrot.slane %v20873_v15, 2  ;;  %v9173_v51 = vrot.slane %v19769_v2, %v21007_v9  ;;  %v19772_v2 = vld.sshfl [vmem:[%s21017_s15 + $0x6c] sm:$0x32 pattern:$0x75316420] }
 0x1d5   : > { %v8411_v61 = vrot.slane %v8404_v16, %v21007_v9  ;;  %v9744_v34 = vrot.slane %v9716_v31, %v21007_v9  ;;  %v9745_v56 = vcombine.low %v9723_v17, %v9730_v32  ;;  %v9763_v37 = vcombine.low %v22907_v12, %v22911_v43  ;;  %v19836_v54 = vld.sshfl [vmem:[%s21017_s15 + $0x24] sm:$0x33 pattern:$0x75316420] }
 0x1d6   : > { %20554 = vmatprep.mubr.msk.bf16.mxu1 %vm2546_vm1, %v9712_v49  ;;  %20816 = vmatprep.subr.msk.bf16.mxu1 %vm26865_vm0, %v13595_v23  ;;  %v13633_v59 = vsel %vm26865_vm0, %v13595_v23, 0  ;;  %v19784_v47 = vcombine.high %v9173_v51, %v9180_v13  ;;  %v19785_v18 = vcombine.high %v22907_v12, %v22911_v43  ;;  %v9765_v48 = vcombine.low %v22918_v52, %v22924_v50  ;;  %v19837_v49 = vld.sshfl [vmem:[%s21017_s15 + $0x28] sm:$0x33 pattern:$0x75316420] }
 0x1d7   : > { %v8418_v0 = vrot.slane %v8411_v61, %v21007_v9  ;;  %v9746_v39 = vcombine.low %v9737_v53, %v9744_v34  ;;  %v9753_v7 = vrot.slane %v9745_v56, %v21007_v9  ;;  %20593 = vmatpush3.bf16.msra.mxu1 %v13633_v59  ;;  %v9779_v4 = vrot.slane %v9763_v37, %v21007_v9 }
 0x1d8   : > { %v9772_v20 = vrot.slane %v19784_v47, %v21007_v9  ;;  %v9786_v22 = vrot.slane %v19785_v18, %v21007_v9  ;;  %v9793_v21 = vrot.slane %v9765_v48, %v21007_v9  ;;  %v10189_v12 = vcombine.high %v19833_v45, %v19833_v45 }
 0x1d9   : > { %20537 = vmatmul.mubr.msk.bf16.gmra.mxu0 %vm2546_vm1, %v8418_v0  ;;  %v9760_v43 = vrot.slane %v9746_v39, %v21007_v9  ;;  %v23167_v52 = vrot.slane %v19833_v45, %v21007_v9  ;;  %v10213_v50 = vcombine.high %v19834_v62, %v19834_v62  ;;  %v23170_v30 = vrot.slane %v19834_v62, %v21007_v9 }
 0x1da   : > { %v9794_v46 = vcombine.low %v9772_v20, %v9779_v4  ;;  %v9795_v6 = vcombine.low %v9786_v22, %v9793_v21  ;;  %v23173_v24 = vrot.slane %v10189_v12, %v21007_v9  ;;  %v9236_v29 = vcombine.high %v19772_v2, %v19772_v2 }
 0x1db   : > { %v9761_v27 = vcombine.low %v9753_v7, %v9760_v43  ;;  %v23176_v40 = vrot.slane %v10213_v50, %v21007_v9  ;;  %v9243_v19 = vrot.slane %v19772_v2, %v21007_v9  ;;  %v9813_v33 = vcombine.low %v22983_v55, %v22992_v28 }
 0x1dc   : > { %v9802_v63 = vrot.slane %v9794_v46, %v21007_v9  ;;  %v9809_v38 = vrot.slane %v9795_v6, %v21007_v9  ;;  %v10803_v57 = vcombine.low %v23167_v52, %v23173_v24  ;;  %v19863_v15 = vcombine.high %v23167_v52, %v23173_v24  ;;  %v20879_v46 = vld [vmem:[%s26841_s2 + $0x10] sm:$0x3] }
 0x1dd   : > { %20555 = vmatmul.mubr.msk.bf16.gmra.mxu1 %vm2546_vm1, %v9761_v27  ;;  %v10805_v60 = vcombine.low %v23170_v30, %v23176_v40  ;;  %v19864_v13 = vcombine.high %v23170_v30, %v23176_v40  ;;  %v9250_v55 = vrot.slane %v9236_v29, %v21007_v9  ;;  %v9251_v28 = vcombine.high %v9243_v19, %v9243_v19 }
 0x1de   : > { %v9810_v11 = vcombine.low %v9802_v63, %v9809_v38  ;;  %v10813_v8 = vrot.slane %v10803_v57, %v21007_v9  ;;  %v10820_v42 = vrot.slane %v19863_v15, %v21007_v9  ;;  %v9814_v1 = vcombine.low %v22996_v41, %v22987_v58  ;;  %v19839_v38 = vld.sshfl [vmem:[%s21017_s15 + $0x30] sm:$0x33 pattern:$0x75316420] }
 0x1df   : > { %v10827_v16 = vrot.slane %v10805_v60, %v21007_v9  ;;  %v10834_v31 = vrot.slane %v19864_v13, %v21007_v9  ;;  %v9252_v17 = vcombine.high %v9250_v55, %v9250_v55  ;;  %v9811_v32 = vcombine.low %v9250_v55, %v9251_v28  ;;  %v19838_v55 = vld.sshfl [vmem:[%s21017_s15 + $0x2c] sm:$0x1 pattern:$0x75316420] }
 0x1e0   : > { %20558 = vmatprep.mubr.msk.bf16.mxu1 %vm2546_vm1, %v9810_v11  ;;  %v10835_v53 = vcombine.low %v10813_v8, %v10820_v42  ;;  %v9835_v23 = vrot.slane %v9813_v33, %v21007_v9  ;;  %v9842_v51 = vrot.slane %v9814_v1, %v21007_v9  ;;  %v10243_v61 = vrot.slane %v19835_v35, %v21007_v9 }
 0x1e1   : > { %v10836_v34 = vcombine.low %v10827_v16, %v10834_v31  ;;  %v9812_v58 = vcombine.low %v9252_v17, %v22978_v44  ;;  %v9821_v41 = vrot.slane %v9811_v32, %v21007_v9  ;;  %v10251_v56 = vcombine.high %v19836_v54, %v19836_v54  ;;  %v19775_v44 = vld.sshfl [vmem:[%s21017_s15 + $0x78] sm:$0x32 pattern:$0x75316420] }
 0x1e2   : > { %v10843_v37 = vrot.slane %v10835_v53, %v21007_v9  ;;  %v9844_v45 = vcombine.low %v9835_v23, %v9842_v51  ;;  %v23210_v59 = vrot.slane %v19836_v54, %v21007_v9  ;;  %v10275_v47 = vcombine.high %v19837_v49, %v19837_v49  ;;  %v19840_v31 = vld.sshfl [vmem:[%s21017_s15 + $0x34] sm:$0x33 pattern:$0x75316420] }
 0x1e3   : > { %v10850_v18 = vrot.slane %v10836_v34, %v21007_v9  ;;  %v9828_v48 = vrot.slane %v9812_v58, %v21007_v9  ;;  %v23215_v62 = vrot.slane %v10251_v56, %v21007_v9  ;;  %v23218_v0 = vrot.slane %v19837_v49, %v21007_v9 }
 0x1e4   : > { %v9858_v39 = vrot.slane %v9844_v45, %v21007_v9  ;;  %v23224_v7 = vcombine.high %v23210_v59, %v23210_v59  ;;  %v23227_v4 = vrot.slane %v10275_v47, %v21007_v9  ;;  %v10852_v2 = vcombine.low %v10243_v61, %v23210_v59 }
 0x1e5   : > { %v10851_v20 = vcombine.low %v10843_v37, %v10850_v18  ;;  %v9843_v22 = vcombine.low %v9821_v41, %v9828_v48  ;;  %v23232_v21 = vcombine.high %v23215_v62, %v23215_v62  ;;  %v23236_v12 = vcombine.high %v23218_v0, %v23218_v0  ;;  %v19842_v41 = vld.sshfl [vmem:[%s21017_s15 + $0x3c] sm:$0x33 pattern:$0x75316420] }
 0x1e6   : > { %v10853_v43 = vcombine.low %v23215_v62, %v23224_v7  ;;  %v10862_v50 = vrot.slane %v10852_v2, %v21007_v9  ;;  %v15138_v6 = vsel %vm26865_vm0, %v20879_v46, 0  ;;  %v9306_v29 = vcombine.high %v19775_v44, %v19775_v44  ;;  %v19841_v18 = vld.sshfl [vmem:[%s21017_s15 + $0x38] sm:$0x1 pattern:$0x75316420] }
 0x1e7   : > { %20568 = vmatprep.mubr.msk.bf16.mxu0 %vm2546_vm1, %v10851_v20  ;;  %v9851_v27 = vrot.slane %v9843_v22, %v21007_v9  ;;  %v10854_v19 = vcombine.low %v23232_v21, %v23218_v0  ;;  %v10855_v33 = vcombine.low %v23227_v4, %v23236_v12  ;;  %v9313_v63 = vrot.slane %v19775_v44, %v21007_v9 }
 0x1e8   : > { %v10869_v57 = vrot.slane %v10853_v43, %v21007_v9  ;;  %v9320_v15 = vrot.slane %v9306_v29, %v21007_v9  ;;  %v9862_v60 = vcombine.low %v23054_v10, %v23059_v36  ;;  %v19787_v13 = vcombine.high %v23054_v10, %v23059_v36 }
 0x1e9   : > { %v9859_v28 = vcombine.low %v9851_v27, %v9858_v39  ;;  %v10876_v35 = vrot.slane %v10854_v19, %v21007_v9  ;;  %v10883_v11 = vrot.slane %v10855_v33, %v21007_v9  ;;  %v23264_v8 = vcombine.high %v23227_v4, %v23227_v4 }
 0x1ea   : > { %v10884_v42 = vcombine.low %v10862_v50, %v10869_v57  ;;  %v9860_v1 = vcombine.low %v23045_v14, %v9320_v15  ;;  %v19786_v54 = vcombine.high %v9313_v63, %v9320_v15  ;;  %v9884_v16 = vrot.slane %v9862_v60, %v21007_v9 }
 0x1eb   : > { %20559 = vmatmul.mubr.msk.bf16.gmra.mxu1 %vm2546_vm1, %v9859_v28  ;;  %v10885_v10 = vcombine.low %v10876_v35, %v10883_v11  ;;  %v9891_v36 = vrot.slane %v19787_v13, %v21007_v9  ;;  %v10305_v17 = vrot.slane %v19838_v55, %v21007_v9  ;;  %v10313_v32 = vcombine.high %v19839_v38, %v19839_v38  ;;  %v19845_v55 = vld.sshfl [vmem:[%s21017_s15 + $0x48] sm:$0x33 pattern:$0x75316420] }
 0x1ec   : > { %v10892_v49 = vrot.slane %v10884_v42, %v21007_v9  ;;  %v9870_v53 = vrot.slane %v9860_v1, %v21007_v9  ;;  %v9877_v14 = vrot.slane %v19786_v54, %v21007_v9  ;;  %v23276_v23 = vrot.slane %v19839_v38, %v21007_v9  ;;  %v19844_v11 = vld.sshfl [vmem:[%s21017_s15 + $0x44] sm:$0x1 pattern:$0x75316420] }
 0x1ed   : > { %v10899_v51 = vrot.slane %v10885_v10, %v21007_v9  ;;  %v9893_v61 = vcombine.low %v9884_v16, %v9891_v36  ;;  %v23280_v34 = vrot.slane %v10313_v32, %v21007_v9  ;;  %v10337_v58 = vcombine.high %v19840_v31, %v19840_v31 }
 0x1ee   : > { %v9892_v56 = vcombine.low %v9870_v53, %v9877_v14  ;;  %v23284_v37 = vrot.slane %v19840_v31, %v21007_v9  ;;  %v10901_v45 = vcombine.low %v23264_v8, %v10305_v17  ;;  %v9909_v47 = vcombine.low %v23108_v25, %v23117_v3  ;;  %v19843_v25 = vld.sshfl [vmem:[%s21017_s15 + $0x40] sm:$0x33 pattern:$0x75316420] }
 0x1ef   : > { %v10900_v48 = vcombine.low %v10892_v49, %v10899_v51  ;;  %v9907_v44 = vrot.slane %v9893_v61, %v21007_v9  ;;  %v23292_v39 = vrot.slane %v10337_v58, %v21007_v9  ;;  %v10902_v2 = vcombine.low %v23276_v23, %v23280_v34 }
 0x1f0   : > { %v9900_v20 = vrot.slane %v9892_v56, %v21007_v9  ;;  %v19865_v22 = vcombine.high %v23276_v23, %v23280_v34  ;;  %v10911_v43 = vrot.slane %v10901_v45, %v21007_v9  ;;  %v9916_v50 = vrot.slane %v9909_v47, %v21007_v9 }
 0x1f1   : > { %20569 = vmatmul.mubr.msk.bf16.vlgmr.msra.gmra.mxu0 %vm2546_vm1, %v10900_v48  ;;  %v10904_v3 = vcombine.low %v23284_v37, %v23292_v39  ;;  %v10918_v46 = vrot.slane %v10902_v2, %v21007_v9  ;;  %v10367_v29 = vrot.slane %v19841_v18, %v21007_v9  ;;  %v10375_v27 = vcombine.high %v19842_v41, %v19842_v41 }
 0x1f2   : > { %20619 = vmatpush3.bf16.msra.mxu0 %v15138_v6  ;;  %v9908_v19 = vcombine.low %v9900_v20, %v9907_v44  ;;  %v10925_v33 = vrot.slane %v19865_v22, %v21007_v9  ;;  %v9923_v63 = vrot.slane %v9916_v50, %v21007_v9  ;;  %v23310_v38 = vrot.slane %v19842_v41, %v21007_v9  ;;  %v19917_v44 = vld.sshfl [vmem:[%s21017_s15 + $0x20] sm:$0x11 pattern:$0x75316420] }
 0x1f3   : > { %v10932_v57 = vrot.slane %v10904_v3, %v21007_v9  ;;  %v10933_v15 = vcombine.low %v10911_v43, %v10918_v46  ;;  %v23314_v60 = vrot.slane %v10375_v27, %v21007_v9  ;;  %v23317_v13 = vrot.slane %v19843_v25, %v21007_v9 }
 0x1f4   : > { %20562 = vmatprep.mubr.msk.bf16.mxu1 %vm2546_vm1, %v9908_v19  ;;  %v23323_v6 = vcombine.high %v23310_v38, %v23310_v38  ;;  %v19866_v28 = vcombine.high %v23284_v37, %v23292_v39  ;;  %v10951_v35 = vcombine.low %v10367_v29, %v23310_v38  ;;  %v10399_v42 = vcombine.high %v19843_v25, %v19843_v25 }
 0x1f5   : > { %v10934_v1 = vcombine.low %v10925_v33, %v10932_v57  ;;  %v10941_v54 = vrot.slane %v10933_v15, %v21007_v9  ;;  %20563 = vmatmul.mubr.msk.bf16.gmra.mxu1 %vm2546_vm1, %v9923_v63  ;;  %v23333_v16 = vcombine.high %v23314_v60, %v23314_v60  ;;  %v23337_v31 = vcombine.high %v23317_v13, %v23317_v13 }
 0x1f6   : > { %v10952_v10 = vcombine.low %v23314_v60, %v23323_v6  ;;  %v10960_v36 = vrot.slane %v19866_v28, %v21007_v9  ;;  %v10967_v17 = vrot.slane %v10951_v35, %v21007_v9  ;;  %v23344_v32 = vrot.slane %v10399_v42, %v21007_v9 }
 0x1f7   : > { %v10948_v49 = vrot.slane %v10934_v1, %v21007_v9  ;;  %v10953_v53 = vcombine.low %v23333_v16, %v23317_v13  ;;  %v10429_v14 = vrot.slane %v19844_v11, %v21007_v9  ;;  %v10437_v51 = vcombine.high %v19845_v55, %v19845_v55 }
 0x1f8   : > { %v10974_v61 = vrot.slane %v10952_v10, %v21007_v9  ;;  %v10982_v58 = vcombine.low %v10960_v36, %v10967_v17  ;;  %v23353_v41 = vcombine.high %v23344_v32, %v23344_v32  ;;  %v23356_v56 = vrot.slane %v19845_v55, %v21007_v9 }
 0x1f9   : > { %v10949_v45 = vcombine.low %v10941_v54, %v10948_v49  ;;  %v10981_v47 = vrot.slane %v10953_v53, %v21007_v9  ;;  %v23360_v18 = vrot.slane %v10437_v51, %v21007_v9  ;;  %v10999_v48 = vcombine.low %v23344_v32, %v23337_v31 }
 0x1fa   : > { %v10990_v2 = vrot.slane %v10982_v58, %v21007_v9  ;;  %v11000_v20 = vcombine.low %v23353_v41, %v10429_v14  ;;  %v11629_v22 = vcombine.high %v23167_v52, %v23167_v52  ;;  %v11630_v43 = vcombine.high %v23173_v24, %v23173_v24 }
 0x1fb   : > { %20572 = vmatprep.mubr.msk.bf16.mxu0 %vm2546_vm1, %v10949_v45  ;;  %v10983_v50 = vcombine.low %v10974_v61, %v10981_v47  ;;  %v11001_v25 = vcombine.low %v23356_v56, %v23360_v18  ;;  %v19867_v3 = vcombine.high %v23356_v56, %v23360_v18  ;;  %v11009_v46 = vrot.slane %v10999_v48, %v21007_v9 }
 0x1fc   : > { %v11016_v29 = vrot.slane %v11000_v20, %v21007_v9  ;;  %v11653_v27 = vcombine.high %v23170_v30, %v23170_v30  ;;  %v11654_v19 = vcombine.high %v23176_v40, %v23176_v40  ;;  %v11662_v33 = vcombine.high %v19917_v44, %v19917_v44 }
 0x1fd   : > { %v10997_v63 = vrot.slane %v10983_v50, %v21007_v9  ;;  %v11023_v57 = vrot.slane %v11001_v25, %v21007_v9  ;;  %v11030_v15 = vrot.slane %v19867_v3, %v21007_v9  ;;  %v11669_v55 = vrot.slane %v19917_v44, %v21007_v9  ;;  %v19846_v44 = vld.sshfl [vmem:[%s21017_s15 + $0x4c] sm:$0x33 pattern:$0x75316420] }
 0x1fe   : > { %v11031_v28 = vcombine.low %v11009_v46, %v11016_v29  ;;  %v11676_v35 = vrot.slane %v11662_v33, %v21007_v9  ;;  %v12308_v11 = vshrl.u32 %v23167_v52, 16  ;;  %v12313_v42 = vshll.u32 %v23173_v24, 16 }
 0x1ff   : > { %v10998_v1 = vcombine.low %v10990_v2, %v10997_v63  ;;  %v11032_v54 = vcombine.low %v11023_v57, %v11030_v15  ;;  %v12316_v10 = vshrl.u32 %v23173_v24, 16  ;;  %v12321_v36 = vshll.u32 %v11629_v22, 16  ;;  %v19848_v57 = vld.sshfl [vmem:[%s21017_s15 + $0x54] sm:$0x33 pattern:$0x75316420] }
 0x200   : > { %v11039_v17 = vrot.slane %v11031_v28, %v21007_v9  ;;  %v12315_v49 = vsel %vm21048_vm15, %v12308_v11, %v12313_v42  ;;  %v12324_v53 = vshrl.u32 %v11629_v22, 16  ;;  %v12329_v14 = vshll.u32 %v11630_v43, 16 }
 0x201   : > { %20573 = vmatmul.mubr.msk.bf16.gmra.mxu0 %vm2546_vm1, %v10998_v1  ;;  %v11046_v52 = vrot.slane %v11032_v54, %v21007_v9  ;;  %v12323_v51 = vsel %vm21048_vm15, %v12316_v10, %v12321_v36  ;;  %v12332_v61 = vshrl.u32 %v11630_v43, 16  ;;  %v12337_v58 = vshll.u32 %v23170_v30, 16  ;;  %v19847_v43 = vld.sshfl [vmem:[%s21017_s15 + $0x50] sm:$0x1 pattern:$0x75316420] }
 0x202   : > { %v12331_v24 = vsel %vm21048_vm15, %v12324_v53, %v12329_v14  ;;  %v12340_v45 = vshrl.u32 %v23170_v30, 16  ;;  %v12345_v47 = vshll.u32 %v23176_v40, 16  ;;  %v12348_v48 = vshrl.u32 %v23176_v40, 16 }
 0x203   : > { %v11047_v2 = vcombine.low %v11039_v17, %v11046_v52  ;;  %v12339_v20 = vsel %vm21048_vm15, %v12332_v61, %v12337_v58  ;;  %v12353_v22 = vshll.u32 %v11653_v27, 16  ;;  %v12356_v50 = vshrl.u32 %v11653_v27, 16 }
 0x204   : > { %v12347_v25 = vsel %vm21048_vm15, %v12340_v45, %v12345_v47  ;;  %v12361_v3 = vshll.u32 %v11654_v19, 16  ;;  %v12364_v46 = vshrl.u32 %v11654_v19, 16  ;;  %v12369_v29 = vshll.u32 %v11669_v55, 16 }
 0x205   : > { %20576 = vmatprep.mubr.msk.bf16.mxu0 %vm2546_vm1, %v11047_v2  ;;  %v12355_v30 = vsel %vm21048_vm15, %v12348_v48, %v12353_v22  ;;  %v12372_v40 = vshrl.u32 %v11669_v55, 16  ;;  %v12377_v33 = vshll.u32 %v11676_v35, 16  ;;  %v13038_v63 = vcombine.low %v12315_v49, %v12323_v51 }
 0x206   : > { %v12363_v15 = vsel %vm21048_vm15, %v12356_v50, %v12361_v3  ;;  %v12371_v27 = vsel %vm21048_vm15, %v12364_v46, %v12369_v29  ;;  %v13039_v28 = vcombine.low %v12331_v24, %v12339_v20  ;;  %v13040_v11 = vcombine.low %v12347_v25, %v12355_v30 }
 0x207   : > { %v13041_v42 = vcombine.low %v12363_v15, %v12371_v27  ;;  %v13048_v19 = vrot.slane %v13038_v63, %v21007_v9  ;;  %v10461_v1 = vcombine.high %v19846_v44, %v19846_v44  ;;  %v23419_v54 = vrot.slane %v19846_v44, %v21007_v9 }
 0x208   : > { %v13055_v55 = vrot.slane %v13039_v28, %v21007_v9  ;;  %v13062_v35 = vrot.slane %v13040_v11, %v21007_v9  ;;  %v10491_v10 = vrot.slane %v19847_v43, %v21007_v9  ;;  %v10499_v36 = vcombine.high %v19848_v57, %v19848_v57 }
 0x209   : > { %v13069_v17 = vrot.slane %v13041_v42, %v21007_v9  ;;  %v23426_v49 = vrot.slane %v10461_v1, %v21007_v9  ;;  %v23429_v53 = vrot.slane %v19848_v57, %v21007_v9  ;;  %v12379_v14 = vsel %vm21048_vm15, %v12372_v40, %v12377_v33 }
 0x20a   : > { %v13070_v52 = vcombine.low %v13048_v19, %v13055_v55  ;;  %v23434_v51 = vrot.slane %v10499_v36, %v21007_v9  ;;  %v12381_v61 = vshrl.u32 %v23210_v59, 16  ;;  %v12386_v58 = vshll.u32 %v23215_v62, 16  ;;  %v19849_v19 = vld.sshfl [vmem:[%s21017_s15 + $0x58] sm:$0x33 pattern:$0x75316420] }
 0x20b   : > { %v13071_v24 = vcombine.low %v13062_v35, %v13069_v17  ;;  %v23440_v45 = vcombine.high %v23429_v53, %v23429_v53  ;;  %v11048_v47 = vcombine.low %v23419_v54, %v23426_v49  ;;  %v19868_v48 = vcombine.high %v23419_v54, %v23426_v49 }
 0x20c   : > { %v13078_v44 = vrot.slane %v13070_v52, %v21007_v9  ;;  %v11050_v2 = vcombine.low %v10491_v10, %v23429_v53  ;;  %v12388_v59 = vsel %vm21048_vm15, %v12381_v61, %v12386_v58  ;;  %v12389_v20 = vshrl.u32 %v23215_v62, 16  ;;  %v19850_v61 = vld.sshfl [vmem:[%s21017_s15 + $0x5c] sm:$0x1 pattern:$0x75316420] }
 0x20d   : > { %v13085_v22 = vrot.slane %v13071_v24, %v21007_v9  ;;  %v11051_v50 = vcombine.low %v23434_v51, %v23440_v45  ;;  %v11058_v43 = vrot.slane %v11048_v47, %v21007_v9  ;;  %v11065_v25 = vrot.slane %v19868_v48, %v21007_v9  ;;  %v19851_v47 = vld.sshfl [vmem:[%s21017_s15 + $0x60] sm:$0x33 pattern:$0x75316420] }
 0x20e   : > { %v11072_v3 = vrot.slane %v11050_v2, %v21007_v9  ;;  %v12394_v46 = vshll.u32 %v23224_v7, 16  ;;  %v12397_v29 = vshrl.u32 %v23224_v7, 16  ;;  %v12402_v30 = vshll.u32 %v23232_v21, 16 }
 0x20f   : > { %v13086_v40 = vcombine.low %v13078_v44, %v13085_v22  ;;  %v11079_v62 = vrot.slane %v11051_v50, %v21007_v9  ;;  %v11080_v33 = vcombine.low %v11058_v43, %v11065_v25  ;;  %v12405_v63 = vshrl.u32 %v23232_v21, 16 }
 0x210   : > { %v12396_v57 = vsel %vm21048_vm15, %v12389_v20, %v12394_v46  ;;  %v12404_v15 = vsel %vm21048_vm15, %v12397_v29, %v12402_v30  ;;  %v12410_v27 = vshll.u32 %v23218_v0, 16  ;;  %v12413_v28 = vshrl.u32 %v23218_v0, 16 }
 0x211   : > { %20594 = vmatprep.mubr.msk.bf16.mxu1 %vm2546_vm1, %v13086_v40  ;;  %v11081_v7 = vcombine.low %v11072_v3, %v11079_v62  ;;  %v11088_v11 = vrot.slane %v11080_v33, %v21007_v9  ;;  %v12418_v42 = vshll.u32 %v23227_v4, 16  ;;  %v12421_v21 = vshrl.u32 %v23227_v4, 16 }
 0x212   : > { %v12412_v1 = vsel %vm21048_vm15, %v12405_v63, %v12410_v27  ;;  %v12426_v55 = vshll.u32 %v23236_v12, 16  ;;  %v12429_v35 = vshrl.u32 %v23236_v12, 16  ;;  %v12434_v0 = vshll.u32 %v23264_v8, 16 }
 0x213   : > { %v11095_v10 = vrot.slane %v11081_v7, %v21007_v9  ;;  %v12420_v36 = vsel %vm21048_vm15, %v12413_v28, %v12418_v42  ;;  %v13087_v17 = vcombine.low %v12379_v14, %v12388_v59  ;;  %v13088_v52 = vcombine.low %v12396_v57, %v12404_v15  ;;  %v19920_v59 = vld.sshfl [vmem:[%s21017_s15 + $0x2c] sm:$0x11 pattern:$0x75316420] }
 0x214   : > { %v12428_v4 = vsel %vm21048_vm15, %v12421_v21, %v12426_v55  ;;  %v12436_v58 = vsel %vm21048_vm15, %v12429_v35, %v12434_v0  ;;  %v13089_v24 = vcombine.low %v12412_v1, %v12420_v36  ;;  %v23489_v12 = vcombine.high %v23434_v51, %v23434_v51 }
 0x215   : > { %v11096_v48 = vcombine.low %v11088_v11, %v11095_v10  ;;  %v13090_v44 = vcombine.low %v12428_v4, %v12436_v58  ;;  %v13097_v2 = vrot.slane %v13087_v17, %v21007_v9  ;;  %v13104_v14 = vrot.slane %v13088_v52, %v21007_v9 }
 0x216   : > { %v13111_v20 = vrot.slane %v13089_v24, %v21007_v9  ;;  %v10523_v22 = vcombine.high %v19849_v19, %v19849_v19  ;;  %v23496_v50 = vrot.slane %v19849_v19, %v21007_v9  ;;  %v10553_v43 = vrot.slane %v19850_v61, %v21007_v9 }
 0x217   : > { %20577 = vmatmul.mubr.msk.bf16.gmra.mxu0 %vm2546_vm1, %v11096_v48  ;;  %v13118_v25 = vrot.slane %v13090_v44, %v21007_v9  ;;  %v13119_v3 = vcombine.low %v13097_v2, %v13104_v14  ;;  %v10561_v46 = vcombine.high %v19851_v47, %v19851_v47  ;;  %v23502_v29 = vrot.slane %v19851_v47, %v21007_v9 }
 0x218   : > { %v23505_v30 = vrot.slane %v10523_v22, %v21007_v9  ;;  %v23509_v40 = vcombine.high %v23496_v50, %v23496_v50  ;;  %v11097_v62 = vcombine.low %v23489_v12, %v23496_v50  ;;  %v11732_v33 = vcombine.high %v19920_v59, %v19920_v59 }
 0x219   : > { %v13120_v63 = vcombine.low %v13111_v20, %v13118_v25  ;;  %v13127_v57 = vrot.slane %v13119_v3, %v21007_v9  ;;  %v23515_v15 = vrot.slane %v10561_v46, %v21007_v9  ;;  %v11739_v27 = vrot.slane %v19920_v59, %v21007_v9 }
 0x21a   : > { %v23520_v28 = vcombine.high %v23505_v30, %v23505_v30  ;;  %v11098_v7 = vcombine.low %v23505_v30, %v23509_v40  ;;  %v11107_v11 = vrot.slane %v11097_v62, %v21007_v9  ;;  %v11746_v42 = vrot.slane %v11732_v33, %v21007_v9  ;;  %v19852_v62 = vld.sshfl [vmem:[%s21017_s15 + $0x64] sm:$0x33 pattern:$0x75316420] }
 0x21b   : > { %v13134_v21 = vrot.slane %v13120_v63, %v21007_v9  ;;  %v11100_v19 = vcombine.low %v23502_v29, %v23515_v15  ;;  %v11769_v1 = vcombine.high %v23276_v23, %v23276_v23  ;;  %v11770_v55 = vcombine.high %v23280_v34, %v23280_v34 }
 0x21c   : > { %v11099_v35 = vcombine.low %v23520_v28, %v10553_v43  ;;  %v11114_v0 = vrot.slane %v11098_v7, %v21007_v9  ;;  %v23537_v10 = vcombine.high %v23284_v37, %v23284_v37  ;;  %v12437_v36 = vshrl.u32 %v23264_v8, 16 }
 0x21d   : > { %v13135_v17 = vcombine.low %v13127_v57, %v13134_v21  ;;  %v11128_v52 = vrot.slane %v11100_v19, %v21007_v9  ;;  %v12442_v61 = vshll.u32 %v11739_v27, 16  ;;  %v12445_v4 = vshrl.u32 %v11739_v27, 16  ;;  %v19853_v21 = vld.sshfl [vmem:[%s21017_s15 + $0x68] sm:$0x1 pattern:$0x75316420] }
 0x21e   : > { %v11121_v58 = vrot.slane %v11099_v35, %v21007_v9  ;;  %v11129_v24 = vcombine.low %v11107_v11, %v11114_v0  ;;  %v12450_v47 = vshll.u32 %v11746_v42, 16  ;;  %v12454_v48 = vshrl.u32 %v23276_v23, 16  ;;  %v23570_v35 = vld.sshfl [vmem:[%s21017_s15 + $0x6c] sm:$0x33 pattern:$0x75316420] }
 0x21f   : > { %20595 = vmatmul.mubr.msk.bf16.vlgmr.msra.gmra.mxu1 %vm2546_vm1, %v13135_v17  ;;  %v12444_v44 = vsel %vm21048_vm15, %v12437_v36, %v12442_v61  ;;  %v12459_v2 = vshll.u32 %v23280_v34, 16  ;;  %v12462_v8 = vshrl.u32 %v23280_v34, 16  ;;  %v12467_v14 = vshll.u32 %v11769_v1, 16 }
 0x220   : > { %v11130_v59 = vcombine.low %v11121_v58, %v11128_v52  ;;  %v11137_v20 = vrot.slane %v11129_v24, %v21007_v9  ;;  %v12452_v22 = vsel %vm21048_vm15, %v12445_v4, %v12450_v47  ;;  %v12470_v43 = vshrl.u32 %v11769_v1, 16  ;;  %v19923_v61 = vld.sshfl [vmem:[%s21017_s15 + $0x38] sm:$0x11 pattern:$0x75316420] }
 0x221   : > { %v12461_v23 = vsel %vm21048_vm15, %v12454_v48, %v12459_v2  ;;  %v12469_v25 = vsel %vm21048_vm15, %v12462_v8, %v12467_v14  ;;  %v12475_v3 = vshll.u32 %v11770_v55, 16  ;;  %v12478_v46 = vshrl.u32 %v11770_v55, 16 }
 0x222   : > { %v11144_v34 = vrot.slane %v11130_v59, %v21007_v9  ;;  %v12483_v33 = vshll.u32 %v23284_v37, 16  ;;  %v12486_v63 = vshrl.u32 %v23284_v37, 16  ;;  %v12491_v57 = vshll.u32 %v23292_v39, 16 }
 0x223   : > { %v12477_v27 = vsel %vm21048_vm15, %v12470_v43, %v12475_v3  ;;  %v12494_v7 = vshrl.u32 %v23292_v39, 16  ;;  %v12499_v11 = vshll.u32 %v23537_v10, 16  ;;  %v13136_v42 = vcombine.low %v12444_v44, %v12452_v22 }
 0x224   : > { %v11145_v19 = vcombine.low %v11137_v20, %v11144_v34  ;;  %v12485_v1 = vsel %vm21048_vm15, %v12478_v46, %v12483_v33  ;;  %v12493_v55 = vsel %vm21048_vm15, %v12486_v63, %v12491_v57  ;;  %v13137_v37 = vcombine.low %v12461_v23, %v12469_v25 }
 0x225   : > { %v12501_v0 = vsel %vm21048_vm15, %v12494_v7, %v12499_v11  ;;  %v13138_v36 = vcombine.low %v12477_v27, %v12485_v1  ;;  %v13146_v17 = vrot.slane %v13136_v42, %v21007_v9  ;;  %v10585_v52 = vcombine.high %v19852_v62, %v19852_v62 }
 0x226   : > { %20580 = vmatprep.mubr.msk.bf16.mxu0 %vm2546_vm1, %v11145_v19  ;;  %v13139_v4 = vcombine.low %v12493_v55, %v12501_v0  ;;  %v13153_v58 = vrot.slane %v13137_v37, %v21007_v9  ;;  %v23579_v24 = vrot.slane %v19852_v62, %v21007_v9  ;;  %v10615_v47 = vrot.slane %v19853_v21, %v21007_v9 }
 0x227   : > { %v13160_v48 = vrot.slane %v13138_v36, %v21007_v9  ;;  %v23584_v44 = vrot.slane %v10585_v52, %v21007_v9  ;;  %v23588_v2 = vrot.slane %v23570_v35, %v21007_v9  ;;  %v19869_v8 = vcombine.high %v23502_v29, %v23515_v15 }
 0x228   : > { %v13167_v14 = vrot.slane %v13139_v4, %v21007_v9  ;;  %v13168_v59 = vcombine.low %v13146_v17, %v13153_v58  ;;  %v11794_v20 = vcombine.high %v23292_v39, %v23292_v39  ;;  %v11802_v22 = vcombine.high %v19923_v61, %v19923_v61 }
 0x229   : > { %v11147_v43 = vcombine.low %v23579_v24, %v23584_v44  ;;  %v19870_v23 = vcombine.high %v23579_v24, %v23584_v44  ;;  %v11149_v25 = vcombine.low %v10615_v47, %v23588_v2  ;;  %v11156_v3 = vrot.slane %v19869_v8, %v21007_v9  ;;  %v23619_v47 = vpop.f32.mrf.mxu0 }
 0x22a   : > { %v13169_v46 = vcombine.low %v13160_v48, %v13167_v14  ;;  %v13176_v62 = vrot.slane %v13168_v59, %v21007_v9  ;;  %v11809_v34 = vrot.slane %v19923_v61, %v21007_v9  ;;  %v11816_v33 = vrot.slane %v11802_v22, %v21007_v9  ;;  %v23621_v48 = vpop.f32.mrf.mxu1 }
 0x22b   : > { %v11163_v39 = vrot.slane %v11147_v43, %v21007_v9  ;;  %v11170_v63 = vrot.slane %v19870_v23, %v21007_v9  ;;  %v11177_v57 = vrot.slane %v11149_v25, %v21007_v9  ;;  %v12502_v27 = vshrl.u32 %v23537_v10, 16  ;;  %26870 = vst [vmem:[#allocation3_spill] sm:$0xff] %v23621_v48  ;;  %v19855_v25 = vld.sshfl [vmem:[%s21017_s15 + $0x70] sm:$0x33 pattern:$0x75316420] }
 0x22c   : > { %v13183_v7 = vrot.slane %v13169_v46, %v21007_v9  ;;  %v12507_v11 = vshll.u32 %v11794_v20, 16  ;;  %v12510_v42 = vshrl.u32 %v11794_v20, 16  ;;  %v12515_v21 = vshll.u32 %v11809_v34, 16 }
 0x22d   : > { %v11178_v19 = vcombine.low %v11156_v3, %v11163_v39  ;;  %v11179_v1 = vcombine.low %v11170_v63, %v11177_v57  ;;  %v12518_v55 = vshrl.u32 %v11809_v34, 16  ;;  %v12523_v37 = vshll.u32 %v11816_v33, 16  ;;  %v19856_v39 = vld.sshfl [vmem:[%s21017_s15 + $0x74] sm:$0x1 pattern:$0x75316420]  ;;  %v23643_v63 = vpop.f32.mrf.mxu0  ;;  %v23645_v57 = vpop.f32.mrf.mxu1 }
 0x22e   : > { %v13184_v0 = vcombine.low %v13176_v62, %v13183_v7  ;;  %v12509_v36 = vsel %vm21048_vm15, %v12502_v27, %v12507_v11  ;;  %v12517_v17 = vsel %vm21048_vm15, %v12510_v42, %v12515_v21  ;;  %v12527_v52 = vshrl.u32 %v23310_v38, 16  ;;  %26871 = vst [vmem:[#allocation4_spill] sm:$0xff] %v23645_v57  ;;  %v19926_v42 = vld.sshfl [vmem:[%s21017_s15 + $0x44] sm:$0x11 pattern:$0x75316420] }
 0x22f   : > { %v11186_v10 = vrot.slane %v11178_v19, %v21007_v9  ;;  %v11193_v61 = vrot.slane %v11179_v1, %v21007_v9  ;;  %v12525_v4 = vsel %vm21048_vm15, %v12518_v55, %v12523_v37  ;;  %v12532_v58 = vshll.u32 %v23314_v60, 16  ;;  %v23659_v37 = vpop.f32.mrf.mxu0 }
 0x230   : > { %20598 = vmatprep.mubr.msk.bf16.mxu1 %vm2546_vm1, %v13184_v0  ;;  %v12535_v8 = vshrl.u32 %v23314_v60, 16  ;;  %v12540_v38 = vshll.u32 %v23323_v6, 16  ;;  %v12543_v14 = vshrl.u32 %v23323_v6, 16  ;;  %v12548_v59 = vshll.u32 %v23333_v16, 16  ;;  %v20435_v0 = vpop.f32.mrf.mxu1 }
 0x231   : > { %v11194_v20 = vcombine.low %v11186_v10, %v11193_v61  ;;  %v12534_v22 = vsel %vm21048_vm15, %v12527_v52, %v12532_v58  ;;  %v12551_v43 = vshrl.u32 %v23333_v16, 16  ;;  %v12556_v23 = vshll.u32 %v23317_v13, 16 }
 0x232   : > { %v12542_v3 = vsel %vm21048_vm15, %v12535_v8, %v12540_v38  ;;  %v12550_v60 = vsel %vm21048_vm15, %v12543_v14, %v12548_v59  ;;  %v12559_v6 = vshrl.u32 %v23317_v13, 16  ;;  %v12564_v46 = vshll.u32 %v23344_v32, 16  ;;  %v23673_v8 = vpop.f32.mrf.mxu0  ;;  %v23675_v38 = vpop.f32.mrf.mxu1 }
 0x233   : > { %20581 = vmatmul.mubr.msk.bf16.gmra.mxu0 %vm2546_vm1, %v11194_v20  ;;  %v12558_v62 = vsel %vm21048_vm15, %v12551_v43, %v12556_v23  ;;  %v13185_v16 = vcombine.low %v12509_v36, %v12517_v17  ;;  %v13186_v34 = vcombine.low %v12525_v4, %v12534_v22  ;;  %v13187_v33 = vcombine.low %v12542_v3, %v12550_v60 }
 0x234   : > { %v12566_v27 = vsel %vm21048_vm15, %v12559_v6, %v12564_v46  ;;  %v10623_v13 = vcombine.high %v23570_v35, %v23570_v35  ;;  %v23653_v7 = vcombine.high %v23588_v2, %v23588_v2  ;;  %v10647_v11 = vcombine.high %v19855_v25, %v19855_v25  ;;  %26872 = vst [vmem:[#allocation5_spill] sm:$0xff] %v23675_v38 }
 0x235   : > { %v13188_v21 = vcombine.low %v12558_v62, %v12566_v27  ;;  %v13195_v19 = vrot.slane %v13185_v16, %v21007_v9  ;;  %v13202_v1 = vrot.slane %v13186_v34, %v21007_v9  ;;  %v13209_v55 = vrot.slane %v13187_v33, %v21007_v9  ;;  %v23701_v16 = vpop.f32.mrf.mxu0  ;;  %v23703_v34 = vpop.f32.mrf.mxu1 }
 0x236   : > { %v23662_v36 = vrot.slane %v10623_v13, %v21007_v9  ;;  %v23665_v35 = vrot.slane %v19855_v25, %v21007_v9  ;;  %v23668_v17 = vrot.slane %v10647_v11, %v21007_v9  ;;  %v10677_v52 = vrot.slane %v19856_v39, %v21007_v9 }
 0x237   : > { %v13216_v10 = vrot.slane %v13188_v21, %v21007_v9  ;;  %v13217_v61 = vcombine.low %v13195_v19, %v13202_v1  ;;  %v11872_v4 = vcombine.high %v19926_v42, %v19926_v42  ;;  %v11879_v58 = vrot.slane %v19926_v42, %v21007_v9  ;;  %v23714_v1 = vpop.f32.mrf.mxu0 }
 0x238   : > { %v23679_v14 = vcombine.high %v23662_v36, %v23662_v36  ;;  %v23683_v59 = vcombine.high %v23665_v35, %v23665_v35  ;;  %v23687_v20 = vcombine.high %v23668_v17, %v23668_v17  ;;  %v11195_v22 = vcombine.low %v23662_v36, %v23653_v7  ;;  %26873 = vst [vmem:[#allocation6_spill] sm:$0xff] %v23714_v1 }
 0x239   : > { %v13218_v43 = vcombine.low %v13209_v55, %v13216_v10  ;;  %v13225_v23 = vrot.slane %v13217_v61, %v21007_v9  ;;  %v11886_v25 = vrot.slane %v11872_v4, %v21007_v9  ;;  %v11909_v3 = vcombine.high %v23356_v56, %v23356_v56  ;;  %v23716_v55 = vpop.f32.mrf.mxu1 }
 0x23a   : > { %v11196_v60 = vcombine.low %v23679_v14, %v23665_v35  ;;  %v11197_v6 = vcombine.low %v23668_v17, %v23683_v59  ;;  %v11198_v46 = vcombine.low %v23687_v20, %v10677_v52  ;;  %v11205_v62 = vrot.slane %v11195_v22, %v21007_v9 }
 0x23b   : > { %v13232_v33 = vrot.slane %v13218_v43, %v21007_v9  ;;  %v11910_v39 = vcombine.high %v23360_v18, %v23360_v18  ;;  %v12567_v27 = vshrl.u32 %v23344_v32, 16  ;;  %v12572_v13 = vshll.u32 %v23337_v31, 16 }
 0x23c   : > { %v11212_v11 = vrot.slane %v11196_v60, %v21007_v9  ;;  %v11219_v42 = vrot.slane %v11197_v6, %v21007_v9  ;;  %v11226_v21 = vrot.slane %v11198_v46, %v21007_v9  ;;  %v12575_v19 = vshrl.u32 %v23337_v31, 16  ;;  %v23722_v60 = vpop.f32.mrf.mxu0  ;;  %v23724_v31 = vpop.f32.mrf.mxu1 }
 0x23d   : > { %v13233_v0 = vcombine.low %v13225_v23, %v13232_v33  ;;  %v12574_v52 = vsel %vm21048_vm15, %v12567_v27, %v12572_v13  ;;  %v12580_v32 = vshll.u32 %v23353_v41, 16  ;;  %v12583_v10 = vshrl.u32 %v23353_v41, 16  ;;  %26874 = vst [vmem:[#allocation7_spill] sm:$0xff] %v23722_v60 }
 0x23e   : > { %v11227_v61 = vcombine.low %v11205_v62, %v11212_v11  ;;  %v11228_v4 = vcombine.low %v11219_v42, %v11226_v21  ;;  %v12588_v22 = vshll.u32 %v11879_v58, 16  ;;  %v12591_v43 = vshrl.u32 %v11879_v58, 16  ;;  %v19857_v13 = vld.sshfl [vmem:[%s21017_s15 + $0x78] sm:$0x33 pattern:$0x75316420] }
 0x23f   : > { %20599 = vmatmul.mubr.msk.bf16.gmra.mxu1 %vm2546_vm1, %v13233_v0  ;;  %v12582_v23 = vsel %vm21048_vm15, %v12575_v19, %v12580_v32  ;;  %v12596_v6 = vshll.u32 %v11886_v25, 16  ;;  %v12600_v46 = vshrl.u32 %v23356_v56, 16  ;;  %v12605_v33 = vshll.u32 %v23360_v18, 16 }
 0x240   : > { %v11235_v41 = vrot.slane %v11227_v61, %v21007_v9  ;;  %v11242_v62 = vrot.slane %v11228_v4, %v21007_v9  ;;  %v12590_v58 = vsel %vm21048_vm15, %v12583_v10, %v12588_v22  ;;  %v12608_v27 = vshrl.u32 %v23360_v18, 16  ;;  %v23742_v61 = vpop.f32.mrf.mxu0  ;;  %v23744_v10 = vpop.f32.mrf.mxu1 }
 0x241   : > { %v12598_v11 = vsel %vm21048_vm15, %v12591_v43, %v12596_v6  ;;  %v12607_v25 = vsel %vm21048_vm15, %v12600_v46, %v12605_v33  ;;  %v12613_v56 = vshll.u32 %v11909_v3, 16  ;;  %v12616_v42 = vshrl.u32 %v11909_v3, 16  ;;  %26875 = vst [vmem:[#allocation8_spill] sm:$0xff] %v23742_v61 }
 0x242   : > { %v11243_v21 = vcombine.low %v11235_v41, %v11242_v62  ;;  %v12621_v19 = vshll.u32 %v11910_v39, 16  ;;  %v12624_v0 = vshrl.u32 %v11910_v39, 16  ;;  %v12629_v32 = vshll.u32 %v23419_v54, 16 }
 0x243   : > { %v12615_v18 = vsel %vm21048_vm15, %v12608_v27, %v12613_v56  ;;  %v13234_v4 = vcombine.low %v12574_v52, %v12582_v23  ;;  %v13235_v22 = vcombine.low %v12590_v58, %v12598_v11  ;;  %v19858_v43 = vld.sshfl [vmem:[%s21017_s15 + $0x7c] sm:$0x33 pattern:$0x75316420]  ;;  %v10685_v6 = vcombine.high %v19857_v13, %v19857_v13 }
 0x244   : > { %20584 = vmatprep.mubr.msk.bf16.mxu0 %vm2546_vm1, %v11243_v21  ;;  %v12623_v3 = vsel %vm21048_vm15, %v12616_v42, %v12621_v19  ;;  %v12631_v39 = vsel %vm21048_vm15, %v12624_v0, %v12629_v32  ;;  %v13236_v46 = vcombine.low %v12607_v25, %v12615_v18  ;;  %v23755_v33 = vrot.slane %v19857_v13, %v21007_v9  ;;  %v19929_v58 = vld.sshfl [vmem:[%s21017_s15 + $0x50] sm:$0x11 pattern:$0x75316420]  ;;  %v23769_v13 = vpop.f32.mrf.mxu0  ;;  %v23771_v42 = vpop.f32.mrf.mxu1 }
 0x245   : > { %v13237_v41 = vcombine.low %v12623_v3, %v12631_v39  ;;  %v13244_v62 = vrot.slane %v13234_v4, %v21007_v9  ;;  %v13251_v52 = vrot.slane %v13235_v22, %v21007_v9  ;;  %v23760_v23 = vrot.slane %v10685_v6, %v21007_v9  ;;  %26876 = vst [vmem:[#allocation9_spill] sm:$0xff] %v23769_v13  ;;  %v19861_v13 = vld.sshfl [vmem:[%s21017_s15 + $0x88] sm:$0x33 pattern:$0x75316420] }
 0x246   : > { %v13258_v27 = vrot.slane %v13236_v46, %v21007_v9  ;;  %v10709_v11 = vcombine.high %v19858_v43, %v19858_v43  ;;  %v23765_v56 = vrot.slane %v19858_v43, %v21007_v9  ;;  %v11933_v25 = vcombine.high %v23419_v54, %v23419_v54 }
 0x247   : > { %v13265_v21 = vrot.slane %v13237_v41, %v21007_v9  ;;  %v13266_v19 = vcombine.low %v13244_v62, %v13251_v52  ;;  %v11244_v0 = vcombine.low %v23755_v33, %v23760_v23  ;;  %v19871_v32 = vcombine.high %v23755_v33, %v23760_v23 }
 0x248   : > { %v23779_v18 = vrot.slane %v10709_v11, %v21007_v9  ;;  %v11934_v4 = vcombine.high %v23426_v49, %v23426_v49  ;;  %v11942_v22 = vcombine.high %v19929_v58, %v19929_v58  ;;  %v23784_v43 = vrot.slane %v19929_v58, %v21007_v9  ;;  %v23797_v58 = vpop.f32.mrf.mxu0 }
 0x249   : > { %v13267_v6 = vcombine.low %v13258_v27, %v13265_v21  ;;  %v13274_v3 = vrot.slane %v13266_v19, %v21007_v9  ;;  %v11254_v39 = vrot.slane %v11244_v0, %v21007_v9  ;;  %v11261_v46 = vrot.slane %v19871_v32, %v21007_v9  ;;  %26877 = vst [vmem:[#allocation10_spill] sm:$0xff] %v23797_v58  ;;  %v23799_v27 = vpop.f32.mrf.mxu1 }
 0x24a   : > { %v11246_v41 = vcombine.low %v23765_v56, %v23779_v18  ;;  %v19872_v62 = vcombine.high %v23765_v56, %v23779_v18  ;;  %v23794_v52 = vrot.slane %v11942_v22, %v21007_v9  ;;  %v12632_v11 = vshrl.u32 %v23419_v54, 16  ;;  %26878 = vst [vmem:[#allocation11_spill] sm:$0xff] %v23799_v27  ;;  %v23806_v57 = vpop.f32.mrf.mxu0 }
 0x24b   : > { %v13281_v21 = vrot.slane %v13267_v6, %v21007_v9  ;;  %v11276_v19 = vcombine.low %v11254_v39, %v11261_v46  ;;  %v12637_v0 = vshll.u32 %v23426_v49, 16  ;;  %v12640_v32 = vshrl.u32 %v23426_v49, 16  ;;  %26879 = vst [vmem:[#allocation12_spill] sm:$0xff] %v23806_v57  ;;  %v23808_v54 = vpop.f32.mrf.mxu1 }
 0x24c   : > { %v11268_v5 = vrot.slane %v11246_v41, %v21007_v9  ;;  %v11275_v38 = vrot.slane %v19872_v62, %v21007_v9  ;;  %v12645_v61 = vshll.u32 %v11933_v25, 16  ;;  %v12648_v22 = vshrl.u32 %v11933_v25, 16  ;;  %26880 = vst [vmem:[#allocation13_spill] sm:$0xff] %v23808_v54  ;;  %v23816_v62 = vpop.f32.mrf.mxu0 }
 0x24d   : > { %v13282_v48 = vcombine.low %v13274_v3, %v13281_v21  ;;  %v11284_v58 = vrot.slane %v11276_v19, %v21007_v9  ;;  %v12639_v6 = vsel %vm21048_vm15, %v12632_v11, %v12637_v0  ;;  %v12653_v39 = vshll.u32 %v11934_v4, 16  ;;  %26881 = vst [vmem:[#allocation14_spill] sm:$0xff] %v23816_v62  ;;  %v23818_v57 = vpop.f32.mrf.mxu1  ;;  %v19860_v21 = vld.sshfl [vmem:[%s21017_s15 + $0x84] sm:$0x33 pattern:$0x75316420] }
 0x24e   : > { %v11277_v46 = vcombine.low %v11268_v5, %v11275_v38  ;;  %v12647_v49 = vsel %vm21048_vm15, %v12640_v32, %v12645_v61  ;;  %v12656_v41 = vshrl.u32 %v11934_v4, 16  ;;  %v12661_v25 = vshll.u32 %v23784_v43, 16  ;;  %26882 = vst [vmem:[#allocation15_spill] sm:$0xff] %v23818_v57  ;;  %v23833_v32 = vpop.f32.mrf.mxu0 }
 0x24f   : > { %20602 = vmatprep.mubr.msk.bf16.mxu1 %vm2546_vm1, %v13282_v48  ;;  %v12655_v3 = vsel %vm21048_vm15, %v12648_v22, %v12653_v39  ;;  %v12664_v11 = vshrl.u32 %v23784_v43, 16  ;;  %v12669_v5 = vshll.u32 %v23794_v52, 16  ;;  %v12673_v38 = vshrl.u32 %v23429_v53, 16  ;;  %26883 = vst [vmem:[#allocation16_spill] sm:$0xff] %v23833_v32  ;;  %v23835_v22 = vpop.f32.mrf.mxu1 }
 0x250   : > { %v11291_v61 = vrot.slane %v11277_v46, %v21007_v9  ;;  %v12663_v4 = vsel %vm21048_vm15, %v12656_v41, %v12661_v25  ;;  %v12678_v19 = vshll.u32 %v23434_v51, 16  ;;  %v12681_v48 = vshrl.u32 %v23434_v51, 16  ;;  %v19859_v0 = vld.sshfl [vmem:[%s21017_s15 + $0x80] sm:$0x1 pattern:$0x75316420] }
 0x251   : > { %26884 = vst [vmem:[#allocation17_spill] sm:$0xff] %v23835_v22  ;;  %v12671_v53 = vsel %vm21048_vm15, %v12664_v11, %v12669_v5  ;;  %v12686_v39 = vshll.u32 %v23440_v45, 16  ;;  %v12689_v46 = vshrl.u32 %v23440_v45, 16  ;;  %v12694_v62 = vshll.u32 %v23489_v12, 16  ;;  %v23851_v45 = vpop.f32.mrf.mxu0  ;;  %v23853_v60 = vpop.f32.mrf.mxu1 }
 0x252   : > { %v11292_v41 = vcombine.low %v11284_v58, %v11291_v61  ;;  %v12680_v25 = vsel %vm21048_vm15, %v12673_v38, %v12678_v19  ;;  %v13283_v51 = vcombine.low %v12639_v6, %v12647_v49  ;;  %v13284_v57 = vcombine.low %v12655_v3, %v12663_v4  ;;  %v19932_v54 = vld.sshfl [vmem:[%s21017_s15 + $0x5c] sm:$0x11 pattern:$0x75316420]  ;;  %26885 = vst [vmem:[#allocation18_spill] sm:$0xff] %v23851_v45 }
 0x253   : > { %v12688_v32 = vsel %vm21048_vm15, %v12681_v48, %v12686_v39  ;;  %v12696_v22 = vsel %vm21048_vm15, %v12689_v46, %v12694_v62  ;;  %v13285_v11 = vcombine.low %v12671_v53, %v12680_v25  ;;  %v10739_v5 = vrot.slane %v19859_v0, %v21007_v9  ;;  %26886 = vst [vmem:[#allocation19_spill] sm:$0xff] %v23853_v60  ;;  %v23865_v19 = vpop.f32.mrf.mxu0  ;;  %v23867_v48 = vpop.f32.mrf.mxu1 }
 0x254   : > { %20585 = vmatmul.mubr.msk.bf16.gmra.mxu0 %vm2546_vm1, %v11292_v41  ;;  %v13286_v58 = vcombine.low %v12688_v32, %v12696_v22  ;;  %v13293_v6 = vrot.slane %v13283_v51, %v21007_v9  ;;  %v13300_v49 = vrot.slane %v13284_v57, %v21007_v9  ;;  %v10747_v3 = vcombine.high %v19860_v21, %v19860_v21 }
 0x255   : > { %v13307_v38 = vrot.slane %v13285_v11, %v21007_v9  ;;  %v23860_v62 = vrot.slane %v19860_v21, %v21007_v9  ;;  %v10771_v61 = vcombine.high %v19861_v13, %v19861_v13  ;;  %v23863_v4 = vrot.slane %v19861_v13, %v21007_v9  ;;  %26887 = vst [vmem:[#allocation20_spill] sm:$0xff] %v23865_v19  ;;  %v23885_v46 = vpop.f32.mrf.mxu0  ;;  %v23887_v41 = vpop.f32.mrf.mxu1 }
 0x256   : > { %26888 = vst [vmem:[#allocation21_spill] sm:$0xff] %v23867_v48  ;;  %v13314_v0 = vrot.slane %v13286_v58, %v21007_v9  ;;  %v13315_v32 = vcombine.low %v13293_v6, %v13300_v49  ;;  %v23871_v22 = vrot.slane %v10747_v3, %v21007_v9  ;;  %v12012_v57 = vcombine.high %v19932_v54, %v19932_v54 }
 0x257   : > { %v23875_v53 = vcombine.high %v23860_v62, %v23860_v62  ;;  %v23878_v21 = vrot.slane %v10771_v61, %v21007_v9  ;;  %v23882_v13 = vcombine.high %v23863_v4, %v23863_v4  ;;  %v11293_v39 = vcombine.low %v10739_v5, %v23860_v62  ;;  %26889 = vst [vmem:[#allocation22_spill] sm:$0xff] %v23885_v46  ;;  %v23907_v61 = vpop.f32.mrf.mxu1 }
 0x258   : > { %26890 = vst [vmem:[#allocation23_spill] sm:$0xff] %v23887_v41  ;;  %v13316_v25 = vcombine.low %v13307_v38, %v13314_v0  ;;  %v13323_v51 = vrot.slane %v13315_v32, %v21007_v9  ;;  %v23892_v11 = vcombine.high %v23871_v22, %v23871_v22  ;;  %v23895_v58 = vrot.slane %v19932_v54, %v21007_v9  ;;  %v23905_v38 = vpop.f32.mrf.mxu0 }
 0x259   : > { %v11294_v6 = vcombine.low %v23871_v22, %v23875_v53  ;;  %v11296_v5 = vcombine.low %v23878_v21, %v23882_v13  ;;  %v11303_v49 = vrot.slane %v11293_v39, %v21007_v9  ;;  %v23903_v3 = vrot.slane %v12012_v57, %v21007_v9  ;;  %26891 = vst [vmem:[#allocation24_spill] sm:$0xff] %v23905_v38 }
 0x25a   : > { %26892 = vst [vmem:[#allocation25_spill] sm:$0xff] %v23907_v61  ;;  %v13330_v0 = vrot.slane %v13316_v25, %v21007_v9  ;;  %v11295_v54 = vcombine.low %v23892_v11, %v23863_v4  ;;  %v23914_v32 = vcombine.high %v23502_v29, %v23502_v29  ;;  %v12697_v46 = vshrl.u32 %v23489_v12, 16  ;;  %v23921_v19 = vpop.f32.mrf.mxu0  ;;  %v23923_v25 = vpop.f32.mrf.mxu1 }
 0x25b   : > { %v11310_v39 = vrot.slane %v11294_v6, %v21007_v9  ;;  %v11324_v57 = vrot.slane %v11296_v5, %v21007_v9  ;;  %v12702_v41 = vshll.u32 %v23496_v50, 16  ;;  %v12705_v38 = vshrl.u32 %v23496_v50, 16  ;;  %26893 = vst [vmem:[#allocation26_spill] sm:$0xff] %v23921_v19  ;;  %26894 = vst [vmem:[#allocation27_spill] sm:$0xff] %v23923_v25 }
 0x25c   : > { %v13331_v45 = vcombine.low %v13323_v51, %v13330_v0  ;;  %v11317_v61 = vrot.slane %v11295_v54, %v21007_v9  ;;  %v12710_v48 = vshll.u32 %v23505_v30, 16  ;;  %v12713_v60 = vshrl.u32 %v23505_v30, 16  ;;  %v23932_v50 = vpop.f32.mrf.mxu0  ;;  %v23934_v19 = vpop.f32.mrf.mxu1 }
 0x25d   : > { %v11325_v12 = vcombine.low %v11303_v49, %v11310_v39  ;;  %v12704_v6 = vsel %vm21048_vm15, %v12697_v46, %v12702_v41  ;;  %v12718_v5 = vshll.u32 %v23509_v40, 16  ;;  %v12721_v27 = vshrl.u32 %v23509_v40, 16  ;;  %26895 = vst [vmem:[#allocation28_spill] sm:$0xff] %v23932_v50  ;;  %26896 = vst [vmem:[#allocation29_spill] sm:$0xff] %v23934_v19 }
 0x25e   : > { %20603 = vmatmul.mubr.msk.bf16.gmra.mxu1 %vm2546_vm1, %v13331_v45  ;;  %v11326_v51 = vcombine.low %v11317_v61, %v11324_v57  ;;  %v12712_v0 = vsel %vm21048_vm15, %v12705_v38, %v12710_v48  ;;  %v12726_v30 = vshll.u32 %v23520_v28, 16  ;;  %v12729_v49 = vshrl.u32 %v23520_v28, 16  ;;  %v23946_v39 = vpop.f32.mrf.mxu0  ;;  %v23948_v45 = vpop.f32.mrf.mxu1  ;;  %v19862_v57 = vld.sshfl [vmem:[%s21017_s15 + $0x8c] sm:$0x1 pattern:$0x75316420] }
 0x25f   : > { %v11333_v46 = vrot.slane %v11325_v12, %v21007_v9  ;;  %v12720_v40 = vsel %vm21048_vm15, %v12713_v60, %v12718_v5  ;;  %v12734_v41 = vshll.u32 %v23895_v58, 16  ;;  %v12737_v54 = vshrl.u32 %v23895_v58, 16  ;;  %26897 = vst [vmem:[#allocation30_spill] sm:$0xff] %v23946_v39  ;;  %26898 = vst [vmem:[#allocation31_spill] sm:$0xff] %v23948_v45 }
 0x260   : > { %v11340_v61 = vrot.slane %v11326_v51, %v21007_v9  ;;  %v12728_v48 = vsel %vm21048_vm15, %v12721_v27, %v12726_v30  ;;  %v12742_v28 = vshll.u32 %v23903_v3, 16  ;;  %v12746_v38 = vshrl.u32 %v23502_v29, 16  ;;  %v23961_v39 = vpop.f32.mrf.mxu1  ;;  %v23963_v51 = vpop.f32.mrf.mxu0 }
 0x261   : > { %v12736_v60 = vsel %vm21048_vm15, %v12729_v49, %v12734_v41  ;;  %v12751_v12 = vshll.u32 %v23515_v15, 16  ;;  %v12754_v5 = vshrl.u32 %v23515_v15, 16  ;;  %v12759_v45 = vshll.u32 %v23914_v32, 16  ;;  %26899 = vst [vmem:[#allocation32_spill] sm:$0xff] %v23961_v39 }
 0x262   : > { %v11341_v27 = vcombine.low %v11333_v46, %v11340_v61  ;;  %v12744_v30 = vsel %vm21048_vm15, %v12737_v54, %v12742_v28  ;;  %v13332_v29 = vcombine.low %v12704_v6, %v12712_v0  ;;  %v13333_v50 = vcombine.low %v12720_v40, %v12728_v48  ;;  %v19935_v39 = vld.sshfl [vmem:[%s21017_s15 + $0x68] sm:$0x11 pattern:$0x75316420]  ;;  %v23976_v1 = vpop.f32.mrf.mxu1  ;;  %v23978_v46 = vpop.f32.mrf.mxu0 }
 0x263   : > { %v12753_v19 = vsel %vm21048_vm15, %v12746_v38, %v12751_v12  ;;  %v12761_v49 = vsel %vm21048_vm15, %v12754_v5, %v12759_v45  ;;  %v13334_v41 = vcombine.low %v12736_v60, %v12744_v30  ;;  %v23973_v25 = vcombine.high %v23878_v21, %v23878_v21 }
 0x264   : > { %20588 = vmatprep.mubr.msk.bf16.mxu0 %vm2546_vm1, %v11341_v27  ;;  %v13335_v6 = vcombine.low %v12753_v19, %v12761_v49  ;;  %v13342_v0 = vrot.slane %v13332_v29, %v21007_v9  ;;  %v13349_v40 = vrot.slane %v13333_v50, %v21007_v9  ;;  %v10801_v54 = vrot.slane %v19862_v57, %v21007_v9  ;;  %v23991_v38 = vpop.f32.mrf.mxu1  ;;  %v23993_v19 = vpop.f32.mrf.mxu0 }
 0x265   : > { %v13356_v45 = vrot.slane %v13334_v41, %v21007_v9  ;;  %v12050_v61 = vcombine.high %v23515_v15, %v23515_v15  ;;  %v12073_v48 = vcombine.high %v23579_v24, %v23579_v24  ;;  %v12074_v28 = vcombine.high %v23584_v44, %v23584_v44  ;;  %26900 = vst [vmem:[#allocation33_spill] sm:$0xff] %v23991_v38  ;;  %v19938_v38 = vld.sshfl [vmem:[%s21017_s15 + $0x74] sm:$0x11 pattern:$0x75316420] }
 0x266   : > { %26901 = vst [vmem:[#allocation34_spill] sm:$0xff] %v23993_v19  ;;  %v13363_v60 = vrot.slane %v13335_v6, %v21007_v9  ;;  %v13364_v50 = vcombine.low %v13342_v0, %v13349_v40  ;;  %v11342_v57 = vcombine.low %v23973_v25, %v10801_v54  ;;  %v12082_v12 = vcombine.high %v19935_v39, %v19935_v39  ;;  %v24001_v29 = vpop.f32.mrf.mxu1  ;;  %v24003_v49 = vpop.f32.mrf.mxu0 }
 0x267   : > { %v23998_v5 = vrot.slane %v19935_v39, %v21007_v9  ;;  %v12762_v15 = vshrl.u32 %v23914_v32, 16  ;;  %v12767_v27 = vshll.u32 %v12050_v61, 16  ;;  %v12770_v30 = vshrl.u32 %v12050_v61, 16  ;;  %26902 = vst [vmem:[#allocation35_spill] sm:$0xff] %v24001_v29  ;;  %26903 = vst [vmem:[#allocation36_spill] sm:$0xff] %v24003_v49 }
 0x268   : > { %v13365_v41 = vcombine.low %v13356_v45, %v13363_v60  ;;  %v13372_v19 = vrot.slane %v13364_v50, %v21007_v9  ;;  %v11349_v6 = vrot.slane %v11342_v57, %v21007_v9  ;;  %v24008_v0 = vrot.slane %v12082_v12, %v21007_v9  ;;  %v24015_v61 = vpop.f32.mrf.mxu1  ;;  %v24017_v29 = vpop.f32.mrf.mxu0 }
 0x269   : > { %v12769_v39 = vsel %vm21048_vm15, %v12762_v15, %v12767_v27  ;;  %v12775_v40 = vshll.u32 %v23579_v24, 16  ;;  %v12778_v32 = vshrl.u32 %v23579_v24, 16  ;;  %v12783_v54 = vshll.u32 %v23584_v44, 16  ;;  %26904 = vst [vmem:[#allocation37_spill] sm:$0xff] %v24015_v61  ;;  %26905 = vst [vmem:[#allocation38_spill] sm:$0xff] %v24017_v29 }
 0x26a   : > { %v13379_v45 = vrot.slane %v13365_v41, %v21007_v9  ;;  %v11356_v60 = vrot.slane %v11349_v6, %v21007_v9  ;;  %v12786_v50 = vshrl.u32 %v23584_v44, 16  ;;  %v12791_v57 = vshll.u32 %v12073_v48, 16  ;;  %v24026_v49 = vpop.f32.mrf.mxu1  ;;  %v24028_v61 = vpop.f32.mrf.mxu0 }
 0x26b   : > { %v12777_v12 = vsel %vm21048_vm15, %v12770_v30, %v12775_v40  ;;  %v12785_v24 = vsel %vm21048_vm15, %v12778_v32, %v12783_v54  ;;  %v12794_v15 = vshrl.u32 %v12073_v48, 16  ;;  %v12799_v27 = vshll.u32 %v12074_v28, 16  ;;  %26906 = vst [vmem:[#allocation39_spill] sm:$0xff] %v24028_v61 }
 0x26c   : > { %v13380_v29 = vcombine.low %v13372_v19, %v13379_v45  ;;  %20589 = vmatmul.mubr.msk.bf16.gmra.mxu0 %vm2546_vm1, %v11356_v60  ;;  %v12793_v41 = vsel %vm21048_vm15, %v12786_v50, %v12791_v57  ;;  %v12802_v44 = vshrl.u32 %v12074_v28, 16  ;;  %v12807_v6 = vshll.u32 %v23998_v5, 16  ;;  %v20461_v54 = vpop.f32.mrf.mxu1  ;;  %v24040_v19 = vpop.f32.mrf.mxu0 }
 0x26d   : > { %v12801_v30 = vsel %vm21048_vm15, %v12794_v15, %v12799_v27  ;;  %v12810_v48 = vshrl.u32 %v23998_v5, 16  ;;  %v12815_v40 = vshll.u32 %v24008_v0, 16  ;;  %v12819_v32 = vshrl.u32 %v23588_v2, 16 }
 0x26e   : > { %20606 = vmatprep.mubr.msk.bf16.mxu1 %vm2546_vm1, %v13380_v29  ;;  %v12809_v28 = vsel %vm21048_vm15, %v12802_v44, %v12807_v6  ;;  %v12824_v45 = vshll.u32 %v23662_v36, 16  ;;  %v13381_v60 = vcombine.low %v12769_v39, %v12777_v12  ;;  %v13382_v50 = vcombine.low %v12785_v24, %v12793_v41  ;;  %v24051_v2 = vpop.f32.mrf.mxu1  ;;  %v24053_v54 = vpop.f32.mrf.mxu0 }
 0x26f   : > { %v12817_v57 = vsel %vm21048_vm15, %v12810_v48, %v12815_v40  ;;  %v13383_v15 = vcombine.low %v12801_v30, %v12809_v28  ;;  %v12152_v27 = vcombine.high %v19938_v38, %v19938_v38  ;;  %v24049_v61 = vrot.slane %v19938_v38, %v21007_v9  ;;  %26907 = vst [vmem:[#allocation40_spill] sm:$0xff] %v24051_v2 }
 0x270   : > { %26908 = vst [vmem:[#allocation41_spill] sm:$0xff] %v24053_v54  ;;  %v12826_v29 = vsel %vm21048_vm15, %v12819_v32, %v12824_v45  ;;  %v13391_v44 = vrot.slane %v13381_v60, %v21007_v9  ;;  %v13398_v39 = vrot.slane %v13382_v50, %v21007_v9  ;;  %v12827_v12 = vshrl.u32 %v23662_v36, 16  ;;  %v24065_v30 = vpop.f32.mrf.mxu0  ;;  %v24067_v48 = vpop.f32.mrf.mxu1 }
 0x271   : > { %v13384_v24 = vcombine.low %v12817_v57, %v12826_v29  ;;  %v13405_v41 = vrot.slane %v13383_v15, %v21007_v9  ;;  %v24062_v6 = vrot.slane %v12152_v27, %v21007_v9  ;;  %v12832_v38 = vshll.u32 %v23653_v7, 16  ;;  %26909 = vst [vmem:[#allocation42_spill] sm:$0xff] %v24065_v30  ;;  %26910 = vst [vmem:[#allocation43_spill] sm:$0xff] %v24067_v48 }
 0x272   : > { %v13413_v40 = vcombine.low %v13391_v44, %v13398_v39  ;;  %v12835_v32 = vshrl.u32 %v23653_v7, 16  ;;  %v12840_v28 = vshll.u32 %v23679_v14, 16  ;;  %v12843_v36 = vshrl.u32 %v23679_v14, 16  ;;  %v24077_v15 = vpop.f32.mrf.mxu0  ;;  %v24079_v27 = vpop.f32.mrf.mxu1 }
 0x273   : > { %v13412_v45 = vrot.slane %v13384_v24, %v21007_v9  ;;  %v12834_v60 = vsel %vm21048_vm15, %v12827_v12, %v12832_v38  ;;  %v12848_v50 = vshll.u32 %v23665_v35, 16  ;;  %v12851_v57 = vshrl.u32 %v23665_v35, 16  ;;  %26911 = vst [vmem:[#allocation44_spill] sm:$0xff] %v24077_v15  ;;  %26912 = vst [vmem:[#allocation45_spill] sm:$0xff] %v24079_v27 }
 0x274   : > { %v13421_v7 = vrot.slane %v13413_v40, %v21007_v9  ;;  %v12842_v29 = vsel %vm21048_vm15, %v12835_v32, %v12840_v28  ;;  %v12856_v14 = vshll.u32 %v23668_v17, 16  ;;  %v12859_v44 = vshrl.u32 %v23668_v17, 16  ;;  %v20078_v38 = vld.sshfl [vmem:[%s21017_s15 + $0x18] sm:$0x32 pattern:$0x75316420]  ;;  %v24091_v2 = vpop.f32.mrf.mxu0  ;;  %v24093_v40 = vpop.f32.mrf.mxu1 }
 0x275   : > { %v13414_v39 = vcombine.low %v13405_v41, %v13412_v45  ;;  %v12850_v12 = vsel %vm21048_vm15, %v12843_v36, %v12848_v50  ;;  %v12864_v24 = vshll.u32 %v23683_v59, 16  ;;  %v12867_v35 = vshrl.u32 %v23683_v59, 16  ;;  %26913 = vst [vmem:[#allocation46_spill] sm:$0xff] %v24091_v2  ;;  %26914 = vst [vmem:[#allocation47_spill] sm:$0xff] %v24093_v40 }
 0x276   : > { %v12858_v32 = vsel %vm21048_vm15, %v12851_v57, %v12856_v14  ;;  %v12872_v28 = vshll.u32 %v23687_v20, 16  ;;  %v12875_v17 = vshrl.u32 %v23687_v20, 16  ;;  %v12880_v41 = vshll.u32 %v24049_v61, 16  ;;  %v24105_v54 = vpop.f32.mrf.mxu0  ;;  %v24107_v40 = vpop.f32.mrf.mxu1 }
 0x277   : > { %v13428_v36 = vrot.slane %v13414_v39, %v21007_v9  ;;  %v12866_v59 = vsel %vm21048_vm15, %v12859_v44, %v12864_v24  ;;  %v12883_v45 = vshrl.u32 %v24049_v61, 16  ;;  %v12888_v50 = vshll.u32 %v24062_v6, 16  ;;  %26915 = vst [vmem:[#allocation48_spill] sm:$0xff] %v24105_v54  ;;  %26916 = vst [vmem:[#allocation49_spill] sm:$0xff] %v24107_v40 }
 0x278   : > { %v12874_v57 = vsel %vm21048_vm15, %v12867_v35, %v12872_v28  ;;  %v12882_v20 = vsel %vm21048_vm15, %v12875_v17, %v12880_v41  ;;  %v13430_v14 = vcombine.low %v12834_v60, %v12842_v29  ;;  %v13431_v39 = vcombine.low %v12850_v12, %v12858_v32  ;;  %v20079_v2 = vld.sshfl [vmem:[%s21017_s15 + $0x1c] sm:$0x33 pattern:$0x75316420]  ;;  %v24117_v54 = vpop.f32.mrf.mxu0  ;;  %v24119_v40 = vpop.f32.mrf.mxu1 }
 0x279   : > { %v13429_v27 = vcombine.low %v13421_v7, %v13428_v36  ;;  %v12890_v44 = vsel %vm21048_vm15, %v12883_v45, %v12888_v50  ;;  %v13432_v24 = vcombine.low %v12866_v59, %v12874_v57  ;;  %v20080_v15 = vld.sshfl [vmem:[%s21017_s15 + $0x20] sm:$0x11 pattern:$0x75316420]  ;;  %v13853_v48 = vcombine.high %v20078_v38, %v20078_v38  ;;  %26917 = vst [vmem:[#allocation50_spill] sm:$0xff] %v24119_v40 }
 0x27a   : > { %v13433_v30 = vcombine.low %v12882_v20, %v12890_v44  ;;  %v13440_v35 = vrot.slane %v13430_v14, %v21007_v9  ;;  %v13447_v28 = vrot.slane %v13431_v39, %v21007_v9  ;;  %v13860_v60 = vrot.slane %v20078_v38, %v21007_v9  ;;  %v24127_v29 = vld.sshfl [vmem:[%s21017_s15 + $0x24] sm:$0x32 pattern:$0x75316420]  ;;  %v24131_v41 = vpop.f32.mrf.mxu0  ;;  %v24133_v36 = vpop.f32.mrf.mxu1 }
 0x27b   : > { %20607 = vmatmul.mubr.msk.bf16.gmra.mxu1 %vm2546_vm1, %v13429_v27  ;;  %v13454_v7 = vrot.slane %v13432_v24, %v21007_v9  ;;  %v13867_v12 = vrot.slane %v13853_v48, %v21007_v9  ;;  %v13877_v32 = vcombine.high %v20079_v2, %v20079_v2  ;;  %v13884_v17 = vrot.slane %v20079_v2, %v21007_v9 }
 0x27c   : > { %26918 = vst [vmem:[#allocation51_spill] sm:$0xff] %v24131_v41  ;;  %26919 = vst [vmem:[#allocation52_spill] sm:$0xff] %v24133_v36  ;;  %v13461_v59 = vrot.slane %v13433_v30, %v21007_v9  ;;  %v13462_v45 = vcombine.low %v13440_v35, %v13447_v28  ;;  %v13868_v50 = vcombine.high %v13860_v60, %v13860_v60  ;;  %v24138_v48 = vpop.f32.mrf.mxu0  ;;  %v24140_v39 = vpop.f32.mrf.mxu1 }
 0x27d   : > { %v13901_v38 = vcombine.high %v20080_v15, %v20080_v15  ;;  %v13869_v57 = vcombine.high %v13867_v12, %v13867_v12  ;;  %v13891_v27 = vrot.slane %v13877_v32, %v21007_v9  ;;  %v13892_v20 = vcombine.high %v13884_v17, %v13884_v17  ;;  %26920 = vst [vmem:[#allocation53_spill] sm:$0xff] %v24138_v48 }
 0x27e   : > { %v13908_v14 = vrot.slane %v20080_v15, %v21007_v9  ;;  %26921 = vst [vmem:[#allocation54_spill] sm:$0xff] %v24140_v39  ;;  %v13463_v2 = vcombine.low %v13454_v7, %v13461_v59  ;;  %v13470_v44 = vrot.slane %v13462_v45, %v21007_v9  ;;  %v13923_v30 = vcombine.high %v24127_v29, %v24127_v29  ;;  %v24148_v36 = vpop.f32.mrf.mxu0  ;;  %v24150_v15 = vpop.f32.mrf.mxu1  ;;  %v24157_v59 = vld.sshfl [vmem:[%s21017_s15 + $0x80] sm:$0x11 pattern:$0x75316420] }
 0x27f   : > { %v24144_v24 = vrot.slane %v13901_v38, %v21007_v9  ;;  %v13893_v35 = vcombine.high %v13891_v27, %v13891_v27  ;;  %v14547_v28 = vcombine.low %v13867_v12, %v13868_v50  ;;  %v14548_v60 = vcombine.low %v13869_v57, %v13884_v17  ;;  %26922 = vst [vmem:[#allocation55_spill] sm:$0xff] %v24148_v36 }
 0x280   : > { %v14549_v32 = vcombine.low %v13891_v27, %v13892_v20  ;;  %26923 = vst [vmem:[#allocation56_spill] sm:$0xff] %v24150_v15  ;;  %v13477_v48 = vrot.slane %v13463_v2, %v21007_v9  ;;  %v24154_v7 = vrot.slane %v13923_v30, %v21007_v9  ;;  %v12189_v45 = vcombine.high %v23755_v33, %v23755_v33  ;;  %v24166_v27 = vpop.f32.mrf.mxu0  ;;  %v24168_v20 = vpop.f32.mrf.mxu1 }
 0x281   : > { %v12190_v38 = vcombine.high %v23760_v23, %v23760_v23  ;;  %v14550_v12 = vcombine.low %v13893_v35, %v13908_v14  ;;  %v14557_v17 = vrot.slane %v14547_v28, %v21007_v9  ;;  %v14564_v50 = vrot.slane %v14548_v60, %v21007_v9  ;;  %26924 = vst [vmem:[#allocation57_spill] sm:$0xff] %v24166_v27 }
 0x282   : > { %v14571_v57 = vrot.slane %v14549_v32, %v21007_v9  ;;  %26925 = vst [vmem:[#allocation58_spill] sm:$0xff] %v24168_v20  ;;  %v13478_v2 = vcombine.low %v13470_v44, %v13477_v48  ;;  %v14596_v30 = vcombine.low %v24144_v24, %v24154_v7  ;;  %v12213_v36 = vcombine.high %v23765_v56, %v23765_v56  ;;  %v24182_v15 = vpop.f32.mrf.mxu0  ;;  %v24184_v48 = vpop.f32.mrf.mxu1 }
 0x283   : > { %v12214_v14 = vcombine.high %v23779_v18, %v23779_v18  ;;  %v14578_v35 = vrot.slane %v14550_v12, %v21007_v9  ;;  %v14579_v28 = vcombine.low %v14557_v17, %v14564_v50  ;;  %v24179_v60 = vrot.slane %v24157_v59, %v21007_v9  ;;  %26926 = vst [vmem:[#allocation59_spill] sm:$0xff] %v24182_v15 }
 0x284   : > { %v12892_v32 = vshrl.u32 %v23755_v33, 16  ;;  %26927 = vst [vmem:[#allocation60_spill] sm:$0xff] %v24184_v48  ;;  %20610 = vmatprep.mubr.msk.bf16.mxu1 %vm2546_vm1, %v13478_v2  ;;  %v12897_v44 = vshll.u32 %v23760_v23, 16  ;;  %v12900_v24 = vshrl.u32 %v23760_v23, 16  ;;  %v12905_v20 = vshll.u32 %v12189_v45, 16  ;;  %v24190_v41 = vpop.f32.mrf.mxu0  ;;  %v24192_v33 = vpop.f32.mrf.mxu1 }
 0x285   : > { %v12908_v12 = vshrl.u32 %v12189_v45, 16  ;;  %v14580_v17 = vcombine.low %v14571_v57, %v14578_v35  ;;  %v14587_v50 = vrot.slane %v14579_v28, %v21007_v9  ;;  %v12913_v27 = vshll.u32 %v12190_v38, 16  ;;  %26928 = vst [vmem:[#allocation61_spill] sm:$0xff] %v24190_v41  ;;  %26929 = vst [vmem:[#allocation62_spill] sm:$0xff] %v24192_v33 }
 0x286   : > { %v12916_v39 = vshrl.u32 %v12190_v38, 16  ;;  %v12899_v48 = vsel %vm21048_vm15, %v12892_v32, %v12897_v44  ;;  %v12907_v2 = vsel %vm21048_vm15, %v12900_v24, %v12905_v20  ;;  %v12921_v23 = vshll.u32 %v23765_v56, 16  ;;  %v20082_v28 = vld.sshfl [vmem:[%s21017_s15 + $0x28] sm:$0x33 pattern:$0x75316420]  ;;  %v24206_v33 = vpop.f32.mrf.mxu0  ;;  %v24208_v32 = vpop.f32.mrf.mxu1 }
 0x287   : > { %v12924_v15 = vshrl.u32 %v23765_v56, 16  ;;  %v14594_v45 = vrot.slane %v14580_v17, %v21007_v9  ;;  %v12915_v57 = vsel %vm21048_vm15, %v12908_v12, %v12913_v27  ;;  %v12929_v38 = vshll.u32 %v23779_v18, 16  ;;  %26930 = vst [vmem:[#allocation63_spill] sm:$0xff] %v24206_v33  ;;  %26931 = vst [vmem:[#allocation64_spill] sm:$0xff] %v24208_v32 }
 0x288   : > { %v12932_v35 = vshrl.u32 %v23779_v18, 16  ;;  %v12923_v20 = vsel %vm21048_vm15, %v12916_v39, %v12921_v23  ;;  %v12937_v44 = vshll.u32 %v12213_v36, 16  ;;  %v12940_v24 = vshrl.u32 %v12213_v36, 16  ;;  %v24215_v40 = vpop.f32.mrf.mxu0  ;;  %v24217_v18 = vpop.f32.mrf.mxu1 }
 0x289   : > { %v12945_v56 = vshll.u32 %v12214_v14, 16  ;;  %v14595_v41 = vcombine.low %v14587_v50, %v14594_v45  ;;  %v12931_v17 = vsel %vm21048_vm15, %v12924_v15, %v12929_v38  ;;  %v12948_v27 = vshrl.u32 %v12214_v14, 16 }
 0x28a   : > { %v12953_v12 = vshll.u32 %v24179_v60, 16  ;;  %v12939_v32 = vsel %vm21048_vm15, %v12932_v35, %v12937_v44  ;;  %v13479_v23 = vcombine.low %v12899_v48, %v12907_v2  ;;  %v13480_v36 = vcombine.low %v12915_v57, %v12923_v20  ;;  %v24228_v38 = vpop.f32.mrf.mxu0  ;;  %v24230_v33 = vpop.f32.mrf.mxu1 }
 0x28b   : > { %v12947_v39 = vsel %vm21048_vm15, %v12940_v24, %v12945_v56  ;;  %20620 = vmatprep.mubr.msk.bf16.mxu0 %vm2546_vm1, %v14595_v41  ;;  %v13481_v14 = vcombine.low %v12931_v17, %v12939_v32  ;;  %v13930_v50 = vrot.slane %v24127_v29, %v21007_v9  ;;  %v13947_v45 = vcombine.high %v20082_v28, %v20082_v28 }
 0x28c   : > { %v12955_v15 = vsel %vm21048_vm15, %v12948_v27, %v12953_v12  ;;  %v13489_v44 = vrot.slane %v13479_v23, %v21007_v9  ;;  %v13496_v48 = vrot.slane %v13480_v36, %v21007_v9  ;;  %v13954_v2 = vrot.slane %v20082_v28, %v21007_v9  ;;  %v20487_v20 = vpop.f32.mrf.mxu0  ;;  %v24239_v24 = vpop.f32.mrf.mxu1 }
 0x28d   : > { %v13482_v35 = vcombine.low %v12947_v39, %v12955_v15  ;;  %v13503_v41 = vrot.slane %v13481_v14, %v21007_v9  ;;  %v13961_v57 = vrot.slane %v13947_v45, %v21007_v9  ;;  %v20108_v32 = vcombine.high %v13930_v50, %v24154_v7 }
 0x28e   : > { %v14606_v29 = vrot.slane %v14596_v30, %v21007_v9  ;;  %v13511_v17 = vcombine.low %v13489_v44, %v13496_v48  ;;  %v12222_v27 = vcombine.high %v24157_v59, %v24157_v59  ;;  %v12956_v12 = vshrl.u32 %v24179_v60, 16  ;;  %v24247_v7 = vpop.f32.mrf.mxu0  ;;  %v24249_v30 = vpop.f32.mrf.mxu1 }
 0x28f   : > { %v13510_v56 = vrot.slane %v13482_v35, %v21007_v9  ;;  %v14598_v28 = vcombine.low %v13954_v2, %v13961_v57  ;;  %v20109_v39 = vcombine.high %v13954_v2, %v13961_v57  ;;  %v14613_v23 = vrot.slane %v20108_v32, %v21007_v9  ;;  %26932 = vst [vmem:[#allocation65_spill] sm:$0xff] %v24247_v7 }
 0x290   : > { %v12965_v36 = vshrl.u32 %v23860_v62, 16  ;;  %26933 = vst [vmem:[#allocation66_spill] sm:$0xff] %v24249_v30  ;;  %v13519_v14 = vrot.slane %v13511_v17, %v21007_v9  ;;  %v24253_v50 = vrot.slane %v12222_v27, %v21007_v9  ;;  %v12970_v59 = vshll.u32 %v23871_v22, 16  ;;  %v24259_v62 = vpop.f32.mrf.mxu1  ;;  %v24261_v2 = vpop.f32.mrf.mxu0 }
 0x291   : > { %v13512_v15 = vcombine.low %v13503_v41, %v13510_v56  ;;  %v14620_v45 = vrot.slane %v14598_v28, %v21007_v9  ;;  %v14627_v35 = vrot.slane %v20109_v39, %v21007_v9  ;;  %v14628_v44 = vcombine.low %v14606_v29, %v14613_v23 }
 0x292   : > { %v12973_v48 = vshrl.u32 %v23871_v22, 16  ;;  %v12961_v57 = vshll.u32 %v24253_v50, 16  ;;  %v12972_v32 = vsel %vm21048_vm15, %v12965_v36, %v12970_v59  ;;  %v12978_v20 = vshll.u32 %v23875_v53, 16  ;;  %v24271_v27 = vpop.f32.mrf.mxu1  ;;  %v24273_v28 = vpop.f32.mrf.mxu0 }
 0x293   : > { %v13526_v41 = vrot.slane %v13512_v15, %v21007_v9  ;;  %v14629_v56 = vcombine.low %v14620_v45, %v14627_v35  ;;  %v14636_v17 = vrot.slane %v14628_v44, %v21007_v9  ;;  %v12981_v29 = vshrl.u32 %v23875_v53, 16  ;;  %v20083_v44 = vld.sshfl [vmem:[%s21017_s15 + $0x2c] sm:$0x11 pattern:$0x75316420] }
 0x294   : > { %v12986_v22 = vshll.u32 %v23892_v11, 16  ;;  %v12963_v23 = vsel %vm21048_vm15, %v12956_v12, %v12961_v57  ;;  %v12980_v36 = vsel %vm21048_vm15, %v12973_v48, %v12978_v20  ;;  %v12989_v15 = vshrl.u32 %v23892_v11, 16 }
 0x295   : > { %v13527_v39 = vcombine.low %v13519_v14, %v13526_v41  ;;  %v14643_v59 = vrot.slane %v14629_v56, %v21007_v9  ;;  %v12994_v45 = vshll.u32 %v23863_v4, 16  ;;  %v12997_v35 = vshrl.u32 %v23863_v4, 16  ;;  %v24286_v14 = vpop.f32.mrf.mxu1  ;;  %v24288_v41 = vpop.f32.mrf.mxu0 }
 0x296   : > { %v12988_v53 = vsel %vm21048_vm15, %v12981_v29, %v12986_v22  ;;  %26934 = vst [vmem:[#allocation67_spill] sm:$0xff] %v24286_v14  ;;  %26935 = vst [vmem:[#allocation68_spill] sm:$0xff] %v24288_v41  ;;  %v13002_v11 = vshll.u32 %v23878_v21, 16  ;;  %v13005_v12 = vshrl.u32 %v23878_v21, 16  ;;  %v13010_v48 = vshll.u32 %v23882_v13, 16 }
 0x297   : > { %20611 = vmatmul.mubr.msk.bf16.gmra.mxu1 %vm2546_vm1, %v13527_v39  ;;  %v13013_v57 = vshrl.u32 %v23882_v13, 16  ;;  %v14644_v20 = vcombine.low %v14636_v17, %v14643_v59  ;;  %v12996_v4 = vsel %vm21048_vm15, %v12989_v15, %v12994_v45  ;;  %v13018_v56 = vshll.u32 %v23973_v25, 16  ;;  %v20084_v22 = vld.sshfl [vmem:[%s21017_s15 + $0x30] sm:$0x32 pattern:$0x75316420]  ;;  %v24299_v30 = vpop.f32.mrf.mxu1  ;;  %v24301_v7 = vpop.f32.mrf.mxu0 }
 0x298   : > { %v13528_v29 = vcombine.low %v12963_v23, %v12972_v32  ;;  %26936 = vst [vmem:[#allocation69_spill] sm:$0xff] %v24299_v30  ;;  %26937 = vst [vmem:[#allocation70_spill] sm:$0xff] %v24301_v7  ;;  %v13004_v39 = vsel %vm21048_vm15, %v12997_v35, %v13002_v11  ;;  %v13012_v21 = vsel %vm21048_vm15, %v13005_v12, %v13010_v48  ;;  %v20085_v17 = vld.sshfl [vmem:[%s21017_s15 + $0x34] sm:$0x33 pattern:$0x75316420] }
 0x299   : > { %v13529_v13 = vcombine.low %v12980_v36, %v12988_v53  ;;  %v13971_v59 = vcombine.high %v20083_v44, %v20083_v44  ;;  %20621 = vmatmul.mubr.msk.bf16.vlgmr.msra.gmra.mxu0 %vm2546_vm1, %v14644_v20  ;;  %v13020_v32 = vsel %vm21048_vm15, %v13013_v57, %v13018_v56  ;;  %v13530_v23 = vcombine.low %v12996_v4, %v13004_v39  ;;  %v24313_v30 = vpop.f32.mrf.mxu1  ;;  %v24315_v35 = vpop.f32.mrf.mxu0  ;;  %v19944_v48 = vld.sshfl [vmem:[%s21017_s15 + $0x8c] sm:$0x11 pattern:$0x75316420] }
 0x29a   : > { %v13538_v15 = vrot.slane %v13528_v29, %v21007_v9  ;;  %v13978_v45 = vrot.slane %v20083_v44, %v21007_v9  ;;  %26938 = vst [vmem:[#allocation71_spill] sm:$0xff] %v24313_v30  ;;  %26939 = vst [vmem:[#allocation72_spill] sm:$0xff] %v24315_v35  ;;  %v13531_v11 = vcombine.low %v13012_v21, %v13020_v32  ;;  %v20089_v41 = vld.sshfl [vmem:[%s21017_s15 + $0x44] sm:$0x11 pattern:$0x75316420] }
 0x29b   : > { %v13545_v12 = vrot.slane %v13529_v13, %v21007_v9  ;;  %v13985_v36 = vrot.slane %v13971_v59, %v21007_v9  ;;  %v13993_v53 = vcombine.high %v20084_v22, %v20084_v22  ;;  %v13552_v20 = vrot.slane %v13530_v23, %v21007_v9  ;;  %v24323_v29 = vpop.f32.mrf.mxu1  ;;  %v24325_v44 = vpop.f32.mrf.mxu0 }
 0x29c   : > { %v14000_v57 = vrot.slane %v20084_v22, %v21007_v9  ;;  %v14017_v4 = vcombine.high %v20085_v17, %v20085_v17  ;;  %v14024_v56 = vrot.slane %v20085_v17, %v21007_v9  ;;  %26940 = vst [vmem:[#allocation73_spill] sm:$0xff] %v24323_v29  ;;  %26941 = vst [vmem:[#allocation74_spill] sm:$0xff] %v24325_v44 }
 0x29d   : > { %v13559_v39 = vrot.slane %v13531_v11, %v21007_v9  ;;  %v13560_v21 = vcombine.low %v13538_v15, %v13545_v12  ;;  %v14007_v13 = vrot.slane %v13993_v53, %v21007_v9  ;;  %v14645_v59 = vcombine.low %v13978_v45, %v13985_v36  ;;  %v20513_v22 = vpop.f32.mrf.mxu1  ;;  %v24330_v7 = vpop.f32.mrf.mxu0  ;;  %v20086_v36 = vld.sshfl [vmem:[%s21017_s15 + $0x38] sm:$0x11 pattern:$0x75316420] }
 0x29e   : > { %v14008_v32 = vcombine.high %v14000_v57, %v14000_v57  ;;  %v14031_v35 = vrot.slane %v14017_v4, %v21007_v9  ;;  %v14032_v23 = vcombine.high %v14024_v56, %v14024_v56  ;;  %v12292_v30 = vcombine.high %v19944_v48, %v19944_v48  ;;  %26942 = vst [vmem:[#allocation75_spill] sm:$0xff] %v24330_v7 }
 0x29f   : > { %v13561_v17 = vcombine.low %v13552_v20, %v13559_v39  ;;  %v13568_v29 = vrot.slane %v13560_v21, %v21007_v9  ;;  %v14009_v44 = vcombine.high %v14007_v13, %v14007_v13  ;;  %v14655_v11 = vrot.slane %v14645_v59, %v21007_v9  ;;  %v24341_v57 = vpop.f32.mrf.mxu1  ;;  %v24343_v4 = vpop.f32.mrf.mxu0  ;;  %v20087_v59 = vld.sshfl [vmem:[%s21017_s15 + $0x3c] sm:$0x32 pattern:$0x75316420] }
 0x2a0   : > { %v14646_v15 = vcombine.low %v14007_v13, %v14008_v32  ;;  %v14648_v12 = vcombine.low %v14031_v35, %v14032_v23  ;;  %v24335_v53 = vrot.slane %v19944_v48, %v21007_v9  ;;  %v24338_v45 = vrot.slane %v12292_v30, %v21007_v9  ;;  %26943 = vst [vmem:[#allocation76_spill] sm:$0xff] %v24341_v57 }
 0x2a1   : > { %26944 = vst [vmem:[#allocation77_spill] sm:$0xff] %v24343_v4  ;;  %v13575_v20 = vrot.slane %v13561_v17, %v21007_v9  ;;  %v14647_v39 = vcombine.low %v14009_v44, %v14024_v56  ;;  %v13021_v21 = vshrl.u32 %v23973_v25, 16  ;;  %v14033_v13 = vcombine.high %v14031_v35, %v14031_v35  ;;  %v24352_v22 = vpop.f32.mrf.mxu0  ;;  %v24354_v57 = vpop.f32.mrf.mxu1  ;;  %v20088_v44 = vld.sshfl [vmem:[%s21017_s15 + $0x40] sm:$0x33 pattern:$0x75316420] }
 0x2a2   : > { %v14662_v48 = vrot.slane %v14646_v15, %v21007_v9  ;;  %v14676_v32 = vrot.slane %v14648_v12, %v21007_v9  ;;  %v13026_v30 = vshll.u32 %v24335_v53, 16  ;;  %v13029_v23 = vshrl.u32 %v24335_v53, 16  ;;  %26945 = vst [vmem:[#allocation78_spill] sm:$0xff] %v24352_v22 }
 0x2a3   : > { %v13576_v4 = vcombine.low %v13568_v29, %v13575_v20  ;;  %v14669_v56 = vrot.slane %v14647_v39, %v21007_v9  ;;  %v13034_v25 = vshll.u32 %v24338_v45, 16  ;;  %v14041_v35 = vcombine.high %v20086_v36, %v20086_v36  ;;  %v24363_v14 = vpop.f32.mrf.mxu0  ;;  %v24365_v22 = vpop.f32.mrf.mxu1 }
 0x2a4   : > { %v14677_v17 = vcombine.low %v14655_v11, %v14662_v48  ;;  %v13028_v15 = vsel %vm21048_vm15, %v13021_v21, %v13026_v30  ;;  %v14048_v12 = vrot.slane %v20086_v36, %v21007_v9  ;;  %v14063_v7 = vcombine.high %v20087_v59, %v20087_v59  ;;  %26946 = vst [vmem:[#allocation79_spill] sm:$0xff] %v24363_v14 }
 0x2a5   : > { %26947 = vst [vmem:[#allocation80_spill] sm:$0xff] %v24365_v22  ;;  %20614 = vmatprep.mubr.msk.bf16.mxu1 %vm2546_vm1, %v13576_v4  ;;  %v14678_v29 = vcombine.low %v14669_v56, %v14676_v32  ;;  %v13036_v20 = vsel %vm21048_vm15, %v13029_v23, %v13034_v25  ;;  %v14055_v39 = vrot.slane %v14041_v35, %v21007_v9  ;;  %v24374_v14 = vpop.f32.mrf.mxu0  ;;  %v24376_v22 = vpop.f32.mrf.mxu1 }
 0x2a6   : > { %v14070_v11 = vrot.slane %v20087_v59, %v21007_v9  ;;  %v14685_v21 = vrot.slane %v14677_v17, %v21007_v9  ;;  %v13577_v36 = vcombine.low %v13028_v15, %v13036_v20  ;;  %v14077_v48 = vrot.slane %v14063_v7, %v21007_v9  ;;  %26948 = vst [vmem:[#allocation81_spill] sm:$0xff] %v24374_v14  ;;  %v20090_v17 = vld.sshfl [vmem:[%s21017_s15 + $0x48] sm:$0x32 pattern:$0x75316420] }
 0x2a7   : > { %v14087_v30 = vcombine.high %v20088_v44, %v20088_v44  ;;  %26949 = vst [vmem:[#allocation82_spill] sm:$0xff] %v24376_v22  ;;  %v14692_v4 = vrot.slane %v14678_v29, %v21007_v9  ;;  %v14094_v26 = vrot.slane %v20088_v44, %v21007_v9  ;;  %v14694_v32 = vcombine.low %v14033_v13, %v14048_v12  ;;  %v24383_v7 = vpop.f32.mrf.mxu0  ;;  %v24385_v15 = vpop.f32.mrf.mxu1 }
 0x2a8   : > { %v14111_v23 = vcombine.high %v20089_v41, %v20089_v41  ;;  %v13584_v56 = vrot.slane %v13577_v36, %v21007_v9  ;;  %v14695_v25 = vcombine.low %v14055_v39, %v14077_v48  ;;  %v20110_v35 = vcombine.high %v14070_v11, %v14077_v48  ;;  %26950 = vst [vmem:[#allocation83_spill] sm:$0xff] %v24383_v7  ;;  %v20091_v11 = vld.sshfl [vmem:[%s21017_s15 + $0x4c] sm:$0x33 pattern:$0x75316420] }
 0x2a9   : > { %v14101_v59 = vrot.slane %v14087_v30, %v21007_v9  ;;  %26951 = vst [vmem:[#allocation84_spill] sm:$0xff] %v24385_v15  ;;  %v14693_v20 = vcombine.low %v14685_v21, %v14692_v4  ;;  %v14704_v22 = vrot.slane %v14694_v32, %v21007_v9  ;;  %v14118_v29 = vrot.slane %v20089_v41, %v21007_v9  ;;  %v24394_v48 = vpop.f32.mrf.mxu0  ;;  %v24396_v30 = vpop.f32.mrf.mxu1 }
 0x2aa   : > { %v14125_v13 = vrot.slane %v14111_v23, %v21007_v9  ;;  %v13591_v44 = vrot.slane %v13584_v56, %v21007_v9  ;;  %v14711_v36 = vrot.slane %v14695_v25, %v21007_v9  ;;  %v14718_v39 = vrot.slane %v20110_v35, %v21007_v9  ;;  %26952 = vst [vmem:[#allocation85_spill] sm:$0xff] %v24394_v48  ;;  %v20093_v35 = vld.sshfl [vmem:[%s21017_s15 + $0x54] sm:$0x32 pattern:$0x75316420] }
 0x2ab   : > { %v14697_v12 = vcombine.low %v14094_v26, %v14101_v59  ;;  %26953 = vst [vmem:[#allocation86_spill] sm:$0xff] %v24396_v30  ;;  %20624 = vmatprep.mubr.msk.bf16.mxu0 %vm2546_vm1, %v14693_v20  ;;  %v14133_v21 = vcombine.high %v20090_v17, %v20090_v17  ;;  %v14140_v41 = vrot.slane %v20090_v17, %v21007_v9  ;;  %v24404_v7 = vpop.f32.mrf.mxu0  ;;  %v24406_v15 = vpop.f32.mrf.mxu1 }
 0x2ac   : > { %v14164_v4 = vrot.slane %v20091_v11, %v21007_v9  ;;  %v20111_v32 = vcombine.high %v14094_v26, %v14101_v59  ;;  %20615 = vmatmul.mubr.msk.bf16.gmra.mxu1 %vm2546_vm1, %v13591_v44  ;;  %v14726_v56 = vcombine.low %v14704_v22, %v14711_v36  ;;  %v14744_v25 = vcombine.low %v14118_v29, %v14125_v13 }
 0x2ad   : > { %v14725_v23 = vrot.slane %v14697_v12, %v21007_v9  ;;  %26954 = vst [vmem:[#allocation87_spill] sm:$0xff] %v24406_v15  ;;  %v14147_v30 = vrot.slane %v14133_v21, %v21007_v9  ;;  %v14148_v20 = vcombine.high %v14140_v41, %v14140_v41  ;;  %v14157_v17 = vcombine.high %v20091_v11, %v20091_v11  ;;  %v24412_v22 = vpop.f32.mrf.mxu0  ;;  %v24414_v29 = vpop.f32.mrf.mxu1 }
 0x2ae   : > { %v14753_v48 = vrot.slane %v20111_v32, %v21007_v9  ;;  %v14734_v26 = vrot.slane %v14726_v56, %v21007_v9  ;;  %v14760_v59 = vrot.slane %v14744_v25, %v21007_v9  ;;  %v14172_v44 = vcombine.high %v14164_v4, %v14164_v4  ;;  %26955 = vst [vmem:[#allocation88_spill] sm:$0xff] %v24412_v22 }
 0x2af   : > { %v14727_v14 = vcombine.low %v14718_v39, %v14725_v23  ;;  %26956 = vst [vmem:[#allocation89_spill] sm:$0xff] %v24414_v29  ;;  %v14149_v13 = vcombine.high %v14147_v30, %v14147_v30  ;;  %v14745_v12 = vcombine.low %v14147_v30, %v14148_v20  ;;  %v14171_v36 = vrot.slane %v14157_v17, %v21007_v9  ;;  %v24419_v11 = vpop.f32.mrf.mxu0  ;;  %v24421_v23 = vpop.f32.mrf.mxu1  ;;  %v20094_v30 = vld.sshfl [vmem:[%s21017_s15 + $0x58] sm:$0x33 pattern:$0x75316420] }
 0x2b0   : > { %v14203_v21 = vcombine.high %v20093_v35, %v20093_v35  ;;  %v14775_v32 = vcombine.low %v14753_v48, %v14760_v59  ;;  %v14210_v39 = vrot.slane %v20093_v35, %v21007_v9  ;;  %26957 = vst [vmem:[#allocation90_spill] sm:$0xff] %v24419_v11  ;;  %26958 = vst [vmem:[#allocation91_spill] sm:$0xff] %v24421_v23 }
 0x2b1   : > { %v14741_v41 = vrot.slane %v14727_v14, %v21007_v9  ;;  %v14746_v56 = vcombine.low %v14149_v13, %v14164_v4  ;;  %v14767_v25 = vrot.slane %v14745_v12, %v21007_v9  ;;  %v14173_v22 = vcombine.high %v14171_v36, %v14171_v36  ;;  %v24426_v15 = vpop.f32.mrf.mxu0  ;;  %v24428_v14 = vpop.f32.mrf.mxu1  ;;  %v20096_v4 = vld.sshfl [vmem:[%s21017_s15 + $0x60] sm:$0x32 pattern:$0x75316420] }
 0x2b2   : > { %v14217_v29 = vrot.slane %v14203_v21, %v21007_v9  ;;  %v14792_v17 = vcombine.low %v14171_v36, %v14172_v44  ;;  %26959 = vst [vmem:[#allocation92_spill] sm:$0xff] %v24426_v15  ;;  %v14783_v13 = vrot.slane %v14775_v32, %v21007_v9  ;;  %v14234_v44 = vrot.slane %v20094_v30, %v21007_v9 }
 0x2b3   : > { %v14742_v20 = vcombine.low %v14734_v26, %v14741_v41  ;;  %v14774_v48 = vrot.slane %v14746_v56, %v21007_v9  ;;  %v14793_v35 = vcombine.low %v14173_v22, %v23784_v43  ;;  %v14227_v26 = vcombine.high %v20094_v30, %v20094_v30  ;;  %v24438_v36 = vpop.f32.mrf.mxu0  ;;  %v24440_v21 = vpop.f32.mrf.mxu1 }
 0x2b4   : > { %v14794_v59 = vcombine.low %v23794_v52, %v14217_v29  ;;  %v20112_v11 = vcombine.high %v14210_v39, %v14217_v29  ;;  %v14802_v12 = vrot.slane %v14792_v17, %v21007_v9  ;;  %26960 = vst [vmem:[#allocation93_spill] sm:$0xff] %v24438_v36  ;;  %v14273_v32 = vcombine.high %v20096_v4, %v20096_v4  ;;  %v20099_v36 = vld.sshfl [vmem:[%s21017_s15 + $0x6c] sm:$0x32 pattern:$0x75316420] }
 0x2b5   : > { %20625 = vmatmul.mubr.msk.bf16.gmra.mxu0 %vm2546_vm1, %v14742_v20  ;;  %v14776_v41 = vcombine.low %v14767_v25, %v14774_v48  ;;  %v14809_v43 = vrot.slane %v14793_v35, %v21007_v9  ;;  %v14241_v29 = vrot.slane %v14227_v26, %v21007_v9  ;;  %v14280_v39 = vrot.slane %v20096_v4, %v21007_v9  ;;  %v24449_v30 = vpop.f32.mrf.mxu0  ;;  %v24451_v20 = vpop.f32.mrf.mxu1  ;;  %v20097_v35 = vld.sshfl [vmem:[%s21017_s15 + $0x64] sm:$0x33 pattern:$0x75316420] }
 0x2b6   : > { %v14816_v52 = vrot.slane %v14794_v59, %v21007_v9  ;;  %v14823_v22 = vrot.slane %v20112_v11, %v21007_v9  ;;  %v14843_v56 = vcombine.low %v23895_v58, %v23903_v3  ;;  %26961 = vst [vmem:[#allocation94_spill] sm:$0xff] %v24449_v30  ;;  %v14287_v59 = vrot.slane %v14273_v32, %v21007_v9 }
 0x2b7   : > { %v14790_v25 = vrot.slane %v14776_v41, %v21007_v9  ;;  %v14824_v17 = vcombine.low %v14802_v12, %v14809_v43  ;;  %v14288_v11 = vcombine.high %v14280_v39, %v14280_v39  ;;  %v14841_v23 = vcombine.low %v14234_v44, %v14241_v29  ;;  %v24457_v15 = vpop.f32.mrf.mxu0  ;;  %v24459_v4 = vpop.f32.mrf.mxu1 }
 0x2b8   : > { %v14825_v48 = vcombine.low %v14816_v52, %v14823_v22  ;;  %v20113_v26 = vcombine.high %v14234_v44, %v14241_v29  ;;  %26962 = vst [vmem:[#allocation95_spill] sm:$0xff] %v24457_v15  ;;  %26963 = vst [vmem:[#allocation96_spill] sm:$0xff] %v24459_v4  ;;  %v14865_v41 = vrot.slane %v14843_v56, %v21007_v9 }
 0x2b9   : > { %v14791_v58 = vcombine.low %v14783_v13, %v14790_v25  ;;  %v14832_v3 = vrot.slane %v14824_v17, %v21007_v9  ;;  %v14844_v12 = vcombine.low %v14287_v59, %v14288_v11  ;;  %v14851_v43 = vrot.slane %v14841_v23, %v21007_v9  ;;  %v24466_v32 = vpop.f32.mrf.mxu0  ;;  %v24468_v44 = vpop.f32.mrf.mxu1 }
 0x2ba   : > { %v14839_v30 = vrot.slane %v14825_v48, %v21007_v9  ;;  %v14858_v52 = vrot.slane %v20113_v26, %v21007_v9  ;;  %v14289_v22 = vcombine.high %v14287_v59, %v14287_v59  ;;  %v14297_v29 = vcombine.high %v20097_v35, %v20097_v35 }
 0x2bb   : > { %20628 = vmatprep.mubr.msk.bf16.mxu0 %vm2546_vm1, %v14791_v58  ;;  %v14304_v39 = vrot.slane %v20097_v35, %v21007_v9  ;;  %v14343_v25 = vcombine.high %v20099_v36, %v20099_v36  ;;  %v14872_v56 = vrot.slane %v14844_v12, %v21007_v9  ;;  %v24473_v48 = vpop.f32.mrf.mxu0  ;;  %v24475_v23 = vpop.f32.mrf.mxu1  ;;  %v20100_v58 = vld.sshfl [vmem:[%s21017_s15 + $0x70] sm:$0x33 pattern:$0x75316420]  ;;  %v14350_v12 = vrot.slane %v20099_v36, %v21007_v9 }
 0x2bc   : > { %v14840_v13 = vcombine.low %v14832_v3, %v14839_v30  ;;  %v14873_v17 = vcombine.low %v14851_v43, %v14858_v52  ;;  %26964 = vst [vmem:[#allocation97_spill] sm:$0xff] %v24475_v23  ;;  %v14311_v59 = vrot.slane %v14297_v29, %v21007_v9  ;;  %v14367_v23 = vcombine.high %v20100_v58, %v20100_v58 }
 0x2bd   : > { %v14312_v11 = vcombine.high %v14304_v39, %v14304_v39  ;;  %v14357_v26 = vrot.slane %v14343_v25, %v21007_v9  ;;  %v14890_v30 = vcombine.low %v14289_v22, %v14304_v39  ;;  %v14874_v3 = vcombine.low %v14865_v41, %v14872_v56  ;;  %v20539_v43 = vpop.f32.mrf.mxu0  ;;  %v24483_v52 = vpop.f32.mrf.mxu1  ;;  %v20102_v39 = vld.sshfl [vmem:[%s21017_s15 + $0x78] sm:$0x32 pattern:$0x75316420] }
 0x2be   : > { %20629 = vmatmul.mubr.msk.bf16.gmra.mxu0 %vm2546_vm1, %v14840_v13  ;;  %v14881_v35 = vrot.slane %v14873_v17, %v21007_v9  ;;  %26965 = vst [vmem:[#allocation98_spill] sm:$0xff] %v24483_v52  ;;  %v14313_v4 = vcombine.high %v14311_v59, %v14311_v59  ;;  %v14374_v22 = vrot.slane %v20100_v58, %v21007_v9  ;;  %v20106_v52 = vld.sshfl [vmem:[%s21017_s15 + $0x88] sm:$0x33 pattern:$0x75316420] }
 0x2bf   : > { %v14891_v15 = vcombine.low %v14311_v59, %v14312_v11  ;;  %v14893_v13 = vcombine.low %v24008_v0, %v14357_v26  ;;  %v14900_v29 = vrot.slane %v14890_v30, %v21007_v9  ;;  %v14888_v25 = vrot.slane %v14874_v3, %v21007_v9  ;;  %v24490_v56 = vpop.f32.mrf.mxu0  ;;  %v24492_v36 = vpop.f32.mrf.mxu1  ;;  %v20103_v11 = vld.sshfl [vmem:[%s21017_s15 + $0x7c] sm:$0x33 pattern:$0x75316420] }
 0x2c0   : > { %v20114_v41 = vcombine.high %v14350_v12, %v14357_v26  ;;  %26966 = vst [vmem:[#allocation99_spill] sm:$0xff] %v24490_v56  ;;  %26967 = vst [vmem:[#allocation100_spill] sm:$0xff] %v24492_v36  ;;  %v14892_v17 = vcombine.low %v14313_v4, %v23998_v5  ;;  %v14942_v0 = vcombine.low %v24049_v61, %v24062_v6 }
 0x2c1   : > { %v14907_v43 = vrot.slane %v14891_v15, %v21007_v9  ;;  %v14921_v59 = vrot.slane %v14893_v13, %v21007_v9  ;;  %v14889_v30 = vcombine.low %v14881_v35, %v14888_v25  ;;  %v14381_v3 = vrot.slane %v14367_v23, %v21007_v9  ;;  %v24502_v58 = vpop.f32.mrf.mxu1  ;;  %v24508_v35 = vpop.f32.mrf.mxu0 }
 0x2c2   : > { %v14949_v26 = vrot.slane %v20114_v41, %v21007_v9  ;;  %26968 = vst [vmem:[#allocation101_spill] sm:$0xff] %v24502_v58  ;;  %v14914_v12 = vrot.slane %v14892_v17, %v21007_v9  ;;  %v14970_v5 = vrot.slane %v14942_v0, %v21007_v9  ;;  %v14413_v4 = vcombine.high %v20102_v39, %v20102_v39 }
 0x2c3   : > { %v14922_v36 = vcombine.low %v14900_v29, %v14907_v43  ;;  %20632 = vmatprep.mubr.msk.bf16.mxu0 %vm2546_vm1, %v14889_v30  ;;  %v14940_v15 = vcombine.low %v14374_v22, %v14381_v3  ;;  %v20115_v13 = vcombine.high %v14374_v22, %v14381_v3  ;;  %v14420_v61 = vrot.slane %v20102_v39, %v21007_v9  ;;  %v24510_v23 = vpop.f32.mrf.mxu1 }
 0x2c4   : > { %v14437_v6 = vcombine.high %v20103_v11, %v20103_v11  ;;  %26969 = vst [vmem:[#allocation102_spill] sm:$0xff] %v24508_v35  ;;  %26970 = vst [vmem:[#allocation103_spill] sm:$0xff] %v24510_v23  ;;  %v14923_v25 = vcombine.low %v14914_v12, %v14921_v59  ;;  %v14427_v29 = vrot.slane %v14413_v4, %v21007_v9  ;;  %v20105_v35 = vld.sshfl [vmem:[%s21017_s15 + $0x84] sm:$0x32 pattern:$0x75316420]  ;;  %s26717_s15 = scalar_lea.vmem %s26845_s6, %s19246_s22 }
 0x2c5   : > { %v14930_v41 = vrot.slane %v14922_v36, %v21007_v9  ;;  %v14444_v17 = vrot.slane %v20103_v11, %v21007_v9  ;;  %v14956_v43 = vrot.slane %v14940_v15, %v21007_v9  ;;  %v14963_v0 = vrot.slane %v20115_v13, %v21007_v9  ;;  %v24518_v30 = vpop.f32.mrf.mxu1  ;;  %v24522_v11 = vpop.f32.mrf.mxu0 }
 0x2c6   : > { %v14428_v22 = vcombine.high %v14420_v61, %v14420_v61  ;;  %v14451_v39 = vrot.slane %v14437_v6, %v21007_v9  ;;  %26971 = vst [vmem:[#allocation104_spill] sm:$0xff] %v24518_v30  ;;  %v14937_v3 = vrot.slane %v14923_v25, %v21007_v9  ;;  %v14429_v59 = vcombine.high %v14427_v29, %v14427_v29 }
 0x2c7   : > { %v14452_v12 = vcombine.high %v14444_v17, %v14444_v17  ;;  %v14971_v56 = vcombine.low %v14949_v26, %v14956_v43  ;;  %v14972_v36 = vcombine.low %v14963_v0, %v14970_v5  ;;  %v24524_v15 = vpop.f32.mrf.mxu1 }
 0x2c8   : > { %v14453_v23 = vcombine.high %v14451_v39, %v14451_v39  ;;  %v14988_v4 = vcombine.low %v14427_v29, %v14428_v22  ;;  %26972 = vst [vmem:[#allocation105_spill] sm:$0xff] %v24524_v15  ;;  %v14938_v13 = vcombine.low %v14930_v41, %v14937_v3  ;;  %v14989_v61 = vcombine.low %v14429_v59, %v14444_v17  ;;  %v27017_v15 = vld [vmem:[#allocation60_spill] sm:$0xff] }
 0x2c9   : > { %v14990_v58 = vcombine.low %v14451_v39, %v14452_v12  ;;  %v14979_v6 = vrot.slane %v14971_v56, %v21007_v9  ;;  %v14986_v30 = vrot.slane %v14972_v36, %v21007_v9  ;;  %v24531_v5 = vpop.f32.mrf.mxu1  ;;  %v14483_v41 = vcombine.high %v20105_v35, %v20105_v35  ;;  %v24538_v39 = vpop.f32.mrf.mxu0 }
 0x2ca   : > { %v14991_v25 = vcombine.low %v14453_v23, %v24179_v60  ;;  %v14998_v26 = vrot.slane %v14988_v4, %v21007_v9  ;;  %20633 = vmatmul.mubr.msk.bf16.gmra.mxu0 %vm2546_vm1, %v14938_v13  ;;  %v15005_v29 = vrot.slane %v14989_v61, %v21007_v9  ;;  %v14490_v56 = vrot.slane %v20105_v35, %v21007_v9 }
 0x2cb   : > { %v15012_v43 = vrot.slane %v14990_v58, %v21007_v9  ;;  %v14987_v17 = vcombine.low %v14979_v6, %v14986_v30  ;;  %v14507_v22 = vcombine.high %v20106_v52, %v20106_v52  ;;  %v24540_v60 = vpop.f32.mrf.mxu1  ;;  %v14497_v3 = vrot.slane %v14483_v41, %v21007_v9 }
 0x2cc   : > { %v15019_v0 = vrot.slane %v14991_v25, %v21007_v9  ;;  %v15020_v23 = vcombine.low %v14998_v26, %v15005_v29  ;;  %v14514_v59 = vrot.slane %v20106_v52, %v21007_v9  ;;  %v15086_v25 = vcombine.low %v24335_v53, %v24338_v45  ;;  %v24551_v26 = vpop.f32.mrf.mxu0 }
 0x2cd   : > { %20636 = vmatprep.mubr.msk.bf16.mxu0 %vm2546_vm1, %v14987_v17  ;;  %v14521_v58 = vrot.slane %v14507_v22, %v21007_v9  ;;  %v20565_v30 = vpop.f32.mrf.mxu1  ;;  %v15037_v35 = vcombine.low %v24253_v50, %v14497_v3  ;;  %v20116_v4 = vcombine.high %v14490_v56, %v14497_v3  ;;  %v3351_v53 = vadd.f32 %v23703_v34, %v23619_v47  ;;  %v26975_v47 = vld [vmem:[#allocation7_spill] sm:$0xff]  ;;  %v26976_v34 = vld [vmem:[#allocation13_spill] sm:$0xff] }
 0x2ce   : > { %v15021_v12 = vcombine.low %v15012_v43, %v15019_v0  ;;  %v15028_v36 = vrot.slane %v15020_v23, %v21007_v9  ;;  %v15093_v56 = vrot.slane %v15086_v25, %v21007_v9  ;;  %v24559_v22 = vpop.f32.mrf.mxu0  ;;  %v3343_v45 = vadd.f32 %v23716_v55, %v23643_v63  ;;  %v26973_v30 = vld [vmem:[#allocation6_spill] sm:$0xff]  ;;  %v26977_v63 = vld [vmem:[#allocation9_spill] sm:$0xff] }
 0x2cf   : > { %v15039_v61 = vcombine.low %v14514_v59, %v14521_v58  ;;  %v20117_v6 = vcombine.high %v14514_v59, %v14521_v58  ;;  %v15047_v52 = vrot.slane %v15037_v35, %v21007_v9  ;;  %v15054_v29 = vrot.slane %v20116_v4, %v21007_v9  ;;  %v26978_v55 = vld [vmem:[#allocation17_spill] sm:$0xff] }
 0x2d0   : > { %v15035_v13 = vrot.slane %v15021_v12, %v21007_v9  ;;  %v3354_v3 = vadd.f32 %v23724_v31, %v23659_v37  ;;  %v3346_v59 = vadd.f32 %v23744_v10, %v23673_v8  ;;  %v3367_v12 = vadd.f32 %v23771_v42, %v23701_v16  ;;  %v26981_v31 = vld [vmem:[#allocation12_spill] sm:$0xff]  ;;  %v26982_v25 = vld [vmem:[#allocation21_spill] sm:$0xff] }
 0x2d1   : > { %v15061_v41 = vrot.slane %v15039_v61, %v21007_v9  ;;  %v15068_v17 = vrot.slane %v20117_v6, %v21007_v9  ;;  %v15069_v50 = vcombine.low %v15047_v52, %v15054_v29  ;;  %v3370_v4 = vadd.f32 %v26976_v34, %v26975_v47  ;;  %v26979_v61 = vld [vmem:[#allocation10_spill] sm:$0xff]  ;;  %v26980_v6 = vld [vmem:[#allocation19_spill] sm:$0xff]  ;;  %v26983_v52 = vld [vmem:[#allocation16_spill] sm:$0xff] }
 0x2d2   : > { %v15036_v43 = vcombine.low %v15028_v36, %v15035_v13  ;;  %v26974_v36 = vld [vmem:[#allocation11_spill] sm:$0xff]  ;;  %v3383_v13 = vadd.f32 %v26978_v55, %v26977_v63  ;;  %v3375_v37 = vadd.f32 %v26980_v6, %v26979_v61  ;;  %v3386_v8 = vadd.f32 %v26982_v25, %v26981_v31  ;;  %v26984_v16 = vld [vmem:[#allocation25_spill] sm:$0xff]  ;;  %v26989_v47 = vld [vmem:[#allocation24_spill] sm:$0xff] }
 0x2d3   : > { %v15070_v0 = vcombine.low %v15061_v41, %v15068_v17  ;;  %v15077_v23 = vrot.slane %v15069_v50, %v21007_v9  ;;  %v3359_v35 = vadd.f32 %v26974_v36, %v26973_v30  ;;  %v3399_v42 = vadd.f32 %v26984_v16, %v26983_v52  ;;  %v26985_v41 = vld [vmem:[#allocation18_spill] sm:$0xff]  ;;  %v26986_v17 = vld [vmem:[#allocation27_spill] sm:$0xff]  ;;  %v26988_v30 = vld [vmem:[#allocation29_spill] sm:$0xff] }
 0x2d4   : > { %20637 = vmatmul.mubr.msk.bf16.gmra.mxu0 %vm2546_vm1, %v15036_v43  ;;  %v15100_v29 = vrot.slane %v15093_v56, %v21007_v9  ;;  %v24586_v43 = vpop.f32.mrf.mxu0  ;;  %v3391_v50 = vadd.f32 %v26986_v17, %v26985_v41  ;;  %v26990_v34 = vld [vmem:[#allocation32_spill] sm:$0xff]  ;;  %v4920_v55 = vadd.f32 %v23963_v51, %v3351_v53  ;;  %v26993_v61 = vld [vmem:[#allocation33_spill] sm:$0xff]  ;;  %v26994_v31 = vld [vmem:[#allocation34_spill] sm:$0xff] }
 0x2d5   : > { %v15084_v58 = vrot.slane %v15070_v0, %v21007_v9  ;;  %v26987_v0 = vld [vmem:[#allocation20_spill] sm:$0xff]  ;;  %v3415_v63 = vadd.f32 %v26990_v34, %v26989_v47  ;;  %v4918_v9 = vadd.f32 %v23978_v46, %v3343_v45  ;;  %v4921_v25 = vadd.f32 %v26994_v31, %v3354_v3  ;;  %v26996_v41 = vld [vmem:[#allocation3_spill] sm:$0xff]  ;;  %v26997_v17 = vld [vmem:[#allocation37_spill] sm:$0xff] }
 0x2d6   : > { %v3402_v36 = vadd.f32 %v26988_v30, %v26987_v0  ;;  %v26992_v56 = vld [vmem:[#allocation28_spill] sm:$0xff]  ;;  %v3431_v0 = vadd.f32 %v26997_v17, %v26996_v41  ;;  %v26998_v30 = vld [vmem:[#allocation38_spill] sm:$0xff]  ;;  %v4925_v46 = vadd.f32 %v24040_v19, %v3370_v4  ;;  %v27004_v31 = vld [vmem:[#allocation45_spill] sm:$0xff]  ;;  %v4932_v19 = vadd.f32 %v24117_v54, %v3399_v42 }
 0x2d7   : > { %v15085_v10 = vcombine.low %v15077_v23, %v15084_v58  ;;  %v26991_v23 = vld [vmem:[#allocation26_spill] sm:$0xff]  ;;  %v3418_v6 = vadd.f32 %v26993_v61, %v26992_v56  ;;  %v26995_v52 = vld [vmem:[#allocation36_spill] sm:$0xff]  ;;  %v4924_v47 = vadd.f32 %v26998_v30, %v3367_v12  ;;  %v24613_v56 = vpop.f32.mrf.mxu0  ;;  %v27006_v17 = vld [vmem:[#allocation47_spill] sm:$0xff]  ;;  %v24619_v30 = vpop.f32.mrf.mxu1 }
 0x2d8   : > { %v3407_v58 = vadd.f32 %v23976_v1, %v26991_v23  ;;  %v4919_v16 = vadd.f32 %v26995_v52, %v3346_v59  ;;  %v26999_v51 = vld [vmem:[#allocation4_spill] sm:$0xff]  ;;  %v27000_v1 = vld [vmem:[#allocation39_spill] sm:$0xff]  ;;  %v27001_v45 = vld [vmem:[#allocation42_spill] sm:$0xff]  ;;  %v6351_v52 = vadd.f32 %v27004_v31, %v4918_v9  ;;  %27007 = vst [vmem:[#allocation6_spill] sm:$0xff] %v24619_v30 }
 0x2d9   : > { %20640 = vmatprep.mubr.msk.bf16.mxu0 %vm2546_vm1, %v15085_v10  ;;  %v3423_v53 = vadd.f32 %v24026_v49, %v26999_v51  ;;  %v4922_v10 = vadd.f32 %v27000_v1, %v3359_v35  ;;  %v4928_v34 = vadd.f32 %v27001_v45, %v3383_v13  ;;  %v27002_v23 = vld [vmem:[#allocation43_spill] sm:$0xff]  ;;  %v27003_v59 = vld [vmem:[#allocation44_spill] sm:$0xff]  ;;  %v27005_v12 = vld [vmem:[#allocation46_spill] sm:$0xff]  ;;  %v6354_v49 = vadd.f32 %v27006_v17, %v4921_v25  ;;  %v24633_v42 = vpop.f32.mrf.mxu0 }
 0x2da   : > { %v6353_v3 = vadd.f32 %v27002_v23, %v4920_v55  ;;  %v4926_v61 = vadd.f32 %v27003_v59, %v3375_v37  ;;  %v4929_v41 = vadd.f32 %v27005_v12, %v3386_v8  ;;  %v27009_v4 = vld [vmem:[#allocation50_spill] sm:$0xff]  ;;  %v27010_v51 = vld [vmem:[#allocation51_spill] sm:$0xff]  ;;  %v27011_v1 = vld [vmem:[#allocation52_spill] sm:$0xff] }
 0x2db   : > { %v6357_v13 = vadd.f32 %v27009_v4, %v4924_v47  ;;  %v4930_v55 = vadd.f32 %v27010_v51, %v3391_v50  ;;  %v6355_v45 = vadd.f32 %v27011_v1, %v4922_v10  ;;  %v27012_v23 = vld [vmem:[#allocation53_spill] sm:$0xff]  ;;  %v27013_v59 = vld [vmem:[#allocation54_spill] sm:$0xff]  ;;  %v27016_v17 = vld [vmem:[#allocation59_spill] sm:$0xff]  ;;  %v4940_v10 = vadd.f32 %v24215_v40, %v3431_v0 }
 0x2dc   : > { %20641 = vmatmul.mubr.msk.bf16.gmra.mxu0 %vm2546_vm1, %v15100_v29  ;;  %v27008_v29 = vld [vmem:[#allocation49_spill] sm:$0xff]  ;;  %v4933_v37 = vadd.f32 %v27012_v23, %v3402_v36  ;;  %v6358_v9 = vadd.f32 %v27013_v59, %v4925_v46  ;;  %v27015_v12 = vld [vmem:[#allocation58_spill] sm:$0xff]  ;;  %v4934_v30 = vadd.f32 %v27016_v17, %v3407_v58  ;;  %v6365_v36 = vadd.f32 %v24217_v18, %v4932_v19  ;;  %v27021_v40 = vld [vmem:[#allocation68_spill] sm:$0xff]  ;;  %v20578_v23 = vpop.f32.mrf.mxu0 }
 0x2dd   : > { %v6352_v35 = vadd.f32 %v27008_v29, %v4919_v16  ;;  %v27014_v31 = vld [vmem:[#allocation57_spill] sm:$0xff]  ;;  %v6361_v25 = vadd.f32 %v27015_v12, %v4928_v34  ;;  %v6359_v16 = vadd.f32 %v27017_v15, %v4926_v61  ;;  %v27019_v47 = vld [vmem:[#allocation62_spill] sm:$0xff]  ;;  %v4938_v46 = vadd.f32 %v24228_v38, %v3423_v53  ;;  %v27023_v38 = vld [vmem:[#allocation71_spill] sm:$0xff] }
 0x2de   : > { %v4936_v8 = vadd.f32 %v27014_v31, %v3415_v63  ;;  %v27018_v29 = vld [vmem:[#allocation61_spill] sm:$0xff]  ;;  %v6362_v50 = vadd.f32 %v27019_v47, %v4929_v41  ;;  %v6363_v63 = vadd.f32 %v24230_v33, %v4930_v55  ;;  %v6366_v34 = vadd.f32 %v24239_v24, %v4933_v37  ;;  %v27020_v41 = vld [vmem:[#allocation67_spill] sm:$0xff]  ;;  %v27022_v18 = vld [vmem:[#allocation70_spill] sm:$0xff] }
 0x2df   : > { %v4937_v54 = vadd.f32 %v27018_v29, %v3418_v6  ;;  %v20596_v4 = vpop.f32.mrf.mxu1  ;;  %v8588_v15 = vadd.f32 %v24261_v2, %v6353_v3  ;;  %v6367_v6 = vadd.f32 %v24271_v27, %v4934_v30  ;;  %v8586_v61 = vadd.f32 %v24273_v28, %v6351_v52  ;;  %v27024_v1 = vld [vmem:[#allocation72_spill] sm:$0xff]  ;;  %v27025_v55 = vld [vmem:[#allocation73_spill] sm:$0xff]  ;;  %v27027_v2 = vld [vmem:[#allocation75_spill] sm:$0xff] }
 0x2e0   : > { %v6369_v58 = vadd.f32 %v24259_v62, %v4936_v8  ;;  %v8589_v0 = vadd.f32 %v27021_v40, %v6354_v49  ;;  %v8587_v19 = vadd.f32 %v27022_v18, %v6352_v35  ;;  %v6373_v53 = vadd.f32 %v27023_v38, %v4940_v10  ;;  %v27026_v62 = vld [vmem:[#allocation74_spill] sm:$0xff]  ;;  %v27029_v59 = vld [vmem:[#allocation79_spill] sm:$0xff]  ;;  %v27030_v31 = vld [vmem:[#allocation80_spill] sm:$0xff] }
 0x2e1   : > { %v6370_v51 = vadd.f32 %v27020_v41, %v4937_v54  ;;  %v8592_v33 = vadd.f32 %v27024_v1, %v6357_v13  ;;  %v6371_v24 = vadd.f32 %v27025_v55, %v4938_v46  ;;  %v8590_v37 = vadd.f32 %v27026_v62, %v6355_v45  ;;  %v27028_v27 = vld [vmem:[#allocation78_spill] sm:$0xff]  ;;  %v13669_v52 = vpop.f32.mrf.mxu1  ;;  %v27031_v8 = vld [vmem:[#allocation81_spill] sm:$0xff]  ;;  %v11462_v41 = vpop.f32.mrf.mxu0 }
 0x2e2   : > { %v8593_v3 = vadd.f32 %v27027_v2, %v6358_v9  ;;  %v8596_v30 = vadd.f32 %v27028_v27, %v6361_v25  ;;  %v10097_v28 = vadd.f32 %v24354_v57, %v8588_v15  ;;  %v8594_v49 = vadd.f32 %v27029_v59, %v6359_v16  ;;  %v27032_v17 = vld [vmem:[#allocation82_spill] sm:$0xff]  ;;  %v27033_v29 = vld [vmem:[#allocation85_spill] sm:$0xff]  ;;  %v27035_v25 = vld [vmem:[#allocation87_spill] sm:$0xff] }
 0x2e3   : > { %v10095_v35 = vadd.f32 %v27030_v31, %v8586_v61  ;;  %v8597_v12 = vadd.f32 %v27031_v8, %v6362_v50  ;;  %v10098_v13 = vadd.f32 %v27032_v17, %v8589_v0  ;;  %v8600_v54 = vadd.f32 %v27033_v29, %v6365_v36  ;;  %v27034_v47 = vld [vmem:[#allocation86_spill] sm:$0xff]  ;;  %v27036_v57 = vld [vmem:[#allocation88_spill] sm:$0xff]  ;;  %v27038_v0 = vld [vmem:[#allocation93_spill] sm:$0xff] }
 0x2e4   : > { %v10101_v10 = vadd.f32 %v27034_v47, %v8592_v33  ;;  %v8598_v45 = vadd.f32 %v24404_v7, %v6363_v63  ;;  %v10105_v9 = vadd.f32 %v24428_v14, %v8596_v30  ;;  %v10099_v46 = vadd.f32 %v27035_v25, %v8590_v37  ;;  %v27037_v50 = vld [vmem:[#allocation92_spill] sm:$0xff]  ;;  %v27039_v36 = vld [vmem:[#allocation94_spill] sm:$0xff]  ;;  %v20597_v7 = vpop.f32.mrf.mxu1  ;;  %v27040_v33 = vld [vmem:[#allocation97_spill] sm:$0xff] }
 0x2e5   : > { %v8601_v15 = vadd.f32 %v27036_v57, %v6366_v34  ;;  %v10103_v16 = vadd.f32 %v24440_v21, %v8594_v49  ;;  %v10106_v61 = vadd.f32 %v24451_v20, %v8597_v12  ;;  %v8604_v40 = vadd.f32 %v27037_v50, %v6369_v58  ;;  %v27041_v55 = vld [vmem:[#allocation98_spill] sm:$0xff]  ;;  %v27042_v62 = vld [vmem:[#allocation101_spill] sm:$0xff]  ;;  %v27044_v58 = vld [vmem:[#allocation103_spill] sm:$0xff] }
 0x2e6   : > { %v8602_v18 = vadd.f32 %v27038_v0, %v6367_v6  ;;  %v8605_v38 = vadd.f32 %v27039_v36, %v6370_v51  ;;  %v10109_v1 = vadd.f32 %v24468_v44, %v8600_v54  ;;  %v8608_v14 = vadd.f32 %v24466_v32, %v6373_v53  ;;  %v27043_v37 = vld [vmem:[#allocation102_spill] sm:$0xff]  ;;  %v27045_v51 = vld [vmem:[#allocation84_spill] sm:$0xff]  ;;  %v27046_v44 = vld [vmem:[#allocation89_spill] sm:$0xff]  ;;  %v20579_v53 = vpop.f32.mrf.mxu0 }
 0x2e7   : > { %v8606_v63 = vadd.f32 %v24473_v48, %v6371_v24  ;;  %v10107_v34 = vadd.f32 %v27040_v33, %v8598_v45  ;;  %v10110_v21 = vadd.f32 %v27041_v55, %v8601_v15  ;;  %v10113_v20 = vadd.f32 %v27042_v62, %v8604_v40  ;;  %v27047_v49 = vld [vmem:[#allocation104_spill] sm:$0xff]  ;;  %v27053_v0 = vld [vmem:[#allocation91_spill] sm:$0xff] }
 0x2e8   : > { %v11526_v2 = vadd.f32 %v27043_v37, %v10097_v28  ;;  %v10111_v27 = vadd.f32 %v27044_v58, %v8602_v18  ;;  %v11524_v6 = vadd.f32 %v24522_v11, %v10095_v35  ;;  %v10096_v30 = vadd.f32 %v27045_v51, %v8587_v19  ;;  %v13672_v11 = vpop.f32.mrf.mxu1  ;;  %v27051_v57 = vld [vmem:[#allocation56_spill] sm:$0xff]  ;;  %v27055_v55 = vld [vmem:[#allocation35_spill] sm:$0xff]  ;;  %v27057_v58 = vld [vmem:[#allocation69_spill] sm:$0xff] }
 0x2e9   : > { %v10102_v59 = vadd.f32 %v27046_v44, %v8593_v3  ;;  %v10114_v32 = vadd.f32 %v27047_v49, %v8605_v38  ;;  %v11527_v48 = vadd.f32 %v24538_v39, %v10098_v13  ;;  %v24684_v24 = vadd.f32 %v24531_v5, %v8608_v14  ;;  %v27056_v62 = vld [vmem:[#allocation63_spill] sm:$0xff] }
 0x2ea   : > { %v11530_v31 = vadd.f32 %v24559_v22, %v10101_v10  ;;  %v24688_v28 = vadd.f32 %v24540_v60, %v8606_v63  ;;  %v11528_v8 = vadd.f32 %v24586_v43, %v10099_v46  ;;  %v11525_v19 = vadd.f32 %v24551_v26, %v10096_v30  ;;  %v11465_v22 = vpop.f32.mrf.mxu0  ;;  %v27058_v44 = vld [vmem:[#allocation95_spill] sm:$0xff] }
 0x2eb   : > { %v11531_v3 = vadd.f32 %v24613_v56, %v10102_v59  ;;  %v11534_v35 = vadd.f32 %v20578_v23, %v10105_v9  ;;  %v24693_v12 = vadd.f32 %v20596_v4, %v11526_v2  ;;  %v11532_v39 = vadd.f32 %v11462_v41, %v10103_v16  ;;  %v20874_v4 = vld [vmem:[%s26843_s4] ss:$0 sps:$4 sm:$0xcc]   ;;  %v27048_v23 = vld [vmem:[#allocation8_spill] sm:$0xff]  ;;  %v27050_v9 = vld [vmem:[#allocation41_spill] sm:$0xff] }
 0x2ec   : > { %v24695_v17 = vadd.f32 %v13669_v52, %v11524_v6  ;;  %v11535_v5 = vadd.f32 %v20579_v53, %v10106_v61  ;;  %v24697_v13 = vadd.f32 %v20597_v7, %v11527_v48  ;;  %v24699_v29 = vadd.f32 %v13672_v11, %v11525_v19  ;;  %v27049_v52 = vld [vmem:[#allocation15_spill] sm:$0xff]  ;;  %v27052_v61 = vld [vmem:[#allocation77_spill] sm:$0xff]  ;;  %v27059_v48 = vld [vmem:[#allocation14_spill] sm:$0xff] }
 0x2ed   : > { %v3362_v10 = vadd.f32 %v27049_v52, %v27048_v23  ;;  %v17826_v45 = vrot.slane %v20874_v4, 2  ;;  %v27060_v53 = vld [vmem:[#allocation23_spill] sm:$0xff]  ;;  %v27063_v4 = vld [vmem:[#allocation64_spill] sm:$0xff] }
 0x2ef   : > { %v4923_v25 = vadd.f32 %v27050_v9, %v3362_v10  ;;  %20818 = vmatprep.subr.msk.bf16.mxu1 %vm26865_vm0, %v17826_v45  ;;  %v17852_v46 = vsel %vm26865_vm0, %v17826_v45, 0  ;;  %v27064_v10 = vld [vmem:[#allocation83_spill] sm:$0xff] }
 0x2f0   : > { %20645 = vmatpush3.bf16.msra.mxu1 %v17852_v46 }
 0x2f1   : > { %v6356_v15 = vadd.f32 %v27051_v57, %v4923_v25 }
 0x2f3   : > { %v20582_v60 = vpop.f32.mrf.mxu0  ;;  %v8591_v41 = vadd.f32 %v27052_v61, %v6356_v15 }
 0x2f4   : > { %v24701_v54 = vadd.f32 %v20582_v60, %v10109_v1  ;;  %v27062_v60 = vld [vmem:[#allocation48_spill] sm:$0xff] }
 0x2f5   : > { %v11478_v43 = vpop.f32.mrf.mxu0  ;;  %v10100_v18 = vadd.f32 %v27053_v0, %v8591_v41  ;;  %v27066_v41 = vld [vmem:[#allocation5_spill] sm:$0xff] }
 0x2f6   : > { %v24703_v47 = vadd.f32 %v11478_v43, %v10107_v34  ;;  %v27054_v34 = vld [vmem:[#allocation30_spill] sm:$0xff] }
 0x2f7   : > { %v20583_v26 = vpop.f32.mrf.mxu0  ;;  %v11529_v1 = vadd.f32 %v24633_v42, %v10100_v18  ;;  %v27068_v18 = vld [vmem:[#allocation65_spill] sm:$0xff] }
 0x2f8   : > { %v24705_v56 = vadd.f32 %v20583_v26, %v10110_v21  ;;  %v3410_v21 = vadd.f32 %v27055_v55, %v27054_v34  ;;  %v27070_v55 = vld [vmem:[#allocation99_spill] sm:$0xff] }
 0x2f9   : > { %v11481_v33 = vpop.f32.mrf.mxu0 }
 0x2fa   : > { %v4935_v37 = vadd.f32 %v27056_v62, %v3410_v21  ;;  %v27071_v62 = vld [vmem:[#allocation6_spill] sm:$0xff] }
 0x2fc   : > { %v6368_v6 = vadd.f32 %v27057_v58, %v4935_v37 }
 0x2fe   : > { %v8603_v59 = vadd.f32 %v27058_v44, %v6368_v6  ;;  %v27072_v6 = vld [vmem:[#allocation22_spill] sm:$0xff] }
 0x2ff   : > { %v20600_v16 = vpop.f32.mrf.mxu1 }
 0x300   : > { %v24717_v50 = vadd.f32 %v20600_v16, %v11530_v31  ;;  %v3378_v31 = vadd.f32 %v27060_v53, %v27059_v48  ;;  %v27075_v48 = vld [vmem:[#allocation66_spill] sm:$0xff] }
 0x301   : > { %v13685_v40 = vpop.f32.mrf.mxu1 }
 0x302   : > { %v24720_v36 = vadd.f32 %v13685_v40, %v11528_v8  ;;  %v27061_v8 = vld [vmem:[#allocation105_spill] sm:$0xff]  ;;  %v4927_v43 = vadd.f32 %v27062_v60, %v3378_v31  ;;  %v27067_v40 = vld [vmem:[#allocation40_spill] sm:$0xff]  ;;  %v27076_v31 = vld [vmem:[#allocation90_spill] sm:$0xff] }
 0x303   : > { %v20601_v38 = vpop.f32.mrf.mxu1  ;;  %v10112_v11 = vadd.f32 %v27061_v8, %v8603_v59  ;;  %v3426_v0 = vadd.f32 %v27067_v40, %v27066_v41  ;;  %v27074_v59 = vld [vmem:[#allocation55_spill] sm:$0xff] }
 0x304   : > { %v24723_v7 = vadd.f32 %v20601_v38, %v11531_v3  ;;  %v6360_v23 = vadd.f32 %v27063_v4, %v4927_v43 }
 0x305   : > { %v13688_v14 = vpop.f32.mrf.mxu1  ;;  %v4939_v38 = vadd.f32 %v27068_v18, %v3426_v0 }
 0x306   : > { %v24725_v63 = vadd.f32 %v13688_v14, %v11529_v1 }
 0x314   : > { %v20586_v2 = vpop.f32.mrf.mxu0 }
 0x315   : > { %v11542_v51 = vadd.f32 %v20586_v2, %v10113_v20  ;;  %v8595_v20 = vadd.f32 %v27064_v10, %v6360_v23 }
 0x316   : > { %v11494_v30 = vpop.f32.mrf.mxu0 }
 0x317   : > { %v11540_v49 = vadd.f32 %v11494_v30, %v10111_v27  ;;  %v27065_v27 = vld [vmem:[#allocation96_spill] sm:$0xff]  ;;  %v27073_v30 = vld [vmem:[#allocation31_spill] sm:$0xff] }
 0x318   : > { %v20587_v42 = vpop.f32.mrf.mxu0  ;;  %v10104_v25 = vadd.f32 %v27065_v27, %v8595_v20  ;;  %v3394_v44 = vadd.f32 %v27073_v30, %v27072_v6 }
 0x319   : > { %v11543_v19 = vadd.f32 %v20587_v42, %v10114_v32 }
 0x31a   : > { %v11497_v3 = vpop.f32.mrf.mxu0  ;;  %v11533_v15 = vadd.f32 %v11465_v22, %v10104_v25  ;;  %v4931_v42 = vadd.f32 %v27074_v59, %v3394_v44 }
 0x31b   : > { %v11541_v26 = vadd.f32 %v11497_v3, %v10112_v11  ;;  %v27077_v3 = vld [vmem:[#allocation100_spill] sm:$0xff] }
 0x31e   : > { %v20604_v52 = vpop.f32.mrf.mxu1 }
 0x31f   : > { %v24738_v45 = vadd.f32 %v20604_v52, %v11534_v35  ;;  %v27069_v35 = vld [vmem:[#allocation76_spill] sm:$0xff] }
 0x320   : > { %v13701_v9 = vpop.f32.mrf.mxu1  ;;  %v6372_v14 = vadd.f32 %v27069_v35, %v4939_v38 }
 0x321   : > { %v24741_v46 = vadd.f32 %v13701_v9, %v11532_v39  ;;  %v20923_v9 = vmov 1983009808  }
 0x322   : > { %v20605_v57 = vpop.f32.mrf.mxu1  ;;  %v8607_v21 = vadd.f32 %v27070_v55, %v6372_v14  ;;  %v15316_v27 = vunpack.c.l.s4 %v20923_v9 }
 0x323   : > { %v24743_v16 = vadd.f32 %v20605_v57, %v11535_v5 }
 0x324   : > { %v13704_v32 = vpop.f32.mrf.mxu1  ;;  %v10116_v37 = vadd.f32 %v27071_v62, %v8607_v21  ;;  %v15317_v25 = vunpack.c.0.s8 %v15316_v27 }
 0x325   : > { %v24745_v61 = vadd.f32 %v13704_v32, %v11533_v15  ;;  %v27079_v15 = vld [vmem:[#allocation2_spill] sm:$0xff] }
 0x326   : > { %v24781_v32 = vsub.s32 %v15317_v25, %v27079_v15  ;;  %vm17018_vm12 = vcmp.ge.s32.totalorder %v27079_v15, 1 }
 0x32c   : > { %v20590_v1 = vpop.f32.mrf.mxu0 }
 0x32d   : > { %v24752_v34 = vadd.f32 %v20590_v1, %v24684_v24  ;;  %v6364_v24 = vadd.f32 %v27075_v48, %v4931_v42  ;;  %v24841_v48 = vld [vmem:[%s26842_s3] ss:$0 sm:$0xff] }
 0x32e   : > { %v11510_v39 = vpop.f32.mrf.mxu0 }
 0x32f   : > { %v24756_v5 = vadd.f32 %v11510_v39, %v24688_v28  ;;  %v8599_v8 = vadd.f32 %v27076_v31, %v6364_v24 }
 0x330   : > { %v20591_v22 = vpop.f32.mrf.mxu0 }
 0x331   : > { %v10108_v60 = vadd.f32 %v27077_v3, %v8599_v8 }
 0x332   : > { %v11513_v2 = vpop.f32.mrf.mxu0 }
 0x333   : > { %v24759_v58 = vadd.f32 %v11513_v2, %v10116_v37  ;;  %v11537_v23 = vadd.f32 %v11481_v33, %v10108_v60 }
 0x33b   : > { %v20608_v53 = vpop.f32.mrf.mxu1 }
 0x33c   : > { %v24767_v11 = vadd.f32 %v20608_v53, %v24701_v54 }
 0x33d   : > { %v13717_v28 = vpop.f32.mrf.mxu1 }
 0x33e   : > { %v24771_v43 = vadd.f32 %v13717_v28, %v24703_v47 }
 0x33f   : > { %v20609_v4 = vpop.f32.mrf.mxu1 }
 0x340   : > { %v24774_v52 = vadd.f32 %v20609_v4, %v24705_v56  ;;  %v24849_v4 = vstv %s20131_s20 }
 0x341   : > { %v13720_v10 = vpop.f32.mrf.mxu1  ;;  %27083 = vst [vmem:[#allocation17_spill] sm:$0xff] %v24849_v4  ;;  %vm16988_vm2 = vcmp.ge.s32.totalorder %v24849_v4, 0  ;;  %vm16998_vm3 = vcmp.lt.s32.totalorder %v24849_v4, 16 }
 0x342   : > { %v24776_v20 = vadd.f32 %v13720_v10, %v11537_v23  ;;  %vm24906_vm10 = vmand %vm16988_vm2, %vm16998_vm3 }
 0x357   : > { %v20612_v57 = vpop.f32.mrf.mxu1 }
 0x358   : > { %v24778_v54 = vadd.f32 %v20612_v57, %v11542_v51 }
 0x359   : > { %v13733_v41 = vpop.f32.mrf.mxu1  ;;  %v20622_v47 = vpop.f32.mrf.mxu0 }
 0x35a   : > { %27078 = vst [vmem:[#allocation11_spill] sm:$0xff] %v24778_v54  ;;  %v24783_v40 = vadd.f32 %v13733_v41, %v11540_v49  ;;  %v15270_v33 = vadd.f32 %v20622_v47, %v24693_v12  ;;  %v18108_v49 = vld [vmem:[%s26843_s4 + $0x4] sm:$0x3] }
 0x35b   : > { %v20613_v56 = vpop.f32.mrf.mxu1  ;;  %v15174_v0 = vpop.f32.mrf.mxu0  ;;  %20820 = vmatprep.subr.msk.bf16.mxu0 %vm26865_vm0, %v18108_v49  ;;  %v18134_v3 = vsel %vm26865_vm0, %v18108_v49, 0 }
 0x35c   : > { %27080 = vst [vmem:[#allocation7_spill] sm:$0xff] %v24783_v40  ;;  %v24786_v18 = vadd.f32 %v20613_v56, %v11543_v19  ;;  %v15348_v38 = vcombine.high %v15270_v33, %v15270_v33  ;;  %v24789_v1 = vrot.slane %v15270_v33, %v24781_v32  ;;  %v15268_v51 = vadd.f32 %v15174_v0, %v24695_v17 }
 0x35d   : > { %v13736_v35 = vpop.f32.mrf.mxu1  ;;  %v20623_v14 = vpop.f32.mrf.mxu0  ;;  %20681 = vmatpush3.bf16.msra.mxu0 %v18134_v3 }
 0x35e   : > { %27081 = vst [vmem:[#allocation13_spill] sm:$0xff] %v24786_v18  ;;  %v24792_v39 = vadd.f32 %v13736_v35, %v11541_v26  ;;  %v24798_v12 = vrot.slane %v15348_v38, %v24781_v32  ;;  %v15363_v19 = vcombine.high %v24789_v1, %v24789_v1  ;;  %v15314_v55 = vcombine.high %v15268_v51, %v15268_v51 }
 0x35f   : > { %v24804_v17 = vrot.slane %v15268_v51, %v24781_v32  ;;  %v24807_v21 = vadd.f32 %v20623_v14, %v24697_v13  ;;  %v15177_v59 = vpop.f32.mrf.mxu0  ;;  %v15923_v42 = vrot.slane %v24789_v1, %v24781_v32  ;;  %v24868_v38 = vadd.s32 16, %v27079_v15 }
 0x360   : > { %27082 = vst [vmem:[#allocation9_spill] sm:$0xff] %v24792_v39  ;;  %v15364_v26 = vcombine.high %v24798_v12, %v24798_v12  ;;  %v24812_v22 = vrot.slane %v15314_v55, %v24781_v32  ;;  %v15924_v2 = vcombine.low %v15363_v19, %v24798_v12  ;;  %v15269_v28 = vadd.f32 %v15177_v59, %v24699_v29 }
 0x361   : > { %v24816_v62 = vcombine.high %v24804_v17, %v24804_v17  ;;  %v24820_v37 = vrot.slane %v24807_v21, %v24781_v32  ;;  %v16325_v23 = vmul.f32 %v24841_v48, %v15923_v42  ;;  %vm15795_vm4 = vcmp.ge.f32.partialorder %v24789_v1, 0.0 }
 0x362   : > { %v24825_v13 = vcombine.high %v24812_v22, %v24812_v22  ;;  %v15932_v24 = vrot.slane %v15924_v2, %v24781_v32  ;;  %v15331_v9 = vcombine.high %v15269_v28, %v15269_v28  ;;  %v24853_v27 = vrot.slane %v15269_v28, %v24781_v32 }
 0x363   : > { %v15883_v6 = vcombine.low %v24804_v17, %v24816_v62  ;;  %v15925_v44 = vcombine.low %v15364_v26, %v24820_v37  ;;  %v16423_v51 = vrot.slane %v16325_v23, %v24781_v32  ;;  %vm15796_vm5 = vcmp.ge.f32.partialorder %v15363_v19, 0.0 }
 0x364   : > { %v15884_v30 = vcombine.low %v24812_v22, %v24825_v13  ;;  %v24857_v41 = vrot.slane %v15331_v9, %v24781_v32  ;;  %v24861_v29 = vcombine.high %v24853_v27, %v24853_v27  ;;  %vm15797_vm6 = vcmp.ge.f32.partialorder %v24798_v12, 0.0 }
 0x365   : > { %v15939_v31 = vrot.slane %v15925_v44, %v24781_v32  ;;  %v15891_v8 = vrot.slane %v15883_v6, %v24781_v32  ;;  %v15365_v44 = vcombine.high %v24807_v21, %v24807_v21  ;;  %vm15798_vm7 = vcmp.ge.f32.partialorder %v15364_v26, 0.0 }
 0x366   : > { %v15898_v53 = vrot.slane %v15884_v30, %v24781_v32  ;;  %v24875_v14 = vcombine.high %v24857_v41, %v24857_v41  ;;  %v15900_v49 = vcombine.low %v24853_v27, %v24861_v29  ;;  %vm15799_vm8 = vcmp.ge.f32.partialorder %v24820_v37, 0.0 }
 0x367   : > { %v15940_v60 = vcombine.low %v15932_v24, %v15939_v31  ;;  %v16891_v42 = vsel %vm15795_vm4, %v24789_v1, %v16423_v51  ;;  %v16975_v21 = vadd.s32 1, %v24849_v4  ;;  %v24896_v9 = vrot.slane %v15365_v44, %v24781_v32 }
 0x368   : > { %v15899_v10 = vcombine.low %v15891_v8, %v15898_v53  ;;  %v15901_v30 = vcombine.low %v24857_v41, %v24875_v14  ;;  %vm26857_vm9 = vcmp.le.s32.totalorder %v24868_v38, 16  ;;  %vm15787_vm15 = vcmp.ge.f32.partialorder %v24804_v17, 0.0 }
 0x369   : > { %v16326_v25 = vmul.f32 %v24841_v48, %v15940_v60  ;;  %vm16989_vm11 = vcmp.ge.s32.totalorder %v16975_v21, 0  ;;  %vm17056_vm13 = vmand %vm24906_vm10, %vm26857_vm9  ;;  %vm16999_vm14 = vcmp.lt.s32.totalorder %v16975_v21, 16  ;;  %vm15788_vm2 = vcmp.ge.f32.partialorder %v24816_v62, 0.0 }
 0x36a   : > { %v16323_v35 = vmul.f32 %v24841_v48, %v15899_v10  ;;  %v15915_v3 = vrot.slane %v15901_v30, %v24781_v32  ;;  %vm15789_vm3 = vcmp.ge.f32.partialorder %v24812_v22, 0.0  ;;  %vm15790_vm4 = vcmp.ge.f32.partialorder %v24825_v13, 0.0 }
 0x36b   : > { %v16424_v33 = vcombine.high %v16326_v25, %v16326_v25  ;;  %v16431_v56 = vrot.slane %v16326_v25, %v24781_v32  ;;  %v27086_v25 = vmov 0 }
 0x36c   : > { %v20616_v57 = vpop.f32.mrf.mxu1  ;;  %v16383_v24 = vcombine.high %v16323_v35, %v16323_v35  ;;  %v27087_v25 = vsel %vm24906_vm10, 4294967295, %v27086_v25 }
 0x36d   : > { %v24864_v47 = vadd.f32 %v20616_v57, %v24752_v34  ;;  %v16438_v34 = vrot.slane %v16424_v33, %v24781_v32  ;;  %v16439_v2 = vcombine.high %v16431_v56, %v16431_v56  ;;  %v16892_v6 = vsel %vm15796_vm5, %v15363_v19, %v16431_v56  ;;  %27088 = vst [vmem:[#allocation12_spill] sm:$0xff] %v27087_v25 }
 0x36e   : > { %v13749_v0 = vpop.f32.mrf.mxu1  ;;  %v15908_v19 = vrot.slane %v15900_v49, %v24781_v32  ;;  %v24913_v57 = vcombine.high %v24820_v37, %v24820_v37  ;;  %v16390_v56 = vrot.slane %v16323_v35, %v24781_v32  ;;  %vm15792_vm5 = vcmp.ge.f32.partialorder %v24861_v29, 0.0 }
 0x36f   : > { %27084 = vst [vmem:[#allocation10_spill] sm:$0xff] %v24864_v47  ;;  %v16440_v59 = vcombine.high %v16438_v34, %v16438_v34  ;;  %v16893_v53 = vsel %vm15797_vm6, %v24798_v12, %v16439_v2  ;;  %v16894_v31 = vsel %vm15798_vm7, %v15364_v26, %v16438_v34  ;;  %v24899_v12 = vadd.f32 %v13749_v0, %v24756_v5 }
 0x370   : > { %v20617_v55 = vpop.f32.mrf.mxu1  ;;  %v17275_v28 = vcombine.low %v16892_v6, %v16893_v53  ;;  %v15916_v1 = vcombine.low %v15908_v19, %v15915_v3  ;;  %v16397_v0 = vrot.slane %v16383_v24, %v24781_v32  ;;  %v16398_v44 = vcombine.high %v16390_v56, %v16390_v56 }
 0x371   : > { %v16895_v8 = vsel %vm15799_vm8, %v24820_v37, %v16440_v59  ;;  %27085 = vst [vmem:[#allocation19_spill] sm:$0xff] %v24899_v12  ;;  %v24953_v19 = vcombine.high %v24896_v9, %v24896_v9  ;;  %vm15794_vm6 = vcmp.ge.f32.partialorder %v24875_v14, 0.0  ;;  %vm15800_vm7 = vcmp.ge.f32.partialorder %v24913_v57, 0.0  ;;  %vm24999_vm8 = vmand %vm16989_vm11, %vm16999_vm14 }
 0x372   : > { %v17276_v23 = vcombine.low %v16894_v31, %v16895_v8  ;;  %v24916_v5 = vrot.slane %v17275_v28, %v24781_v32  ;;  %v16324_v51 = vmul.f32 %v24841_v48, %v15916_v1  ;;  %v16399_v59 = vcombine.high %v16397_v0, %v16397_v0 }
 0x373   : > { %vm15801_vm11 = vcmp.ge.f32.partialorder %v24896_v9, 0.0  ;;  %vm15802_vm14 = vcmp.ge.f32.partialorder %v24953_v19, 0.0 }
 0x374   : > { %v24919_v33 = vrot.slane %v17276_v23, %v24781_v32  ;;  %v16400_v30 = vcombine.high %v16324_v51, %v16324_v51  ;;  %v24941_v24 = vrot.slane %v16324_v51, %v24781_v32  ;;  %v24991_v51 = vsel %vm15789_vm3, %v24812_v22, %v16397_v0 }
 0x375   : > { %v20626_v60 = vpop.f32.mrf.mxu0 }
 0x376   : > { %v15274_v10 = vadd.f32 %v20626_v60, %v24717_v50  ;;  %v17274_v50 = vrot.slane %v16891_v42, %v24781_v32  ;;  %v17291_v37 = vcombine.low %v24916_v5, %v24919_v33  ;;  %v24986_v33 = vsel %vm15788_vm2, %v24816_v62, %v16398_v44 }
 0x377   : > { %v15190_v26 = vpop.f32.mrf.mxu0  ;;  %v16415_v62 = vcombine.high %v24941_v24, %v24941_v24 }
 0x378   : > { %v15272_v34 = vadd.f32 %v15190_v26, %v24720_v36  ;;  %v15416_v35 = vcombine.high %v15274_v10, %v15274_v10  ;;  %v24933_v55 = vrot.slane %v15274_v10, %v24781_v32  ;;  %v15941_v36 = vcombine.low %v24913_v57, %v24896_v9 }
 0x379   : > { %v20627_v49 = vpop.f32.mrf.mxu0  ;;  %v17676_v42 = vsel %vm17056_vm13, %v17274_v50, 0.0  ;;  %v24974_v26 = vsel %vm15787_vm15, %v24804_v17, %v16390_v56  ;;  %v24994_v17 = vsel %vm15790_vm4, %v24825_v13, %v16399_v59  ;;  %vm25009_vm13 = vmand %vm24999_vm8, %vm17018_vm12 }
 0x37a   : > { %v15382_v2 = vcombine.high %v15272_v34, %v15272_v34  ;;  %v24944_v53 = vrot.slane %v15272_v34, %v24781_v32  ;;  %v15275_v8 = vadd.f32 %v20627_v49, %v24723_v7  ;;  %v24956_v3 = vrot.slane %v15416_v35, %v24781_v32 }
 0x37b   : > { %v15193_v6 = vpop.f32.mrf.mxu0  ;;  %v24960_v60 = vcombine.high %v24933_v55, %v24933_v55  ;;  %v15949_v23 = vrot.slane %v15941_v36, %v24781_v32  ;;  %v24965_v7 = vrot.slane %v16400_v30, %v24781_v32  ;;  %v24969_v1 = vpack.c.bf16 %v17676_v42, %v17676_v42 }
 0x37c   : > { %v24947_v31 = vrot.slane %v15382_v2, %v24781_v32  ;;  %v15942_v5 = vcombine.low %v24953_v19, %v24944_v53  ;;  %v25015_v13 = vcombine.high %v24956_v3, %v24956_v3  ;;  %v16005_v0 = vrot.slane %v24956_v3, %v24781_v32 }
 0x37d   : > { %v15983_v21 = vcombine.low %v24933_v55, %v24960_v60  ;;  %v16416_v49 = vcombine.high %v24965_v7, %v24965_v7  ;;  %v25027_v35 = vcombine.high %v24944_v53, %v24944_v53  ;;  %v15433_v2 = vcombine.high %v15275_v8, %v15275_v8 }
 0x37e   : > { %v20630_v28 = vpop.f32.mrf.mxu0  ;;  %v24979_v50 = vcombine.high %v24947_v31, %v24947_v31  ;;  %v15956_v34 = vrot.slane %v15942_v5, %v24781_v32  ;;  %v25031_v36 = vrot.slane %v15275_v8, %v24781_v32  ;;  %v25043_v4 = vsel %vm25009_vm13, %v17291_v37, 0.0 }
 0x37f   : > { %v25048_v8 = vsel %vm15792_vm5, %v24861_v29, %v16415_v62  ;;  %v25051_v25 = vrot.slane %v15433_v2, %v24781_v32  ;;  %v15273_v22 = vadd.f32 %v15193_v6, %v24725_v63  ;;  %v25067_v29 = vsel %vm15794_vm6, %v24875_v14, %v16416_v49 }
 0x380   : > { %v24967_v10 = vpop.f32.mrf.mxu0  ;;  %v15957_v42 = vcombine.low %v15949_v23, %v15956_v34  ;;  %v15965_v5 = vcombine.low %v24947_v31, %v24979_v50  ;;  %v25055_v44 = vcombine.high %v25031_v36, %v25031_v36  ;;  %v25058_v23 = vrot.slane %v15983_v21, %v24781_v32 }
 0x381   : > { %v16006_v37 = vcombine.low %v25015_v13, %v25031_v36  ;;  %v25070_v62 = vmul.f32 %v24841_v48, %v16005_v0  ;;  %v15964_v2 = vrot.slane %v25027_v35, %v24781_v32  ;;  %vm15803_vm15 = vcmp.ge.f32.partialorder %v24944_v53, 0.0 }
 0x382   : > { %v25033_v30 = vpop.f32.mrf.mxu0  ;;  %v16327_v34 = vmul.f32 %v24841_v48, %v15957_v42  ;;  %v16007_v21 = vcombine.low %v25055_v44, %v25051_v25  ;;  %v15973_v63 = vrot.slane %v15965_v5, %v24781_v32  ;;  %v15399_v49 = vcombine.high %v15273_v22, %v15273_v22 }
 0x383   : > { %v16014_v14 = vrot.slane %v16006_v37, %v24781_v32  ;;  %v25084_v15 = vrot.slane %v15273_v22, %v24781_v32  ;;  %v15278_v5 = vadd.f32 %v20630_v28, %v24738_v45  ;;  %v25092_v18 = vmul.f32 %v24841_v48, %v15964_v2 }
 0x384   : > { %v25076_v42 = vpop.f32.mrf.mxu0  ;;  %v16441_v6 = vcombine.high %v16327_v34, %v16327_v34  ;;  %v16448_v59 = vrot.slane %v16327_v34, %v24781_v32  ;;  %v16021_v0 = vrot.slane %v16007_v21, %v24781_v32  ;;  %v25095_v37 = vrot.slane %v15399_v49, %v24781_v32 }
 0x385   : > { %v25099_v22 = vcombine.high %v25084_v15, %v25084_v15  ;;  %vm15814_vm2 = vcmp.ge.f32.partialorder %v25015_v13, 0.0  ;;  %vm15815_vm3 = vcmp.ge.f32.partialorder %v25031_v36, 0.0  ;;  %vm15816_vm4 = vcmp.ge.f32.partialorder %v25055_v44, 0.0 }
 0x386   : > { %v16455_v12 = vrot.slane %v16441_v6, %v24781_v32  ;;  %v16456_v47 = vcombine.high %v16448_v59, %v16448_v59  ;;  %v16896_v39 = vsel %vm15800_vm7, %v24913_v57, %v16448_v59  ;;  %v16022_v34 = vcombine.low %v16014_v14, %v16021_v0 }
 0x387   : > { %v25114_v2 = vcombine.high %v25095_v37, %v25095_v37  ;;  %vm15817_vm5 = vcmp.ge.f32.partialorder %v25051_v25, 0.0  ;;  %vm15805_vm6 = vcmp.ge.f32.partialorder %v24947_v31, 0.0  ;;  %vm15806_vm7 = vcmp.ge.f32.partialorder %v24979_v50, 0.0 }
 0x388   : > { %v16457_v6 = vcombine.high %v16455_v12, %v16455_v12  ;;  %v16897_v57 = vsel %vm15801_vm11, %v24896_v9, %v16456_v47  ;;  %v16898_v45 = vsel %vm15802_vm14, %v24953_v19, %v16455_v12  ;;  %v16332_v59 = vmul.f32 %v24841_v48, %v16022_v34 }
 0x389   : > { %v17292_v28 = vcombine.low %v16896_v39, %v16897_v57  ;;  %v15966_v9 = vcombine.low %v25084_v15, %v25099_v22  ;;  %v15484_v39 = vcombine.high %v15278_v5, %v15278_v5  ;;  %v25134_v57 = vrot.slane %v15278_v5, %v24781_v32 }
 0x38a   : > { %v25101_v21 = vpop.f32.mrf.mxu0  ;;  %v16899_v47 = vsel %vm15803_vm15, %v24944_v53, %v16457_v6  ;;  %v16506_v19 = vcombine.high %v16332_v59, %v16332_v59  ;;  %v16513_v0 = vrot.slane %v16332_v59, %v24781_v32  ;;  %v15982_v6 = vcombine.low %v25095_v37, %v25114_v2 }
 0x38b   : > { %v17293_v12 = vcombine.low %v16898_v45, %v16899_v47  ;;  %v17300_v34 = vrot.slane %v17292_v28, %v24781_v32  ;;  %v15980_v53 = vrot.slane %v15966_v9, %v24781_v32  ;;  %vm15807_vm13 = vcmp.ge.f32.partialorder %v25084_v15, 0.0 }
 0x38c   : > { %v25116_v14 = vpop.f32.mrf.mxu0  ;;  %v16520_v47 = vrot.slane %v16506_v19, %v24781_v32  ;;  %v16521_v40 = vcombine.high %v16513_v0, %v16513_v0  ;;  %v16910_v59 = vsel %vm15814_vm2, %v25015_v13, %v16513_v0  ;;  %v15990_v9 = vrot.slane %v15982_v6, %v24781_v32 }
 0x38d   : > { %v17307_v45 = vrot.slane %v17293_v12, %v24781_v32  ;;  %v15981_v28 = vcombine.low %v15973_v63, %v15980_v53  ;;  %v25147_v5 = vrot.slane %v15484_v39, %v24781_v32  ;;  %vm15811_vm11 = vcmp.ge.f32.partialorder %v24933_v55, 0.0  ;;  %v25159_v63 = vld [vmem:[%s26843_s4] sm:$0x3] }
 0x38e   : > { %v25126_v49 = vpop.f32.mrf.mxu0  ;;  %v16522_v19 = vcombine.high %v16520_v47, %v16520_v47  ;;  %v16911_v13 = vsel %vm15815_vm3, %v25031_v36, %v16521_v40  ;;  %v16912_v0 = vsel %vm15816_vm4, %v25055_v44, %v16520_v47  ;;  %27093 = vst [vmem:[#allocation21_spill] sm:$0xff] %v25159_v63  ;;  %v15998_v39 = vcombine.low %v15990_v9, %v25058_v23 }
 0x38f   : > { %v17308_v12 = vcombine.low %v17300_v34, %v17307_v45  ;;  %v17357_v53 = vcombine.low %v16910_v59, %v16911_v13  ;;  %v16329_v6 = vmul.f32 %v24841_v48, %v15981_v28  ;;  %v25165_v34 = vcombine.high %v25134_v57, %v25134_v57  ;;  %20819 = vmatprep.subr.msk.bf16.mxu1 %vm26865_vm0, %v25159_v63 }
 0x390   : > { %v25141_v54 = vpop.f32.mrf.mxu0  ;;  %vm15812_vm14 = vcmp.ge.f32.partialorder %v24960_v60, 0.0  ;;  %v16913_v36 = vsel %vm15817_vm5, %v25051_v25, %v16522_v19  ;;  %vm15808_vm15 = vcmp.ge.f32.partialorder %v25099_v22, 0.0  ;;  %v25180_v44 = vcombine.high %v25147_v5, %v25147_v5 }
 0x391   : > { %v17678_v40 = vsel %vm24999_vm8, %v17308_v12, 0.0  ;;  %v17358_v47 = vcombine.low %v16912_v0, %v16913_v36  ;;  %vm15809_vm2 = vcmp.ge.f32.partialorder %v25095_v37, 0.0  ;;  %v16330_v59 = vmul.f32 %v24841_v48, %v15998_v39 }
 0x392   : > { %v25183_v23 = vpack.c.bf16 %v17678_v40, %v25043_v4  ;;  %v25190_v9 = vrot.slane %v17357_v53, %v24781_v32  ;;  %vm15810_vm3 = vcmp.ge.f32.partialorder %v25114_v2, 0.0  ;;  %v16465_v12 = vcombine.high %v16329_v6, %v16329_v6 }
 0x393   : > { %v16472_v19 = vrot.slane %v16329_v6, %v24781_v32  ;;  %v25195_v13 = vrot.slane %v17358_v47, %v24781_v32  ;;  %v16482_v4 = vcombine.high %v16330_v59, %v16330_v59  ;;  %v16489_v0 = vrot.slane %v16330_v59, %v24781_v32 }
 0x394   : > { %v25167_v45 = vpop.f32.mrf.mxu0  ;;  %27094 = vst [vmem:[#allocation16_spill] sm:$0xff] %v25183_v23  ;;  %27096 = vst [vmem:[#allocation18_spill] sm:$0xff] %v25190_v9  ;;  %v16064_v40 = vcombine.low %v25134_v57, %v25165_v34  ;;  %v16479_v36 = vrot.slane %v16465_v12, %v24781_v32  ;;  %v16065_v6 = vcombine.low %v25147_v5, %v25180_v44  ;;  %vm15791_vm4 = vcmp.ge.f32.partialorder %v24853_v27, 0.0 }
 0x395   : > { %27097 = vst [vmem:[#allocation27_spill] sm:$0xff] %v25195_v13  ;;  %v16480_v53 = vcombine.high %v16472_v19, %v16472_v19  ;;  %v16901_v63 = vsel %vm15805_vm6, %v24947_v31, %v16472_v19  ;;  %vm15793_vm5 = vcmp.ge.f32.partialorder %v24857_v41, 0.0  ;;  %v16496_v59 = vrot.slane %v16482_v4, %v24781_v32 }
 0x396   : > { %v25187_v28 = vpop.f32.mrf.mxu0  ;;  %v16497_v23 = vcombine.high %v16489_v0, %v16489_v0  ;;  %v16905_v12 = vsel %vm15809_vm2, %v25095_v37, %v16489_v0  ;;  %v16481_v31 = vcombine.high %v16479_v36, %v16479_v36  ;;  %v16072_v47 = vrot.slane %v16064_v40, %v24781_v32 }
 0x397   : > { %27095 = vst [vmem:[#allocation25_spill] sm:$0xff] %v25187_v28  ;;  %v16902_v19 = vsel %vm15806_vm7, %v24979_v50, %v16480_v53  ;;  %v16903_v28 = vsel %vm15807_vm13, %v25084_v15, %v16479_v36  ;;  %v16498_v13 = vcombine.high %v16496_v59, %v16496_v59  ;;  %v16907_v37 = vsel %vm15811_vm11, %v24933_v55, %v16496_v59 }
 0x398   : > { %v25200_v39 = vpop.f32.mrf.mxu0  ;;  %v16906_v4 = vsel %vm15810_vm3, %v25114_v2, %v16497_v23  ;;  %v17316_v0 = vcombine.low %v16901_v63, %v16902_v19  ;;  %v16904_v50 = vsel %vm15808_vm15, %v25099_v22, %v16481_v31  ;;  %v16079_v15 = vrot.slane %v16065_v6, %v24781_v32 }
 0x399   : > { %27098 = vst [vmem:[#allocation20_spill] sm:$0xff] %v25200_v39  ;;  %v17333_v53 = vcombine.low %v16905_v12, %v16906_v4  ;;  %v15276_v40 = vadd.f32 %v24967_v10, %v24741_v46  ;;  %v16464_v2 = vrot.slane %v25092_v18, %v24781_v32  ;;  %v25243_v23 = vcombine.high %v25051_v25, %v25051_v25 }
 0x39a   : > { %v25216_v39 = vpop.f32.mrf.mxu0  ;;  %v16908_v55 = vsel %vm15812_vm14, %v24960_v60, %v16498_v13  ;;  %v17317_v63 = vcombine.low %v16903_v28, %v16904_v50  ;;  %v25251_v22 = vrot.slane %v17316_v0, %v24781_v32  ;;  %v16080_v59 = vcombine.low %v16072_v47, %v16079_v15 }
 0x39b   : > { %v17334_v6 = vcombine.low %v16907_v37, %v16908_v55  ;;  %v15450_v46 = vcombine.high %v15276_v40, %v15276_v40  ;;  %v25257_v18 = vrot.slane %v15276_v40, %v24781_v32  ;;  %v25261_v25 = vadd.f32 %v25033_v30, %v24743_v16 }
 0x39c   : > { %v25231_v9 = vpop.f32.mrf.mxu0  ;;  %v25254_v10 = vrot.slane %v17317_v63, %v24781_v32  ;;  %v15277_v60 = vadd.f32 %v25076_v42, %v24745_v61  ;;  %v25266_v13 = vrot.slane %v17333_v53, %v24781_v32  ;;  %v25276_v31 = vadd.f32 %v25101_v21, %v24767_v11 }
 0x39d   : > { %v25269_v47 = vrot.slane %v17334_v6, %v24781_v32  ;;  %v25272_v12 = vrot.slane %v15450_v46, %v24781_v32  ;;  %v16336_v30 = vmul.f32 %v24841_v48, %v16080_v59  ;;  %v15465_v61 = vcombine.high %v25257_v18, %v25257_v18 }
 0x39e   : > { %v25248_v36 = vpop.f32.mrf.mxu0  ;;  %v16023_v42 = vcombine.low %v25243_v23, %v25257_v18  ;;  %v27099_v19 = vcombine.low %v24991_v51, %v24994_v17  ;;  %v16887_v11 = vsel %vm15791_vm4, %v24853_v27, %v24941_v24  ;;  %v16889_v21 = vsel %vm15793_vm5, %v24857_v41, %v24965_v7  ;;  %v13752_v51 = vpop.f32.mrf.mxu1 }
 0x39f   : > { %v17251_v0 = vcombine.low %v16887_v11, %v25048_v8  ;;  %v17252_v50 = vcombine.low %v16889_v21, %v25067_v29  ;;  %v16024_v17 = vcombine.low %v15465_v61, %v25272_v12  ;;  %v27100_v53 = vcombine.low %v24974_v26, %v24986_v33 }
 0x3a0   : > { %v20643_v28 = vpop.f32.mrf.mxu0  ;;  %v25289_v4 = vrot.slane %v27099_v19, %v24781_v32  ;;  %v16505_v24 = vrot.slane %v25070_v62, %v24781_v32  ;;  %vm15804_vm6 = vcmp.ge.f32.partialorder %v25027_v35, 0.0  ;;  %v16564_v7 = vcombine.high %v16336_v30, %v16336_v30 }
 0x3a1   : > { %v25308_v27 = vrot.slane %v27100_v53, %v24781_v32  ;;  %v25314_v41 = vsel %vm15804_vm6, %v25027_v35, %v16464_v2  ;;  %v16031_v8 = vrot.slane %v16023_v42, %v24781_v32  ;;  %v16038_v29 = vrot.slane %v16024_v17, %v24781_v32  ;;  %vm17059_vm6 = vmand %vm24999_vm8, %vm26857_vm9 }
 0x3a2   : > { %v25321_v26 = vadd.f32 %v13752_v51, %v24759_v58  ;;  %v25326_v40 = vrot.slane %v17251_v0, %v24781_v32  ;;  %v25329_v35 = vrot.slane %v17252_v50, %v24781_v32  ;;  %vm15813_vm7 = vcmp.ge.f32.partialorder %v24956_v3, 0.0 }
 0x3a3   : > { %v16039_v2 = vcombine.low %v16031_v8, %v16038_v29  ;;  %v25333_v55 = vsel %vm15813_vm7, %v24956_v3, %v16505_v24  ;;  %v17315_v58 = vrot.slane %v25314_v41, %v24781_v32  ;;  %v16571_v63 = vrot.slane %v16336_v30, %v24781_v32 }
 0x3a4   : > { %v15467_v6 = vcombine.high %v15277_v60, %v15277_v60  ;;  %vm15827_vm13 = vcmp.ge.f32.partialorder %v25134_v57, 0.0  ;;  %vm15828_vm11 = vcmp.ge.f32.partialorder %v25165_v34, 0.0  ;;  %v16578_v59 = vrot.slane %v16564_v7, %v24781_v32 }
 0x3a5   : > { %v16333_v46 = vmul.f32 %v24841_v48, %v16039_v2  ;;  %vm15830_vm14 = vcmp.ge.f32.partialorder %v25180_v44, 0.0  ;;  %vm15818_vm15 = vcmp.ge.f32.partialorder %v25243_v23, 0.0  ;;  %vm15819_vm2 = vcmp.ge.f32.partialorder %v25257_v18, 0.0 }
 0x3a6   : > { %v25347_v3 = vrot.slane %v25261_v25, %v24781_v32  ;;  %vm15829_vm3 = vcmp.ge.f32.partialorder %v25147_v5, 0.0  ;;  %v25352_v28 = vcombine.high %v25272_v12, %v25272_v12  ;;  %v25356_v19 = vrot.slane %v15277_v60, %v24781_v32 }
 0x3a7   : > { %v16523_v30 = vcombine.high %v16333_v46, %v16333_v46  ;;  %v16530_v42 = vrot.slane %v16333_v46, %v24781_v32  ;;  %v16579_v11 = vcombine.high %v16571_v63, %v16571_v63  ;;  %vm15820_vm4 = vcmp.ge.f32.partialorder %v15465_v61, 0.0 }
 0x3a8   : > { %v15501_v21 = vcombine.high %v25261_v25, %v25261_v25  ;;  %v25361_v0 = vrot.slane %v15467_v6, %v24781_v32  ;;  %v16580_v50 = vcombine.high %v16578_v59, %v16578_v59  ;;  %vm15821_vm5 = vcmp.ge.f32.partialorder %v25272_v12, 0.0 }
 0x3a9   : > { %v16537_v51 = vrot.slane %v16523_v30, %v24781_v32  ;;  %v16538_v17 = vcombine.high %v16530_v42, %v16530_v42  ;;  %v16914_v53 = vsel %vm15818_vm15, %v25243_v23, %v16530_v42  ;;  %v16087_v60 = vrot.slane %v25347_v3, %v24781_v32 }
 0x3aa   : > { %v25370_v24 = vcombine.high %v25356_v19, %v25356_v19  ;;  %v25374_v25 = vcombine.high %v25361_v0, %v25361_v0  ;;  %v15552_v23 = vcombine.high %v25276_v31, %v25276_v31  ;;  %v16923_v2 = vsel %vm15827_vm13, %v25134_v57, %v16571_v63 }
 0x3ab   : > { %v16539_v7 = vcombine.high %v16537_v51, %v16537_v51  ;;  %v16915_v8 = vsel %vm15819_vm2, %v25257_v18, %v16538_v17  ;;  %v16916_v29 = vsel %vm15820_vm4, %v15465_v61, %v16537_v51  ;;  %v16924_v6 = vsel %vm15828_vm11, %v25165_v34, %v16579_v11  ;;  %v18384_v18 = vld [vmem:[%s26843_s4 + $0x8] sm:$0x3] }
 0x3ac   : > { %v17374_v46 = vcombine.low %v16914_v53, %v16915_v8  ;;  %v25388_v30 = vrot.slane %v15501_v21, %v24781_v32  ;;  %v16926_v61 = vsel %vm15830_vm14, %v25180_v44, %v16580_v50  ;;  %v16047_v57 = vcombine.low %v25356_v19, %v25370_v24  ;;  %20822 = vmatprep.subr.msk.bf16.mxu0 %vm26865_vm0, %v18384_v18 }
 0x3ad   : > { %v16917_v42 = vsel %vm15821_vm5, %v25272_v12, %v16539_v7  ;;  %v16048_v34 = vcombine.low %v25361_v0, %v25374_v25  ;;  %v25404_v11 = vcombine.high %v25347_v3, %v25347_v3  ;;  %v16337_v21 = vmul.f32 %v24841_v48, %v16087_v60 }
 0x3ae   : > { %v17375_v63 = vcombine.low %v16916_v29, %v16917_v42  ;;  %v15280_v44 = vadd.f32 %v25116_v14, %v24771_v43  ;;  %v16055_v12 = vrot.slane %v16047_v57, %v24781_v32  ;;  %v25413_v51 = vrot.slane %v25276_v31, %v24781_v32 }
 0x3af   : > { %v16062_v50 = vrot.slane %v16048_v34, %v24781_v32  ;;  %v25416_v17 = vrot.slane %v15552_v23, %v24781_v32  ;;  %v16925_v53 = vsel %vm15829_vm3, %v25147_v5, %v16578_v59  ;;  %v16046_v60 = vrot.slane %v25352_v28, %v24781_v32 }
 0x3b0   : > { %v25424_v43 = vrot.slane %v17374_v46, %v24781_v32  ;;  %v25427_v14 = vrot.slane %v17375_v63, %v24781_v32  ;;  %v17415_v31 = vcombine.low %v16923_v2, %v16924_v6  ;;  %v17416_v7 = vcombine.low %v16925_v53, %v16926_v61 }
 0x3b1   : > { %v16063_v8 = vcombine.low %v16055_v12, %v16062_v50  ;;  %v25434_v29 = vrot.slane %v15280_v44, %v24781_v32  ;;  %v16088_v23 = vcombine.low %v25404_v11, %v25388_v30  ;;  %v16587_v46 = vrot.slane %v16337_v21, %v24781_v32 }
 0x3b2   : > { %v25445_v56 = vcombine.high %v25388_v30, %v25388_v30  ;;  %v25450_v6 = vcombine.high %v25413_v51, %v25413_v51  ;;  %v25454_v18 = vcombine.high %v25416_v17, %v25416_v17  ;;  %v25459_v61 = vsel %vm17059_vm6, %v17315_v58, 0.0 }
 0x3b3   : > { %v16335_v2 = vmul.f32 %v24841_v48, %v16063_v8  ;;  %v25462_v42 = vmul.f32 %v24841_v48, %v16046_v60  ;;  %vm15831_vm8 = vcmp.ge.f32.partialorder %v25347_v3, 0.0  ;;  %v15518_v57 = vcombine.high %v15280_v44, %v15280_v44 }
 0x3b4   : > { %v25466_v34 = vrot.slane %v17415_v31, %v24781_v32  ;;  %v25469_v63 = vrot.slane %v17416_v7, %v24781_v32  ;;  %v16089_v12 = vcombine.low %v25445_v56, %v25434_v29  ;;  %vm15832_vm7 = vcmp.ge.f32.partialorder %v25404_v11, 0.0 }
 0x3b5   : > { %v16547_v21 = vcombine.high %v16335_v2, %v16335_v2  ;;  %v16096_v41 = vrot.slane %v16088_v23, %v24781_v32  ;;  %v25476_v58 = vsel %vm15831_vm8, %v25347_v3, %v16587_v46  ;;  %v15283_v44 = vadd.f32 %v25126_v49, %v24774_v52 }
 0x3b6   : > { %v15281_v50 = vadd.f32 %v25141_v54, %v24776_v20  ;;  %v16130_v60 = vcombine.low %v25413_v51, %v25450_v6  ;;  %v16146_v31 = vcombine.low %v25416_v17, %v25454_v18  ;;  %v16103_v7 = vrot.slane %v16089_v12, %v24781_v32 }
 0x3b7   : > { %v16561_v53 = vrot.slane %v16547_v21, %v24781_v32  ;;  %vm15833_vm13 = vcmp.ge.f32.partialorder %v25388_v30, 0.0  ;;  %v25490_v3 = vrot.slane %v15518_v57, %v24781_v32  ;;  %v25494_v52 = vcombine.high %v25434_v29, %v25434_v29 }
 0x3b8   : > { %v25497_v20 = vrot.slane %v15283_v44, %v24781_v32  ;;  %v15535_v54 = vcombine.high %v15281_v50, %v15281_v50  ;;  %vm15823_vm11 = vcmp.ge.f32.partialorder %v25356_v19, 0.0  ;;  %vm15824_vm14 = vcmp.ge.f32.partialorder %v25370_v24, 0.0 }
 0x3b9   : > { %vm15825_vm15 = vcmp.ge.f32.partialorder %v25361_v0, 0.0  ;;  %v16104_v49 = vcombine.low %v16096_v41, %v16103_v7  ;;  %vm15826_vm2 = vcmp.ge.f32.partialorder %v25374_v25, 0.0  ;;  %v16554_v8 = vrot.slane %v16335_v2, %v24781_v32 }
 0x3ba   : > { %v16563_v23 = vcombine.high %v16561_v53, %v16561_v53  ;;  %v25506_v46 = vcombine.high %v25497_v20, %v25497_v20  ;;  %v25509_v57 = vrot.slane %v16130_v60, %v24781_v32  ;;  %v16154_v21 = vrot.slane %v16146_v31, %v24781_v32 }
 0x3bb   : > { %vm15834_vm3 = vcmp.ge.f32.partialorder %v25445_v56, 0.0  ;;  %v16338_v12 = vmul.f32 %v24841_v48, %v16104_v49  ;;  %v25516_v41 = vcombine.high %v25490_v3, %v25490_v3  ;;  %v16105_v2 = vcombine.low %v25494_v52, %v25490_v3 }
 0x3bc   : > { %v15569_v7 = vcombine.high %v15283_v44, %v15283_v44  ;;  %v25521_v59 = vrot.slane %v15535_v54, %v24781_v32  ;;  %vm15835_vm4 = vcmp.ge.f32.partialorder %v25434_v29, 0.0  ;;  %v16147_v16 = vcombine.low %v25497_v20, %v25506_v46 }
 0x3bd   : > { %v16588_v60 = vcombine.high %v16338_v12, %v16338_v12  ;;  %v16595_v31 = vrot.slane %v16338_v12, %v24781_v32  ;;  %v16562_v49 = vcombine.high %v16554_v8, %v16554_v8  ;;  %v25530_v37 = vsel %vm15823_vm11, %v25356_v19, %v16554_v8 }
 0x3be   : > { %v25535_v44 = vsel %vm15826_vm2, %v25374_v25, %v16563_v23  ;;  %vm15845_vm5 = vcmp.ge.f32.partialorder %v25416_v17, 0.0  ;;  %v25539_v54 = vrot.slane %v15281_v50, %v24781_v32  ;;  %v16161_v19 = vrot.slane %v16147_v16, %v24781_v32 }
 0x3bf   : > { %v16602_v12 = vrot.slane %v16588_v60, %v24781_v32  ;;  %v16603_v62 = vcombine.high %v16595_v31, %v16595_v31  ;;  %v16928_v33 = vsel %vm15832_vm7, %v25404_v11, %v16595_v31  ;;  %v25549_v8 = vsel %vm15825_vm15, %v25361_v0, %v16561_v53 }
 0x3c0   : > { %vm15846_vm6 = vcmp.ge.f32.partialorder %v25454_v18, 0.0  ;;  %v16113_v25 = vrot.slane %v16105_v2, %v24781_v32  ;;  %v25554_v50 = vrot.slane %v15569_v7, %v24781_v32  ;;  %v25558_v23 = vcombine.high %v25521_v59, %v25521_v59 }
 0x3c1   : > { %v16604_v60 = vcombine.high %v16602_v12, %v16602_v12  ;;  %v16929_v16 = vsel %vm15833_vm13, %v25388_v30, %v16603_v62  ;;  %v16930_v0 = vsel %vm15834_vm3, %v25445_v56, %v16602_v12  ;;  %v16162_v11 = vcombine.low %v16154_v21, %v16161_v19 }
 0x3c2   : > { %v25569_v53 = vsel %vm15824_vm14, %v25370_v24, %v16562_v49  ;;  %v17399_v2 = vcombine.low %v25549_v8, %v25535_v44  ;;  %v17439_v7 = vcombine.low %v16928_v33, %v16929_v16  ;;  %vm15847_vm8 = vcmp.ge.f32.partialorder %v25497_v20, 0.0 }
 0x3c3   : > { %v16931_v62 = vsel %vm15835_vm4, %v25434_v29, %v16604_v60  ;;  %vm15848_vm7 = vcmp.ge.f32.partialorder %v25506_v46, 0.0  ;;  %v16342_v30 = vmul.f32 %v24841_v48, %v16162_v11  ;;  %v16106_v56 = vcombine.low %v25516_v41, %v25539_v54 }
 0x3c4   : > { %vm15836_vm13 = vcmp.ge.f32.partialorder %v25494_v52, 0.0  ;;  %v17440_v24 = vcombine.low %v16930_v0, %v16931_v62  ;;  %v16169_v21 = vrot.slane %v25554_v50, %v24781_v32  ;;  %v25586_v33 = vcombine.high %v25539_v54, %v25539_v54  ;;  %v27103_v0 = vld [vmem:[#allocation11_spill] sm:$0xff]  ;;  %v27105_v62 = vld [vmem:[#allocation25_spill] sm:$0xff] }
 0x3c5   : > { %v16129_v29 = vcombine.low %v25521_v59, %v25558_v23  ;;  %v25591_v31 = vrot.slane %v17439_v7, %v24781_v32  ;;  %v16646_v49 = vcombine.high %v16342_v30, %v16342_v30  ;;  %v16653_v12 = vrot.slane %v16342_v30, %v24781_v32  ;;  %v27104_v7 = vld [vmem:[#allocation7_spill] sm:$0xff] }
 0x3c6   : > { %vm15841_vm11 = vcmp.ge.f32.partialorder %v25521_v59, 0.0  ;;  %v16120_v19 = vrot.slane %v16106_v56, %v24781_v32  ;;  %vm15837_vm14 = vcmp.ge.f32.partialorder %v25490_v3, 0.0  ;;  %v25598_v60 = vrot.slane %v17440_v24, %v24781_v32 }
 0x3c7   : > { %27101 = vst [vmem:[#allocation29_spill] sm:$0xff] %v25591_v31  ;;  %vm15838_vm15 = vcmp.ge.f32.partialorder %v25516_v41, 0.0  ;;  %v16137_v16 = vrot.slane %v16129_v29, %v24781_v32  ;;  %v15286_v11 = vadd.f32 %v25167_v45, %v27103_v0  ;;  %v25606_v5 = vadd.f32 %v27105_v62, %v27104_v7 }
 0x3c8   : > { %27102 = vst [vmem:[#allocation24_spill] sm:$0xff] %v25598_v60  ;;  %vm15843_vm2 = vcmp.ge.f32.partialorder %v25413_v51, 0.0  ;;  %v16660_v30 = vrot.slane %v16646_v49, %v24781_v32  ;;  %v16661_v56 = vcombine.high %v16653_v12, %v16653_v12  ;;  %v16941_v24 = vsel %vm15845_vm5, %v25416_v17, %v16653_v12 }
 0x3c9   : > { %v16121_v15 = vcombine.low %v16113_v25, %v16120_v19  ;;  %vm15839_vm3 = vcmp.ge.f32.partialorder %v25539_v54, 0.0  ;;  %vm15842_vm4 = vcmp.ge.f32.partialorder %v25558_v23, 0.0  ;;  %v16145_v45 = vcombine.low %v16137_v16, %v25509_v57 }
 0x3ca   : > { %v15620_v0 = vcombine.high %v15286_v11, %v15286_v11  ;;  %vm15844_vm9 = vcmp.ge.f32.partialorder %v25450_v6, 0.0  ;;  %v16662_v7 = vcombine.high %v16660_v30, %v16660_v30  ;;  %v16942_v49 = vsel %vm15846_vm6, %v25454_v18, %v16661_v56 }
 0x3cb   : > { %v16943_v17 = vsel %vm15847_vm8, %v25497_v20, %v16660_v30  ;;  %v16339_v25 = vmul.f32 %v24841_v48, %v16121_v15  ;;  %v17497_v12 = vcombine.low %v16941_v24, %v16942_v49  ;;  %v16128_v19 = vrot.slane %v25586_v33, %v24781_v32 }
 0x3cc   : > { %v16341_v57 = vmul.f32 %v24841_v48, %v16145_v45  ;;  %v25630_v16 = vrot.slane %v15286_v11, %v24781_v32  ;;  %v16944_v62 = vsel %vm15848_vm7, %v25506_v46, %v16662_v7  ;;  %v25637_v20 = vrot.slane %v15620_v0, %v24781_v32 }
 0x3cd   : > { %v16605_v18 = vcombine.high %v16339_v25, %v16339_v25  ;;  %v16612_v56 = vrot.slane %v16339_v25, %v24781_v32  ;;  %v17498_v15 = vcombine.low %v16943_v17, %v16944_v62  ;;  %v25640_v30 = vrot.slane %v17497_v12, %v24781_v32 }
 0x3ce   : > { %v16629_v24 = vcombine.high %v16341_v57, %v16341_v57  ;;  %v16636_v45 = vrot.slane %v16341_v57, %v24781_v32  ;;  %v25649_v7 = vcombine.high %v25630_v16, %v25630_v16  ;;  %vm15840_vm5 = vcmp.ge.f32.partialorder %v25586_v33, 0.0 }
 0x3cf   : > { %27106 = vst [vmem:[#allocation32_spill] sm:$0xff] %v25640_v30  ;;  %v16619_v11 = vrot.slane %v16605_v18, %v24781_v32  ;;  %v16620_v49 = vcombine.high %v16612_v56, %v16612_v56  ;;  %v16932_v46 = vsel %vm15836_vm13, %v25494_v52, %v16612_v56  ;;  %v25652_v0 = vrot.slane %v17498_v15, %v24781_v32  ;;  %v27113_v30 = vld [vmem:[#allocation10_spill] sm:$0xff] }
 0x3d0   : > { %v16643_v17 = vrot.slane %v16629_v24, %v24781_v32  ;;  %v16644_v25 = vcombine.high %v16636_v45, %v16636_v45  ;;  %v16937_v12 = vsel %vm15841_vm11, %v25521_v59, %v16636_v45  ;;  %v25666_v18 = vcombine.high %v25637_v20, %v25637_v20 }
 0x3d1   : > { %27107 = vst [vmem:[#allocation26_spill] sm:$0xff] %v25652_v0  ;;  %v16621_v57 = vcombine.high %v16619_v11, %v16619_v11  ;;  %v16933_v62 = vsel %vm15837_vm14, %v25490_v3, %v16620_v49  ;;  %v16934_v52 = vsel %vm15838_vm15, %v25516_v41, %v16619_v11  ;;  %v17398_v24 = vcombine.low %v25530_v37, %v25569_v53 }
 0x3d2   : > { %v16645_v15 = vcombine.high %v16643_v17, %v16643_v17  ;;  %v16938_v59 = vsel %vm15842_vm4, %v25558_v23, %v16644_v25  ;;  %v16939_v3 = vsel %vm15843_vm2, %v25413_v51, %v16643_v17  ;;  %v17456_v45 = vcombine.low %v16932_v46, %v16933_v62  ;;  %v27110_v25 = vld [vmem:[#allocation13_spill] sm:$0xff] }
 0x3d3   : > { %v16935_v41 = vsel %vm15839_vm3, %v25539_v54, %v16621_v57  ;;  %v17480_v11 = vcombine.low %v16937_v12, %v16938_v59  ;;  %v25685_v49 = vrot.slane %v17399_v2, %v24781_v32  ;;  %v25689_v23 = vcombine.high %v25554_v50, %v25554_v50  ;;  %v27111_v12 = vld [vmem:[#allocation20_spill] sm:$0xff] }
 0x3d4   : > { %v16940_v37 = vsel %vm15844_vm9, %v25450_v6, %v16645_v15  ;;  %v17457_v51 = vcombine.low %v16934_v52, %v16935_v41  ;;  %v16343_v54 = vmul.f32 %v24841_v48, %v16169_v21  ;;  %v16340_v53 = vmul.f32 %v24841_v48, %v16128_v19 }
 0x3d5   : > { %v25700_v44 = vrot.slane %v17456_v45, %v24781_v32  ;;  %v17481_v8 = vcombine.low %v16939_v3, %v16940_v37  ;;  %v16211_v46 = vcombine.low %v25630_v16, %v25649_v7  ;;  %v16212_v6 = vcombine.low %v25637_v20, %v25666_v18 }
 0x3d6   : > { %v25703_v2 = vrot.slane %v17457_v51, %v24781_v32  ;;  %v15586_v17 = vcombine.high %v25606_v5, %v25606_v5  ;;  %v25712_v21 = vrot.slane %v17480_v11, %v24781_v32  ;;  %v25719_v19 = vrot.slane %v25606_v5, %v24781_v32  ;;  %v27112_v5 = vld [vmem:[#allocation9_spill] sm:$0xff] }
 0x3d7   : > { %v25715_v48 = vrot.slane %v17481_v8, %v24781_v32  ;;  %v15287_v57 = vadd.f32 %v27111_v12, %v27110_v25  ;;  %v16219_v52 = vrot.slane %v16211_v46, %v24781_v32  ;;  %v16226_v15 = vrot.slane %v16212_v6, %v24781_v32 }
 0x3d8   : > { %27108 = vst [vmem:[#allocation28_spill] sm:$0xff] %v25712_v21  ;;  %v25728_v59 = vrot.slane %v15586_v17, %v24781_v32  ;;  %v15601_v41 = vcombine.high %v25719_v19, %v25719_v19  ;;  %v16170_v45 = vcombine.low %v25689_v23, %v25719_v19  ;;  %v25741_v37 = vrot.slane %v17398_v24, %v24781_v32  ;;  %v25755_v24 = vld [vmem:[%s26842_s3] ss:$0 sm:$0xff] }
 0x3d9   : > { %27109 = vst [vmem:[#allocation33_spill] sm:$0xff] %v25715_v48  ;;  %v16227_v51 = vcombine.low %v16219_v52, %v16226_v15  ;;  %v15637_v8 = vcombine.high %v15287_v57, %v15287_v57  ;;  %v16669_v46 = vrot.slane %v16343_v54, %v24781_v32  ;;  %v16628_v6 = vrot.slane %v16340_v53, %v24781_v32 }
 0x3da   : > { %v16171_v17 = vcombine.low %v15601_v41, %v25728_v59  ;;  %v25747_v25 = vrot.slane %v15287_v57, %v24781_v32  ;;  %vm15849_vm9 = vcmp.ge.f32.partialorder %v25554_v50, 0.0  ;;  %v16178_v53 = vrot.slane %v16170_v45, %v24781_v32 }
 0x3db   : > { %v16347_v52 = vmul.f32 %v25755_v24, %v16227_v51  ;;  %v25759_v54 = vrot.slane %v15637_v8, %v24781_v32  ;;  %v15285_v56 = vadd.f32 %v25216_v39, %v27112_v5  ;;  %v25776_v45 = vsel %vm15849_vm9, %v25554_v50, %v16669_v46 }
 0x3dc   : > { %v16185_v57 = vrot.slane %v16171_v17, %v24781_v32  ;;  %v25765_v15 = vcombine.high %v25747_v25, %v25747_v25  ;;  %v25779_v8 = vsel %vm15840_vm5, %v25586_v33, %v16628_v6  ;;  %vm15859_vm6 = vcmp.ge.f32.partialorder %v25630_v16, 0.0 }
 0x3dd   : > { %v16711_v29 = vcombine.high %v16347_v52, %v16347_v52  ;;  %v16718_v62 = vrot.slane %v16347_v52, %v24781_v32  ;;  %v25773_v51 = vcombine.high %v25759_v54, %v25759_v54  ;;  %vm15860_vm8 = vcmp.ge.f32.partialorder %v25649_v7, 0.0 }
 0x3de   : > { %v16186_v17 = vcombine.low %v16178_v53, %v16185_v57  ;;  %vm15861_vm7 = vcmp.ge.f32.partialorder %v25637_v20, 0.0  ;;  %v16228_v5 = vcombine.low %v25747_v25, %v25765_v15  ;;  %v15603_v46 = vcombine.high %v15285_v56, %v15285_v56 }
 0x3df   : > { %v16725_v39 = vrot.slane %v16711_v29, %v24781_v32  ;;  %v16229_v50 = vcombine.low %v25759_v54, %v25773_v51  ;;  %v25791_v33 = vrot.slane %v15285_v56, %v24781_v32  ;;  %vm15862_vm13 = vcmp.ge.f32.partialorder %v25666_v18, 0.0 }
 0x3e0   : > { %v16344_v52 = vmul.f32 %v25755_v24, %v16186_v17  ;;  %v16726_v6 = vcombine.high %v16718_v62, %v16718_v62  ;;  %vm15850_vm11 = vcmp.ge.f32.partialorder %v25689_v23, 0.0  ;;  %vm15851_vm14 = vcmp.ge.f32.partialorder %v25719_v19, 0.0 }
 0x3e1   : > { %v16727_v29 = vcombine.high %v16725_v39, %v16725_v39  ;;  %v16243_v17 = vrot.slane %v16229_v50, %v24781_v32  ;;  %v25800_v11 = vcombine.high %v25728_v59, %v25728_v59  ;;  %vm15852_vm15 = vcmp.ge.f32.partialorder %v15601_v41, 0.0 }
 0x3e2   : > { %v16670_v53 = vcombine.high %v16344_v52, %v16344_v52  ;;  %v16677_v57 = vrot.slane %v16344_v52, %v24781_v32  ;;  %vm15853_vm2 = vcmp.ge.f32.partialorder %v25728_v59, 0.0  ;;  %v16236_v56 = vrot.slane %v16228_v5, %v24781_v32 }
 0x3e3   : > { %v25806_v48 = vrot.slane %v15603_v46, %v24781_v32  ;;  %v25810_v52 = vcombine.high %v25791_v33, %v25791_v33  ;;  %v16956_v50 = vsel %vm15860_vm8, %v25649_v7, %v16726_v6  ;;  %v15290_v5 = vadd.f32 %v25231_v9, %v27113_v30 }
 0x3e4   : > { %v16684_v12 = vrot.slane %v16670_v53, %v24781_v32  ;;  %v16685_v3 = vcombine.high %v16677_v57, %v16677_v57  ;;  %v16946_v21 = vsel %vm15850_vm11, %v25689_v23, %v16677_v57  ;;  %v16244_v0 = vcombine.low %v16236_v56, %v16243_v17  ;;  %v27114_v56 = vld [vmem:[#allocation19_spill] sm:$0xff]  ;;  %vm17021_vm11 = vmand %vm24906_vm10, %vm17018_vm12 }
 0x3e5   : > { %v16958_v53 = vsel %vm15862_vm13, %v25666_v18, %v16727_v29  ;;  %v16955_v7 = vsel %vm15859_vm6, %v25630_v16, %v16718_v62  ;;  %vm15863_vm3 = vcmp.ge.f32.partialorder %v25747_v25, 0.0  ;;  %v16187_v9 = vcombine.low %v25800_v11, %v25791_v33 }
 0x3e6   : > { %v16686_v46 = vcombine.high %v16684_v12, %v16684_v12  ;;  %v16947_v60 = vsel %vm15851_vm14, %v25719_v19, %v16685_v3  ;;  %v16948_v31 = vsel %vm15852_vm15, %v15601_v41, %v16684_v12  ;;  %v16348_v23 = vmul.f32 %v25755_v24, %v16244_v0 }
 0x3e7   : > { %v17521_v6 = vcombine.low %v16946_v21, %v16947_v60  ;;  %v16957_v30 = vsel %vm15861_vm7, %v25637_v20, %v16725_v39  ;;  %v17562_v18 = vcombine.low %v16955_v7, %v16956_v50  ;;  %v16188_v16 = vcombine.low %v25810_v52, %v25806_v48 }
 0x3e8   : > { %v16949_v19 = vsel %vm15853_vm2, %v25728_v59, %v16686_v46  ;;  %v17563_v60 = vcombine.low %v16957_v30, %v16958_v53  ;;  %vm15865_vm4 = vcmp.ge.f32.partialorder %v25759_v54, 0.0  ;;  %v16728_v0 = vcombine.high %v16348_v23, %v16348_v23 }
 0x3e9   : > { %v17522_v21 = vcombine.low %v16948_v31, %v16949_v19  ;;  %v16735_v62 = vrot.slane %v16348_v23, %v24781_v32  ;;  %vm15854_vm9 = vcmp.ge.f32.partialorder %v25800_v11, 0.0  ;;  %v25844_v20 = vcombine.high %v25806_v48, %v25806_v48 }
 0x3ea   : > { %v16195_v3 = vrot.slane %v16187_v9, %v24781_v32  ;;  %v16202_v59 = vrot.slane %v16188_v16, %v24781_v32  ;;  %v25849_v41 = vrot.slane %v15290_v5, %v24781_v32  ;;  %v25852_v31 = vrot.slane %v17521_v6, %v24781_v32 }
 0x3eb   : > { %v25855_v12 = vrot.slane %v17522_v21, %v24781_v32  ;;  %v16742_v39 = vrot.slane %v16728_v0, %v24781_v32  ;;  %v16743_v29 = vcombine.high %v16735_v62, %v16735_v62  ;;  %vm15864_vm5 = vcmp.ge.f32.partialorder %v25765_v15, 0.0 }
 0x3ec   : > { %v16203_v57 = vcombine.low %v16195_v3, %v16202_v59  ;;  %v25861_v17 = vcombine.high %v25849_v41, %v25849_v41  ;;  %v15288_v50 = vadd.f32 %v25248_v36, %v27114_v56  ;;  %v25866_v5 = vrot.slane %v17563_v60, %v24781_v32 }
 0x3ed   : > { %vm15866_vm6 = vcmp.ge.f32.partialorder %v25773_v51, 0.0  ;;  %v16744_v46 = vcombine.high %v16742_v39, %v16742_v39  ;;  %v25872_v7 = vrot.slane %v17562_v18, %v24781_v32  ;;  %v16960_v6 = vsel %vm15864_vm5, %v25765_v15, %v16743_v29 }
 0x3ee   : > { %vm15855_vm8 = vcmp.ge.f32.partialorder %v25791_v33, 0.0  ;;  %v16345_v23 = vmul.f32 %v25755_v24, %v16203_v57  ;;  %vm15856_vm7 = vcmp.ge.f32.partialorder %v25810_v52, 0.0  ;;  %v16210_v36 = vrot.slane %v25844_v20, %v24781_v32 }
 0x3ef   : > { %v16292_v9 = vrot.slane %v25861_v17, %v24781_v32  ;;  %v15654_v30 = vcombine.high %v15288_v50, %v15288_v50  ;;  %v16959_v18 = vsel %vm15863_vm3, %v25747_v25, %v16735_v62  ;;  %v16962_v19 = vsel %vm15866_vm6, %v25773_v51, %v16744_v46 }
 0x3f0   : > { %v16687_v15 = vcombine.high %v16345_v23, %v16345_v23  ;;  %v16694_v16 = vrot.slane %v16345_v23, %v24781_v32  ;;  %v17579_v21 = vcombine.low %v16959_v18, %v16960_v6  ;;  %vm15857_vm13 = vcmp.ge.f32.partialorder %v25806_v48, 0.0  ;;  %v15257_v18 = vpop.f32.mrf.mxu0 }
 0x3f1   : > { %v25891_v0 = vrot.slane %v15288_v50, %v24781_v32  ;;  %v16961_v3 = vsel %vm15865_vm4, %v25759_v54, %v16742_v39  ;;  %v25905_v56 = vmul.f32 %v25755_v24, %v16210_v36  ;;  %v16352_v50 = vmul.f32 %v25755_v24, %v16292_v9 }
 0x3f2   : > { %v16701_v25 = vrot.slane %v16687_v15, %v24781_v32  ;;  %v16702_v62 = vcombine.high %v16694_v16, %v16694_v16  ;;  %v16950_v51 = vsel %vm15854_vm9, %v25800_v11, %v16694_v16  ;;  %v17580_v57 = vcombine.low %v16961_v3, %v16962_v19 }
 0x3f3   : > { %v25909_v54 = vrot.slane %v15654_v30, %v24781_v32  ;;  %vm15876_vm14 = vcmp.ge.f32.partialorder %v25861_v17, 0.0  ;;  %v25919_v6 = vrot.slane %v17579_v21, %v24781_v32  ;;  %v25923_v36 = vcombine.high %v25891_v0, %v25891_v0 }
 0x3f4   : > { %v16703_v39 = vcombine.high %v16701_v25, %v16701_v25  ;;  %v16951_v46 = vsel %vm15855_vm8, %v25791_v33, %v16702_v62  ;;  %v16952_v11 = vsel %vm15856_vm7, %v25810_v52, %v16701_v25  ;;  %v27117_v9 = vcombine.low %v25308_v27, %v25289_v4 }
 0x3f5   : > { %v17538_v23 = vcombine.low %v16950_v51, %v16951_v46  ;;  %v16251_v52 = vrot.slane %v25891_v0, %v24781_v32  ;;  %v27118_v19 = vcombine.low %v25326_v40, %v25329_v35  ;;  %v17707_v16 = vpack.c.bf16 %v25459_v61, %v25459_v61  ;;  %v27119_v40 = vld [vmem:[#allocation16_spill] sm:$0xff] }
 0x3f6   : > { %v17674_v30 = vsel %vm17021_vm11, %v27117_v9, 0.0  ;;  %v16953_v33 = vsel %vm15857_vm13, %v25806_v48, %v16703_v39  ;;  %v25941_v4 = vrot.slane %v17580_v57, %v24781_v32  ;;  %v16792_v21 = vrot.slane %v16352_v50, %v24781_v32 }
 0x3f7   : > { %v17675_v15 = vsel %vm24906_vm10, %v27118_v19, 0.0  ;;  %v17539_v27 = vcombine.low %v16952_v11, %v16953_v33  ;;  %v25946_v48 = vcombine.high %v25909_v54, %v25909_v54  ;;  %vm18083_vm15 = vcmask 1046528  }
 0x3f8   : > { %v25948_v3 = vpack.c.bf16 %v17675_v15, %v17674_v30  ;;  %v18087_v35 = vrot.slane %v27119_v40, 1  ;;  %v15289_v25 = vadd.f32 %v15257_v18, %v25321_v26  ;;  %v25953_v62 = vrot.slane %v17538_v23, %v24781_v32 }
 0x3f9   : > { %v25956_v61 = vrot.slane %v17539_v27, %v24781_v32  ;;  %v16252_v51 = vcombine.low %v25923_v36, %v25909_v54  ;;  %v18088_v29 = vrot.slane %v17707_v16, 1  ;;  %v25961_v57 = vmul.f32 %v25755_v24, %v16251_v52 }
 0x3fa   : > { %v18084_v50 = vrot.slane %v25948_v3, 1  ;;  %v15671_v39 = vcombine.high %v15289_v25, %v15289_v25  ;;  %v25965_v46 = vrot.slane %v15289_v25, %v24781_v32  ;;  %v17729_v9 = vshll.u32 %v25948_v3, 16 }
 0x3fb   : > { %v25972_v23 = vsel %vm18083_vm15, %v18087_v35, %v18088_v29  ;;  %v25978_v30 = vsel %vm15876_vm14, %v25861_v17, %v16792_v21  ;;  %v27121_v18 = vrot.slane %v24969_v1, 1  ;;  %vm15822_vm10 = vcmp.ge.f32.partialorder %v25352_v28, 0.0 }
 0x3fc   : > { %27120 = vst [vmem:[#allocation34_spill] sm:$0xff] %v25972_v23  ;;  %v25984_v52 = vrot.slane %v15671_v39, %v24781_v32  ;;  %v25988_v19 = vcombine.high %v25965_v46, %v25965_v46  ;;  %v16260_v15 = vrot.slane %v16252_v51, %v24781_v32  ;;  %v16253_v17 = vcombine.low %v25946_v48, %v25965_v46 }
 0x3fd   : > { %v18086_v33 = vsel %vm18083_vm15, %v18084_v50, %v27121_v18  ;;  %v17727_v27 = vshrl.u32 %v25948_v3, 16  ;;  %v17731_v21 = vrot.slane %v17729_v9, 1  ;;  %vm26866_vm2 = vsmask.f32 7424 }
 0x3fe   : > { %20682 = vmatprep.mubr.msk.bf16.mxu0 %vm2546_vm1, %v18086_v33  ;;  %v26002_v25 = vcombine.high %v25984_v52, %v25984_v52  ;;  %v16269_v51 = vcombine.low %v25988_v19, %v25984_v52  ;;  %v16267_v29 = vrot.slane %v16253_v17, %v24781_v32  ;;  %v27122_v39 = vshll.u32 %v24969_v1, 16 }
 0x3ff   : > { %20683 = vmatmul.mubr.msk.bf16.vlgmr.msra.gmra.mxu0 %vm2546_vm1, %v25972_v23  ;;  %v17732_v50 = vor.u32 %v17731_v21, %v17727_v27  ;;  %v17741_v18 = vshll.u32 %v27119_v40, 16  ;;  %vm15870_vm3 = vcmp.ge.f32.partialorder %v25946_v48, 0.0  ;;  %v17739_v60 = vshrl.u32 %v27119_v40, 16  ;;  %v27123_v27 = vld [vmem:[#allocation17_spill] sm:$0xff] }
 0x400   : > { %v17736_v9 = vrot.slane %v27122_v39, 1  ;;  %v16270_v33 = vcombine.low %v26002_v25, %v25849_v41  ;;  %v17746_v26 = vshll.u32 %v17707_v16, 16  ;;  %vm15872_vm4 = vcmp.ge.f32.partialorder %v25988_v19, 0.0 }
 0x401   : > { %v16268_v53 = vcombine.low %v16260_v15, %v16267_v29  ;;  %v17743_v17 = vrot.slane %v17741_v18, 1  ;;  %v16976_v21 = vadd.s32 2, %v27123_v27  ;;  %vm15871_vm9 = vcmp.ge.f32.partialorder %v25965_v46, 0.0 }
 0x402   : > { %v17737_v11 = vsel %vm26866_vm2, %v17732_v50, %v17736_v9  ;;  %v16277_v1 = vrot.slane %v16269_v51, %v24781_v32  ;;  %v16284_v39 = vrot.slane %v16270_v33, %v24781_v32  ;;  %v17748_v35 = vrot.slane %v17746_v26, 1  ;;  %v27124_v50 = vld [vmem:[#allocation21_spill] sm:$0xff] }
 0x403   : > { %20646 = vmatprep.mubr.msk.bf16.mxu1 %vm2546_vm1, %v17737_v11  ;;  %v17356_v16 = vrot.slane %v25333_v55, %v24781_v32  ;;  %v26024_v23 = vmul.f32 %v25755_v24, %v16268_v53  ;;  %v17744_v15 = vor.u32 %v17743_v17, %v17739_v60  ;;  %vm16990_vm5 = vcmp.ge.s32.totalorder %v16976_v21, 0 }
 0x404   : > { %vm17000_vm6 = vcmp.lt.s32.totalorder %v16976_v21, 16  ;;  %v16285_v29 = vcombine.low %v16277_v1, %v16284_v39  ;;  %v17968_v9 = vsel %vm26865_vm0, %v27124_v50, 0  ;;  %v16546_v51 = vrot.slane %v25462_v42, %v24781_v32 }
 0x405   : > { %vm17010_vm8 = vmand %vm16990_vm5, %vm17000_vm6  ;;  %v16977_v11 = vadd.s32 3, %v27123_v27  ;;  %vm15875_vm7 = vcmp.ge.f32.partialorder %v25849_v41, 0.0  ;;  %vm15867_vm13 = vcmp.ge.f32.partialorder %v25891_v0, 0.0  ;;  %vm15873_vm11 = vcmp.ge.f32.partialorder %v25984_v52, 0.0 }
 0x406   : > { %v16752_v55 = vcombine.high %v26024_v23, %v26024_v23  ;;  %v26037_v53 = vsel %vm26866_vm2, %v17744_v15, %v17748_v35  ;;  %vm17027_vm14 = vmand %vm17010_vm8, %vm17018_vm12  ;;  %v27125_v42 = vcombine.low %v25266_v13, %v25269_v47  ;;  %v16351_v26 = vmul.f32 %v25755_v24, %v16285_v29 }
 0x407   : > { %20647 = vmatmul.mubr.msk.bf16.vlgmr.msra.gmra.mxu1 %vm2546_vm1, %v26037_v53  ;;  %vm27126_vm5 = vcmp.le.s32.totalorder %v24868_v38, 16  ;;  %v27127_v18 = vcombine.low %v25251_v22, %v25254_v10  ;;  %v16918_v33 = vsel %vm15822_vm10, %v25352_v28, %v16546_v51  ;;  %vm16991_vm0 = vcmp.ge.s32.totalorder %v16977_v11, 0  ;;  %v27129_v51 = vld [vmem:[#allocation18_spill] sm:$0xff] }
 0x408   : > { %v17681_v60 = vsel %vm17010_vm8, %v27125_v42, 0.0  ;;  %vm17062_vm6 = vmand %vm17010_vm8, %vm27126_vm5  ;;  %vm15874_vm2 = vcmp.ge.f32.partialorder %v26002_v25, 0.0  ;;  %v16766_v13 = vrot.slane %v16752_v55, %v24781_v32  ;;  %20663 = vmatpush3.bf16.msra.mxu1 %v17968_v9  ;;  %v16769_v17 = vcombine.high %v16351_v26, %v16351_v26 }
 0x409   : > { %v17680_v35 = vsel %vm17027_vm14, %v27127_v18, 0.0  ;;  %v17682_v47 = vsel %vm17062_vm6, %v17356_v16, 0.0  ;;  %v16776_v21 = vrot.slane %v16351_v26, %v24781_v32  ;;  %vm17001_vm8 = vcmp.lt.s32.totalorder %v16977_v11, 16  ;;  %v27130_v11 = vld [vmem:[#allocation27_spill] sm:$0xff] }
 0x40a   : > { %v26057_v24 = vpack.c.bf16 %v17681_v60, %v17680_v35  ;;  %v17709_v1 = vpack.c.bf16 %v17682_v47, %v17682_v47  ;;  %v16768_v22 = vcombine.high %v16766_v13, %v16766_v13  ;;  %v26063_v10 = vsel %vm15870_vm3, %v25946_v48, %v16766_v13  ;;  %vm17011_vm10 = vmand %vm16991_vm0, %vm17001_vm8 }
 0x40b   : > { %v17397_v39 = vrot.slane %v16918_v33, %v24781_v32  ;;  %v16783_v16 = vrot.slane %v16769_v17, %v24781_v32  ;;  %v16784_v15 = vcombine.high %v16776_v21, %v16776_v21  ;;  %v26071_v29 = vsel %vm15872_vm4, %v25988_v19, %v16776_v21  ;;  %vm17030_vm14 = vmand %vm17011_vm10, %vm17018_vm12 }
 0x40c   : > { %v18090_v28 = vrot.slane %v26057_v24, 1  ;;  %v16978_v50 = vadd.s32 4, %v27123_v27  ;;  %v26079_v48 = vsel %vm15871_vm9, %v25965_v46, %v16768_v22  ;;  %v18091_v9 = vrot.slane %v17709_v1, 1  ;;  %vm27128_vm0 = vmmov %vm27126_vm5 }
 0x40d   : > { %vm17065_vm3 = vmand %vm17011_vm10, %vm27128_vm0  ;;  %v27131_v55 = vcombine.low %v27129_v51, %v27130_v11  ;;  %v27132_v19 = vcombine.low %v25424_v43, %v25427_v14  ;;  %v16785_v26 = vcombine.high %v16783_v16, %v16783_v16  ;;  %v26092_v18 = vsel %vm15873_vm11, %v25984_v52, %v16784_v15 }
 0x40e   : > { %v26097_v46 = vsel %vm15874_vm2, %v26002_v25, %v16783_v16  ;;  %v17604_v35 = vcombine.low %v26063_v10, %v26079_v48  ;;  %v17620_v33 = vcombine.low %v26071_v29, %v26092_v18  ;;  %v26104_v43 = vsel %vm18083_vm15, %v18090_v28, %v18091_v9  ;;  %vm27136_vm11 = vmmov %vm27128_vm0 }
 0x40f   : > { %v17683_v42 = vsel %vm17030_vm14, %v27131_v55, 0.0  ;;  %v17684_v60 = vsel %vm17011_vm10, %v27132_v19, 0.0  ;;  %v17685_v14 = vsel %vm17065_vm3, %v17397_v39, 0.0  ;;  %v27133_v52 = vrot.slane %v25961_v57, %v24781_v32  ;;  %20686 = vmatprep.mubr.msk.bf16.mxu0 %vm2546_vm1, %v26104_v43 }
 0x410   : > { %v26106_v13 = vpack.c.bf16 %v17684_v60, %v17683_v42  ;;  %v26119_v47 = vsel %vm15875_vm7, %v25849_v41, %v16785_v26  ;;  %v17711_v17 = vpack.c.bf16 %v17685_v14, %v17685_v14  ;;  %v17753_v21 = vshll.u32 %v26057_v24, 16 }
 0x411   : > { %v26114_v25 = vsel %vm15867_vm13, %v25891_v0, %v27133_v52  ;;  %v17621_v22 = vcombine.low %v26097_v46, %v26119_v47  ;;  %v17751_v28 = vshrl.u32 %v26057_v24, 16  ;;  %v17758_v0 = vshll.u32 %v17709_v1, 16 }
 0x412   : > { %v18093_v57 = vrot.slane %v26106_v13, 1  ;;  %v18094_v39 = vrot.slane %v17711_v17, 1  ;;  %v17755_v16 = vrot.slane %v17753_v21, 1  ;;  %v17763_v15 = vshrl.u32 %v26106_v13, 16 }
 0x413   : > { %v17765_v41 = vshll.u32 %v26106_v13, 16  ;;  %v17760_v9 = vrot.slane %v17758_v0, 1  ;;  %v17770_v51 = vshll.u32 %v17711_v17, 16  ;;  %vm16992_vm2 = vcmp.ge.s32.totalorder %v16978_v50, 0 }
 0x414   : > { %vm17002_vm4 = vcmp.lt.s32.totalorder %v16978_v50, 16  ;;  %v26131_v11 = vsel %vm18083_vm15, %v18093_v57, %v18094_v39  ;;  %v17756_v55 = vor.u32 %v17755_v16, %v17751_v28  ;;  %v16979_v19 = vadd.s32 5, %v27123_v27 }
 0x415   : > { %v17767_v42 = vrot.slane %v17765_v41, 1  ;;  %vm17012_vm9 = vmand %vm16992_vm2, %vm17002_vm4  ;;  %20687 = vmatmul.mubr.msk.bf16.gmra.mxu0 %vm2546_vm1, %v26131_v11  ;;  %v17772_v1 = vrot.slane %v17770_v51, 1  ;;  %v27134_v60 = vcombine.low %v25466_v34, %v25469_v63  ;;  %v17479_v50 = vrot.slane %v25779_v8, %v24781_v32  ;;  %v27143_v51 = vld [vmem:[#allocation24_spill] sm:$0xff] }
 0x416   : > { %vm17033_vm7 = vmand %vm17012_vm9, %vm17018_vm12  ;;  %v16980_v14 = vadd.s32 6, %v27123_v27  ;;  %vm27135_vm13 = vsmask.f32 7424  ;;  %v27137_v21 = vcombine.low %v25741_v37, %v25685_v49  ;;  %vm16993_vm6 = vcmp.ge.s32.totalorder %v16979_v19, 0 }
 0x417   : > { %v17687_v26 = vsel %vm17012_vm9, %v27134_v60, 0.0  ;;  %v26145_v52 = vsel %vm27135_vm13, %v17756_v55, %v17760_v9  ;;  %v17768_v17 = vor.u32 %v17767_v42, %v17763_v15  ;;  %vm17068_vm5 = vmand %vm17012_vm9, %vm27136_vm11  ;;  %vm15858_vm8 = vcmp.ge.f32.partialorder %v25844_v20, 0.0 }
 0x418   : > { %v17686_v57 = vsel %vm17033_vm7, %v27137_v21, 0.0  ;;  %20650 = vmatprep.mubr.msk.bf16.mxu1 %vm2546_vm1, %v26145_v52  ;;  %v27138_v34 = vrot.slane %v25476_v58, %v24781_v32  ;;  %vm17003_vm10 = vcmp.lt.s32.totalorder %v16979_v19, 16  ;;  %vm16994_vm14 = vcmp.ge.s32.totalorder %v16980_v14, 0  ;;  %vm27139_vm0 = vmmov %vm27135_vm13 }
 0x419   : > { %v26158_v8 = vpack.c.bf16 %v17687_v26, %v17686_v57  ;;  %v26161_v28 = vsel %vm27139_vm0, %v17768_v17, %v17772_v1  ;;  %vm17013_vm3 = vmand %vm16993_vm6, %vm17003_vm10  ;;  %vm17004_vm2 = vcmp.lt.s32.totalorder %v16980_v14, 16  ;;  %v17520_v49 = vrot.slane %v25776_v45, %v24781_v32  ;;  %v27142_v45 = vld [vmem:[#allocation29_spill] sm:$0xff]  ;;  %v27145_v57 = vld [vmem:[#allocation32_spill] sm:$0xff] }
 0x41a   : > { %v17688_v63 = vsel %vm17068_vm5, %v27138_v34, 0.0  ;;  %20651 = vmatmul.mubr.msk.bf16.gmra.mxu1 %vm2546_vm1, %v26161_v28  ;;  %vm17036_vm4 = vmand %vm17013_vm3, %vm17018_vm12  ;;  %v27140_v16 = vcombine.low %v25700_v44, %v25703_v2  ;;  %v27144_v55 = vcombine.low %v27142_v45, %v27143_v51  ;;  %v16710_v19 = vrot.slane %v25905_v56, %v24781_v32  ;;  %v27146_v34 = vld [vmem:[#allocation26_spill] sm:$0xff] }
 0x41b   : > { %v17713_v0 = vpack.c.bf16 %v17688_v63, %v17688_v63  ;;  %v18096_v37 = vrot.slane %v26158_v8, 1  ;;  %v17775_v58 = vshrl.u32 %v26158_v8, 16  ;;  %v17777_v39 = vshll.u32 %v26158_v8, 16  ;;  %vm27141_vm9 = vmmov %vm27136_vm11 }
 0x41c   : > { %v17690_v15 = vsel %vm17013_vm3, %v27140_v16, 0.0  ;;  %vm17071_vm7 = vmand %vm17013_vm3, %vm27141_vm9  ;;  %v17689_v42 = vsel %vm17036_vm4, %v27144_v55, 0.0  ;;  %v16981_v44 = vadd.s32 7, %v27123_v27  ;;  %v27147_v56 = vcombine.low %v27145_v57, %v27146_v34 }
 0x41d   : > { %v18097_v41 = vrot.slane %v17713_v0, 1  ;;  %v17782_v9 = vshll.u32 %v17713_v0, 16  ;;  %v17779_v1 = vrot.slane %v17777_v39, 1  ;;  %v17691_v60 = vsel %vm17071_vm7, %v17479_v50, 0.0  ;;  %vm17014_vm13 = vmand %vm16994_vm14, %vm17004_vm2 }
 0x41e   : > { %v26182_v26 = vpack.c.bf16 %v17690_v15, %v17689_v42  ;;  %v17715_v21 = vpack.c.bf16 %v17691_v60, %v17691_v60  ;;  %vm17039_vm11 = vmand %vm17014_vm13, %vm17018_vm12  ;;  %v17693_v63 = vsel %vm17014_vm13, %v27147_v56, 0.0  ;;  %vm15868_vm10 = vcmp.ge.f32.partialorder %v25923_v36, 0.0  ;;  %v27149_v15 = vld [vmem:[#allocation28_spill] sm:$0xff]  ;;  %v26214_v60 = vld [vmem:[%s26843_s4 + $0x4] ss:$0 sps:$4 sm:$0xcc]  }
 0x41f   : > { %v26188_v2 = vsel %vm18083_vm15, %v18096_v37, %v18097_v41  ;;  %v17784_v17 = vrot.slane %v17782_v9, 1  ;;  %v17780_v50 = vor.u32 %v17779_v1, %v17775_v58  ;;  %vm27148_vm5 = vmmov %vm27141_vm9  ;;  %v27150_v41 = vld [vmem:[#allocation33_spill] sm:$0xff]  ;;  %vm16995_vm3 = vcmp.ge.s32.totalorder %v16981_v44, 0 }
 0x420   : > { %20690 = vmatprep.mubr.msk.bf16.mxu0 %vm2546_vm1, %v26188_v2  ;;  %v18099_v14 = vrot.slane %v26182_v26, 1  ;;  %v17787_v0 = vshrl.u32 %v26182_v26, 16  ;;  %v17789_v37 = vshll.u32 %v26182_v26, 16  ;;  %vm17074_vm6 = vmand %vm17014_vm13, %vm27148_vm5  ;;  %v18100_v39 = vrot.slane %v17715_v21, 1 }
 0x421   : > { %v17794_v16 = vshll.u32 %v17715_v21, 16  ;;  %v27151_v9 = vcombine.low %v27149_v15, %v27150_v41  ;;  %v17694_v51 = vsel %vm17074_vm6, %v17520_v49, 0.0  ;;  %vm27152_vm14 = vmmov %vm27139_vm0  ;;  %vm15869_vm0 = vcmp.ge.f32.partialorder %v25909_v54, 0.0 }
 0x422   : > { %v26207_v58 = vsel %vm27152_vm14, %v17780_v50, %v17784_v17  ;;  %v17791_v55 = vrot.slane %v17789_v37, 1  ;;  %v17717_v1 = vpack.c.bf16 %v17694_v51, %v17694_v51  ;;  %v16759_v21 = vrot.slane %v26024_v23, %v24781_v32  ;;  %vm27153_vm4 = vmmov %vm27152_vm14 }
 0x423   : > { %v17692_v45 = vsel %vm17039_vm11, %v27151_v9, 0.0  ;;  %20654 = vmatprep.mubr.msk.bf16.mxu1 %vm2546_vm1, %v26207_v58  ;;  %v26222_v49 = vsel %vm18083_vm15, %v18099_v14, %v18100_v39  ;;  %v16954_v17 = vsel %vm15858_vm8, %v25844_v20, %v16710_v19  ;;  %v17796_v34 = vrot.slane %v17794_v16, 1  ;;  %v26250_v16 = vld [vmem:[%s26843_s4 + $0xc] sm:$0x3]  ;;  %vm27158_vm13 = vmmov %vm27148_vm5 }
 0x424   : > { %v26209_v42 = vpack.c.bf16 %v17693_v63, %v17692_v45  ;;  %20691 = vmatmul.mubr.msk.bf16.gmra.mxu0 %vm2546_vm1, %v26222_v49  ;;  %v17792_v57 = vor.u32 %v17791_v55, %v17787_v0  ;;  %v18103_v63 = vrot.slane %v17717_v1, 1  ;;  %v17806_v50 = vshll.u32 %v17717_v1, 16  ;;  %v20881_v0 = vld [vmem:[%s26843_s4 + $0x8] sm:$0x3] }
 0x425   : > { %vm17005_vm2 = vcmp.lt.s32.totalorder %v16981_v44, 16  ;;  %v17561_v14 = vrot.slane %v16954_v17, %v24781_v32  ;;  %vm27156_vm9 = vcmask 1041408   ;;  %v18253_v44 = vrot.slane %v26214_v60, 2 }
 0x426   : > { %v18102_v56 = vrot.slane %v26209_v42, 1  ;;  %v17801_v23 = vshll.u32 %v26209_v42, 16  ;;  %v26233_v37 = vsel %vm27153_vm4, %v17792_v57, %v17796_v34  ;;  %vm26238_vm8 = vmand %vm16995_vm3, %vm17005_vm2  ;;  %v18389_v39 = vsel %vm27156_vm9, %v20881_v0, 0 }
 0x427   : > { %20655 = vmatmul.mubr.msk.bf16.gmra.mxu1 %vm2546_vm1, %v26233_v37  ;;  %v17799_v15 = vshrl.u32 %v26209_v42, 16  ;;  %vm17042_vm7 = vmand %vm26238_vm8, %vm17018_vm12  ;;  %v27157_v9 = vcombine.low %v25953_v62, %v25956_v61  ;;  %v16982_v51 = vadd.s32 8, %v27123_v27  ;;  %v17602_v55 = vrot.slane %v26114_v25, %v24781_v32  ;;  %20717 = vmatpush3.bf16.msra.mxu0 %v18389_v39 }
 0x428   : > { %v26236_v20 = vsel %vm18083_vm15, %v18102_v56, %v18103_v63  ;;  %v17803_v41 = vrot.slane %v17801_v23, 1  ;;  %v16767_v1 = vcombine.high %v16759_v21, %v16759_v21  ;;  %v17808_v17 = vrot.slane %v17806_v50, 1  ;;  %vm17077_vm11 = vmand %vm26238_vm8, %vm27158_vm13 }
 0x429   : > { %20694 = vmatprep.mubr.msk.bf16.mxu0 %vm2546_vm1, %v26236_v20  ;;  %v17696_v45 = vsel %vm26238_vm8, %v27157_v9, 0.0  ;;  %v27159_v57 = vcombine.low %v25852_v31, %v25855_v12  ;;  %vm27160_vm5 = vmmov %vm27156_vm9  ;;  %v17697_v61 = vsel %vm17077_vm11, %v17561_v14, 0.0  ;;  %vm16996_vm6 = vcmp.ge.s32.totalorder %v16982_v51, 0 }
 0x42a   : > { %20821 = vmatprep.subr.msk.bf16.mxu1 %vm27160_vm5, %v18253_v44  ;;  %v17804_v62 = vor.u32 %v17803_v41, %v17799_v15  ;;  %vm27161_vm14 = vmmov %vm27160_vm5  ;;  %v17618_v25 = vrot.slane %v17604_v35, %v24781_v32  ;;  %v17719_v31 = vpack.c.bf16 %v17697_v61, %v17697_v61  ;;  %vm17006_vm3 = vcmp.lt.s32.totalorder %v16982_v51, 16 }
 0x42b   : > { %v17695_v34 = vsel %vm17042_vm7, %v27159_v57, 0.0  ;;  %20824 = vmatprep.subr.msk.bf16.mxu0 %vm27161_vm14, %v26250_v16  ;;  %v16964_v12 = vsel %vm15868_vm10, %v25923_v36, %v16759_v21  ;;  %vm27162_vm2 = vmmov %vm27153_vm4  ;;  %v27163_v36 = vcombine.low %v25919_v6, %v25941_v4  ;;  %v16965_v21 = vsel %vm15869_vm0, %v25909_v54, %v16767_v1 }
 0x42c   : > { %v26279_v56 = vpack.c.bf16 %v17696_v45, %v17695_v34  ;;  %v26291_v63 = vsel %vm27162_vm2, %v17804_v62, %v17808_v17  ;;  %vm17016_vm4 = vmand %vm16996_vm6, %vm17006_vm3  ;;  %v18106_v10 = vrot.slane %v17719_v31, 1  ;;  %v17818_v48 = vshll.u32 %v17719_v31, 16  ;;  %v20876_v62 = vld [vmem:[%s26843_s4 + $0x8] ss:$0 sps:$4 sm:$0xcc]  }
 0x42d   : > { %20658 = vmatprep.mubr.msk.bf16.mxu1 %vm2546_vm1, %v26291_v63  ;;  %vm17045_vm8 = vmand %vm17016_vm4, %vm17018_vm12  ;;  %v17699_v35 = vsel %vm17016_vm4, %v27163_v36, 0.0  ;;  %v27165_v0 = vcombine.low %v25872_v7, %v25866_v5  ;;  %v16983_v15 = vadd.s32 9, %v27123_v27  ;;  %v17603_v41 = vcombine.low %v16964_v12, %v16965_v21 }
 0x42e   : > { %v18105_v23 = vrot.slane %v26279_v56, 1  ;;  %v17811_v50 = vshrl.u32 %v26279_v56, 16  ;;  %v17813_v14 = vshll.u32 %v26279_v56, 16  ;;  %vm27164_vm10 = vmmov %vm27158_vm13  ;;  %v17820_v6 = vrot.slane %v17818_v48, 1 }
 0x42f   : > { %vm17080_vm9 = vmand %vm17016_vm4, %vm27164_vm10  ;;  %v17698_v39 = vsel %vm17045_vm8, %v27165_v0, 0.0  ;;  %vm16997_vm0 = vcmp.ge.s32.totalorder %v16983_v15, 0  ;;  %vm17007_vm7 = vcmp.lt.s32.totalorder %v16983_v15, 16  ;;  %v17628_v5 = vrot.slane %v17620_v33, %v24781_v32 }
 0x430   : > { %v17815_v19 = vrot.slane %v17813_v14, 1  ;;  %v26313_v9 = vsel %vm18083_vm15, %v18105_v23, %v18106_v10  ;;  %v17700_v4 = vsel %vm17080_vm9, %v17602_v55, 0.0  ;;  %v26315_v45 = vpack.c.bf16 %v17699_v35, %v17698_v39  ;;  %vm26326_vm13 = vmand %vm16997_vm0, %vm17007_vm7  ;;  %v20877_v39 = vld [vmem:[%s26843_s4 + $0xc] ss:$0 sps:$4 sm:$0xcc]  }
 0x431   : > { %20695 = vmatmul.mubr.msk.bf16.gmra.mxu0 %vm2546_vm1, %v26313_v9  ;;  %v17721_v51 = vpack.c.bf16 %v17700_v4, %v17700_v4  ;;  %v17611_v55 = vrot.slane %v17603_v41, %v24781_v32  ;;  %v17635_v1 = vrot.slane %v17621_v22, %v24781_v32  ;;  %vm27168_vm11 = vmmov %vm27162_vm2  ;;  %v17643_v47 = vrot.slane %v25978_v30, %v24781_v32  ;;  %v18893_v30 = vld [vmem:[%s26843_s4 + $0x10] sm:$0x3] }
 0x432   : > { %v17816_v54 = vor.u32 %v17815_v19, %v17811_v50  ;;  %20718 = vmatprep.mubr.msk.bf16.mxu0 %vm2546_vm1, %v26037_v53  ;;  %v18375_v7 = vshll.u32 %v26315_v45, 16  ;;  %v18373_v29 = vshrl.u32 %v26315_v45, 16  ;;  %vm17048_vm5 = vmand %vm26326_vm13, %vm17018_vm12  ;;  %v18506_v46 = vrot.slane %v26315_v45, 1 }
 0x433   : > { %v18380_v18 = vshll.u32 %v17721_v51, 16  ;;  %v17619_v33 = vcombine.low %v17611_v55, %v17618_v25  ;;  %v17636_v57 = vcombine.low %v17628_v5, %v17635_v1  ;;  %vm27169_vm6 = vmmov %vm27164_vm10  ;;  %v18507_v59 = vrot.slane %v17721_v51, 1 }
 0x434   : > { %v26336_v17 = vsel %vm27168_vm11, %v17816_v54, %v17820_v6  ;;  %v18377_v53 = vrot.slane %v18375_v7, 1  ;;  %vm17083_vm14 = vmand %vm26326_vm13, %vm27169_vm6  ;;  %vm27170_vm12 = vcmask 1041408   ;;  %v18513_v10 = vrot.slane %v20876_v62, 2 }
 0x435   : > { %20659 = vmatmul.mubr.msk.bf16.gmra.mxu1 %vm2546_vm1, %v26336_v17  ;;  %v18382_v34 = vrot.slane %v18380_v18, 1  ;;  %v17701_v61 = vsel %vm17048_vm5, %v17619_v33, 0.0  ;;  %v17702_v38 = vsel %vm26326_vm13, %v17636_v57, 0.0  ;;  %v18638_v25 = vsel %vm27170_vm12, %v26250_v16, 0  ;;  %vm27171_vm3 = vmmov %vm27162_vm2 }
 0x436   : > { %20664 = vmatprep.mubr.msk.bf16.mxu1 %vm2546_vm1, %v25948_v3  ;;  %v18378_v22 = vor.u32 %v18377_v53, %v18373_v29  ;;  %v17722_v31 = vpack.c.bf16 %v17702_v38, %v17701_v61  ;;  %v26362_v3 = vsel %vm18083_vm15, %v18506_v46, %v18507_v59  ;;  %v17703_v12 = vsel %vm17083_vm14, %v17643_v47, 0.0  ;;  %vm27172_vm2 = vmmov %vm27170_vm12 }
 0x437   : > { %v17723_v23 = vpack.c.bf16 %v17703_v12, %v17703_v12  ;;  %v18258_v16 = vsel %vm27172_vm2, %v18253_v44, 0  ;;  %vm27173_vm4 = vmmov %vm27172_vm2  ;;  %v18768_v6 = vrot.slane %v20877_v39, 2 }
 0x438   : > { %v26365_v32 = vsel %vm27171_vm3, %v18378_v22, %v18382_v34  ;;  %v18890_v50 = vrot.slane %v17722_v31, 1  ;;  %v18755_v14 = vshll.u32 %v17722_v31, 16  ;;  %v18753_v35 = vshrl.u32 %v17722_v31, 16  ;;  %vm27174_vm8 = vmmov %vm27172_vm2 }
 0x439   : > { %20719 = vmatmul.mubr.msk.bf16.vlgmr.msra.gmra.mxu0 %vm2546_vm1, %v26145_v52  ;;  %v18891_v48 = vrot.slane %v17723_v23, 1  ;;  %v18760_v36 = vshll.u32 %v17723_v23, 16  ;;  %vm27175_vm10 = vmmov %vm27171_vm3 }
 0x43a   : > { %20722 = vmatprep.mubr.msk.bf16.mxu0 %vm2546_vm1, %v26161_v28  ;;  %20753 = vmatpush3.bf16.msra.mxu0 %v18638_v25  ;;  %v18757_v21 = vrot.slane %v18755_v14, 1  ;;  %vm27177_vm9 = vmmov %vm27172_vm2 }
 0x43b   : > { %20826 = vmatprep.subr.msk.bf16.mxu0 %vm27173_vm4, %v18893_v30  ;;  %v18892_v19 = vsel %vm18083_vm15, %v18890_v50, %v18891_v48  ;;  %v18762_v0 = vrot.slane %v18760_v36, 1  ;;  %vm27176_vm15 = vmmov %vm27172_vm2  ;;  %v18518_v41 = vsel %vm27177_vm9, %v18513_v10, 0 }
 0x43c   : > { %v18758_v60 = vor.u32 %v18757_v21, %v18753_v35  ;;  %v18898_v15 = vsel %vm27176_vm15, %v18893_v30, 0  ;;  %vm27178_vm0 = vmmov %vm27172_vm2 }
 0x43d   : > { %20665 = vmatmul.mubr.msk.bf16.vlgmr.msra.gmra.mxu1 %vm2546_vm1, %v27119_v40  ;;  %vm27180_vm7 = vmmov %vm27178_vm0 }
 0x43e   : > { %20699 = vmatpush3.bf16.msra.mxu1 %v18258_v16  ;;  %20668 = vmatprep.mubr.msk.bf16.mxu1 %vm2546_vm1, %v26057_v24  ;;  %v18763_v44 = vsel %vm27175_vm10, %v18758_v60, %v18762_v0 }
 0x43f   : > { %20823 = vmatprep.subr.msk.bf16.mxu1 %vm27174_vm8, %v18513_v10 }
 0x441   : > { %20723 = vmatmul.mubr.msk.bf16.gmra.mxu0 %vm2546_vm1, %v26207_v58 }
 0x442   : > { %20726 = vmatprep.mubr.msk.bf16.mxu0 %vm2546_vm1, %v26233_v37 }
 0x445   : > { %20669 = vmatmul.mubr.msk.bf16.gmra.mxu1 %vm2546_vm1, %v26106_v13 }
 0x446   : > { %20672 = vmatprep.mubr.msk.bf16.mxu1 %vm2546_vm1, %v26158_v8 }
 0x449   : > { %20727 = vmatmul.mubr.msk.bf16.gmra.mxu0 %vm2546_vm1, %v26291_v63 }
 0x44a   : > { %20730 = vmatprep.mubr.msk.bf16.mxu0 %vm2546_vm1, %v26336_v17 }
 0x44d   : > { %20673 = vmatmul.mubr.msk.bf16.gmra.mxu1 %vm2546_vm1, %v26182_v26 }
 0x44e   : > { %20676 = vmatprep.mubr.msk.bf16.mxu1 %vm2546_vm1, %v26209_v42 }
 0x451   : > { %20731 = vmatmul.mubr.msk.bf16.gmra.mxu0 %vm2546_vm1, %v26365_v32 }
 0x452   : > { %20754 = vmatprep.mubr.msk.bf16.mxu0 %vm2546_vm1, %v26057_v24 }
 0x455   : > { %20677 = vmatmul.mubr.msk.bf16.gmra.mxu1 %vm2546_vm1, %v26279_v56 }
 0x456   : > { %20700 = vmatprep.mubr.msk.bf16.mxu1 %vm2546_vm1, %v27119_v40  ;;  %v27179_v40 = vld [vmem:[#allocation34_spill] sm:$0xff] }
 0x459   : > { %20755 = vmatmul.mubr.msk.bf16.vlgmr.msra.gmra.mxu0 %vm2546_vm1, %v26106_v13 }
 0x45a   : > { %20758 = vmatprep.mubr.msk.bf16.mxu0 %vm2546_vm1, %v26158_v8  ;;  %20789 = vmatpush3.bf16.msra.mxu0 %v18898_v15 }
 0x45d   : > { %20701 = vmatmul.mubr.msk.bf16.vlgmr.msra.gmra.mxu1 %vm2546_vm1, %v26057_v24  ;;  %v18773_v24 = vsel %vm27180_vm7, %v18768_v6, 0 }
 0x45e   : > { %20735 = vmatpush3.bf16.msra.mxu1 %v18518_v41  ;;  %20704 = vmatprep.mubr.msk.bf16.mxu1 %vm2546_vm1, %v26106_v13 }
 0x45f   : > { %20825 = vmatprep.subr.msk.bf16.mxu1 %vm27178_vm0, %v18768_v6 }
 0x461   : > { %20759 = vmatmul.mubr.msk.bf16.gmra.mxu0 %vm2546_vm1, %v26182_v26 }
 0x462   : > { %20762 = vmatprep.mubr.msk.bf16.mxu0 %vm2546_vm1, %v26209_v42 }
 0x465   : > { %20705 = vmatmul.mubr.msk.bf16.gmra.mxu1 %vm2546_vm1, %v26158_v8 }
 0x466   : > { %20708 = vmatprep.mubr.msk.bf16.mxu1 %vm2546_vm1, %v26182_v26 }
 0x469   : > { %20763 = vmatmul.mubr.msk.bf16.gmra.mxu0 %vm2546_vm1, %v26279_v56 }
 0x46a   : > { %20766 = vmatprep.mubr.msk.bf16.mxu0 %vm2546_vm1, %v26315_v45 }
 0x46d   : > { %20709 = vmatmul.mubr.msk.bf16.gmra.mxu1 %vm2546_vm1, %v26209_v42 }
 0x46e   : > { %20712 = vmatprep.mubr.msk.bf16.mxu1 %vm2546_vm1, %v26279_v56 }
 0x471   : > { %20767 = vmatmul.mubr.msk.bf16.gmra.mxu0 %vm2546_vm1, %v17722_v31 }
 0x472   : > { %20790 = vmatprep.mubr.msk.bf16.mxu0 %vm2546_vm1, %v26104_v43 }
 0x475   : > { %20713 = vmatmul.mubr.msk.bf16.gmra.mxu1 %vm2546_vm1, %v26315_v45 }
 0x476   : > { %20736 = vmatprep.mubr.msk.bf16.mxu1 %vm2546_vm1, %v27179_v40 }
 0x479   : > { %20791 = vmatmul.mubr.msk.bf16.vlgmr.msra.gmra.mxu0 %vm2546_vm1, %v26131_v11 }
 0x47a   : > { %20794 = vmatprep.mubr.msk.bf16.mxu0 %vm2546_vm1, %v26188_v2 }
 0x47d   : > { %20737 = vmatmul.mubr.msk.bf16.vlgmr.msra.gmra.mxu1 %vm2546_vm1, %v26104_v43 }
 0x47e   : > { %20771 = vmatpush3.bf16.msra.mxu1 %v18773_v24  ;;  %20740 = vmatprep.mubr.msk.bf16.mxu1 %vm2546_vm1, %v26131_v11 }
 0x481   : > { %20795 = vmatmul.mubr.msk.bf16.gmra.mxu0 %vm2546_vm1, %v26222_v49 }
 0x482   : > { %20798 = vmatprep.mubr.msk.bf16.mxu0 %vm2546_vm1, %v26236_v20 }
 0x485   : > { %20741 = vmatmul.mubr.msk.bf16.gmra.mxu1 %vm2546_vm1, %v26188_v2 }
 0x486   : > { %20744 = vmatprep.mubr.msk.bf16.mxu1 %vm2546_vm1, %v26222_v49 }
 0x489   : > { %20799 = vmatmul.mubr.msk.bf16.gmra.mxu0 %vm2546_vm1, %v26313_v9 }
 0x48a   : > { %20802 = vmatprep.mubr.msk.bf16.mxu0 %vm2546_vm1, %v26362_v3 }
 0x48d   : > { %20745 = vmatmul.mubr.msk.bf16.gmra.mxu1 %vm2546_vm1, %v26236_v20 }
 0x48e   : > { %20748 = vmatprep.mubr.msk.bf16.mxu1 %vm2546_vm1, %v26313_v9 }
 0x491   : > { %20803 = vmatmul.mubr.msk.bf16.gmra.mxu0 %vm2546_vm1, %v18892_v19 }
 0x495   : > { %20749 = vmatmul.mubr.msk.bf16.gmra.mxu1 %vm2546_vm1, %v26362_v3 }
 0x496   : > { %20772 = vmatprep.mubr.msk.bf16.mxu1 %vm2546_vm1, %v26145_v52 }
 0x49d   : > { %20773 = vmatmul.mubr.msk.bf16.vlgmr.msra.gmra.mxu1 %vm2546_vm1, %v26161_v28 }
 0x49e   : > { %20776 = vmatprep.mubr.msk.bf16.mxu1 %vm2546_vm1, %v26207_v58 }
 0x4a5   : > { %20777 = vmatmul.mubr.msk.bf16.gmra.mxu1 %vm2546_vm1, %v26233_v37 }
 0x4a6   : > { %20780 = vmatprep.mubr.msk.bf16.mxu1 %vm2546_vm1, %v26291_v63 }
 0x4ad   : > { %20781 = vmatmul.mubr.msk.bf16.gmra.mxu1 %vm2546_vm1, %v26336_v17 }
 0x4ae   : > { %20784 = vmatprep.mubr.msk.bf16.mxu1 %vm2546_vm1, %v26365_v32 }
 0x4b5   : > { %20785 = vmatmul.mubr.msk.bf16.gmra.mxu1 %vm2546_vm1, %v18763_v44 }
 0x4bf   : > { %v20684_v43 = vpop.f32.mrf.mxu0 }
 0x4c1   : > { %v18170_v13 = vpop.f32.mrf.mxu0 }
 0x4c3   : > { %v20685_v52 = vpop.f32.mrf.mxu0 }
 0x4c5   : > { %v18173_v28 = vpop.f32.mrf.mxu0 }
 0x4c7   : > { %v20648_v11 = vpop.f32.mrf.mxu1 }
 0x4c9   : > { %v17888_v8 = vpop.f32.mrf.mxu1 }
 0x4cb   : > { %v20649_v26 = vpop.f32.mrf.mxu1 }
 0x4cd   : > { %v17891_v58 = vpop.f32.mrf.mxu1 }
 0x4d5   : > { %v20688_v2 = vpop.f32.mrf.mxu0 }
 0x4d7   : > { %v18186_v42 = vpop.f32.mrf.mxu0 }
 0x4d9   : > { %v20689_v37 = vpop.f32.mrf.mxu0 }
 0x4da   : > { %v20652_v49 = vpop.f32.mrf.mxu1 }
 0x4db   : > { %v18189_v63 = vpop.f32.mrf.mxu0 }
 0x4dc   : > { %v17904_v20 = vpop.f32.mrf.mxu1 }
 0x4de   : > { %v20653_v56 = vpop.f32.mrf.mxu1 }
 0x4e0   : > { %v17907_v4 = vpop.f32.mrf.mxu1 }
 0x4e4   : > { %v20692_v9 = vpop.f32.mrf.mxu0 }
 0x4e6   : > { %v18202_v45 = vpop.f32.mrf.mxu0 }
 0x4e7   : > { %v20656_v54 = vpop.f32.mrf.mxu1 }
 0x4e8   : > { %v20693_v51 = vpop.f32.mrf.mxu0 }
 0x4e9   : > { %v17920_v5 = vpop.f32.mrf.mxu1 }
 0x4ea   : > { %v18205_v27 = vpop.f32.mrf.mxu0 }
 0x4eb   : > { %v20657_v7 = vpop.f32.mrf.mxu1 }
 0x4ed   : > { %v17923_v1 = vpop.f32.mrf.mxu1 }
 0x4f1   : > { %v26489_v55 = vpop.f32.mrf.mxu0 }
 0x4f3   : > { %v26491_v17 = vpop.f32.mrf.mxu0 }
 0x4f5   : > { %v20660_v29 = vpop.f32.mrf.mxu1  ;;  %v26493_v18 = vpop.f32.mrf.mxu0 }
 0x4f7   : > { %v17936_v53 = vpop.f32.mrf.mxu1  ;;  %v26495_v33 = vpop.f32.mrf.mxu0 }
 0x4f9   : > { %v20661_v57 = vpop.f32.mrf.mxu1  ;;  %v26497_v46 = vpop.f32.mrf.mxu0 }
 0x4fb   : > { %v17939_v59 = vpop.f32.mrf.mxu1  ;;  %v26499_v47 = vpop.f32.mrf.mxu0 }
 0x4fd   : > { %v20666_v22 = vpop.f32.mrf.mxu1  ;;  %v26501_v62 = vpop.f32.mrf.mxu0 }
 0x4fe   : > { %v18013_v34 = vadd.f32 %v20666_v22, %v20648_v11 }
 0x4ff   : > { %v18004_v61 = vpop.f32.mrf.mxu1  ;;  %v26503_v25 = vpop.f32.mrf.mxu0 }
 0x500   : > { %v18005_v38 = vadd.f32 %v18004_v61, %v17888_v8  ;;  %v26505_v31 = vadd.f32 %v20684_v43, %v18013_v34 }
 0x501   : > { %v20667_v3 = vpop.f32.mrf.mxu1  ;;  %v26507_v32 = vpop.f32.mrf.mxu0 }
 0x502   : > { %v18016_v12 = vadd.f32 %v20667_v3, %v20649_v26  ;;  %v26509_v30 = vadd.f32 %v18170_v13, %v18005_v38 }
 0x503   : > { %v18007_v23 = vpop.f32.mrf.mxu1  ;;  %v26511_v14 = vpop.f32.mrf.mxu0 }
 0x504   : > { %v18008_v50 = vadd.f32 %v18007_v23, %v17891_v58  ;;  %v26513_v16 = vadd.f32 %v20685_v52, %v18016_v12 }
 0x505   : > { %v20670_v10 = vpop.f32.mrf.mxu1  ;;  %v26515_v36 = vpop.f32.mrf.mxu0 }
 0x506   : > { %v18029_v48 = vadd.f32 %v20670_v10, %v20652_v49  ;;  %v26517_v35 = vadd.f32 %v18173_v28, %v18008_v50 }
 0x507   : > { %v18020_v21 = vpop.f32.mrf.mxu1  ;;  %v26519_v60 = vpop.f32.mrf.mxu0 }
 0x508   : > { %v18021_v19 = vadd.f32 %v18020_v21, %v17904_v20  ;;  %v26521_v0 = vadd.f32 %v20688_v2, %v18029_v48 }
 0x509   : > { %v20671_v44 = vpop.f32.mrf.mxu1  ;;  %v26523_v15 = vpop.f32.mrf.mxu0 }
 0x50a   : > { %v18032_v39 = vadd.f32 %v20671_v44, %v20653_v56  ;;  %v26525_v41 = vadd.f32 %v18186_v42, %v18021_v19 }
 0x50b   : > { %v18023_v6 = vpop.f32.mrf.mxu1  ;;  %v26527_v24 = vpop.f32.mrf.mxu0 }
 0x50c   : > { %v18024_v40 = vadd.f32 %v18023_v6, %v17907_v4  ;;  %v26529_v43 = vadd.f32 %v20689_v37, %v18032_v39 }
 0x50d   : > { %v20674_v13 = vpop.f32.mrf.mxu1  ;;  %v26531_v52 = vpop.f32.mrf.mxu0 }
 0x50e   : > { %v18045_v11 = vadd.f32 %v20674_v13, %v20656_v54  ;;  %v26533_v8 = vadd.f32 %v18189_v63, %v18024_v40 }
 0x50f   : > { %v18036_v28 = vpop.f32.mrf.mxu1  ;;  %v26535_v2 = vpop.f32.mrf.mxu0 }
 0x510   : > { %v18037_v26 = vadd.f32 %v18036_v28, %v17920_v5  ;;  %v26537_v58 = vadd.f32 %v20692_v9, %v18045_v11 }
 0x511   : > { %v20675_v42 = vpop.f32.mrf.mxu1  ;;  %v26539_v20 = vpop.f32.mrf.mxu0 }
 0x512   : > { %v18048_v49 = vadd.f32 %v20675_v42, %v20657_v7  ;;  %v26541_v56 = vadd.f32 %v18202_v45, %v18037_v26 }
 0x513   : > { %v18039_v37 = vpop.f32.mrf.mxu1  ;;  %v26543_v22 = vpop.f32.mrf.mxu0 }
 0x514   : > { %v18040_v4 = vadd.f32 %v18039_v37, %v17923_v1  ;;  %v26545_v54 = vadd.f32 %v20693_v51, %v18048_v49 }
 0x515   : > { %v20678_v63 = vpop.f32.mrf.mxu1  ;;  %v26547_v61 = vpop.f32.mrf.mxu0 }
 0x516   : > { %v18061_v34 = vadd.f32 %v20678_v63, %v20660_v29  ;;  %27181 = vst [vmem:[#allocation36_spill] sm:$0xff] %v26547_v61  ;;  %v26549_v5 = vadd.f32 %v18205_v27, %v18040_v4 }
 0x517   : > { %v18052_v9 = vpop.f32.mrf.mxu1  ;;  %v26551_v3 = vpop.f32.mrf.mxu0 }
 0x518   : > { %v18053_v38 = vadd.f32 %v18052_v9, %v17936_v53  ;;  %27182 = vst [vmem:[#allocation3_spill] sm:$0xff] %v26551_v3  ;;  %v26554_v7 = vadd.f32 %v26489_v55, %v18061_v34 }
 0x519   : > { %v20679_v45 = vpop.f32.mrf.mxu1  ;;  %v26556_v1 = vpop.f32.mrf.mxu0 }
 0x51a   : > { %v18064_v12 = vadd.f32 %v20679_v45, %v20661_v57  ;;  %v26559_v51 = vadd.f32 %v26491_v17, %v18053_v38 }
 0x51b   : > { %v18055_v23 = vpop.f32.mrf.mxu1  ;;  %v26561_v50 = vpop.f32.mrf.mxu0 }
 0x51c   : > { %v18056_v29 = vadd.f32 %v18055_v23, %v17939_v59  ;;  %v26564_v27 = vadd.f32 %v26493_v18, %v18064_v12 }
 0x51d   : > { %v20702_v53 = vpop.f32.mrf.mxu1  ;;  %v26566_v10 = vpop.f32.mrf.mxu0 }
 0x51e   : > { %v26569_v55 = vadd.f32 %v26495_v33, %v18056_v29 }
 0x51f   : > { %v18294_v48 = vpop.f32.mrf.mxu1  ;;  %v26571_v57 = vpop.f32.mrf.mxu0 }
 0x520   : > { %27183 = vst [vmem:[#allocation37_spill] sm:$0xff] %v26569_v55  ;;  %27184 = vst [vmem:[#allocation38_spill] sm:$0xff] %v26571_v57 }
 0x521   : > { %v20703_v21 = vpop.f32.mrf.mxu1  ;;  %v26573_v19 = vpop.f32.mrf.mxu0 }
 0x522   : > { %27185 = vst [vmem:[#allocation4_spill] sm:$0xff] %v26573_v19 }
 0x523   : > { %v18297_v17 = vpop.f32.mrf.mxu1  ;;  %v26575_v44 = vpop.f32.mrf.mxu0 }
 0x524   : > { %27186 = vst [vmem:[#allocation39_spill] sm:$0xff] %v26575_v44 }
 0x525   : > { %v20706_v59 = vpop.f32.mrf.mxu1  ;;  %v26577_v39 = vpop.f32.mrf.mxu0 }
 0x526   : > { %27187 = vst [vmem:[#allocation42_spill] sm:$0xff] %v26577_v39 }
 0x527   : > { %v18310_v18 = vpop.f32.mrf.mxu1  ;;  %v26579_v6 = vpop.f32.mrf.mxu0 }
 0x528   : > { %27188 = vst [vmem:[#allocation43_spill] sm:$0xff] %v26579_v6 }
 0x529   : > { %v20707_v40 = vpop.f32.mrf.mxu1  ;;  %v26581_v13 = vpop.f32.mrf.mxu0 }
 0x52a   : > { %27189 = vst [vmem:[#allocation44_spill] sm:$0xff] %v26581_v13 }
 0x52b   : > { %v18313_v33 = vpop.f32.mrf.mxu1  ;;  %v26583_v11 = vpop.f32.mrf.mxu0 }
 0x52c   : > { %27190 = vst [vmem:[#allocation45_spill] sm:$0xff] %v26583_v11 }
 0x52d   : > { %v20710_v28 = vpop.f32.mrf.mxu1  ;;  %v26585_v26 = vpop.f32.mrf.mxu0 }
 0x52e   : > { %27191 = vst [vmem:[#allocation46_spill] sm:$0xff] %v26585_v26 }
 0x52f   : > { %v18326_v42 = vpop.f32.mrf.mxu1  ;;  %v26587_v49 = vpop.f32.mrf.mxu0 }
 0x530   : > { %27192 = vst [vmem:[#allocation47_spill] sm:$0xff] %v26587_v49 }
 0x531   : > { %v20711_v37 = vpop.f32.mrf.mxu1  ;;  %v26589_v4 = vpop.f32.mrf.mxu0 }
 0x532   : > { %27193 = vst [vmem:[#allocation49_spill] sm:$0xff] %v26589_v4 }
 0x533   : > { %v18329_v63 = vpop.f32.mrf.mxu1  ;;  %v26591_v9 = vpop.f32.mrf.mxu0 }
 0x534   : > { %27194 = vst [vmem:[#allocation50_spill] sm:$0xff] %v26591_v9 }
 0x535   : > { %v20714_v34 = vpop.f32.mrf.mxu1  ;;  %v26595_v12 = vpop.f32.mrf.mxu0 }
 0x536   : > { %27195 = vst [vmem:[#allocation51_spill] sm:$0xff] %v26595_v12 }
 0x537   : > { %v18342_v38 = vpop.f32.mrf.mxu1  ;;  %v26599_v26 = vpop.f32.mrf.mxu0 }
 0x538   : > { %27197 = vst [vmem:[#allocation53_spill] sm:$0xff] %v26599_v26 }
 0x539   : > { %v26593_v45 = vpop.f32.mrf.mxu1  ;;  %v26601_v11 = vpop.f32.mrf.mxu0 }
 0x53b   : > { %v26597_v23 = vpop.f32.mrf.mxu1  ;;  %v26603_v6 = vpop.f32.mrf.mxu0 }
 0x53c   : > { %27196 = vst [vmem:[#allocation52_spill] sm:$0xff] %v26597_v23  ;;  %27198 = vst [vmem:[#allocation54_spill] sm:$0xff] %v26603_v6  ;;  %v18359_v23 = vadd.f32 %v20702_v53, %v26505_v31  ;;  %v18363_v31 = vadd.f32 %v20706_v59, %v26521_v0  ;;  %v18368_v59 = vadd.f32 %v20711_v37, %v26545_v54 }
 0x53d   : > { %v20738_v29 = vpop.f32.mrf.mxu1  ;;  %v26609_v12 = vpop.f32.mrf.mxu0 }
 0x53e   : > { %27200 = vst [vmem:[#allocation58_spill] sm:$0xff] %v26609_v12  ;;  %v18357_v12 = vadd.f32 %v18294_v48, %v26509_v30  ;;  %v18361_v30 = vadd.f32 %v18310_v18, %v26525_v41 }
 0x53f   : > { %v18554_v49 = vpop.f32.mrf.mxu1  ;;  %v26616_v26 = vpop.f32.mrf.mxu0 }
 0x540   : > { %27203 = vst [vmem:[#allocation61_spill] sm:$0xff] %v26616_v26  ;;  %v18490_v26 = vadd.f32 %v26497_v46, %v18359_v23  ;;  %v18362_v46 = vadd.f32 %v18313_v33, %v26533_v8 }
 0x541   : > { %v20739_v3 = vpop.f32.mrf.mxu1  ;;  %v26624_v55 = vpop.f32.mrf.mxu0 }
 0x542   : > { %v18619_v53 = vadd.f32 %v20738_v29, %v18490_v26 }
 0x543   : > { %v18557_v4 = vpop.f32.mrf.mxu1 }
 0x544   : > { %v18739_v18 = vadd.f32 %v26556_v1, %v18619_v53  ;;  %v26679_v1 = vadd.f32 %v26531_v52, %v18368_v59  ;;  %v19068_v53 = vld [vmem:[%s26675_s10] sm:$0xff]  ;;  %v27215_v59 = vld [vmem:[#allocation39_spill] sm:$0xff] }
 0x545   : > { %v20742_v13 = vpop.f32.mrf.mxu1 }
 0x547   : > { %v26605_v9 = vpop.f32.mrf.mxu1 }
 0x549   : > { %v26607_v39 = vpop.f32.mrf.mxu1 }
 0x54a   : > { %27199 = vst [vmem:[#allocation57_spill] sm:$0xff] %v26607_v39 }
 0x54b   : > { %v26611_v44 = vpop.f32.mrf.mxu1 }
 0x54c   : > { %27201 = vst [vmem:[#allocation59_spill] sm:$0xff] %v26611_v44 }
 0x54d   : > { %v26613_v61 = vpop.f32.mrf.mxu1 }
 0x54e   : > { %27202 = vst [vmem:[#allocation60_spill] sm:$0xff] %v26613_v61  ;;  %v18360_v61 = vadd.f32 %v20703_v21, %v26513_v16  ;;  %v18364_v16 = vadd.f32 %v20707_v40, %v26529_v43  ;;  %v18366_v43 = vadd.f32 %v18329_v63, %v26549_v5  ;;  %v27209_v63 = vld [vmem:[#allocation52_spill] sm:$0xff] }
 0x54f   : > { %v26618_v19 = vpop.f32.mrf.mxu1 }
 0x550   : > { %27204 = vst [vmem:[#allocation62_spill] sm:$0xff] %v26618_v19  ;;  %v26634_v19 = vpop.f32.mrf.mxu0  ;;  %v18495_v54 = vadd.f32 %v26515_v36, %v18364_v16 }
 0x551   : > { %v26620_v57 = vpop.f32.mrf.mxu1 }
 0x552   : > { %27205 = vst [vmem:[#allocation67_spill] sm:$0xff] %v26620_v57  ;;  %v18358_v57 = vadd.f32 %v18297_v17, %v26517_v35  ;;  %v18367_v35 = vadd.f32 %v20710_v28, %v26537_v58  ;;  %v18491_v17 = vadd.f32 %v26501_v62, %v18360_v61  ;;  %v26650_v0 = vpop.f32.mrf.mxu0  ;;  %v18494_v58 = vadd.f32 %v26507_v32, %v18363_v31 }
 0x553   : > { %v26626_v6 = vpop.f32.mrf.mxu1  ;;  %v18371_v62 = vadd.f32 %v20714_v34, %v26554_v7  ;;  %v18369_v61 = vadd.f32 %v18342_v38, %v26559_v51  ;;  %v26687_v51 = vadd.f32 %v26535_v2, %v18366_v43  ;;  %v27211_v38 = vld [vmem:[#allocation38_spill] sm:$0xff] }
 0x554   : > { %27206 = vst [vmem:[#allocation68_spill] sm:$0xff] %v26626_v6  ;;  %v18488_v6 = vadd.f32 %v26499_v47, %v18357_v12  ;;  %v18365_v47 = vadd.f32 %v18326_v42, %v26541_v56  ;;  %v18489_v26 = vadd.f32 %v26503_v25, %v18358_v57  ;;  %v18620_v8 = vadd.f32 %v20739_v3, %v18491_v17  ;;  %v26665_v57 = vpop.f32.mrf.mxu0  ;;  %v27212_v12 = vld [vmem:[#allocation4_spill] sm:$0xff] }
 0x555   : > { %v26629_v39 = vpop.f32.mrf.mxu1  ;;  %v18492_v56 = vadd.f32 %v26511_v14, %v18361_v30  ;;  %v18498_v5 = vadd.f32 %v26523_v15, %v18367_v35  ;;  %v18623_v14 = vadd.f32 %v20742_v13, %v18494_v58  ;;  %v26695_v33 = vadd.f32 %v26539_v20, %v18371_v62  ;;  %v27210_v20 = vld [vmem:[#allocation57_spill] sm:$0xff]  ;;  %v27213_v30 = vld [vmem:[#allocation58_spill] sm:$0xff] }
 0x556   : > { %v18617_v21 = vadd.f32 %v18554_v49, %v18488_v6  ;;  %v18493_v6 = vadd.f32 %v26519_v60, %v18362_v46  ;;  %v18618_v7 = vadd.f32 %v18557_v4, %v18489_v26  ;;  %v18496_v36 = vadd.f32 %v26527_v24, %v18365_v47  ;;  %v26684_v60 = vld [vmem:[%s26844_s5] ss:$0 sm:$0xff]  ;;  %v26700_v2 = vpop.f32.mrf.mxu0  ;;  %v27208_v4 = vld [vmem:[#allocation37_spill] sm:$0xff]  ;;  %v27214_v46 = vld [vmem:[#allocation36_spill] sm:$0xff] }
 0x557   : > { %v26637_v44 = vpop.f32.mrf.mxu1  ;;  %v18740_v13 = vadd.f32 %v26566_v10, %v18620_v8  ;;  %v18372_v24 = vadd.f32 %v26593_v45, %v26564_v27  ;;  %v18621_v52 = vadd.f32 %v26605_v9, %v18492_v56  ;;  %v26698_v28 = vadd.f32 %v26543_v22, %v18369_v61  ;;  %v19070_v10 = vld [vmem:[%s26675_s10 + $0x10] sm:$0xff]  ;;  %v27207_v49 = vld [vmem:[#allocation54_spill] sm:$0xff]  ;;  %v27216_v61 = vld [vmem:[#allocation59_spill] sm:$0xff] }
 0x558   : > { %v18737_v32 = vadd.f32 %v26561_v50, %v18617_v21  ;;  %v26707_v34 = vadd.f32 %v27209_v63, %v27208_v4  ;;  %v18624_v9 = vadd.f32 %v27210_v20, %v18495_v54  ;;  %v18738_v22 = vadd.f32 %v27211_v38, %v18618_v7  ;;  %v26726_v43 = vpop.f32.mrf.mxu0  ;;  %v27217_v54 = vld [vmem:[#allocation60_spill] sm:$0xff] }
 0x559   : > { %v26645_v48 = vpop.f32.mrf.mxu1  ;;  %v18743_v23 = vadd.f32 %v27212_v12, %v18623_v14  ;;  %v26723_v35 = vadd.f32 %v27214_v46, %v18372_v24  ;;  %v18741_v26 = vadd.f32 %v27215_v59, %v18621_v52  ;;  %v18622_v56 = vadd.f32 %v27216_v61, %v18493_v6  ;;  %v27220_v52 = vld [vmem:[#allocation62_spill] sm:$0xff]  ;;  %v27224_v46 = vld [vmem:[#allocation45_spill] sm:$0xff] }
 0x55b   : > { %v26655_v41 = vpop.f32.mrf.mxu1 }
 0x55d   : > { %v20774_v25 = vpop.f32.mrf.mxu1 }
 0x55e   : > { %v18874_v3 = vadd.f32 %v20774_v25, %v18739_v18  ;;  %v19071_v18 = vld [vmem:[%s26675_s10 + $0x18] sm:$0xff]  ;;  %v18627_v25 = vadd.f32 %v27217_v54, %v18498_v5 }
 0x55f   : > { %v18809_v15 = vpop.f32.mrf.mxu1 }
 0x560   : > { %v18999_v50 = vadd.f32 %v26601_v11, %v18874_v3  ;;  %v18872_v40 = vadd.f32 %v18809_v15, %v18737_v32  ;;  %v27218_v32 = vld [vmem:[#allocation61_spill] sm:$0xff] }
 0x561   : > { %v20775_v42 = vpop.f32.mrf.mxu1 }
 0x562   : > { %vm19016_vm13 = vcmp.ge.f32.partialorder %v18999_v50, 0.0  ;;  %v19038_v11 = vmul.f32 %v26684_v60, %v18999_v50  ;;  %v18997_v37 = vadd.f32 %v27207_v49, %v18872_v40  ;;  %v18875_v27 = vadd.f32 %v20775_v42, %v18740_v13  ;;  %v27219_v13 = vld [vmem:[#allocation42_spill] sm:$0xff]  ;;  %v26742_v49 = vpop.f32.mrf.mxu0 }
 0x563   : > { %v18812_v45 = vpop.f32.mrf.mxu1  ;;  %v18744_v24 = vadd.f32 %v27219_v13, %v18624_v9  ;;  %v18625_v42 = vadd.f32 %v27220_v52, %v18496_v36  ;;  %v27221_v36 = vld [vmem:[#allocation67_spill] sm:$0xff] }
 0x564   : > { %v19054_v29 = vsel %vm19016_vm13, %v18999_v50, %v19038_v11  ;;  %vm19014_vm11 = vcmp.ge.f32.partialorder %v18997_v37, 0.0  ;;  %v19036_v31 = vmul.f32 %v26684_v60, %v18997_v37  ;;  %v19000_v16 = vadd.f32 %v27213_v30, %v18875_v27  ;;  %v19069_v11 = vld [vmem:[%s26675_s10 + $0x8] sm:$0xff] }
 0x565   : > { %v19086_v21 = vadd.f32 %v19070_v10, %v19054_v29  ;;  %v18873_v17 = vadd.f32 %v18812_v45, %v18738_v22  ;;  %v20778_v47 = vpop.f32.mrf.mxu1  ;;  %v18628_v63 = vadd.f32 %v27221_v36, %v26679_v1  ;;  %v27222_v9 = vld [vmem:[#allocation43_spill] sm:$0xff]  ;;  %v27223_v45 = vld [vmem:[#allocation44_spill] sm:$0xff] }
 0x566   : > { %v19052_v8 = vsel %vm19014_vm11, %v18997_v37, %v19036_v31  ;;  %vm19017_vm5 = vcmp.ge.f32.partialorder %v19000_v16, 0.0  ;;  %v19039_v58 = vmul.f32 %v26684_v60, %v19000_v16  ;;  %v18878_v62 = vadd.f32 %v20778_v47, %v18743_v23  ;;  %v19074_v37 = vld [vmem:[%s26675_s10 + $0x30] sm:$0xff] }
 0x567   : > { %19102 = vst.msk [vmem:[%s26717_s15 + $0x10] sm:$0xff] %vm2546_vm1, %v19086_v21  ;;  %v19084_v3 = vadd.f32 %v19068_v53, %v19052_v8  ;;  %v18998_v7 = vadd.f32 %v27218_v32, %v18873_v17  ;;  %v18825_v14 = vpop.f32.mrf.mxu1  ;;  %v18742_v38 = vadd.f32 %v27222_v9, %v18622_v56  ;;  %v18747_v12 = vadd.f32 %v27223_v45, %v18627_v25  ;;  %v18969_v17 = vpop.f32.mrf.mxu0  ;;  %v27225_v47 = vld [vmem:[#allocation68_spill] sm:$0xff]  ;;  %v27227_v25 = vld [vmem:[#allocation46_spill] sm:$0xff] }
 0x568   : > { %v19055_v15 = vsel %vm19017_vm5, %v19000_v16, %v19039_v58  ;;  %v19003_v50 = vadd.f32 %v26624_v55, %v18878_v62  ;;  %v18876_v40 = vadd.f32 %v18825_v14, %v18741_v26  ;;  %v18745_v21 = vadd.f32 %v27224_v46, %v18625_v42  ;;  %v19075_v62 = vld [vmem:[%s26675_s10 + $0x38] sm:$0xff]  ;;  %v19073_v14 = vld [vmem:[%s26675_s10 + $0x28] sm:$0xff]  ;;  %v27230_v45 = vld [vmem:[#allocation50_spill] sm:$0xff] }
 0x569   : > { %19100 = vst.msk [vmem:[%s26717_s15] sm:$0xff] %vm2546_vm1, %v19084_v3  ;;  %v19087_v6 = vadd.f32 %v19071_v18, %v19055_v15  ;;  %vm19015_vm6 = vcmp.ge.f32.partialorder %v18998_v7, 0.0  ;;  %v19037_v5 = vmul.f32 %v26684_v60, %v18998_v7  ;;  %v20779_v10 = vpop.f32.mrf.mxu1  ;;  %v18626_v59 = vadd.f32 %v27225_v47, %v26687_v51  ;;  %v27226_v51 = vld [vmem:[#allocation3_spill] sm:$0xff] }
 0x56a   : > { %vm19020_vm14 = vcmp.ge.f32.partialorder %v19003_v50, 0.0  ;;  %v19042_v55 = vmul.f32 %v26684_v60, %v19003_v50  ;;  %v19001_v27 = vadd.f32 %v26634_v19, %v18876_v40  ;;  %v18879_v4 = vadd.f32 %v20779_v10, %v18744_v24  ;;  %v19072_v19 = vld [vmem:[%s26675_s10 + $0x20] sm:$0xff]  ;;  %v19078_v40 = vld [vmem:[%s26675_s10 + $0x50] sm:$0xff] }
 0x56b   : > { %19103 = vst.msk [vmem:[%s26717_s15 + $0x18] sm:$0xff] %vm2546_vm1, %v19087_v6  ;;  %v19053_v20 = vsel %vm19015_vm6, %v18998_v7, %v19037_v5  ;;  %v18828_v22 = vpop.f32.mrf.mxu1  ;;  %v18631_v26 = vadd.f32 %v26629_v39, %v26695_v33  ;;  %v18501_v39 = vadd.f32 %v27226_v51, %v26707_v34  ;;  %v18748_v3 = vadd.f32 %v27227_v25, %v18628_v63  ;;  %v27229_v6 = vld [vmem:[#allocation49_spill] sm:$0xff] }
 0x56c   : > { %v19085_v23 = vadd.f32 %v19069_v11, %v19053_v20  ;;  %v19058_v29 = vsel %vm19020_vm14, %v19003_v50, %v19042_v55  ;;  %vm19018_vm12 = vcmp.ge.f32.partialorder %v19001_v27, 0.0  ;;  %v19040_v31 = vmul.f32 %v26684_v60, %v19001_v27  ;;  %v20804_v50 = vpop.f32.mrf.mxu0 }
 0x56d   : > { %v19090_v53 = vadd.f32 %v19074_v37, %v19058_v29  ;;  %v19004_v1 = vadd.f32 %v26650_v0, %v18879_v4  ;;  %v18877_v30 = vadd.f32 %v18828_v22, %v18742_v38  ;;  %v20782_v16 = vpop.f32.mrf.mxu1  ;;  %v18629_v32 = vadd.f32 %v26637_v44, %v26698_v28  ;;  %v27228_v28 = vld [vmem:[#allocation47_spill] sm:$0xff]  ;;  %v19076_v37 = vld [vmem:[%s26675_s10 + $0x40] sm:$0xff] }
 0x56e   : > { %19101 = vst.msk [vmem:[%s26717_s15 + $0x8] sm:$0xff] %vm2546_vm1, %v19085_v23  ;;  %v19056_v8 = vsel %vm19018_vm12, %v19001_v27, %v19040_v31  ;;  %v18882_v58 = vadd.f32 %v20782_v16, %v18747_v12  ;;  %v18746_v52 = vadd.f32 %v27228_v28, %v18626_v59  ;;  %v18751_v5 = vadd.f32 %v27229_v6, %v18631_v26  ;;  %v18982_v20 = vpop.f32.mrf.mxu0  ;;  %v19082_v59 = vld [vmem:[%s26675_s10 + $0x70] sm:$0xff] }
 0x56f   : > { %19106 = vst.msk [vmem:[%s26717_s15 + $0x30] sm:$0xff] %vm2546_vm1, %v19090_v53  ;;  %v19088_v0 = vadd.f32 %v19072_v19, %v19056_v8  ;;  %vm19021_vm3 = vcmp.ge.f32.partialorder %v19004_v1, 0.0  ;;  %v19043_v18 = vmul.f32 %v26684_v60, %v19004_v1  ;;  %v19002_v61 = vadd.f32 %v26665_v57, %v18877_v30  ;;  %v18841_v56 = vpop.f32.mrf.mxu1  ;;  %v27231_v30 = vld [vmem:[#allocation51_spill] sm:$0xff] }
 0x570   : > { %v19007_v33 = vadd.f32 %v26700_v2, %v18882_v58  ;;  %v18880_v54 = vadd.f32 %v18841_v56, %v18745_v21  ;;  %v18630_v9 = vadd.f32 %v26655_v41, %v18501_v39  ;;  %v18749_v12 = vadd.f32 %v27230_v45, %v18629_v32  ;;  %v20805_v21 = vpop.f32.mrf.mxu0  ;;  %v19080_v39 = vld [vmem:[%s26675_s10 + $0x60] sm:$0xff] }
 0x571   : > { %19104 = vst.msk [vmem:[%s26717_s15 + $0x20] sm:$0xff] %vm2546_vm1, %v19088_v0  ;;  %v19059_v7 = vsel %vm19021_vm3, %v19004_v1, %v19043_v18  ;;  %vm19019_vm2 = vcmp.ge.f32.partialorder %v19002_v61, 0.0  ;;  %v19041_v57 = vmul.f32 %v26684_v60, %v19002_v61  ;;  %v20783_v15 = vpop.f32.mrf.mxu1  ;;  %v19077_v1 = vld [vmem:[%s26675_s10 + $0x48] sm:$0xff]  ;;  %v27232_v0 = vld [vmem:[#allocation53_spill] sm:$0xff] }
 0x572   : > { %v19091_v34 = vadd.f32 %v19075_v62, %v19059_v7  ;;  %vm19024_vm4 = vcmp.ge.f32.partialorder %v19007_v33, 0.0  ;;  %v19046_v2 = vmul.f32 %v26684_v60, %v19007_v33  ;;  %v19005_v13 = vadd.f32 %v26726_v43, %v18880_v54 }
 0x573   : > { %v19057_v24 = vsel %vm19019_vm2, %v19002_v61, %v19041_v57  ;;  %v18883_v44 = vadd.f32 %v20783_v15, %v18748_v3  ;;  %v18844_v42 = vpop.f32.mrf.mxu1  ;;  %v18632_v43 = vadd.f32 %v26645_v48, %v26723_v35  ;;  %v19079_v35 = vld [vmem:[%s26675_s10 + $0x58] sm:$0xff]  ;;  %v18750_v18 = vadd.f32 %v27232_v0, %v18630_v9  ;;  %v18985_v3 = vpop.f32.mrf.mxu0 }
 0x574   : > { %19107 = vst.msk [vmem:[%s26717_s15 + $0x38] sm:$0xff] %vm2546_vm1, %v19091_v34  ;;  %v19089_v11 = vadd.f32 %v19073_v14, %v19057_v24  ;;  %v19062_v10 = vsel %vm19024_vm4, %v19007_v33, %v19046_v2  ;;  %vm19022_vm8 = vcmp.ge.f32.partialorder %v19005_v13, 0.0  ;;  %v19044_v55 = vmul.f32 %v26684_v60, %v19005_v13  ;;  %v19083_v14 = vld [vmem:[%s26675_s10 + $0x78] sm:$0xff]  ;;  %v19081_v2 = vld [vmem:[%s26675_s10 + $0x68] sm:$0xff] }
 0x575   : > { %v19094_v27 = vadd.f32 %v19078_v40, %v19062_v10  ;;  %v19008_v4 = vadd.f32 %v26742_v49, %v18883_v44  ;;  %v18881_v36 = vadd.f32 %v18844_v42, %v18746_v52  ;;  %v20786_v63 = vpop.f32.mrf.mxu1  ;;  %v18752_v16 = vadd.f32 %v27231_v30, %v18632_v43 }
 0x576   : > { %19105 = vst.msk [vmem:[%s26717_s15 + $0x28] sm:$0xff] %vm2546_vm1, %v19089_v11  ;;  %v19060_v38 = vsel %vm19022_vm8, %v19005_v13, %v19044_v55  ;;  %v18886_v22 = vadd.f32 %v20786_v63, %v18751_v5 }
 0x577   : > { %19110 = vst.msk [vmem:[%s26717_s15 + $0x50] sm:$0xff] %vm2546_vm1, %v19094_v27  ;;  %v19092_v23 = vadd.f32 %v19076_v37, %v19060_v38  ;;  %vm19025_vm10 = vcmp.ge.f32.partialorder %v19008_v4, 0.0  ;;  %v19047_v48 = vmul.f32 %v26684_v60, %v19008_v4  ;;  %v19006_v49 = vadd.f32 %v18969_v17, %v18881_v36  ;;  %v18857_v29 = vpop.f32.mrf.mxu1 }
 0x578   : > { %v19011_v31 = vadd.f32 %v20804_v50, %v18886_v22  ;;  %v18884_v19 = vadd.f32 %v18857_v29, %v18749_v12 }
 0x579   : > { %19108 = vst.msk [vmem:[%s26717_s15 + $0x40] sm:$0xff] %vm2546_vm1, %v19092_v23  ;;  %v19063_v41 = vsel %vm19025_vm10, %v19008_v4, %v19047_v48  ;;  %vm19023_vm15 = vcmp.ge.f32.partialorder %v19006_v49, 0.0  ;;  %v19045_v53 = vmul.f32 %v26684_v60, %v19006_v49  ;;  %v20787_v46 = vpop.f32.mrf.mxu1 }
 0x57a   : > { %v19095_v47 = vadd.f32 %v19079_v35, %v19063_v41  ;;  %vm19028_vm9 = vcmp.ge.f32.partialorder %v19011_v31, 0.0  ;;  %v19050_v17 = vmul.f32 %v26684_v60, %v19011_v31  ;;  %v19009_v26 = vadd.f32 %v18982_v20, %v18884_v19 }
 0x57b   : > { %v19061_v8 = vsel %vm19023_vm15, %v19006_v49, %v19045_v53  ;;  %v18887_v58 = vadd.f32 %v20787_v46, %v18752_v16  ;;  %v18860_v62 = vpop.f32.mrf.mxu1 }
 0x57c   : > { %19111 = vst.msk [vmem:[%s26717_s15 + $0x58] sm:$0xff] %vm2546_vm1, %v19095_v47  ;;  %v19093_v61 = vadd.f32 %v19077_v1, %v19061_v8  ;;  %v19066_v56 = vsel %vm19028_vm9, %v19011_v31, %v19050_v17  ;;  %vm19026_vm0 = vcmp.ge.f32.partialorder %v19009_v26, 0.0  ;;  %v19048_v51 = vmul.f32 %v26684_v60, %v19009_v26 }
 0x57d   : > { %v19098_v33 = vadd.f32 %v19082_v59, %v19066_v56  ;;  %v19012_v54 = vadd.f32 %v20805_v21, %v18887_v58  ;;  %v18885_v25 = vadd.f32 %v18860_v62, %v18750_v18 }
 0x57e   : > { %19109 = vst.msk [vmem:[%s26717_s15 + $0x48] sm:$0xff] %vm2546_vm1, %v19093_v61  ;;  %v19064_v32 = vsel %vm19026_vm0, %v19009_v26, %v19048_v51 }
 0x57f   : > { %19114 = vst.msk [vmem:[%s26717_s15 + $0x70] sm:$0xff] %vm2546_vm1, %v19098_v33  ;;  %v19096_v7 = vadd.f32 %v19080_v39, %v19064_v32  ;;  %vm19029_vm7 = vcmp.ge.f32.partialorder %v19012_v54, 0.0  ;;  %v19051_v57 = vmul.f32 %v26684_v60, %v19012_v54  ;;  %v19010_v15 = vadd.f32 %v18985_v3, %v18885_v25 }
 0x581   : > { %19112 = vst.msk [vmem:[%s26717_s15 + $0x60] sm:$0xff] %vm2546_vm1, %v19096_v7  ;;  %v19067_v50 = vsel %vm19029_vm7, %v19012_v54, %v19051_v57  ;;  %vm19027_vm13 = vcmp.ge.f32.partialorder %v19010_v15, 0.0  ;;  %v19049_v34 = vmul.f32 %v26684_v60, %v19010_v15 }
 0x582   : > { %v19099_v40 = vadd.f32 %v19083_v14, %v19067_v50 }
 0x583   : > { %v19065_v13 = vsel %vm19027_vm13, %v19010_v15, %v19049_v34 }
 0x584   : > { %19115 = vst.msk [vmem:[%s26717_s15 + $0x78] sm:$0xff] %vm2546_vm1, %v19099_v40  ;;  %v19097_v24 = vadd.f32 %v19081_v2, %v19065_v13 }
 0x586   : > { %19113 = vst.msk [vmem:[%s26717_s15 + $0x68] sm:$0xff] %vm2546_vm1, %v19097_v24 }
 0x587 PF: > { %s16_s25 = sadd.s32 1, %s20920_s25   ;;  %s27233_s21 = smov %s20912_s23 }
 0x588   : > { %p13_p7 = scmp.ge.s32.totalorder %s16_s25, 6   ;;  %s27234_s22 = smov %s20916_s24 }
 0x589   : > { %s27235_s23 = smov %s27238_s26  ;;  %s27236_s24 = smov %s27242_s27 }
 0x58a   :  { %15 = sbr.rel (!%p13_p7) target bundleno = 3 (0x3), region = 80 }

</bundles_post_ra>
